<compile_context>
chip_gen: v6e
topology: v6e:2x2x1
jax: 0.10.0
libtpu: 0.0.40
codegen_flags: <defaults>
</compile_context>

<pallas_src>
import jax
import jax.numpy as jnp
from jax.experimental import pallas as pl
from jax.experimental.pallas import tpu as pltpu

# ----------------------------------------------------------------------------
# Small config (scaled-down but structurally identical to the PyTorch module:
# nz -> 8*ngf -> 4*ngf -> 2*ngf -> ngf -> nc, spatial 1 -> 4 -> 8 -> 16 -> 32 -> 64)
# ----------------------------------------------------------------------------
BATCH = 2
NZ = 16
NGF = 8
NC = 3
KSIZE = 4
BN_EPS = 1e-5
LANES = 128   # kernel output channel padding target (lane-dense stores)

# (in_ch, out_ch, stride, padding, has_bn_relu)
LAYER_CFG = [
    (NZ,      NGF * 8, 1, 0, True),
    (NGF * 8, NGF * 4, 2, 1, True),
    (NGF * 4, NGF * 2, 2, 1, True),
    (NGF * 2, NGF,     2, 1, True),
    (NGF,     NC,      2, 1, False),   # final layer: Tanh, no BN
]


def _round_up(n, m):
    return (n + m - 1) // m * m


def _pad_last(x, target):
    pad = target - x.shape[-1]
    if pad == 0:
        return x
    cfg = [(0, 0)] * (x.ndim - 1) + [(0, pad)]
    return jnp.pad(x, cfg)


# ----------------------------------------------------------------------------
# Pallas kernels
# ----------------------------------------------------------------------------
def _conv_stats_kernel(p_ref, w_ref, y_ref, sum_ref, sq_ref):
    # One "group" (sub-pixel phase / kernel position) per grid step:
    # (Mp, K) @ (K, OCP) on the MXU with f32 accumulation, plus per-channel
    # sum / sum-of-squares accumulated across the whole grid (BN statistics).
    y = jnp.dot(p_ref[...], w_ref[...], preferred_element_type=jnp.float32)
    y_ref[...] = y

    @pl.when(pl.program_id(0) == 0)
    def _():
        sum_ref[...] = jnp.zeros_like(sum_ref)
        sq_ref[...] = jnp.zeros_like(sq_ref)

    sum_ref[...] += jnp.sum(y, axis=0, keepdims=True)
    sq_ref[...] += jnp.sum(y * y, axis=0, keepdims=True)


def _conv_tanh_kernel(p_ref, w_ref, y_ref):
    # Final layer: matmul with Tanh fused in the epilogue (no BN).
    y = jnp.dot(p_ref[...], w_ref[...], preferred_element_type=jnp.float32)
    y_ref[...] = jnp.tanh(y)


def _bn_relu_kernel(y_ref, sc_ref, sh_ref, o_ref):
    # Fused BatchNorm affine + ReLU, f32 math, bf16 activation output.
    y = y_ref[...] * sc_ref[...] + sh_ref[...]
    o_ref[...] = jnp.maximum(y, 0.0).astype(o_ref.dtype)


# ----------------------------------------------------------------------------
# Pallas wrappers
# ----------------------------------------------------------------------------
def conv_stats_pallas(patches, weights):
    # patches: (G, Mp, K) bf16, weights: (G, K, OCP) bf16
    g, mp, k = patches.shape
    ocp = weights.shape[-1]
    return pl.pallas_call(
        _conv_stats_kernel,
        out_shape=(jax.ShapeDtypeStruct((g, mp, ocp), jnp.float32),
                   jax.ShapeDtypeStruct((1, ocp), jnp.float32),
                   jax.ShapeDtypeStruct((1, ocp), jnp.float32)),
        grid=(g,),
        in_specs=[pl.BlockSpec((None, mp, k), lambda i: (i, 0, 0)),
                  pl.BlockSpec((None, k, ocp), lambda i: (i, 0, 0))],
        out_specs=(pl.BlockSpec((None, mp, ocp), lambda i: (i, 0, 0)),
                   pl.BlockSpec((1, ocp), lambda i: (0, 0)),
                   pl.BlockSpec((1, ocp), lambda i: (0, 0))),
        compiler_params=pltpu.CompilerParams(
            dimension_semantics=("arbitrary",)),   # stats accumulate across grid
    )(patches, weights)


def conv_tanh_pallas(patches, weights):
    g, mp, k = patches.shape
    ocp = weights.shape[-1]
    return pl.pallas_call(
        _conv_tanh_kernel,
        out_shape=jax.ShapeDtypeStruct((g, mp, ocp), jnp.float32),
        grid=(g,),
        in_specs=[pl.BlockSpec((None, mp, k), lambda i: (i, 0, 0)),
                  pl.BlockSpec((None, k, ocp), lambda i: (i, 0, 0))],
        out_specs=pl.BlockSpec((None, mp, ocp), lambda i: (i, 0, 0)),
        compiler_params=pltpu.CompilerParams(
            dimension_semantics=("parallel",)),
    )(patches, weights)


def bn_relu_pallas(y, scale, shift):
    # y: (G, Mp, OCP) f32; scale/shift: (1, OCP) f32 -> (G, Mp, OCP) bf16
    g, mp, ocp = y.shape
    return pl.pallas_call(
        _bn_relu_kernel,
        out_shape=jax.ShapeDtypeStruct((g, mp, ocp), jnp.bfloat16),
        grid=(1,),
        in_specs=[pl.BlockSpec((g, mp, ocp), lambda i: (0, 0, 0)),
                  pl.BlockSpec((1, 1, ocp), lambda i: (0, 0, 0)),
                  pl.BlockSpec((1, 1, ocp), lambda i: (0, 0, 0))],
        out_specs=pl.BlockSpec((g, mp, ocp), lambda i: (0, 0, 0)),
        compiler_params=pltpu.CompilerParams(
            dimension_semantics=("parallel",)),
    )(y, scale.reshape(1, 1, ocp), shift.reshape(1, 1, ocp))


# ----------------------------------------------------------------------------
# Layout glue: weight prep, im2col (phase-decomposed), pixel shuffle
# ----------------------------------------------------------------------------
def _prep_w_1x1_input(w_t, ocp):
    # Layer 1 (stride 1, pad 0, 1x1 spatial input): each of the k*k output
    # positions is an independent (nz -> oc) matmul.
    # w_t: (IC, OC, kH, kW) -> (kH*kW, IC, OCP), group p = kh*k + kw
    ic, oc, k, _ = w_t.shape
    w = jnp.transpose(w_t, (2, 3, 0, 1)).reshape(k * k, ic, oc)
    return _pad_last(w, ocp).astype(jnp.bfloat16)


def _prep_w_stride2(w_t, ocp):
    # 4-phase decomposition of ConvTranspose2d(k=4, s=2, p=1):
    #   out[2i+r, 2j+c, oc] = sum_{a,b in {0,1}} sum_ic
    #       xpad1[i+r+a, j+c+b, ic] * w_t[ic, oc, 3-(2a+r), 3-(2b+c)]
    # Phase g = 2r+c gets a (2*2*IC, OCP) weight matrix (tap order (a, b)).
    ic, oc, k, _ = w_t.shape
    wf = jnp.transpose(jnp.flip(w_t, axis=(2, 3)), (2, 3, 0, 1))   # (kh, kw, ic, oc)
    groups = []
    for r in (0, 1):
        for c in (0, 1):
            taps = [wf[2 * a + r, 2 * b + c] for a in (0, 1) for b in (0, 1)]
            groups.append(jnp.concatenate(taps, axis=0))            # (4*ic, oc)
    w = jnp.stack(groups, axis=0)                                   # (4, 4*ic, oc)
    return _pad_last(w, ocp).astype(jnp.bfloat16)


def _patches_1x1_input(z2d, k):
    # z2d: (B, NZ) -> (k*k, B, NZ); every output position sees the same z.
    return jnp.broadcast_to(z2d[None], (k * k,) + z2d.shape).astype(jnp.bfloat16)


def _patches_stride2(x):
    # x: (B, H, W, IC) -> (4, B*H*W, 4*IC); phase g = 2r+c, tap order (a, b).
    b, h, w, ic = x.shape
    xp = jnp.pad(x, ((0, 0), (1, 1), (1, 1), (0, 0)))
    groups = []
    for r in (0, 1):
        for c in (0, 1):
            taps = [xp[:, r + a:r + a + h, c + bb:c + bb + w, :]
                    for a in (0, 1) for bb in (0, 1)]
            groups.append(jnp.concatenate(taps, axis=-1).reshape(b * h * w, 4 * ic))
    return jnp.stack(groups, axis=0).astype(jnp.bfloat16)


def _pixel_shuffle(y, b, h, w):
    # y: (4, B*H*W, C), group g = 2r+c -> (B, 2H, 2W, C) interleaved output.
    ch = y.shape[-1]
    y = y.reshape(2, 2, b, h, w, ch)            # (r, c, b, i, j, ch)
    y = jnp.transpose(y, (2, 3, 0, 4, 1, 5))    # (b, i, r, j, c, ch)
    return y.reshape(b, 2 * h, 2 * w, ch)


def _assemble_1x1(y, b, k):
    # y: (k*k, B, C), group p = kh*k + kw -> (B, k, k, C)
    ch = y.shape[-1]
    return jnp.transpose(y, (1, 0, 2)).reshape(b, k, k, ch)


def _bn_scale_shift(s, sq, gamma_p, beta_p, m_total):
    mean = s / m_total
    var = jnp.maximum(sq / m_total - mean * mean, 0.0)   # biased var; clamp cancellation
    scale = gamma_p * jax.lax.rsqrt(var + BN_EPS)
    shift = beta_p - mean * scale
    return scale, shift


# ----------------------------------------------------------------------------
# Parameters (deterministic DCGAN-style init) and forward pass
# ----------------------------------------------------------------------------
def init_params(key):
    params = []
    for (ic, oc, _, _, has_bn) in LAYER_CFG:
        key, kw, kg = jax.random.split(key, 3)
        layer = {"w": 0.02 * jax.random.normal(kw, (ic, oc, KSIZE, KSIZE),
                                               jnp.float32)}
        if has_bn:
            layer["gamma"] = 1.0 + 0.02 * jax.random.normal(kg, (oc,), jnp.float32)
            layer["beta"] = jnp.zeros((oc,), jnp.float32)
        params.append(layer)
    return params


def preprocess_params(params):
    # Convert PyTorch-layout ConvTranspose weights to phase-decomposed,
    # channel-padded bf16 kernel weights; pad BN gamma/beta to 128 lanes.
    prepped = []
    for layer, (ic, oc, stride, _pad, has_bn) in zip(params, LAYER_CFG):
        ocp = _round_up(oc, LANES)
        if stride == 1:
            w_mat = _prep_w_1x1_input(layer["w"], ocp)
        else:
            w_mat = _prep_w_stride2(layer["w"], ocp)
        entry = {"w_mat": w_mat}
        if has_bn:
            entry["gamma_p"] = _pad_last(layer["gamma"][None, :], ocp)
            entry["beta_p"] = _pad_last(layer["beta"][None, :], ocp)
        prepped.append(entry)
    return prepped


def netG_forward(prepped, z_nchw):
    # z_nchw: (B, nz, 1, 1) -> output (B, nc, 64, 64), NCHW like PyTorch.
    b = z_nchw.shape[0]
    z = z_nchw.reshape(b, NZ).astype(jnp.float32)

    # layer 1: ConvTranspose(nz, 8ngf, 4, 1, 0) + BN + ReLU   (1x1 -> 4x4)
    oc = LAYER_CFG[0][1]
    p = _patches_1x1_input(z, KSIZE)                            # (16, B, NZ)
    y, s, sq = conv_stats_pallas(p, prepped[0]["w_mat"])        # (16, B, OCP)
    scale, shift = _bn_scale_shift(s, sq, prepped[0]["gamma_p"],
                                   prepped[0]["beta_p"],
                                   y.shape[0] * y.shape[1])
    act = bn_relu_pallas(y, scale, shift)                       # bf16
    x = _assemble_1x1(act, b, KSIZE)[..., :oc]                  # (B, 4, 4, oc)

    # layers 2-4: stride-2 ConvTranspose + BN + ReLU (4-phase decomposition)
    for li in (1, 2, 3):
        oc = LAYER_CFG[li][1]
        h, w = x.shape[1], x.shape[2]
        p = _patches_stride2(x)                                 # (4, B*H*W, 4*IC)
        y, s, sq = conv_stats_pallas(p, prepped[li]["w_mat"])   # (4, B*H*W, OCP)
        scale, shift = _bn_scale_shift(s, sq, prepped[li]["gamma_p"],
                                       prepped[li]["beta_p"],
                                       y.shape[0] * y.shape[1])
        act = bn_relu_pallas(y, scale, shift)
        x = _pixel_shuffle(act, b, h, w)[..., :oc]              # (B, 2H, 2W, oc)

    # layer 5: stride-2 ConvTranspose + Tanh (fused into the matmul kernel)
    oc = LAYER_CFG[4][1]
    h, w = x.shape[1], x.shape[2]
    p = _patches_stride2(x)
    y = conv_tanh_pallas(p, prepped[4]["w_mat"])                # (4, B*H*W, OCP)
    img = _pixel_shuffle(y, b, h, w)[..., :oc]                  # (B, 64, 64, nc)
    return jnp.transpose(img, (0, 3, 1, 2))                     # NCHW


if __name__ == "__main__":
    key = jax.random.PRNGKey(0)
    key, zk = jax.random.split(key)
    params = init_params(key)
    prepped = preprocess_params(params)
    z = jax.random.normal(zk, (BATCH, NZ, 1, 1), jnp.float32)

    fwd = jax.jit(netG_forward)
    out = jax.block_until_ready(fwd(prepped, z))

    assert out.shape == (BATCH, NC, 64, 64), out.shape
    assert bool(jnp.all(jnp.isfinite(out)))
    assert float(jnp.max(jnp.abs(out))) <= 1.0 + 1e-5   # tanh range
    print("KERNEL_OK")
</pallas_src>

<mosaic_0001>
module attributes {stable_mosaic.version = 11 : i64} {
  func.func @_conv_stats_kernel(%arg0: i32, %arg1: memref<1x2x16xbf16, #tpu.memory_space<vmem>>, %arg2: memref<1x16x128xbf16, #tpu.memory_space<vmem>>, %arg3: memref<1x2x128xf32, #tpu.memory_space<vmem>>, %arg4: memref<1x128xf32, #tpu.memory_space<vmem>>, %arg5: memref<1x128xf32, #tpu.memory_space<vmem>>) attributes {dimension_semantics = [#tpu.dimension_semantics<arbitrary>], iteration_bounds = array<i64: 16>, scalar_prefetch = 0 : i64, scratch_operands = 0 : i64, tpu.core_type = #tpu.core_type<tc>, window_params = [{transform_indices = @transform_0, window_bounds = array<i64: 1, 2, 16>}, {transform_indices = @transform_1, window_bounds = array<i64: 1, 16, 128>}, {transform_indices = @transform_2, window_bounds = array<i64: 1, 2, 128>}, {pipeline_mode = #tpu.pipeline_mode<synchronous>, transform_indices = @transform_3, window_bounds = array<i64: 1, 128>}, {pipeline_mode = #tpu.pipeline_mode<synchronous>, transform_indices = @transform_4, window_bounds = array<i64: 1, 128>}]} {
    %c0 = arith.constant 0 : index
    %c0_0 = arith.constant 0 : index
    %c0_1 = arith.constant 0 : index
    %0 = vector.load %arg1[%c0, %c0_0, %c0_1] : memref<1x2x16xbf16, #tpu.memory_space<vmem>>, vector<1x2x16xbf16>
    %1 = vector.shape_cast %0 : vector<1x2x16xbf16> to vector<2x16xbf16>
    %c0_2 = arith.constant 0 : index
    %c0_3 = arith.constant 0 : index
    %c0_4 = arith.constant 0 : index
    %2 = vector.load %arg2[%c0_2, %c0_3, %c0_4] : memref<1x16x128xbf16, #tpu.memory_space<vmem>>, vector<1x16x128xbf16>
    %3 = vector.shape_cast %2 : vector<1x16x128xbf16> to vector<16x128xbf16>
    %cst = arith.constant dense<0.000000e+00> : vector<2x128xf32>
    %4 = tpu.matmul %1, %3, %cst {dimension_numbers = #tpu.dot_dimension_numbers<[1], [0], [0], [1], [0, 0, 1, 1], [], []>} : vector<2x16xbf16>, vector<16x128xbf16>, vector<2x128xf32> -> vector<2x128xf32>
    %c0_5 = arith.constant 0 : index
    %c0_6 = arith.constant 0 : index
    %c0_7 = arith.constant 0 : index
    %5 = vector.load %arg3[%c0_5, %c0_6, %c0_7] : memref<1x2x128xf32, #tpu.memory_space<vmem>>, vector<1x2x128xf32>
    %6 = vector.shape_cast %5 : vector<1x2x128xf32> to vector<2x128xf32>
    %7 = vector.shape_cast %4 : vector<2x128xf32> to vector<1x2x128xf32>
    tpu.vector_store %arg3[%c0_5, %c0_6, %c0_7], %7 {strides = array<i32>} : memref<1x2x128xf32, #tpu.memory_space<vmem>>, vector<1x2x128xf32>,
    %c0_i32 = arith.constant 0 : i32
    %8 = arith.cmpi eq, %arg0, %c0_i32 : i32
    %9 = arith.extui %8 : i1 to i32
    %c0_i32_8 = arith.constant 0 : i32
    %10 = arith.cmpi ne, %9, %c0_i32_8 : i32
    scf.if %10 {
      %cst_19 = arith.constant 0.000000e+00 : f32
      %22 = vector.broadcast %cst_19 : f32 to vector<1x128xf32>
      %c0_20 = arith.constant 0 : index
      %c0_21 = arith.constant 0 : index
      %23 = vector.load %arg4[%c0_20, %c0_21] : memref<1x128xf32, #tpu.memory_space<vmem>>, vector<1x128xf32>
      tpu.vector_store %arg4[%c0_20, %c0_21], %22 {strides = array<i32>} : memref<1x128xf32, #tpu.memory_space<vmem>>, vector<1x128xf32>,
      %cst_22 = arith.constant 0.000000e+00 : f32
      %24 = vector.broadcast %cst_22 : f32 to vector<1x128xf32>
      %c0_23 = arith.constant 0 : index
      %c0_24 = arith.constant 0 : index
      %25 = vector.load %arg5[%c0_23, %c0_24] : memref<1x128xf32, #tpu.memory_space<vmem>>, vector<1x128xf32>
      tpu.vector_store %arg5[%c0_23, %c0_24], %24 {strides = array<i32>} : memref<1x128xf32, #tpu.memory_space<vmem>>, vector<1x128xf32>,
    } else {
    }
    %c0_9 = arith.constant 0 : index
    %c0_10 = arith.constant 0 : index
    %11 = vector.load %arg4[%c0_9, %c0_10] : memref<1x128xf32, #tpu.memory_space<vmem>>, vector<1x128xf32>
    %cst_11 = arith.constant dense<0.000000e+00> : vector<128xf32>
    %12 = vector.multi_reduction <add>, %4, %cst_11 [0] : vector<2x128xf32> to vector<128xf32>
    %13 = vector.shape_cast %12 : vector<128xf32> to vector<1x128xf32>
    %14 = arith.addf %11, %13 : vector<1x128xf32>
    %c0_12 = arith.constant 0 : index
    %c0_13 = arith.constant 0 : index
    %15 = vector.load %arg4[%c0_12, %c0_13] : memref<1x128xf32, #tpu.memory_space<vmem>>, vector<1x128xf32>
    tpu.vector_store %arg4[%c0_12, %c0_13], %14 {strides = array<i32>} : memref<1x128xf32, #tpu.memory_space<vmem>>, vector<1x128xf32>,
    %c0_14 = arith.constant 0 : index
    %c0_15 = arith.constant 0 : index
    %16 = vector.load %arg5[%c0_14, %c0_15] : memref<1x128xf32, #tpu.memory_space<vmem>>, vector<1x128xf32>
    %17 = arith.mulf %4, %4 : vector<2x128xf32>
    %cst_16 = arith.constant dense<0.000000e+00> : vector<128xf32>
    %18 = vector.multi_reduction <add>, %17, %cst_16 [0] : vector<2x128xf32> to vector<128xf32>
    %19 = vector.shape_cast %18 : vector<128xf32> to vector<1x128xf32>
    %20 = arith.addf %16, %19 : vector<1x128xf32>
    %c0_17 = arith.constant 0 : index
    %c0_18 = arith.constant 0 : index
    %21 = vector.load %arg5[%c0_17, %c0_18] : memref<1x128xf32, #tpu.memory_space<vmem>>, vector<1x128xf32>
    tpu.vector_store %arg5[%c0_17, %c0_18], %20 {strides = array<i32>} : memref<1x128xf32, #tpu.memory_space<vmem>>, vector<1x128xf32>,
    return
  }
  func.func @transform_0(%arg0: i32) -> (i32, i32, i32) {
    %c0_i32 = arith.constant 0 : i32
    %c0_i32_0 = arith.constant 0 : i32
    %c0_i32_1 = arith.constant 0 : i32
    return %arg0, %c0_i32, %c0_i32_0 : i32, i32, i32
  }
  func.func @transform_1(%arg0: i32) -> (i32, i32, i32) {
    %c0_i32 = arith.constant 0 : i32
    %c0_i32_0 = arith.constant 0 : i32
    %c0_i32_1 = arith.constant 0 : i32
    return %arg0, %c0_i32, %c0_i32_0 : i32, i32, i32
  }
  func.func @transform_2(%arg0: i32) -> (i32, i32, i32) {
    %c0_i32 = arith.constant 0 : i32
    %c0_i32_0 = arith.constant 0 : i32
    %c0_i32_1 = arith.constant 0 : i32
    return %arg0, %c0_i32, %c0_i32_0 : i32, i32, i32
  }
  func.func @transform_3(%arg0: i32) -> (i32, i32) {
    %c0_i32 = arith.constant 0 : i32
    %c0_i32_0 = arith.constant 0 : i32
    %c0_i32_1 = arith.constant 0 : i32
    return %c0_i32, %c0_i32_0 : i32, i32
  }
  func.func @transform_4(%arg0: i32) -> (i32, i32) {
    %c0_i32 = arith.constant 0 : i32
    %c0_i32_0 = arith.constant 0 : i32
    %c0_i32_1 = arith.constant 0 : i32
    return %c0_i32, %c0_i32_0 : i32, i32
  }
}

module attributes {stable_mosaic.version = 11 : i64} {
  func.func @_bn_relu_kernel(%arg0: i32, %arg1: memref<16x2x128xf32, #tpu.memory_space<vmem>>, %arg2: memref<1x1x128xf32, #tpu.memory_space<vmem>>, %arg3: memref<1x1x128xf32, #tpu.memory_space<vmem>>, %arg4: memref<16x2x128xbf16, #tpu.memory_space<vmem>>) attributes {dimension_semantics = [#tpu.dimension_semantics<parallel>], iteration_bounds = array<i64: 1>, scalar_prefetch = 0 : i64, scratch_operands = 0 : i64, tpu.core_type = #tpu.core_type<tc>, window_params = [{pipeline_mode = #tpu.pipeline_mode<synchronous>, transform_indices = @transform_0, window_bounds = array<i64: 16, 2, 128>}, {pipeline_mode = #tpu.pipeline_mode<synchronous>, transform_indices = @transform_1, window_bounds = array<i64: 1, 1, 128>}, {pipeline_mode = #tpu.pipeline_mode<synchronous>, transform_indices = @transform_2, window_bounds = array<i64: 1, 1, 128>}, {pipeline_mode = #tpu.pipeline_mode<synchronous>, transform_indices = @transform_3, window_bounds = array<i64: 16, 2, 128>}]} {
    %c0 = arith.constant 0 : index
    %c0_0 = arith.constant 0 : index
    %c0_1 = arith.constant 0 : index
    %0 = vector.load %arg1[%c0, %c0_0, %c0_1] : memref<16x2x128xf32, #tpu.memory_space<vmem>>, vector<16x2x128xf32>
    %c0_2 = arith.constant 0 : index
    %c0_3 = arith.constant 0 : index
    %c0_4 = arith.constant 0 : index
    %1 = vector.load %arg2[%c0_2, %c0_3, %c0_4] : memref<1x1x128xf32, #tpu.memory_space<vmem>>, vector<1x1x128xf32>
    %2 = vector.broadcast %1 : vector<1x1x128xf32> to vector<16x2x128xf32>
    %3 = arith.mulf %0, %2 : vector<16x2x128xf32>
    %c0_5 = arith.constant 0 : index
    %c0_6 = arith.constant 0 : index
    %c0_7 = arith.constant 0 : index
    %4 = vector.load %arg3[%c0_5, %c0_6, %c0_7] : memref<1x1x128xf32, #tpu.memory_space<vmem>>, vector<1x1x128xf32>
    %5 = vector.broadcast %4 : vector<1x1x128xf32> to vector<16x2x128xf32>
    %6 = arith.addf %3, %5 : vector<16x2x128xf32>
    %cst = arith.constant 0.000000e+00 : f32
    %7 = vector.broadcast %cst : f32 to vector<16x2x128xf32>
    %8 = arith.maximumf %6, %7 : vector<16x2x128xf32>
    %9 = arith.truncf %8 : vector<16x2x128xf32> to vector<16x2x128xbf16>
    %c0_8 = arith.constant 0 : index
    %c0_9 = arith.constant 0 : index
    %c0_10 = arith.constant 0 : index
    %10 = vector.load %arg4[%c0_8, %c0_9, %c0_10] : memref<16x2x128xbf16, #tpu.memory_space<vmem>>, vector<16x2x128xbf16>
    tpu.vector_store %arg4[%c0_8, %c0_9, %c0_10], %9 {strides = array<i32>} : memref<16x2x128xbf16, #tpu.memory_space<vmem>>, vector<16x2x128xbf16>,
    return
  }
  func.func @transform_0(%arg0: i32) -> (i32, i32, i32) {
    %c0_i32 = arith.constant 0 : i32
    %c0_i32_0 = arith.constant 0 : i32
    %c0_i32_1 = arith.constant 0 : i32
    %c0_i32_2 = arith.constant 0 : i32
    return %c0_i32, %c0_i32_0, %c0_i32_1 : i32, i32, i32
  }
  func.func @transform_1(%arg0: i32) -> (i32, i32, i32) {
    %c0_i32 = arith.constant 0 : i32
    %c0_i32_0 = arith.constant 0 : i32
    %c0_i32_1 = arith.constant 0 : i32
    %c0_i32_2 = arith.constant 0 : i32
    return %c0_i32, %c0_i32_0, %c0_i32_1 : i32, i32, i32
  }
  func.func @transform_2(%arg0: i32) -> (i32, i32, i32) {
    %c0_i32 = arith.constant 0 : i32
    %c0_i32_0 = arith.constant 0 : i32
    %c0_i32_1 = arith.constant 0 : i32
    %c0_i32_2 = arith.constant 0 : i32
    return %c0_i32, %c0_i32_0, %c0_i32_1 : i32, i32, i32
  }
  func.func @transform_3(%arg0: i32) -> (i32, i32, i32) {
    %c0_i32 = arith.constant 0 : i32
    %c0_i32_0 = arith.constant 0 : i32
    %c0_i32_1 = arith.constant 0 : i32
    %c0_i32_2 = arith.constant 0 : i32
    return %c0_i32, %c0_i32_0, %c0_i32_1 : i32, i32, i32
  }
}

module attributes {stable_mosaic.version = 11 : i64} {
  func.func @_bn_relu_kernel(%arg0: i32, %arg1: memref<4x32x128xf32, #tpu.memory_space<vmem>>, %arg2: memref<1x1x128xf32, #tpu.memory_space<vmem>>, %arg3: memref<1x1x128xf32, #tpu.memory_space<vmem>>, %arg4: memref<4x32x128xbf16, #tpu.memory_space<vmem>>) attributes {dimension_semantics = [#tpu.dimension_semantics<parallel>], iteration_bounds = array<i64: 1>, scalar_prefetch = 0 : i64, scratch_operands = 0 : i64, tpu.core_type = #tpu.core_type<tc>, window_params = [{pipeline_mode = #tpu.pipeline_mode<synchronous>, transform_indices = @transform_0, window_bounds = array<i64: 4, 32, 128>}, {pipeline_mode = #tpu.pipeline_mode<synchronous>, transform_indices = @transform_1, window_bounds = array<i64: 1, 1, 128>}, {pipeline_mode = #tpu.pipeline_mode<synchronous>, transform_indices = @transform_2, window_bounds = array<i64: 1, 1, 128>}, {pipeline_mode = #tpu.pipeline_mode<synchronous>, transform_indices = @transform_3, window_bounds = array<i64: 4, 32, 128>}]} {
    %c0 = arith.constant 0 : index
    %c0_0 = arith.constant 0 : index
    %c0_1 = arith.constant 0 : index
    %0 = vector.load %arg1[%c0, %c0_0, %c0_1] : memref<4x32x128xf32, #tpu.memory_space<vmem>>, vector<4x32x128xf32>
    %c0_2 = arith.constant 0 : index
    %c0_3 = arith.constant 0 : index
    %c0_4 = arith.constant 0 : index
    %1 = vector.load %arg2[%c0_2, %c0_3, %c0_4] : memref<1x1x128xf32, #tpu.memory_space<vmem>>, vector<1x1x128xf32>
    %2 = vector.broadcast %1 : vector<1x1x128xf32> to vector<4x32x128xf32>
    %3 = arith.mulf %0, %2 : vector<4x32x128xf32>
    %c0_5 = arith.constant 0 : index
    %c0_6 = arith.constant 0 : index
    %c0_7 = arith.constant 0 : index
    %4 = vector.load %arg3[%c0_5, %c0_6, %c0_7] : memref<1x1x128xf32, #tpu.memory_space<vmem>>, vector<1x1x128xf32>
    %5 = vector.broadcast %4 : vector<1x1x128xf32> to vector<4x32x128xf32>
    %6 = arith.addf %3, %5 : vector<4x32x128xf32>
    %cst = arith.constant 0.000000e+00 : f32
    %7 = vector.broadcast %cst : f32 to vector<4x32x128xf32>
    %8 = arith.maximumf %6, %7 : vector<4x32x128xf32>
    %9 = arith.truncf %8 : vector<4x32x128xf32> to vector<4x32x128xbf16>
    %c0_8 = arith.constant 0 : index
    %c0_9 = arith.constant 0 : index
    %c0_10 = arith.constant 0 : index
    %10 = vector.load %arg4[%c0_8, %c0_9, %c0_10] : memref<4x32x128xbf16, #tpu.memory_space<vmem>>, vector<4x32x128xbf16>
    tpu.vector_store %arg4[%c0_8, %c0_9, %c0_10], %9 {strides = array<i32>} : memref<4x32x128xbf16, #tpu.memory_space<vmem>>, vector<4x32x128xbf16>,
    return
  }
  func.func @transform_0(%arg0: i32) -> (i32, i32, i32) {
    %c0_i32 = arith.constant 0 : i32
    %c0_i32_0 = arith.constant 0 : i32
    %c0_i32_1 = arith.constant 0 : i32
    %c0_i32_2 = arith.constant 0 : i32
    return %c0_i32, %c0_i32_0, %c0_i32_1 : i32, i32, i32
  }
  func.func @transform_1(%arg0: i32) -> (i32, i32, i32) {
    %c0_i32 = arith.constant 0 : i32
    %c0_i32_0 = arith.constant 0 : i32
    %c0_i32_1 = arith.constant 0 : i32
    %c0_i32_2 = arith.constant 0 : i32
    return %c0_i32, %c0_i32_0, %c0_i32_1 : i32, i32, i32
  }
  func.func @transform_2(%arg0: i32) -> (i32, i32, i32) {
    %c0_i32 = arith.constant 0 : i32
    %c0_i32_0 = arith.constant 0 : i32
    %c0_i32_1 = arith.constant 0 : i32
    %c0_i32_2 = arith.constant 0 : i32
    return %c0_i32, %c0_i32_0, %c0_i32_1 : i32, i32, i32
  }
  func.func @transform_3(%arg0: i32) -> (i32, i32, i32) {
    %c0_i32 = arith.constant 0 : i32
    %c0_i32_0 = arith.constant 0 : i32
    %c0_i32_1 = arith.constant 0 : i32
    %c0_i32_2 = arith.constant 0 : i32
    return %c0_i32, %c0_i32_0, %c0_i32_1 : i32, i32, i32
  }
}

module attributes {stable_mosaic.version = 11 : i64} {
  func.func @_conv_stats_kernel(%arg0: i32, %arg1: memref<1x32x256xbf16, #tpu.memory_space<vmem>>, %arg2: memref<1x256x128xbf16, #tpu.memory_space<vmem>>, %arg3: memref<1x32x128xf32, #tpu.memory_space<vmem>>, %arg4: memref<1x128xf32, #tpu.memory_space<vmem>>, %arg5: memref<1x128xf32, #tpu.memory_space<vmem>>) attributes {dimension_semantics = [#tpu.dimension_semantics<arbitrary>], iteration_bounds = array<i64: 4>, scalar_prefetch = 0 : i64, scratch_operands = 0 : i64, tpu.core_type = #tpu.core_type<tc>, window_params = [{transform_indices = @transform_0, window_bounds = array<i64: 1, 32, 256>}, {transform_indices = @transform_1, window_bounds = array<i64: 1, 256, 128>}, {transform_indices = @transform_2, window_bounds = array<i64: 1, 32, 128>}, {pipeline_mode = #tpu.pipeline_mode<synchronous>, transform_indices = @transform_3, window_bounds = array<i64: 1, 128>}, {pipeline_mode = #tpu.pipeline_mode<synchronous>, transform_indices = @transform_4, window_bounds = array<i64: 1, 128>}]} {
    %c0 = arith.constant 0 : index
    %c0_0 = arith.constant 0 : index
    %c0_1 = arith.constant 0 : index
    %0 = vector.load %arg1[%c0, %c0_0, %c0_1] : memref<1x32x256xbf16, #tpu.memory_space<vmem>>, vector<1x32x256xbf16>
    %1 = vector.shape_cast %0 : vector<1x32x256xbf16> to vector<32x256xbf16>
    %c0_2 = arith.constant 0 : index
    %c0_3 = arith.constant 0 : index
    %c0_4 = arith.constant 0 : index
    %2 = vector.load %arg2[%c0_2, %c0_3, %c0_4] : memref<1x256x128xbf16, #tpu.memory_space<vmem>>, vector<1x256x128xbf16>
    %3 = vector.shape_cast %2 : vector<1x256x128xbf16> to vector<256x128xbf16>
    %cst = arith.constant dense<0.000000e+00> : vector<32x128xf32>
    %4 = tpu.matmul %1, %3, %cst {dimension_numbers = #tpu.dot_dimension_numbers<[1], [0], [0], [1], [0, 0, 1, 1], [], []>} : vector<32x256xbf16>, vector<256x128xbf16>, vector<32x128xf32> -> vector<32x128xf32>
    %c0_5 = arith.constant 0 : index
    %c0_6 = arith.constant 0 : index
    %c0_7 = arith.constant 0 : index
    %5 = vector.load %arg3[%c0_5, %c0_6, %c0_7] : memref<1x32x128xf32, #tpu.memory_space<vmem>>, vector<1x32x128xf32>
    %6 = vector.shape_cast %5 : vector<1x32x128xf32> to vector<32x128xf32>
    %7 = vector.shape_cast %4 : vector<32x128xf32> to vector<1x32x128xf32>
    tpu.vector_store %arg3[%c0_5, %c0_6, %c0_7], %7 {strides = array<i32>} : memref<1x32x128xf32, #tpu.memory_space<vmem>>, vector<1x32x128xf32>,
    %c0_i32 = arith.constant 0 : i32
    %8 = arith.cmpi eq, %arg0, %c0_i32 : i32
    %9 = arith.extui %8 : i1 to i32
    %c0_i32_8 = arith.constant 0 : i32
    %10 = arith.cmpi ne, %9, %c0_i32_8 : i32
    scf.if %10 {
      %cst_19 = arith.constant 0.000000e+00 : f32
      %22 = vector.broadcast %cst_19 : f32 to vector<1x128xf32>
      %c0_20 = arith.constant 0 : index
      %c0_21 = arith.constant 0 : index
      %23 = vector.load %arg4[%c0_20, %c0_21] : memref<1x128xf32, #tpu.memory_space<vmem>>, vector<1x128xf32>
      tpu.vector_store %arg4[%c0_20, %c0_21], %22 {strides = array<i32>} : memref<1x128xf32, #tpu.memory_space<vmem>>, vector<1x128xf32>,
      %cst_22 = arith.constant 0.000000e+00 : f32
      %24 = vector.broadcast %cst_22 : f32 to vector<1x128xf32>
      %c0_23 = arith.constant 0 : index
      %c0_24 = arith.constant 0 : index
      %25 = vector.load %arg5[%c0_23, %c0_24] : memref<1x128xf32, #tpu.memory_space<vmem>>, vector<1x128xf32>
      tpu.vector_store %arg5[%c0_23, %c0_24], %24 {strides = array<i32>} : memref<1x128xf32, #tpu.memory_space<vmem>>, vector<1x128xf32>,
    } else {
    }
    %c0_9 = arith.constant 0 : index
    %c0_10 = arith.constant 0 : index
    %11 = vector.load %arg4[%c0_9, %c0_10] : memref<1x128xf32, #tpu.memory_space<vmem>>, vector<1x128xf32>
    %cst_11 = arith.constant dense<0.000000e+00> : vector<128xf32>
    %12 = vector.multi_reduction <add>, %4, %cst_11 [0] : vector<32x128xf32> to vector<128xf32>
    %13 = vector.shape_cast %12 : vector<128xf32> to vector<1x128xf32>
    %14 = arith.addf %11, %13 : vector<1x128xf32>
    %c0_12 = arith.constant 0 : index
    %c0_13 = arith.constant 0 : index
    %15 = vector.load %arg4[%c0_12, %c0_13] : memref<1x128xf32, #tpu.memory_space<vmem>>, vector<1x128xf32>
    tpu.vector_store %arg4[%c0_12, %c0_13], %14 {strides = array<i32>} : memref<1x128xf32, #tpu.memory_space<vmem>>, vector<1x128xf32>,
    %c0_14 = arith.constant 0 : index
    %c0_15 = arith.constant 0 : index
    %16 = vector.load %arg5[%c0_14, %c0_15] : memref<1x128xf32, #tpu.memory_space<vmem>>, vector<1x128xf32>
    %17 = arith.mulf %4, %4 : vector<32x128xf32>
    %cst_16 = arith.constant dense<0.000000e+00> : vector<128xf32>
    %18 = vector.multi_reduction <add>, %17, %cst_16 [0] : vector<32x128xf32> to vector<128xf32>
    %19 = vector.shape_cast %18 : vector<128xf32> to vector<1x128xf32>
    %20 = arith.addf %16, %19 : vector<1x128xf32>
    %c0_17 = arith.constant 0 : index
    %c0_18 = arith.constant 0 : index
    %21 = vector.load %arg5[%c0_17, %c0_18] : memref<1x128xf32, #tpu.memory_space<vmem>>, vector<1x128xf32>
    tpu.vector_store %arg5[%c0_17, %c0_18], %20 {strides = array<i32>} : memref<1x128xf32, #tpu.memory_space<vmem>>, vector<1x128xf32>,
    return
  }
  func.func @transform_0(%arg0: i32) -> (i32, i32, i32) {
    %c0_i32 = arith.constant 0 : i32
    %c0_i32_0 = arith.constant 0 : i32
    %c0_i32_1 = arith.constant 0 : i32
    return %arg0, %c0_i32, %c0_i32_0 : i32, i32, i32
  }
  func.func @transform_1(%arg0: i32) -> (i32, i32, i32) {
    %c0_i32 = arith.constant 0 : i32
    %c0_i32_0 = arith.constant 0 : i32
    %c0_i32_1 = arith.constant 0 : i32
    return %arg0, %c0_i32, %c0_i32_0 : i32, i32, i32
  }
  func.func @transform_2(%arg0: i32) -> (i32, i32, i32) {
    %c0_i32 = arith.constant 0 : i32
    %c0_i32_0 = arith.constant 0 : i32
    %c0_i32_1 = arith.constant 0 : i32
    return %arg0, %c0_i32, %c0_i32_0 : i32, i32, i32
  }
  func.func @transform_3(%arg0: i32) -> (i32, i32) {
    %c0_i32 = arith.constant 0 : i32
    %c0_i32_0 = arith.constant 0 : i32
    %c0_i32_1 = arith.constant 0 : i32
    return %c0_i32, %c0_i32_0 : i32, i32
  }
  func.func @transform_4(%arg0: i32) -> (i32, i32) {
    %c0_i32 = arith.constant 0 : i32
    %c0_i32_0 = arith.constant 0 : i32
    %c0_i32_1 = arith.constant 0 : i32
    return %c0_i32, %c0_i32_0 : i32, i32
  }
}

module attributes {stable_mosaic.version = 11 : i64} {
  func.func @_conv_stats_kernel(%arg0: i32, %arg1: memref<1x128x128xbf16, #tpu.memory_space<vmem>>, %arg2: memref<1x128x128xbf16, #tpu.memory_space<vmem>>, %arg3: memref<1x128x128xf32, #tpu.memory_space<vmem>>, %arg4: memref<1x128xf32, #tpu.memory_space<vmem>>, %arg5: memref<1x128xf32, #tpu.memory_space<vmem>>) attributes {dimension_semantics = [#tpu.dimension_semantics<arbitrary>], iteration_bounds = array<i64: 4>, scalar_prefetch = 0 : i64, scratch_operands = 0 : i64, tpu.core_type = #tpu.core_type<tc>, window_params = [{transform_indices = @transform_0, window_bounds = array<i64: 1, 128, 128>}, {transform_indices = @transform_1, window_bounds = array<i64: 1, 128, 128>}, {transform_indices = @transform_2, window_bounds = array<i64: 1, 128, 128>}, {pipeline_mode = #tpu.pipeline_mode<synchronous>, transform_indices = @transform_3, window_bounds = array<i64: 1, 128>}, {pipeline_mode = #tpu.pipeline_mode<synchronous>, transform_indices = @transform_4, window_bounds = array<i64: 1, 128>}]} {
    %c0 = arith.constant 0 : index
    %c0_0 = arith.constant 0 : index
    %c0_1 = arith.constant 0 : index
    %0 = vector.load %arg1[%c0, %c0_0, %c0_1] : memref<1x128x128xbf16, #tpu.memory_space<vmem>>, vector<1x128x128xbf16>
    %1 = vector.shape_cast %0 : vector<1x128x128xbf16> to vector<128x128xbf16>
    %c0_2 = arith.constant 0 : index
    %c0_3 = arith.constant 0 : index
    %c0_4 = arith.constant 0 : index
    %2 = vector.load %arg2[%c0_2, %c0_3, %c0_4] : memref<1x128x128xbf16, #tpu.memory_space<vmem>>, vector<1x128x128xbf16>
    %3 = vector.shape_cast %2 : vector<1x128x128xbf16> to vector<128x128xbf16>
    %cst = arith.constant dense<0.000000e+00> : vector<128x128xf32>
    %4 = tpu.matmul %1, %3, %cst {dimension_numbers = #tpu.dot_dimension_numbers<[1], [0], [0], [1], [0, 0, 1, 1], [], []>} : vector<128x128xbf16>, vector<128x128xbf16>, vector<128x128xf32> -> vector<128x128xf32>
    %c0_5 = arith.constant 0 : index
    %c0_6 = arith.constant 0 : index
    %c0_7 = arith.constant 0 : index
    %5 = vector.load %arg3[%c0_5, %c0_6, %c0_7] : memref<1x128x128xf32, #tpu.memory_space<vmem>>, vector<1x128x128xf32>
    %6 = vector.shape_cast %5 : vector<1x128x128xf32> to vector<128x128xf32>
    %7 = vector.shape_cast %4 : vector<128x128xf32> to vector<1x128x128xf32>
    tpu.vector_store %arg3[%c0_5, %c0_6, %c0_7], %7 {strides = array<i32>} : memref<1x128x128xf32, #tpu.memory_space<vmem>>, vector<1x128x128xf32>,
    %c0_i32 = arith.constant 0 : i32
    %8 = arith.cmpi eq, %arg0, %c0_i32 : i32
    %9 = arith.extui %8 : i1 to i32
    %c0_i32_8 = arith.constant 0 : i32
    %10 = arith.cmpi ne, %9, %c0_i32_8 : i32
    scf.if %10 {
      %cst_19 = arith.constant 0.000000e+00 : f32
      %22 = vector.broadcast %cst_19 : f32 to vector<1x128xf32>
      %c0_20 = arith.constant 0 : index
      %c0_21 = arith.constant 0 : index
      %23 = vector.load %arg4[%c0_20, %c0_21] : memref<1x128xf32, #tpu.memory_space<vmem>>, vector<1x128xf32>
      tpu.vector_store %arg4[%c0_20, %c0_21], %22 {strides = array<i32>} : memref<1x128xf32, #tpu.memory_space<vmem>>, vector<1x128xf32>,
      %cst_22 = arith.constant 0.000000e+00 : f32
      %24 = vector.broadcast %cst_22 : f32 to vector<1x128xf32>
      %c0_23 = arith.constant 0 : index
      %c0_24 = arith.constant 0 : index
      %25 = vector.load %arg5[%c0_23, %c0_24] : memref<1x128xf32, #tpu.memory_space<vmem>>, vector<1x128xf32>
      tpu.vector_store %arg5[%c0_23, %c0_24], %24 {strides = array<i32>} : memref<1x128xf32, #tpu.memory_space<vmem>>, vector<1x128xf32>,
    } else {
    }
    %c0_9 = arith.constant 0 : index
    %c0_10 = arith.constant 0 : index
    %11 = vector.load %arg4[%c0_9, %c0_10] : memref<1x128xf32, #tpu.memory_space<vmem>>, vector<1x128xf32>
    %cst_11 = arith.constant dense<0.000000e+00> : vector<128xf32>
    %12 = vector.multi_reduction <add>, %4, %cst_11 [0] : vector<128x128xf32> to vector<128xf32>
    %13 = vector.shape_cast %12 : vector<128xf32> to vector<1x128xf32>
    %14 = arith.addf %11, %13 : vector<1x128xf32>
    %c0_12 = arith.constant 0 : index
    %c0_13 = arith.constant 0 : index
    %15 = vector.load %arg4[%c0_12, %c0_13] : memref<1x128xf32, #tpu.memory_space<vmem>>, vector<1x128xf32>
    tpu.vector_store %arg4[%c0_12, %c0_13], %14 {strides = array<i32>} : memref<1x128xf32, #tpu.memory_space<vmem>>, vector<1x128xf32>,
    %c0_14 = arith.constant 0 : index
    %c0_15 = arith.constant 0 : index
    %16 = vector.load %arg5[%c0_14, %c0_15] : memref<1x128xf32, #tpu.memory_space<vmem>>, vector<1x128xf32>
    %17 = arith.mulf %4, %4 : vector<128x128xf32>
    %cst_16 = arith.constant dense<0.000000e+00> : vector<128xf32>
    %18 = vector.multi_reduction <add>, %17, %cst_16 [0] : vector<128x128xf32> to vector<128xf32>
    %19 = vector.shape_cast %18 : vector<128xf32> to vector<1x128xf32>
    %20 = arith.addf %16, %19 : vector<1x128xf32>
    %c0_17 = arith.constant 0 : index
    %c0_18 = arith.constant 0 : index
    %21 = vector.load %arg5[%c0_17, %c0_18] : memref<1x128xf32, #tpu.memory_space<vmem>>, vector<1x128xf32>
    tpu.vector_store %arg5[%c0_17, %c0_18], %20 {strides = array<i32>} : memref<1x128xf32, #tpu.memory_space<vmem>>, vector<1x128xf32>,
    return
  }
  func.func @transform_0(%arg0: i32) -> (i32, i32, i32) {
    %c0_i32 = arith.constant 0 : i32
    %c0_i32_0 = arith.constant 0 : i32
    %c0_i32_1 = arith.constant 0 : i32
    return %arg0, %c0_i32, %c0_i32_0 : i32, i32, i32
  }
  func.func @transform_1(%arg0: i32) -> (i32, i32, i32) {
    %c0_i32 = arith.constant 0 : i32
    %c0_i32_0 = arith.constant 0 : i32
    %c0_i32_1 = arith.constant 0 : i32
    return %arg0, %c0_i32, %c0_i32_0 : i32, i32, i32
  }
  func.func @transform_2(%arg0: i32) -> (i32, i32, i32) {
    %c0_i32 = arith.constant 0 : i32
    %c0_i32_0 = arith.constant 0 : i32
    %c0_i32_1 = arith.constant 0 : i32
    return %arg0, %c0_i32, %c0_i32_0 : i32, i32, i32
  }
  func.func @transform_3(%arg0: i32) -> (i32, i32) {
    %c0_i32 = arith.constant 0 : i32
    %c0_i32_0 = arith.constant 0 : i32
    %c0_i32_1 = arith.constant 0 : i32
    return %c0_i32, %c0_i32_0 : i32, i32
  }
  func.func @transform_4(%arg0: i32) -> (i32, i32) {
    %c0_i32 = arith.constant 0 : i32
    %c0_i32_0 = arith.constant 0 : i32
    %c0_i32_1 = arith.constant 0 : i32
    return %c0_i32, %c0_i32_0 : i32, i32
  }
}

module attributes {stable_mosaic.version = 11 : i64} {
  func.func @_bn_relu_kernel(%arg0: i32, %arg1: memref<4x128x128xf32, #tpu.memory_space<vmem>>, %arg2: memref<1x1x128xf32, #tpu.memory_space<vmem>>, %arg3: memref<1x1x128xf32, #tpu.memory_space<vmem>>, %arg4: memref<4x128x128xbf16, #tpu.memory_space<vmem>>) attributes {dimension_semantics = [#tpu.dimension_semantics<parallel>], iteration_bounds = array<i64: 1>, scalar_prefetch = 0 : i64, scratch_operands = 0 : i64, tpu.core_type = #tpu.core_type<tc>, window_params = [{pipeline_mode = #tpu.pipeline_mode<synchronous>, transform_indices = @transform_0, window_bounds = array<i64: 4, 128, 128>}, {pipeline_mode = #tpu.pipeline_mode<synchronous>, transform_indices = @transform_1, window_bounds = array<i64: 1, 1, 128>}, {pipeline_mode = #tpu.pipeline_mode<synchronous>, transform_indices = @transform_2, window_bounds = array<i64: 1, 1, 128>}, {pipeline_mode = #tpu.pipeline_mode<synchronous>, transform_indices = @transform_3, window_bounds = array<i64: 4, 128, 128>}]} {
    %c0 = arith.constant 0 : index
    %c0_0 = arith.constant 0 : index
    %c0_1 = arith.constant 0 : index
    %0 = vector.load %arg1[%c0, %c0_0, %c0_1] : memref<4x128x128xf32, #tpu.memory_space<vmem>>, vector<4x128x128xf32>
    %c0_2 = arith.constant 0 : index
    %c0_3 = arith.constant 0 : index
    %c0_4 = arith.constant 0 : index
    %1 = vector.load %arg2[%c0_2, %c0_3, %c0_4] : memref<1x1x128xf32, #tpu.memory_space<vmem>>, vector<1x1x128xf32>
    %2 = vector.broadcast %1 : vector<1x1x128xf32> to vector<4x128x128xf32>
    %3 = arith.mulf %0, %2 : vector<4x128x128xf32>
    %c0_5 = arith.constant 0 : index
    %c0_6 = arith.constant 0 : index
    %c0_7 = arith.constant 0 : index
    %4 = vector.load %arg3[%c0_5, %c0_6, %c0_7] : memref<1x1x128xf32, #tpu.memory_space<vmem>>, vector<1x1x128xf32>
    %5 = vector.broadcast %4 : vector<1x1x128xf32> to vector<4x128x128xf32>
    %6 = arith.addf %3, %5 : vector<4x128x128xf32>
    %cst = arith.constant 0.000000e+00 : f32
    %7 = vector.broadcast %cst : f32 to vector<4x128x128xf32>
    %8 = arith.maximumf %6, %7 : vector<4x128x128xf32>
    %9 = arith.truncf %8 : vector<4x128x128xf32> to vector<4x128x128xbf16>
    %c0_8 = arith.constant 0 : index
    %c0_9 = arith.constant 0 : index
    %c0_10 = arith.constant 0 : index
    %10 = vector.load %arg4[%c0_8, %c0_9, %c0_10] : memref<4x128x128xbf16, #tpu.memory_space<vmem>>, vector<4x128x128xbf16>
    tpu.vector_store %arg4[%c0_8, %c0_9, %c0_10], %9 {strides = array<i32>} : memref<4x128x128xbf16, #tpu.memory_space<vmem>>, vector<4x128x128xbf16>,
    return
  }
  func.func @transform_0(%arg0: i32) -> (i32, i32, i32) {
    %c0_i32 = arith.constant 0 : i32
    %c0_i32_0 = arith.constant 0 : i32
    %c0_i32_1 = arith.constant 0 : i32
    %c0_i32_2 = arith.constant 0 : i32
    return %c0_i32, %c0_i32_0, %c0_i32_1 : i32, i32, i32
  }
  func.func @transform_1(%arg0: i32) -> (i32, i32, i32) {
    %c0_i32 = arith.constant 0 : i32
    %c0_i32_0 = arith.constant 0 : i32
    %c0_i32_1 = arith.constant 0 : i32
    %c0_i32_2 = arith.constant 0 : i32
    return %c0_i32, %c0_i32_0, %c0_i32_1 : i32, i32, i32
  }
  func.func @transform_2(%arg0: i32) -> (i32, i32, i32) {
    %c0_i32 = arith.constant 0 : i32
    %c0_i32_0 = arith.constant 0 : i32
    %c0_i32_1 = arith.constant 0 : i32
    %c0_i32_2 = arith.constant 0 : i32
    return %c0_i32, %c0_i32_0, %c0_i32_1 : i32, i32, i32
  }
  func.func @transform_3(%arg0: i32) -> (i32, i32, i32) {
    %c0_i32 = arith.constant 0 : i32
    %c0_i32_0 = arith.constant 0 : i32
    %c0_i32_1 = arith.constant 0 : i32
    %c0_i32_2 = arith.constant 0 : i32
    return %c0_i32, %c0_i32_0, %c0_i32_1 : i32, i32, i32
  }
}

module attributes {stable_mosaic.version = 11 : i64} {
  func.func @_conv_stats_kernel(%arg0: i32, %arg1: memref<1x512x64xbf16, #tpu.memory_space<vmem>>, %arg2: memref<1x64x128xbf16, #tpu.memory_space<vmem>>, %arg3: memref<1x512x128xf32, #tpu.memory_space<vmem>>, %arg4: memref<1x128xf32, #tpu.memory_space<vmem>>, %arg5: memref<1x128xf32, #tpu.memory_space<vmem>>) attributes {dimension_semantics = [#tpu.dimension_semantics<arbitrary>], iteration_bounds = array<i64: 4>, scalar_prefetch = 0 : i64, scratch_operands = 0 : i64, tpu.core_type = #tpu.core_type<tc>, window_params = [{transform_indices = @transform_0, window_bounds = array<i64: 1, 512, 64>}, {transform_indices = @transform_1, window_bounds = array<i64: 1, 64, 128>}, {transform_indices = @transform_2, window_bounds = array<i64: 1, 512, 128>}, {pipeline_mode = #tpu.pipeline_mode<synchronous>, transform_indices = @transform_3, window_bounds = array<i64: 1, 128>}, {pipeline_mode = #tpu.pipeline_mode<synchronous>, transform_indices = @transform_4, window_bounds = array<i64: 1, 128>}]} {
    %c0 = arith.constant 0 : index
    %c0_0 = arith.constant 0 : index
    %c0_1 = arith.constant 0 : index
    %0 = vector.load %arg1[%c0, %c0_0, %c0_1] : memref<1x512x64xbf16, #tpu.memory_space<vmem>>, vector<1x512x64xbf16>
    %1 = vector.shape_cast %0 : vector<1x512x64xbf16> to vector<512x64xbf16>
    %c0_2 = arith.constant 0 : index
    %c0_3 = arith.constant 0 : index
    %c0_4 = arith.constant 0 : index
    %2 = vector.load %arg2[%c0_2, %c0_3, %c0_4] : memref<1x64x128xbf16, #tpu.memory_space<vmem>>, vector<1x64x128xbf16>
    %3 = vector.shape_cast %2 : vector<1x64x128xbf16> to vector<64x128xbf16>
    %cst = arith.constant dense<0.000000e+00> : vector<512x128xf32>
    %4 = tpu.matmul %1, %3, %cst {dimension_numbers = #tpu.dot_dimension_numbers<[1], [0], [0], [1], [0, 0, 1, 1], [], []>} : vector<512x64xbf16>, vector<64x128xbf16>, vector<512x128xf32> -> vector<512x128xf32>
    %c0_5 = arith.constant 0 : index
    %c0_6 = arith.constant 0 : index
    %c0_7 = arith.constant 0 : index
    %5 = vector.load %arg3[%c0_5, %c0_6, %c0_7] : memref<1x512x128xf32, #tpu.memory_space<vmem>>, vector<1x512x128xf32>
    %6 = vector.shape_cast %5 : vector<1x512x128xf32> to vector<512x128xf32>
    %7 = vector.shape_cast %4 : vector<512x128xf32> to vector<1x512x128xf32>
    tpu.vector_store %arg3[%c0_5, %c0_6, %c0_7], %7 {strides = array<i32>} : memref<1x512x128xf32, #tpu.memory_space<vmem>>, vector<1x512x128xf32>,
    %c0_i32 = arith.constant 0 : i32
    %8 = arith.cmpi eq, %arg0, %c0_i32 : i32
    %9 = arith.extui %8 : i1 to i32
    %c0_i32_8 = arith.constant 0 : i32
    %10 = arith.cmpi ne, %9, %c0_i32_8 : i32
    scf.if %10 {
      %cst_19 = arith.constant 0.000000e+00 : f32
      %22 = vector.broadcast %cst_19 : f32 to vector<1x128xf32>
      %c0_20 = arith.constant 0 : index
      %c0_21 = arith.constant 0 : index
      %23 = vector.load %arg4[%c0_20, %c0_21] : memref<1x128xf32, #tpu.memory_space<vmem>>, vector<1x128xf32>
      tpu.vector_store %arg4[%c0_20, %c0_21], %22 {strides = array<i32>} : memref<1x128xf32, #tpu.memory_space<vmem>>, vector<1x128xf32>,
      %cst_22 = arith.constant 0.000000e+00 : f32
      %24 = vector.broadcast %cst_22 : f32 to vector<1x128xf32>
      %c0_23 = arith.constant 0 : index
      %c0_24 = arith.constant 0 : index
      %25 = vector.load %arg5[%c0_23, %c0_24] : memref<1x128xf32, #tpu.memory_space<vmem>>, vector<1x128xf32>
      tpu.vector_store %arg5[%c0_23, %c0_24], %24 {strides = array<i32>} : memref<1x128xf32, #tpu.memory_space<vmem>>, vector<1x128xf32>,
    } else {
    }
    %c0_9 = arith.constant 0 : index
    %c0_10 = arith.constant 0 : index
    %11 = vector.load %arg4[%c0_9, %c0_10] : memref<1x128xf32, #tpu.memory_space<vmem>>, vector<1x128xf32>
    %cst_11 = arith.constant dense<0.000000e+00> : vector<128xf32>
    %12 = vector.multi_reduction <add>, %4, %cst_11 [0] : vector<512x128xf32> to vector<128xf32>
    %13 = vector.shape_cast %12 : vector<128xf32> to vector<1x128xf32>
    %14 = arith.addf %11, %13 : vector<1x128xf32>
    %c0_12 = arith.constant 0 : index
    %c0_13 = arith.constant 0 : index
    %15 = vector.load %arg4[%c0_12, %c0_13] : memref<1x128xf32, #tpu.memory_space<vmem>>, vector<1x128xf32>
    tpu.vector_store %arg4[%c0_12, %c0_13], %14 {strides = array<i32>} : memref<1x128xf32, #tpu.memory_space<vmem>>, vector<1x128xf32>,
    %c0_14 = arith.constant 0 : index
    %c0_15 = arith.constant 0 : index
    %16 = vector.load %arg5[%c0_14, %c0_15] : memref<1x128xf32, #tpu.memory_space<vmem>>, vector<1x128xf32>
    %17 = arith.mulf %4, %4 : vector<512x128xf32>
    %cst_16 = arith.constant dense<0.000000e+00> : vector<128xf32>
    %18 = vector.multi_reduction <add>, %17, %cst_16 [0] : vector<512x128xf32> to vector<128xf32>
    %19 = vector.shape_cast %18 : vector<128xf32> to vector<1x128xf32>
    %20 = arith.addf %16, %19 : vector<1x128xf32>
    %c0_17 = arith.constant 0 : index
    %c0_18 = arith.constant 0 : index
    %21 = vector.load %arg5[%c0_17, %c0_18] : memref<1x128xf32, #tpu.memory_space<vmem>>, vector<1x128xf32>
    tpu.vector_store %arg5[%c0_17, %c0_18], %20 {strides = array<i32>} : memref<1x128xf32, #tpu.memory_space<vmem>>, vector<1x128xf32>,
    return
  }
  func.func @transform_0(%arg0: i32) -> (i32, i32, i32) {
    %c0_i32 = arith.constant 0 : i32
    %c0_i32_0 = arith.constant 0 : i32
    %c0_i32_1 = arith.constant 0 : i32
    return %arg0, %c0_i32, %c0_i32_0 : i32, i32, i32
  }
  func.func @transform_1(%arg0: i32) -> (i32, i32, i32) {
    %c0_i32 = arith.constant 0 : i32
    %c0_i32_0 = arith.constant 0 : i32
    %c0_i32_1 = arith.constant 0 : i32
    return %arg0, %c0_i32, %c0_i32_0 : i32, i32, i32
  }
  func.func @transform_2(%arg0: i32) -> (i32, i32, i32) {
    %c0_i32 = arith.constant 0 : i32
    %c0_i32_0 = arith.constant 0 : i32
    %c0_i32_1 = arith.constant 0 : i32
    return %arg0, %c0_i32, %c0_i32_0 : i32, i32, i32
  }
  func.func @transform_3(%arg0: i32) -> (i32, i32) {
    %c0_i32 = arith.constant 0 : i32
    %c0_i32_0 = arith.constant 0 : i32
    %c0_i32_1 = arith.constant 0 : i32
    return %c0_i32, %c0_i32_0 : i32, i32
  }
  func.func @transform_4(%arg0: i32) -> (i32, i32) {
    %c0_i32 = arith.constant 0 : i32
    %c0_i32_0 = arith.constant 0 : i32
    %c0_i32_1 = arith.constant 0 : i32
    return %c0_i32, %c0_i32_0 : i32, i32
  }
}

module attributes {stable_mosaic.version = 11 : i64} {
  func.func @_bn_relu_kernel(%arg0: i32, %arg1: memref<4x512x128xf32, #tpu.memory_space<vmem>>, %arg2: memref<1x1x128xf32, #tpu.memory_space<vmem>>, %arg3: memref<1x1x128xf32, #tpu.memory_space<vmem>>, %arg4: memref<4x512x128xbf16, #tpu.memory_space<vmem>>) attributes {dimension_semantics = [#tpu.dimension_semantics<parallel>], iteration_bounds = array<i64: 1>, scalar_prefetch = 0 : i64, scratch_operands = 0 : i64, tpu.core_type = #tpu.core_type<tc>, window_params = [{pipeline_mode = #tpu.pipeline_mode<synchronous>, transform_indices = @transform_0, window_bounds = array<i64: 4, 512, 128>}, {pipeline_mode = #tpu.pipeline_mode<synchronous>, transform_indices = @transform_1, window_bounds = array<i64: 1, 1, 128>}, {pipeline_mode = #tpu.pipeline_mode<synchronous>, transform_indices = @transform_2, window_bounds = array<i64: 1, 1, 128>}, {pipeline_mode = #tpu.pipeline_mode<synchronous>, transform_indices = @transform_3, window_bounds = array<i64: 4, 512, 128>}]} {
    %c0 = arith.constant 0 : index
    %c0_0 = arith.constant 0 : index
    %c0_1 = arith.constant 0 : index
    %0 = vector.load %arg1[%c0, %c0_0, %c0_1] : memref<4x512x128xf32, #tpu.memory_space<vmem>>, vector<4x512x128xf32>
    %c0_2 = arith.constant 0 : index
    %c0_3 = arith.constant 0 : index
    %c0_4 = arith.constant 0 : index
    %1 = vector.load %arg2[%c0_2, %c0_3, %c0_4] : memref<1x1x128xf32, #tpu.memory_space<vmem>>, vector<1x1x128xf32>
    %2 = vector.broadcast %1 : vector<1x1x128xf32> to vector<4x512x128xf32>
    %3 = arith.mulf %0, %2 : vector<4x512x128xf32>
    %c0_5 = arith.constant 0 : index
    %c0_6 = arith.constant 0 : index
    %c0_7 = arith.constant 0 : index
    %4 = vector.load %arg3[%c0_5, %c0_6, %c0_7] : memref<1x1x128xf32, #tpu.memory_space<vmem>>, vector<1x1x128xf32>
    %5 = vector.broadcast %4 : vector<1x1x128xf32> to vector<4x512x128xf32>
    %6 = arith.addf %3, %5 : vector<4x512x128xf32>
    %cst = arith.constant 0.000000e+00 : f32
    %7 = vector.broadcast %cst : f32 to vector<4x512x128xf32>
    %8 = arith.maximumf %6, %7 : vector<4x512x128xf32>
    %9 = arith.truncf %8 : vector<4x512x128xf32> to vector<4x512x128xbf16>
    %c0_8 = arith.constant 0 : index
    %c0_9 = arith.constant 0 : index
    %c0_10 = arith.constant 0 : index
    %10 = vector.load %arg4[%c0_8, %c0_9, %c0_10] : memref<4x512x128xbf16, #tpu.memory_space<vmem>>, vector<4x512x128xbf16>
    tpu.vector_store %arg4[%c0_8, %c0_9, %c0_10], %9 {strides = array<i32>} : memref<4x512x128xbf16, #tpu.memory_space<vmem>>, vector<4x512x128xbf16>,
    return
  }
  func.func @transform_0(%arg0: i32) -> (i32, i32, i32) {
    %c0_i32 = arith.constant 0 : i32
    %c0_i32_0 = arith.constant 0 : i32
    %c0_i32_1 = arith.constant 0 : i32
    %c0_i32_2 = arith.constant 0 : i32
    return %c0_i32, %c0_i32_0, %c0_i32_1 : i32, i32, i32
  }
  func.func @transform_1(%arg0: i32) -> (i32, i32, i32) {
    %c0_i32 = arith.constant 0 : i32
    %c0_i32_0 = arith.constant 0 : i32
    %c0_i32_1 = arith.constant 0 : i32
    %c0_i32_2 = arith.constant 0 : i32
    return %c0_i32, %c0_i32_0, %c0_i32_1 : i32, i32, i32
  }
  func.func @transform_2(%arg0: i32) -> (i32, i32, i32) {
    %c0_i32 = arith.constant 0 : i32
    %c0_i32_0 = arith.constant 0 : i32
    %c0_i32_1 = arith.constant 0 : i32
    %c0_i32_2 = arith.constant 0 : i32
    return %c0_i32, %c0_i32_0, %c0_i32_1 : i32, i32, i32
  }
  func.func @transform_3(%arg0: i32) -> (i32, i32, i32) {
    %c0_i32 = arith.constant 0 : i32
    %c0_i32_0 = arith.constant 0 : i32
    %c0_i32_1 = arith.constant 0 : i32
    %c0_i32_2 = arith.constant 0 : i32
    return %c0_i32, %c0_i32_0, %c0_i32_1 : i32, i32, i32
  }
}

module attributes {stable_mosaic.version = 11 : i64} {
  func.func @_conv_tanh_kernel(%arg0: i32, %arg1: memref<1x2048x32xbf16, #tpu.memory_space<vmem>>, %arg2: memref<1x32x128xbf16, #tpu.memory_space<vmem>>, %arg3: memref<1x2048x128xf32, #tpu.memory_space<vmem>>) attributes {dimension_semantics = [#tpu.dimension_semantics<parallel>], iteration_bounds = array<i64: 4>, scalar_prefetch = 0 : i64, scratch_operands = 0 : i64, tpu.core_type = #tpu.core_type<tc>, window_params = [{transform_indices = @transform_0, window_bounds = array<i64: 1, 2048, 32>}, {transform_indices = @transform_1, window_bounds = array<i64: 1, 32, 128>}, {transform_indices = @transform_2, window_bounds = array<i64: 1, 2048, 128>}]} {
    %c0 = arith.constant 0 : index
    %c0_0 = arith.constant 0 : index
    %c0_1 = arith.constant 0 : index
    %0 = vector.load %arg1[%c0, %c0_0, %c0_1] : memref<1x2048x32xbf16, #tpu.memory_space<vmem>>, vector<1x2048x32xbf16>
    %1 = vector.shape_cast %0 : vector<1x2048x32xbf16> to vector<2048x32xbf16>
    %c0_2 = arith.constant 0 : index
    %c0_3 = arith.constant 0 : index
    %c0_4 = arith.constant 0 : index
    %2 = vector.load %arg2[%c0_2, %c0_3, %c0_4] : memref<1x32x128xbf16, #tpu.memory_space<vmem>>, vector<1x32x128xbf16>
    %3 = vector.shape_cast %2 : vector<1x32x128xbf16> to vector<32x128xbf16>
    %cst = arith.constant dense<0.000000e+00> : vector<2048x128xf32>
    %4 = tpu.matmul %1, %3, %cst {dimension_numbers = #tpu.dot_dimension_numbers<[1], [0], [0], [1], [0, 0, 1, 1], [], []>} : vector<2048x32xbf16>, vector<32x128xbf16>, vector<2048x128xf32> -> vector<2048x128xf32>
    %5 = math.tanh %4 : vector<2048x128xf32>
    %c0_5 = arith.constant 0 : index
    %c0_6 = arith.constant 0 : index
    %c0_7 = arith.constant 0 : index
    %6 = vector.load %arg3[%c0_5, %c0_6, %c0_7] : memref<1x2048x128xf32, #tpu.memory_space<vmem>>, vector<1x2048x128xf32>
    %7 = vector.shape_cast %6 : vector<1x2048x128xf32> to vector<2048x128xf32>
    %8 = vector.shape_cast %5 : vector<2048x128xf32> to vector<1x2048x128xf32>
    tpu.vector_store %arg3[%c0_5, %c0_6, %c0_7], %8 {strides = array<i32>} : memref<1x2048x128xf32, #tpu.memory_space<vmem>>, vector<1x2048x128xf32>,
    return
  }
  func.func @transform_0(%arg0: i32) -> (i32, i32, i32) {
    %c0_i32 = arith.constant 0 : i32
    %c0_i32_0 = arith.constant 0 : i32
    %c0_i32_1 = arith.constant 0 : i32
    return %arg0, %c0_i32, %c0_i32_0 : i32, i32, i32
  }
  func.func @transform_1(%arg0: i32) -> (i32, i32, i32) {
    %c0_i32 = arith.constant 0 : i32
    %c0_i32_0 = arith.constant 0 : i32
    %c0_i32_1 = arith.constant 0 : i32
    return %arg0, %c0_i32, %c0_i32_0 : i32, i32, i32
  }
  func.func @transform_2(%arg0: i32) -> (i32, i32, i32) {
    %c0_i32 = arith.constant 0 : i32
    %c0_i32_0 = arith.constant 0 : i32
    %c0_i32_1 = arith.constant 0 : i32
    return %arg0, %c0_i32, %c0_i32_0 : i32, i32, i32
  }
}

</mosaic_0001>

<bundles_post_ra>
// kernel: netG_forward.9
= control target key start
LH: loop header
LB: loop body
LE: loop exit
PB: predicated region body
PF: predicated region fallthrough
CT: control target
= control target key end

     0   :  { %10 = vsyncpa [#allocation3], 0  ;;  %s680_s0 = inlined_call_operand.vmem [shape: bf16[16,2,16], index: 0, kind: input, shape index: {}]   ;;  %s681_s1 = inlined_call_operand.hbm [shape: bf16[16,16,128], index: 1, kind: input, shape index: {}]   ;;  %s682_s2 = inlined_call_operand.vmem [shape: f32[16,2,128], index: 2, kind: output, shape index: {0}]   ;;  %s683_s3 = inlined_call_operand.vmem [shape: f32[1,128], index: 3, kind: output, shape index: {1}]   ;;  %s684_s4 = inlined_call_operand.vmem [shape: f32[1,128], index: 4, kind: output, shape index: {2}]  }
   0x1   :  { %12 = vsyncpa [#allocation3 + $0x1], 0  ;;  %s557_s15 = smov 0   ;;  %s559_s16 = smov 0  }
   0x2   :  { %s561_s17 = smov 0   ;;  %s563_s18 = smov 0  }
   0x3 LB: > { %s576_s19 = sadd.s32 4294967295, %s524_s18   ;;  %s579_s20 = sadd.s32 1, %s524_s18   ;;  %s524_s18 = sphi %s563_s18, %s693_s18   ;;  %s520_s17 = sphi %s561_s17, %s692_s17   ;;  %s516_s16 = sphi %s559_s16, %s691_s16   ;;  %s512_s15 = sphi %s557_s15, %s690_s15  }
   0x4   : > { %s48_s21 = ssub.s32 %s524_s18, %s579_s20  ;;  %s51_s22 = sadd.s32 1, %s520_s17 }
   0x5   : > { %p49_p0 = scmp.eq.s32.totalorder %s48_s21, 0  ;;  %p58_p1 = scmp.ne.s32.totalorder %s520_s17, %s516_s16 }
   0x6   : > { %p59_p2 = scmp.eq.s32.totalorder %s524_s18, 0  ;;  %p64_p3 = scmp.ne.s32.totalorder %s516_s16, %s512_s15 }
   0x7   : > { %s589_s23 = scalar_select %p49_p0, %s520_s17, %s51_s22  }
   0x8   : > { %p60_p4 = por %p59_p2, %p58_p1  ;;  %p65_p5 = scmp.eq.s32.totalorder %s576_s19, 0 }
   0x9   : > { %p423_p6 = scmp.lt.s32.totalorder %s524_s18, 16  ;;  %s162_s25 = sand.u32 1, %s520_s17  }
   0xa   : > { %p593_p7 = por %p65_p5, %p64_p3  ;;  %s397_s26 = sshll.u32 %s162_s25, 3 }
   0xb   : > { %s408_s27 = sshll.u32 %s524_s18, 7  ;;  %s166_s5 = scalar_lea.vmem [#allocation2], %s397_s26 }
   0xc   : > { %s686_s24 = scalar_select %p593_p7, 1, 0 }
   0xd   : > { %s602_s30 = scalar_lea.hbm %s681_s1, %s408_s27  ;;  %s173_s6 = sshll.u32 %s166_s5, 4  ;;  %s604_s6 = int_to_ptr.vmem [resolvable:$true] %s173_s6 }
   0xe   : > { %p606_p8 = pnand %p423_p6, %p60_p4  ;;  %s611_s8 = scalar_lea.sflag [#allocation3], %s162_s25 }
   0xf   : > { %s462_s9 = scalar_lea.hbm %s602_s30, 128  ;;  %s467_s12 = scalar_lea.hbm %s681_s1, 2048 }
  0x10   : > { %p463_p10 = scmp.ne.s32.totalorder %s602_s30, %s462_s9  ;;  %p464_p11 = pneg %p606_p8 }
  0x11   : > { %p468_p0 = scmp.lt.s32.totalorder %s602_s30, %s681_s1  ;;  %p469_p1 = scmp.lt.s32.totalorder %s467_s12, %s462_s9 }
  0x12   : > { %p465_p12 = pnand %p464_p11, %p463_p10 }
  0x13   : > { %p470_p2 = por %p469_p1, %p468_p0 }
  0x14   : > { %p466_p13 = pneg %p465_p12 }
  0x16   : > { %p471_p3 = pnand %p470_p2, %p466_p13 }
  0x18   : > { %474 = shalt.err (!%p471_p3)
}
  0x19   : > { %s475_s15 = scalar_lea.vmem %s604_s6, 128  ;;  %s526_s21 = smov [#allocation2]  }
  0x1a   : > { %p476_p4 = scmp.ne.s32.totalorder %s604_s6, %s475_s15  ;;  %s480_s22 = sshll.u32 %s526_s21, 4  ;;  %s481_s22 = int_to_ptr.vmem [resolvable:$false] %s480_s22 }
  0x1b   : > { %s482_s25 = scalar_lea.vmem %s481_s22, 256  ;;  %p483_p10 = scmp.lt.s32.totalorder %s604_s6, %s481_s22 }
  0x1c   : > { %p478_p5 = pnand %p476_p4, %p464_p11  ;;  %p484_p12 = scmp.lt.s32.totalorder %s482_s25, %s475_s15 }
  0x1e   : > { %p479_p6 = pneg %p478_p5  ;;  %p485_p9 = por %p484_p12, %p483_p10 }
  0x20   : > { %p486_p7 = pnand %p485_p9, %p479_p6 }
  0x22   : > { %489 = shalt.err (!%p486_p7)
}
  0x23   : > { %s527_s26 = smov 64   ;;  %s528_s27 = smov 4  }
  0x24   : > { %422 = dma.hbm_to_vmem [thread:$0]  (!%p606_p8), %s602_s30, 128, %s604_s6, %s611_s8, %s527_s26, %s527_s26, %s528_s27  }
  0x25   : > { %p181_p11 = scmp.lt.s32.totalorder %s524_s18, 17  ;;  %p688_p13 = scmp.ge.s32.totalorder %s524_s18, 1 }
  0x27   : > { %p182_p0 = pnand %p688_p13, %p181_p11 }
  0x28   : > { %s187_s28 = sand.u32 (!%p182_p0), 1, %s516_s16   ;;  %p689_p7 = scmp.ne.s32.totalorder (!%p182_p0), %s686_s24, 0 }
  0x29   : > { %185 = sbr.rel (%p182_p0) target bundleno = 272 (0x110), region = 28  ;;  %s401_s29 = sshll.u32 (!%p182_p0), %s187_s28, 3 }
  0x2a   : > { %s188_s5 = scalar_lea.sflag (!%p182_p0), [#allocation3], %s187_s28  ;;  %s191_s9 = scalar_lea.vmem (!%p182_p0), [#allocation2], %s401_s29 }
  0x2e   : > { %507 = dma.done.wait (%p689_p7), %s188_s5, 128  }
  0x2f   : > { %509 = vsyncadd (%p689_p7), %s188_s5, 4294967168  ;;  %p218_p9 = scmp.lt.s32.totalorder %s576_s19, 15  ;;  %v529_v0 = vmov 0.0   ;;  %vm530_vm0 = vmmov 0   ;;  %v461_v1 = vld [vmem:[%s191_s9] sm:$0xff]   ;;  %vm235_vm1 = vcmask 130048  }
  0x30   : > { %411 = vmatprep.subr.bf16.mxu0 %v529_v0  ;;  %413 = vmatprep.mubr.msk.bf16.mxu0 %vm530_vm0, %v529_v0  ;;  %p405_p8 = scmp.ne.s32.totalorder %s576_s19, 0 }
  0x31   : > { %s219_s18 = scalar_select %p218_p9, %s576_s19, 15  ;;  %412 = vmatpush3.bf16.msra.mxu0 %v461_v1 }
  0x33   : > { %s220_s7 = scalar_lea.vmem %s680_s0, %s219_s18  ;;  %s402_s8 = sshll.u32 %s219_s18, 1 }
  0x34   : > { %v226_v2 = vld [vmem:[%s220_s7] sm:$0x1]  ;;  %s224_s11 = scalar_lea.vmem %s682_s2, %s402_s8 }
  0x35   : > { %414 = vmatmul.mubr.msk.bf16.vlgmr.msra.gmra.mxu0 %vm235_vm1, %v226_v2 }
  0xf5   : > { %v273_v3 = vpop.f32.mrf.mxu0 }
  0xf6   : > { %279 = vst [vmem:[%s224_s11] sm:$0x3] %v273_v3 }
  0xf7   : > { %v415_v4 = vpop.f32.mrf.mxu0  ;;  %283 = sbr.rel (%p405_p8) target bundleno = 254 (0xfe), region = 36 }
  0xf9   : > { %v276_v5 = vpop.f32.mrf.mxu0 }
  0xfb   : > { %v416_v6 = vpop.f32.mrf.mxu0 }
  0xfc   : > { %v531_v7 = vmov 0.0  }
  0xfd   : > { %284 = vst [vmem:[%s683_s3] sm:$0x1] %v531_v7  ;;  %285 = vst [vmem:[%s684_s4] sm:$0x1] %v531_v7 }
  0xfe PF: > { %vm287_vm2 = vcmask 1041408   ;;  %v298_v8 = vmul.f32 %v273_v3, %v273_v3 }
  0xff   : > { %v288_v9 = vsel %vm287_vm2, %v273_v3, 0.0 }
 0x100   : > { %v289_v10 = vrot.slane %v288_v9, 4  ;;  %v299_v11 = vsel %vm287_vm2, %v298_v8, 0.0 }
 0x101   : > { %v300_v12 = vrot.slane %v299_v11, 4 }
 0x102   : > { %v290_v13 = vadd.f32 %v289_v10, %v288_v9 }
 0x103   : > { %v301_v14 = vadd.f32 %v300_v12, %v299_v11 }
 0x104   : > { %v291_v15 = vrot.slane %v290_v13, 2  ;;  %v286_v20 = vld [vmem:[%s683_s3] sm:$0x1] }
 0x105   : > { %v302_v16 = vrot.slane %v301_v14, 2  ;;  %v297_v23 = vld [vmem:[%s684_s4] sm:$0x1] }
 0x106   : > { %v292_v17 = vadd.f32 %v291_v15, %v290_v13 }
 0x107   : > { %v303_v18 = vadd.f32 %v302_v16, %v301_v14 }
 0x108   : > { %v293_v19 = vrot.slane %v292_v17, 1 }
 0x109   : > { %v304_v21 = vrot.slane %v303_v18, 1 }
 0x10a   : > { %v294_v22 = vadd.f32 %v293_v19, %v292_v17 }
 0x10b   : > { %v305_v24 = vadd.f32 %v304_v21, %v303_v18 }
 0x10c   : > { %v295_v25 = vadd.f32 %v294_v22, %v286_v20 }
 0x10d   : > { %v306_v26 = vadd.f32 %v305_v24, %v297_v23 }
 0x10e   : > { %296 = vst [vmem:[%s683_s3] sm:$0x1] %v295_v25 }
 0x10f   : > { %307 = vst [vmem:[%s684_s4] sm:$0x1] %v306_v26 }
 0x110 PF: > { %p15_p1 = scmp.ge.s32.totalorder %s579_s20, 18   ;;  %s690_s15 = smov %s516_s16 }
 0x111   : > { %s691_s16 = smov %s520_s17  ;;  %s692_s17 = smov %s589_s23 }
 0x112   : > { %s693_s18 = smov %s579_s20  ;;  %17 = sbr.rel (!%p15_p1) target bundleno = 3 (0x3), region = 91 }
 0x117   :  { %339 = vsyncpa [#allocation3], 1 }
 0x118   :  { %341 = vsyncpa [#allocation3 + $0x1], 1 }

// kernel: netG_forward.10
= control target key start
LH: loop header
LB: loop body
LE: loop exit
PB: predicated region body
PF: predicated region fallthrough
CT: control target
= control target key end

     0   :  { %s288_s0 = inlined_call_operand.vmem [shape: f32[16,2,128], index: 0, kind: input, shape index: {}]   ;;  %s289_s1 = inlined_call_operand.vmem [shape: f32[1,1,128], index: 1, kind: input, shape index: {}]   ;;  %s290_s2 = inlined_call_operand.vmem [shape: f32[1,1,128], index: 2, kind: input, shape index: {}]   ;;  %s291_s3 = inlined_call_operand.vmem [shape: bf16[16,2,128], index: 3, kind: output, shape index: {}]  }
   0x1   :  { %v14_v0 = vld [vmem:[%s288_s0] sm:$0x3]  ;;  %v15_v4 = vld [vmem:[%s288_s0 + $0x2] sm:$0x3]  ;;  %v16_v5 = vld [vmem:[%s288_s0 + $0x4] sm:$0x3] }
   0x2   :  { %v156_v1 = vld [vmem:[%s289_s1] ss:$0 sm:$0xff]  ;;  %v17_v6 = vld [vmem:[%s288_s0 + $0x6] sm:$0x3]  ;;  %v18_v10 = vld [vmem:[%s288_s0 + $0x8] sm:$0x3] }
   0x3   :  { %v161_v2 = vld [vmem:[%s290_s2] ss:$0 sm:$0xff]  ;;  %v37_v3 = vmul.f32 %v156_v1, %v14_v0  ;;  %v38_v7 = vmul.f32 %v156_v1, %v15_v4  ;;  %v39_v8 = vmul.f32 %v156_v1, %v16_v5  ;;  %v40_v9 = vmul.f32 %v156_v1, %v17_v6  ;;  %v19_v11 = vld [vmem:[%s288_s0 + $0xa] sm:$0x3]  ;;  %v20_v12 = vld [vmem:[%s288_s0 + $0xc] sm:$0x3] }
   0x4   :  { %v41_v14 = vmul.f32 %v156_v1, %v18_v10  ;;  %v42_v15 = vmul.f32 %v156_v1, %v19_v11  ;;  %v43_v16 = vmul.f32 %v156_v1, %v20_v12  ;;  %v21_v17 = vld [vmem:[%s288_s0 + $0xe] sm:$0x3]  ;;  %v22_v22 = vld [vmem:[%s288_s0 + $0x10] sm:$0x3]  ;;  %v23_v27 = vld [vmem:[%s288_s0 + $0x12] sm:$0x3] }
   0x5   :  { %v60_v13 = vadd.f32 %v161_v2, %v37_v3  ;;  %v61_v18 = vadd.f32 %v161_v2, %v38_v7  ;;  %v62_v19 = vadd.f32 %v161_v2, %v39_v8  ;;  %v63_v20 = vadd.f32 %v161_v2, %v40_v9  ;;  %v24_v28 = vld [vmem:[%s288_s0 + $0x14] sm:$0x3]  ;;  %v25_v33 = vld [vmem:[%s288_s0 + $0x16] sm:$0x3]  ;;  %v26_v38 = vld [vmem:[%s288_s0 + $0x18] sm:$0x3] }
   0x6   :  { %v44_v21 = vmul.f32 %v156_v1, %v21_v17  ;;  %v64_v24 = vadd.f32 %v161_v2, %v41_v14  ;;  %v65_v25 = vadd.f32 %v161_v2, %v42_v15  ;;  %v66_v26 = vadd.f32 %v161_v2, %v43_v16  ;;  %v27_v43 = vld [vmem:[%s288_s0 + $0x1a] sm:$0x3]  ;;  %v28_v44 = vld [vmem:[%s288_s0 + $0x1c] sm:$0x3]  ;;  %v29_v49 = vld [vmem:[%s288_s0 + $0x1e] sm:$0x3] }
   0x7   :  { %v76_v23 = vmax.f32 %v60_v13, 0.0  ;;  %v77_v29 = vmax.f32 %v61_v18, 0.0  ;;  %v78_v30 = vmax.f32 %v62_v19, 0.0  ;;  %v79_v31 = vmax.f32 %v63_v20, 0.0 }
   0x8   :  { %v67_v32 = vadd.f32 %v161_v2, %v44_v21  ;;  %v80_v35 = vmax.f32 %v64_v24, 0.0  ;;  %v81_v36 = vmax.f32 %v65_v25, 0.0  ;;  %v82_v37 = vmax.f32 %v66_v26, 0.0 }
   0x9   :  { %v92_v34 = vpack.c.bf16 %v76_v23, %v76_v23  ;;  %v93_v39 = vpack.c.bf16 %v77_v29, %v77_v29  ;;  %v94_v40 = vpack.c.bf16 %v78_v30, %v78_v30  ;;  %v95_v41 = vpack.c.bf16 %v79_v31, %v79_v31 }
   0xa   :  { %v83_v42 = vmax.f32 %v67_v32, 0.0  ;;  %v96_v45 = vpack.c.bf16 %v80_v35, %v80_v35  ;;  %v97_v46 = vpack.c.bf16 %v81_v36, %v81_v36  ;;  %v98_v47 = vpack.c.bf16 %v82_v37, %v82_v37 }
   0xb   :  { %108 = vst [vmem:[%s291_s3] sm:$0x1] %v92_v34  ;;  %v45_v48 = vmul.f32 %v156_v1, %v22_v22  ;;  %109 = vst [vmem:[%s291_s3 + $0x1] sm:$0x1] %v93_v39  ;;  %v46_v51 = vmul.f32 %v156_v1, %v23_v27  ;;  %v47_v52 = vmul.f32 %v156_v1, %v24_v28 }
   0xc   :  { %110 = vst [vmem:[%s291_s3 + $0x2] sm:$0x1] %v94_v40  ;;  %111 = vst [vmem:[%s291_s3 + $0x3] sm:$0x1] %v95_v41  ;;  %v99_v50 = vpack.c.bf16 %v83_v42, %v83_v42  ;;  %v48_v53 = vmul.f32 %v156_v1, %v25_v33  ;;  %v49_v55 = vmul.f32 %v156_v1, %v26_v38 }
   0xd   :  { %112 = vst [vmem:[%s291_s3 + $0x4] sm:$0x1] %v96_v45  ;;  %113 = vst [vmem:[%s291_s3 + $0x5] sm:$0x1] %v97_v46  ;;  %v68_v54 = vadd.f32 %v161_v2, %v45_v48  ;;  %v50_v56 = vmul.f32 %v156_v1, %v27_v43  ;;  %v51_v57 = vmul.f32 %v156_v1, %v28_v44 }
   0xe   :  { %114 = vst [vmem:[%s291_s3 + $0x6] sm:$0x1] %v98_v47  ;;  %115 = vst [vmem:[%s291_s3 + $0x7] sm:$0x1] %v99_v50  ;;  %v69_v58 = vadd.f32 %v161_v2, %v46_v51  ;;  %v70_v59 = vadd.f32 %v161_v2, %v47_v52  ;;  %v71_v60 = vadd.f32 %v161_v2, %v48_v53 }
   0xf   :  { %v52_v61 = vmul.f32 %v156_v1, %v29_v49  ;;  %v84_v62 = vmax.f32 %v68_v54, 0.0  ;;  %v72_v63 = vadd.f32 %v161_v2, %v49_v55  ;;  %v73_v0 = vadd.f32 %v161_v2, %v50_v56 }
  0x10   :  { %v74_v3 = vadd.f32 %v161_v2, %v51_v57  ;;  %v85_v4 = vmax.f32 %v69_v58, 0.0  ;;  %v86_v5 = vmax.f32 %v70_v59, 0.0  ;;  %v87_v6 = vmax.f32 %v71_v60, 0.0 }
  0x11   :  { %v75_v7 = vadd.f32 %v161_v2, %v52_v61  ;;  %v100_v8 = vpack.c.bf16 %v84_v62, %v84_v62  ;;  %v88_v9 = vmax.f32 %v72_v63, 0.0  ;;  %v89_v10 = vmax.f32 %v73_v0, 0.0 }
  0x12   :  { %v90_v11 = vmax.f32 %v74_v3, 0.0  ;;  %v101_v12 = vpack.c.bf16 %v85_v4, %v85_v4  ;;  %v102_v13 = vpack.c.bf16 %v86_v5, %v86_v5  ;;  %v103_v14 = vpack.c.bf16 %v87_v6, %v87_v6 }
  0x13   :  { %v91_v1 = vmax.f32 %v75_v7, 0.0  ;;  %116 = vst [vmem:[%s291_s3 + $0x8] sm:$0x1] %v100_v8  ;;  %v104_v15 = vpack.c.bf16 %v88_v9, %v88_v9  ;;  %v105_v16 = vpack.c.bf16 %v89_v10, %v89_v10 }
  0x14   :  { %v106_v17 = vpack.c.bf16 %v90_v11, %v90_v11  ;;  %117 = vst [vmem:[%s291_s3 + $0x9] sm:$0x1] %v101_v12  ;;  %118 = vst [vmem:[%s291_s3 + $0xa] sm:$0x1] %v102_v13 }
  0x15   :  { %119 = vst [vmem:[%s291_s3 + $0xb] sm:$0x1] %v103_v14  ;;  %v107_v2 = vpack.c.bf16 %v91_v1, %v91_v1  ;;  %120 = vst [vmem:[%s291_s3 + $0xc] sm:$0x1] %v104_v15 }
  0x16   :  { %121 = vst [vmem:[%s291_s3 + $0xd] sm:$0x1] %v105_v16  ;;  %122 = vst [vmem:[%s291_s3 + $0xe] sm:$0x1] %v106_v17 }
  0x17   :  { %123 = vst [vmem:[%s291_s3 + $0xf] sm:$0x1] %v107_v2 }

// kernel: netG_forward.12
= control target key start
LH: loop header
LB: loop body
LE: loop exit
PB: predicated region body
PF: predicated region fallthrough
CT: control target
= control target key end

     0   :  { %s391_s0 = inlined_call_operand.vmem [shape: f32[4,32,128], index: 0, kind: input, shape index: {}]   ;;  %s392_s1 = inlined_call_operand.vmem [shape: f32[1,1,128], index: 1, kind: input, shape index: {}]   ;;  %s393_s2 = inlined_call_operand.vmem [shape: f32[1,1,128], index: 2, kind: input, shape index: {}]   ;;  %s394_s3 = inlined_call_operand.vmem [shape: bf16[4,32,128], index: 3, kind: output, shape index: {}]  }
   0x1   :  { %v14_v0 = vld [vmem:[%s391_s0] sm:$0xff]  ;;  %v15_v1 = vld [vmem:[%s391_s0 + $0x8] sm:$0xff]  ;;  %v16_v6 = vld [vmem:[%s391_s0 + $0x10] sm:$0xff] }
   0x2   :  { %v286_v2 = vld [vmem:[%s392_s1] ss:$0 sm:$0xff]  ;;  %v17_v7 = vld [vmem:[%s391_s0 + $0x18] sm:$0xff]  ;;  %v19_v11 = vld [vmem:[%s391_s0 + $0x28] sm:$0xff] }
   0x3   :  { %v37_v3 = vmul.f32 %v286_v2, %v14_v0  ;;  %v38_v4 = vmul.f32 %v286_v2, %v15_v1  ;;  %v293_v5 = vld [vmem:[%s393_s2] ss:$0 sm:$0xff]  ;;  %v39_v8 = vmul.f32 %v286_v2, %v16_v6  ;;  %v40_v9 = vmul.f32 %v286_v2, %v17_v7  ;;  %v20_v12 = vld [vmem:[%s391_s0 + $0x30] sm:$0xff]  ;;  %v21_v17 = vld [vmem:[%s391_s0 + $0x38] sm:$0xff] }
   0x4   :  { %v18_v10 = vld [vmem:[%s391_s0 + $0x20] sm:$0xff]  ;;  %v42_v16 = vmul.f32 %v286_v2, %v19_v11  ;;  %v43_v20 = vmul.f32 %v286_v2, %v20_v12  ;;  %v44_v21 = vmul.f32 %v286_v2, %v21_v17  ;;  %v23_v27 = vld [vmem:[%s391_s0 + $0x48] sm:$0xff]  ;;  %v24_v32 = vld [vmem:[%s391_s0 + $0x50] sm:$0xff] }
   0x5   :  { %v60_v13 = vadd.f32 %v293_v5, %v37_v3  ;;  %v61_v14 = vadd.f32 %v293_v5, %v38_v4  ;;  %v41_v15 = vmul.f32 %v286_v2, %v18_v10  ;;  %v62_v18 = vadd.f32 %v293_v5, %v39_v8  ;;  %v22_v22 = vld [vmem:[%s391_s0 + $0x40] sm:$0xff]  ;;  %v25_v33 = vld [vmem:[%s391_s0 + $0x58] sm:$0xff]  ;;  %v27_v39 = vld [vmem:[%s391_s0 + $0x68] sm:$0xff] }
   0x6   :  { %v63_v19 = vadd.f32 %v293_v5, %v40_v9  ;;  %v65_v26 = vadd.f32 %v293_v5, %v42_v16  ;;  %v66_v30 = vadd.f32 %v293_v5, %v43_v20  ;;  %v67_v31 = vadd.f32 %v293_v5, %v44_v21  ;;  %v26_v38 = vld [vmem:[%s391_s0 + $0x60] sm:$0xff]  ;;  %v28_v44 = vld [vmem:[%s391_s0 + $0x70] sm:$0xff]  ;;  %v29_v49 = vld [vmem:[%s391_s0 + $0x78] sm:$0xff] }
   0x7   :  { %v76_v23 = vmax.f32 %v60_v13, 0.0  ;;  %v77_v24 = vmax.f32 %v61_v14, 0.0  ;;  %v64_v25 = vadd.f32 %v293_v5, %v41_v15  ;;  %v78_v28 = vmax.f32 %v62_v18, 0.0 }
   0x8   :  { %v79_v29 = vmax.f32 %v63_v19, 0.0  ;;  %v81_v36 = vmax.f32 %v65_v26, 0.0  ;;  %v45_v37 = vmul.f32 %v286_v2, %v22_v22  ;;  %v82_v41 = vmax.f32 %v66_v30, 0.0 }
   0x9   :  { %v213_v34 = vpack.c.bf16 %v77_v24, %v76_v23  ;;  %v80_v35 = vmax.f32 %v64_v25, 0.0  ;;  %v83_v42 = vmax.f32 %v67_v31, 0.0  ;;  %v46_v43 = vmul.f32 %v286_v2, %v23_v27 }
   0xa   :  { %v218_v40 = vpack.c.bf16 %v79_v29, %v78_v28  ;;  %v68_v46 = vadd.f32 %v293_v5, %v45_v37  ;;  %v47_v47 = vmul.f32 %v286_v2, %v24_v32  ;;  %v48_v48 = vmul.f32 %v286_v2, %v25_v33 }
   0xb   :  { %214 = vst [vmem:[%s394_s3] sm:$0xff] %v213_v34   ;;  %v223_v45 = vpack.c.bf16 %v81_v36, %v80_v35  ;;  %v228_v50 = vpack.c.bf16 %v83_v42, %v82_v41  ;;  %v69_v51 = vadd.f32 %v293_v5, %v46_v43  ;;  %v49_v52 = vmul.f32 %v286_v2, %v26_v38 }
   0xc   :  { %250 = vst [vmem:[%s394_s3 + $0x8] sm:$0xff] %v218_v40   ;;  %v50_v53 = vmul.f32 %v286_v2, %v27_v39  ;;  %v84_v54 = vmax.f32 %v68_v46, 0.0  ;;  %v70_v55 = vadd.f32 %v293_v5, %v47_v47  ;;  %v71_v56 = vadd.f32 %v293_v5, %v48_v48 }
   0xd   :  { %251 = vst [vmem:[%s394_s3 + $0x10] sm:$0xff] %v223_v45   ;;  %v51_v57 = vmul.f32 %v286_v2, %v28_v44  ;;  %252 = vst [vmem:[%s394_s3 + $0x18] sm:$0xff] %v228_v50   ;;  %v85_v58 = vmax.f32 %v69_v51, 0.0  ;;  %v72_v59 = vadd.f32 %v293_v5, %v49_v52  ;;  %v52_v61 = vmul.f32 %v286_v2, %v29_v49 }
   0xe   :  { %v73_v60 = vadd.f32 %v293_v5, %v50_v53  ;;  %v86_v62 = vmax.f32 %v70_v55, 0.0  ;;  %v87_v63 = vmax.f32 %v71_v56, 0.0 }
   0xf   :  { %v74_v0 = vadd.f32 %v293_v5, %v51_v57  ;;  %v233_v1 = vpack.c.bf16 %v85_v58, %v84_v54  ;;  %v88_v3 = vmax.f32 %v72_v59, 0.0  ;;  %v75_v6 = vadd.f32 %v293_v5, %v52_v61 }
  0x10   :  { %v89_v4 = vmax.f32 %v73_v60, 0.0  ;;  %v238_v7 = vpack.c.bf16 %v87_v63, %v86_v62 }
  0x11   :  { %v90_v8 = vmax.f32 %v74_v0, 0.0  ;;  %253 = vst [vmem:[%s394_s3 + $0x20] sm:$0xff] %v233_v1   ;;  %v91_v10 = vmax.f32 %v75_v6, 0.0 }
  0x12   :  { %v243_v9 = vpack.c.bf16 %v89_v4, %v88_v3  ;;  %254 = vst [vmem:[%s394_s3 + $0x28] sm:$0xff] %v238_v7  }
  0x13   :  { %v248_v2 = vpack.c.bf16 %v91_v10, %v90_v8 }
  0x14   :  { %255 = vst [vmem:[%s394_s3 + $0x30] sm:$0xff] %v243_v9  }
  0x15   :  { %256 = vst [vmem:[%s394_s3 + $0x38] sm:$0xff] %v248_v2  }

// kernel: netG_forward.11
= control target key start
LH: loop header
LB: loop body
LE: loop exit
PB: predicated region body
PF: predicated region fallthrough
CT: control target
= control target key end

     0   :  { %10 = vsyncpa [#allocation3], 0  ;;  %s951_s0 = inlined_call_operand.vmem [shape: bf16[4,32,256], index: 0, kind: input, shape index: {}]   ;;  %s952_s1 = inlined_call_operand.hbm [shape: bf16[4,256,128], index: 1, kind: input, shape index: {}]   ;;  %s953_s2 = inlined_call_operand.vmem [shape: f32[4,32,128], index: 2, kind: output, shape index: {0}]   ;;  %s954_s3 = inlined_call_operand.vmem [shape: f32[1,128], index: 3, kind: output, shape index: {1}]   ;;  %s955_s4 = inlined_call_operand.vmem [shape: f32[1,128], index: 4, kind: output, shape index: {2}]  }
   0x1   :  { %12 = vsyncpa [#allocation3 + $0x1], 0  ;;  %s803_s15 = smov 0   ;;  %s805_s16 = smov 0  }
   0x2   :  { %s807_s17 = smov 0   ;;  %s809_s18 = smov 0  }
   0x3 LB: > { %s822_s19 = sadd.s32 4294967295, %s772_s18   ;;  %s825_s20 = sadd.s32 1, %s772_s18   ;;  %s772_s18 = sphi %s809_s18, %s964_s18   ;;  %s768_s17 = sphi %s807_s17, %s963_s17   ;;  %s764_s16 = sphi %s805_s16, %s962_s16   ;;  %s760_s15 = sphi %s803_s15, %s961_s15  }
   0x4   : > { %s48_s21 = ssub.s32 %s772_s18, %s825_s20  ;;  %s51_s22 = sadd.s32 1, %s768_s17 }
   0x5   : > { %p49_p0 = scmp.eq.s32.totalorder %s48_s21, 0  ;;  %p58_p1 = scmp.ne.s32.totalorder %s768_s17, %s764_s16 }
   0x6   : > { %p59_p2 = scmp.eq.s32.totalorder %s772_s18, 0  ;;  %p64_p3 = scmp.ne.s32.totalorder %s764_s16, %s760_s15 }
   0x7   : > { %s835_s23 = scalar_select %p49_p0, %s768_s17, %s51_s22  }
   0x8   : > { %p60_p4 = por %p59_p2, %p58_p1  ;;  %p65_p5 = scmp.eq.s32.totalorder %s822_s19, 0 }
   0x9   : > { %p652_p6 = scmp.lt.s32.totalorder %s772_s18, 4  ;;  %s164_s25 = sand.u32 1, %s768_s17  }
   0xa   : > { %p839_p7 = por %p65_p5, %p64_p3  ;;  %s567_s26 = sshll.u32 %s164_s25, 7 }
   0xb   : > { %s599_s27 = sshll.u32 %s772_s18, 11  ;;  %s168_s5 = scalar_lea.vmem [#allocation2], %s567_s26 }
   0xc   : > { %s957_s24 = scalar_select %p839_p7, 1, 0 }
   0xd   : > { %s848_s30 = scalar_lea.hbm %s952_s1, %s599_s27  ;;  %s175_s6 = sshll.u32 %s168_s5, 4  ;;  %s850_s6 = int_to_ptr.vmem [resolvable:$true] %s175_s6 }
   0xe   : > { %p852_p8 = pnand %p652_p6, %p60_p4  ;;  %s857_s8 = scalar_lea.sflag [#allocation3], %s164_s25 }
   0xf   : > { %s710_s9 = scalar_lea.hbm %s848_s30, 2048  ;;  %s715_s12 = scalar_lea.hbm %s952_s1, 8192 }
  0x10   : > { %p711_p10 = scmp.ne.s32.totalorder %s848_s30, %s710_s9  ;;  %p712_p11 = pneg %p852_p8 }
  0x11   : > { %p716_p0 = scmp.lt.s32.totalorder %s848_s30, %s952_s1  ;;  %p717_p1 = scmp.lt.s32.totalorder %s715_s12, %s710_s9 }
  0x12   : > { %p713_p12 = pnand %p712_p11, %p711_p10 }
  0x13   : > { %p718_p2 = por %p717_p1, %p716_p0 }
  0x14   : > { %p714_p13 = pneg %p713_p12 }
  0x16   : > { %p719_p3 = pnand %p718_p2, %p714_p13 }
  0x18   : > { %722 = shalt.err (!%p719_p3)
}
  0x19   : > { %s723_s15 = scalar_lea.vmem %s850_s6, 2048  ;;  %s774_s21 = smov [#allocation2]  }
  0x1a   : > { %p724_p4 = scmp.ne.s32.totalorder %s850_s6, %s723_s15  ;;  %s728_s22 = sshll.u32 %s774_s21, 4  ;;  %s729_s22 = int_to_ptr.vmem [resolvable:$false] %s728_s22 }
  0x1b   : > { %s730_s25 = scalar_lea.vmem %s729_s22, 4096  ;;  %p731_p10 = scmp.lt.s32.totalorder %s850_s6, %s729_s22 }
  0x1c   : > { %p726_p5 = pnand %p724_p4, %p712_p11  ;;  %p732_p12 = scmp.lt.s32.totalorder %s730_s25, %s723_s15 }
  0x1e   : > { %p727_p6 = pneg %p726_p5  ;;  %p733_p9 = por %p732_p12, %p731_p10 }
  0x20   : > { %p734_p7 = pnand %p733_p9, %p727_p6 }
  0x22   : > { %737 = shalt.err (!%p734_p7)
}
  0x23   : > { %s775_s26 = smov 64   ;;  %s776_s27 = smov 4  }
  0x24   : > { %651 = dma.hbm_to_vmem [thread:$0]  (!%p852_p8), %s848_s30, 2048, %s850_s6, %s857_s8, %s775_s26, %s775_s26, %s776_s27  }
  0x25   : > { %p183_p11 = scmp.lt.s32.totalorder %s772_s18, 5  ;;  %p959_p13 = scmp.ge.s32.totalorder %s772_s18, 1 }
  0x27   : > { %p184_p0 = pnand %p959_p13, %p183_p11 }
  0x28   : > { %s189_s28 = sand.u32 (!%p184_p0), 1, %s764_s16   ;;  %p960_p7 = scmp.ne.s32.totalorder (!%p184_p0), %s957_s24, 0 }
  0x29   : > { %187 = sbr.rel (%p184_p0) target bundleno = 307 (0x133), region = 28  ;;  %s571_s29 = sshll.u32 (!%p184_p0), %s189_s28, 7 }
  0x2a   : > { %s190_s5 = scalar_lea.sflag (!%p184_p0), [#allocation3], %s189_s28  ;;  %s882_s9 = scalar_lea.vmem (!%p184_p0), [#allocation2], %s571_s29 }
  0x2e   : > { %755 = dma.done.wait (%p960_p7), %s190_s5, 2048  }
  0x2f   : > { %757 = vsyncadd (%p960_p7), %s190_s5, 4294965248  ;;  %v688_v0 = vld [vmem:[%s882_s9 + $0x78] sm:$0xff]   ;;  %v690_v2 = vld [vmem:[%s882_s9 + $0x70] sm:$0xff]   ;;  %p223_p8 = scmp.lt.s32.totalorder %s822_s19, 3  ;;  %p596_p9 = scmp.ne.s32.totalorder %s822_s19, 0 }
  0x30   : > { %v689_v1 = vld [vmem:[%s882_s9 + $0x38] sm:$0xff]   ;;  %602 = vmatprep.subr.bf16.mxu0 %v688_v0  ;;  %630 = vmatprep.subr.bf16.mxu1 %v688_v0  ;;  %v691_v3 = vld [vmem:[%s882_s9 + $0x30] sm:$0xff]   ;;  %v692_v4 = vld [vmem:[%s882_s9 + $0x68] sm:$0xff]  }
  0x31   : > { %603 = vmatpush3.bf16.msra.mxu0 %v689_v1  ;;  %638 = vmatpush3.bf16.msra.mxu1 %v689_v1  ;;  %v693_v5 = vld [vmem:[%s882_s9 + $0x28] sm:$0xff]   ;;  %s896_s18 = scalar_select %p223_p8, %s822_s19, 3  ;;  %v694_v6 = vld [vmem:[%s882_s9 + $0x60] sm:$0xff]   ;;  %v696_v8 = vld [vmem:[%s882_s9 + $0x58] sm:$0xff]  }
  0x32   : > { %604 = vmatprep.subr.bf16.mxu0 %v690_v2  ;;  %631 = vmatprep.subr.bf16.mxu1 %v690_v2  ;;  %v695_v7 = vld [vmem:[%s882_s9 + $0x20] sm:$0xff]   ;;  %v697_v9 = vld [vmem:[%s882_s9 + $0x18] sm:$0xff]   ;;  %v698_v10 = vld [vmem:[%s882_s9 + $0x50] sm:$0xff]  }
  0x33   : > { %s600_s24 = sshll.u32 %s896_s18, 5  ;;  %v699_v13 = vld [vmem:[%s882_s9 + $0x10] sm:$0xff]   ;;  %v700_v14 = vld [vmem:[%s882_s9 + $0x48] sm:$0xff]   ;;  %v702_v16 = vld [vmem:[%s882_s9 + $0x40] sm:$0xff]  }
  0x34   : > { %s227_s7 = scalar_lea.vmem %s951_s0, %s600_s24  ;;  %v701_v15 = vld [vmem:[%s882_s9 + $0x8] sm:$0xff]   ;;  %v703_v17 = vld [vmem:[%s882_s9] sm:$0xff]   ;;  %s232_s11 = scalar_lea.vmem %s953_s2, %s600_s24 }
  0x35   : > { %605 = vmatpush3.bf16.msra.mxu0 %v691_v3  ;;  %639 = vmatpush3.bf16.msra.mxu1 %v691_v3  ;;  %v706_v11 = vld [vmem:[%s227_s7 + $0x4] ss:$8 sps:$4 sm:$0xff]   ;;  %v709_v12 = vld [vmem:[%s227_s7 + $0x14] ss:$8 sps:$4 sm:$0xff]   ;;  %v704_v18 = vld [vmem:[%s227_s7] ss:$8 sps:$4 sm:$0xff]  }
  0x36   : > { %606 = vmatprep.subr.bf16.mxu0 %v692_v4  ;;  %632 = vmatprep.subr.bf16.mxu1 %v692_v4  ;;  %v707_v19 = vld [vmem:[%s227_s7 + $0x10] ss:$8 sps:$4 sm:$0xff]  }
  0x37   : > { %418 = vmatprep.mubr.bf16.mxu0 %v706_v11  ;;  %426 = vmatprep.mubr.bf16.mxu1 %v709_v12 }
  0x39   : > { %607 = vmatpush3.bf16.msra.mxu0 %v693_v5  ;;  %640 = vmatpush3.bf16.msra.mxu1 %v693_v5 }
  0x3a   : > { %608 = vmatprep.subr.bf16.mxu0 %v694_v6  ;;  %633 = vmatprep.subr.bf16.mxu1 %v694_v6 }
  0x3d   : > { %609 = vmatpush3.bf16.msra.mxu0 %v695_v7  ;;  %641 = vmatpush3.bf16.msra.mxu1 %v695_v7 }
  0x3e   : > { %610 = vmatprep.subr.bf16.mxu0 %v696_v8  ;;  %634 = vmatprep.subr.bf16.mxu1 %v696_v8 }
  0x41   : > { %611 = vmatpush3.bf16.msra.mxu0 %v697_v9  ;;  %642 = vmatpush3.bf16.msra.mxu1 %v697_v9 }
  0x42   : > { %612 = vmatprep.subr.bf16.mxu0 %v698_v10  ;;  %635 = vmatprep.subr.bf16.mxu1 %v698_v10 }
  0x45   : > { %613 = vmatpush3.bf16.msra.mxu0 %v699_v13  ;;  %643 = vmatpush3.bf16.msra.mxu1 %v699_v13 }
  0x46   : > { %614 = vmatprep.subr.bf16.mxu0 %v700_v14  ;;  %636 = vmatprep.subr.bf16.mxu1 %v700_v14 }
  0x49   : > { %615 = vmatpush3.bf16.msra.mxu0 %v701_v15  ;;  %644 = vmatpush3.bf16.msra.mxu1 %v701_v15 }
  0x4a   : > { %616 = vmatprep.subr.bf16.mxu0 %v702_v16  ;;  %637 = vmatprep.subr.bf16.mxu1 %v702_v16 }
  0x4d   : > { %617 = vmatpush3.bf16.msra.mxu0 %v703_v17  ;;  %645 = vmatpush3.bf16.msra.mxu1 %v703_v17 }
  0x50   : > { %419 = vmatmul.mubr.bf16.vlgmr.msra.gmra.mxu0 %v704_v18  ;;  %427 = vmatmul.mubr.bf16.vlgmr.msra.gmra.mxu1 %v707_v19 }
 0x110   : > { %v618_v20 = vpop.f32.mrf.mxu0  ;;  %v624_v21 = vpop.f32.mrf.mxu1 }
 0x112   : > { %v619_v22 = vpop.f32.mrf.mxu0  ;;  %v625_v23 = vpop.f32.mrf.mxu1 }
 0x113   : > { %v620_v24 = vadd.f32 %v619_v22, %v618_v20  ;;  %v626_v25 = vadd.f32 %v625_v23, %v624_v21 }
 0x114   : > { %v621_v26 = vpop.f32.mrf.mxu0  ;;  %v627_v27 = vpop.f32.mrf.mxu1 }
 0x115   : > { %435 = vst [vmem:[%s232_s11] sm:$0xff] %v620_v24  ;;  %437 = vst [vmem:[%s232_s11 + $0x10] sm:$0xff] %v626_v25  ;;  %442 = sbr.rel (%p596_p9) target bundleno = 284 (0x11c), region = 36 }
 0x116   : > { %v622_v28 = vpop.f32.mrf.mxu0  ;;  %v628_v29 = vpop.f32.mrf.mxu1 }
 0x117   : > { %v623_v30 = vadd.f32 %v622_v28, %v621_v26  ;;  %v629_v31 = vadd.f32 %v628_v29, %v627_v27 }
 0x119   : > { %436 = vst [vmem:[%s232_s11 + $0x8] sm:$0xff] %v623_v30  ;;  %438 = vst [vmem:[%s232_s11 + $0x18] sm:$0xff] %v629_v31 }
 0x11a   : > { %v777_v32 = vmov 0.0  }
 0x11b   : > { %443 = vst [vmem:[%s954_s3] sm:$0x1] %v777_v32  ;;  %444 = vst [vmem:[%s955_s4] sm:$0x1] %v777_v32 }
 0x11c PF: > { %v446_v33 = vadd.f32 %v623_v30, %v620_v24  ;;  %v458_v34 = vmul.f32 %v620_v24, %v620_v24  ;;  %v459_v35 = vmul.f32 %v623_v30, %v623_v30  ;;  %v460_v36 = vmul.f32 %v626_v25, %v626_v25 }
 0x11d   : > { %v461_v38 = vmul.f32 %v629_v31, %v629_v31 }
 0x11e   : > { %v447_v37 = vadd.f32 %v626_v25, %v446_v33  ;;  %v462_v39 = vadd.f32 %v459_v35, %v458_v34 }
 0x120   : > { %v448_v40 = vadd.f32 %v629_v31, %v447_v37  ;;  %v463_v41 = vadd.f32 %v462_v39, %v460_v36 }
 0x122   : > { %v449_v42 = vrot.slane %v448_v40, 4  ;;  %v464_v43 = vadd.f32 %v463_v41, %v461_v38  ;;  %v445_v52 = vld [vmem:[%s954_s3] sm:$0x1] }
 0x123   : > { %v457_v55 = vld [vmem:[%s955_s4] sm:$0x1] }
 0x124   : > { %v450_v44 = vadd.f32 %v449_v42, %v448_v40  ;;  %v465_v45 = vrot.slane %v464_v43, 4 }
 0x126   : > { %v451_v46 = vrot.slane %v450_v44, 2  ;;  %v466_v47 = vadd.f32 %v465_v45, %v464_v43 }
 0x128   : > { %v452_v48 = vadd.f32 %v451_v46, %v450_v44  ;;  %v467_v49 = vrot.slane %v466_v47, 2 }
 0x12a   : > { %v453_v50 = vrot.slane %v452_v48, 1  ;;  %v468_v51 = vadd.f32 %v467_v49, %v466_v47 }
 0x12c   : > { %v454_v53 = vadd.f32 %v453_v50, %v452_v48  ;;  %v469_v54 = vrot.slane %v468_v51, 1 }
 0x12e   : > { %v455_v56 = vadd.f32 %v454_v53, %v445_v52  ;;  %v470_v57 = vadd.f32 %v469_v54, %v468_v51 }
 0x130   : > { %456 = vst [vmem:[%s954_s3] sm:$0x1] %v455_v56  ;;  %v471_v58 = vadd.f32 %v470_v57, %v457_v55 }
 0x132   : > { %472 = vst [vmem:[%s955_s4] sm:$0x1] %v471_v58 }
 0x133 PF: > { %p15_p1 = scmp.ge.s32.totalorder %s825_s20, 6   ;;  %s961_s15 = smov %s764_s16 }
 0x134   : > { %s962_s16 = smov %s768_s17  ;;  %s963_s17 = smov %s835_s23 }
 0x135   : > { %s964_s18 = smov %s825_s20  ;;  %17 = sbr.rel (!%p15_p1) target bundleno = 3 (0x3), region = 91 }
 0x13a   :  { %506 = vsyncpa [#allocation3], 1 }
 0x13b   :  { %508 = vsyncpa [#allocation3 + $0x1], 1 }

// kernel: netG_forward.13
= control target key start
LH: loop header
LB: loop body
LE: loop exit
PB: predicated region body
PF: predicated region fallthrough
CT: control target
= control target key end

     0   :  { %s760_s15 = smov 0   ;;  %s851_s0 = inlined_call_operand.vmem [shape: bf16[4,128,128], index: 0, kind: input, shape index: {}]   ;;  %s852_s1 = inlined_call_operand.vmem [shape: bf16[4,128,128], index: 1, kind: input, shape index: {}]   ;;  %s853_s2 = inlined_call_operand.vmem [shape: f32[4,128,128], index: 2, kind: output, shape index: {0}]   ;;  %s854_s3 = inlined_call_operand.vmem [shape: f32[1,128], index: 3, kind: output, shape index: {1}]   ;;  %s855_s4 = inlined_call_operand.vmem [shape: f32[1,128], index: 4, kind: output, shape index: {2}]  }
   0x1 LB: > { %s766_s16 = sadd.s32 4294967295, %s732_s15   ;;  %p608_p0 = scmp.ge.s32.totalorder %s732_s15, 1  ;;  %s732_s15 = sphi %s760_s15, %s15_s15  }
   0x2   : > { %p167_p1 = scmp.lt.s32.totalorder %s732_s15, 5 }
   0x4   : > { %p168_p2 = pnand %p608_p0, %p167_p1 }
   0x5   : > { %p198_p3 = scmp.lt.s32.totalorder (!%p168_p2), %s766_s16, 3  ;;  %p631_p4 = scmp.ne.s32.totalorder (!%p168_p2), %s766_s16, 0 }
   0x6   : > { %171 = sbr.rel (%p168_p2) target bundleno = 305 (0x131), region = 28 }
   0xb   : > { %s772_s17 = scalar_select %p198_p3, %s766_s16, 3 }
   0xd   : > { %s634_s18 = sshll.u32 %s772_s17, 6  ;;  %s636_s25 = sshll.u32 %s772_s17, 7 }
   0xe   : > { %s778_s21 = scalar_lea.vmem %s852_s1, %s634_s18  ;;  %s786_s24 = scalar_lea.vmem %s851_s0, %s634_s18 }
   0xf   : > { %v710_v0 = vld [vmem:[%s778_s21 + $0x38] sm:$0xff]   ;;  %v711_v1 = vld [vmem:[%s778_s21 + $0x30] sm:$0xff]   ;;  %v712_v2 = vld [vmem:[%s778_s21 + $0x28] sm:$0xff]   ;;  %s805_s28 = scalar_lea.vmem %s853_s2, %s636_s25 }
  0x10   : > { %653 = vmatprep.subr.bf16.mxu0 %v710_v0  ;;  %685 = vmatprep.subr.bf16.mxu1 %v710_v0  ;;  %v713_v3 = vld [vmem:[%s778_s21 + $0x20] sm:$0xff]   ;;  %v714_v6 = vld [vmem:[%s778_s21 + $0x18] sm:$0xff]   ;;  %v715_v7 = vld [vmem:[%s778_s21 + $0x10] sm:$0xff]  }
  0x11   : > { %654 = vmatpush3.bf16.msra.mxu0 %v710_v0  ;;  %693 = vmatpush3.bf16.msra.mxu1 %v710_v0  ;;  %v718_v4 = vld [vmem:[%s786_s24] sm:$0xff]   ;;  %v716_v8 = vld [vmem:[%s778_s21 + $0x8] sm:$0xff]   ;;  %v722_v12 = vld [vmem:[%s786_s24 + $0x10] sm:$0xff]  }
  0x12   : > { %655 = vmatprep.subr.bf16.mxu0 %v711_v1  ;;  %686 = vmatprep.subr.bf16.mxu1 %v711_v1  ;;  %v719_v5 = vld [vmem:[%s786_s24 + $0x20] sm:$0xff]   ;;  %v720_v10 = vld [vmem:[%s786_s24 + $0x8] sm:$0xff]   ;;  %v723_v13 = vld [vmem:[%s786_s24 + $0x30] sm:$0xff]  }
  0x13   : > { %669 = vmatprep.mubr.bf16.mxu0 %v718_v4  ;;  %677 = vmatprep.mubr.bf16.mxu1 %v719_v5  ;;  %v717_v9 = vld [vmem:[%s778_s21] sm:$0xff]   ;;  %v721_v11 = vld [vmem:[%s786_s24 + $0x28] sm:$0xff]   ;;  %v724_v14 = vld [vmem:[%s786_s24 + $0x18] sm:$0xff]  }
  0x14   : > { %v725_v15 = vld [vmem:[%s786_s24 + $0x38] sm:$0xff]  }
  0x15   : > { %656 = vmatpush3.bf16.msra.mxu0 %v711_v1  ;;  %694 = vmatpush3.bf16.msra.mxu1 %v711_v1 }
  0x16   : > { %657 = vmatprep.subr.bf16.mxu0 %v712_v2  ;;  %687 = vmatprep.subr.bf16.mxu1 %v712_v2 }
  0x19   : > { %658 = vmatpush3.bf16.msra.mxu0 %v712_v2  ;;  %695 = vmatpush3.bf16.msra.mxu1 %v712_v2 }
  0x1a   : > { %659 = vmatprep.subr.bf16.mxu0 %v713_v3  ;;  %688 = vmatprep.subr.bf16.mxu1 %v713_v3 }
  0x1d   : > { %660 = vmatpush3.bf16.msra.mxu0 %v713_v3  ;;  %696 = vmatpush3.bf16.msra.mxu1 %v713_v3 }
  0x1e   : > { %661 = vmatprep.subr.bf16.mxu0 %v714_v6  ;;  %689 = vmatprep.subr.bf16.mxu1 %v714_v6 }
  0x21   : > { %662 = vmatpush3.bf16.msra.mxu0 %v714_v6  ;;  %697 = vmatpush3.bf16.msra.mxu1 %v714_v6 }
  0x22   : > { %663 = vmatprep.subr.bf16.mxu0 %v715_v7  ;;  %690 = vmatprep.subr.bf16.mxu1 %v715_v7 }
  0x25   : > { %664 = vmatpush3.bf16.msra.mxu0 %v715_v7  ;;  %698 = vmatpush3.bf16.msra.mxu1 %v715_v7 }
  0x26   : > { %665 = vmatprep.subr.bf16.mxu0 %v716_v8  ;;  %691 = vmatprep.subr.bf16.mxu1 %v716_v8 }
  0x29   : > { %666 = vmatpush3.bf16.msra.mxu0 %v716_v8  ;;  %699 = vmatpush3.bf16.msra.mxu1 %v716_v8 }
  0x2a   : > { %667 = vmatprep.subr.bf16.mxu0 %v717_v9  ;;  %692 = vmatprep.subr.bf16.mxu1 %v717_v9 }
  0x2d   : > { %668 = vmatpush3.bf16.msra.mxu0 %v717_v9  ;;  %700 = vmatpush3.bf16.msra.mxu1 %v717_v9 }
  0x30   : > { %670 = vmatmul.mubr.bf16.vlgmr.msra.gmra.mxu0 %v720_v10  ;;  %678 = vmatmul.mubr.bf16.vlgmr.msra.gmra.mxu1 %v721_v11 }
  0x31   : > { %673 = vmatprep.mubr.bf16.mxu0 %v722_v12  ;;  %681 = vmatprep.mubr.bf16.mxu1 %v723_v13 }
  0x38   : > { %674 = vmatmul.mubr.bf16.gmra.mxu0 %v724_v14  ;;  %682 = vmatmul.mubr.bf16.gmra.mxu1 %v725_v15 }
  0xf0   : > { %v671_v16 = vpop.f32.mrf.mxu0  ;;  %v807_v17 = vpop.f32.mrf.mxu1 }
  0xf1   : > { %441 = vst [vmem:[%s805_s28 + $0x10] sm:$0xff] %v671_v16  ;;  %449 = vst [vmem:[%s805_s28 + $0x50] sm:$0xff] %v807_v17 }
  0xf2   : > { %v376_v18 = vpop.f32.mrf.mxu0  ;;  %v408_v19 = vpop.f32.mrf.mxu1 }
  0xf3   : > { %439 = vst [vmem:[%s805_s28] sm:$0xff] %v376_v18  ;;  %447 = vst [vmem:[%s805_s28 + $0x40] sm:$0xff] %v408_v19 }
  0xf4   : > { %v672_v20 = vpop.f32.mrf.mxu0  ;;  %v680_v21 = vpop.f32.mrf.mxu1 }
  0xf5   : > { %442 = vst [vmem:[%s805_s28 + $0x18] sm:$0xff] %v672_v20  ;;  %450 = vst [vmem:[%s805_s28 + $0x58] sm:$0xff] %v680_v21 }
  0xf6   : > { %v379_v22 = vpop.f32.mrf.mxu0  ;;  %v411_v23 = vpop.f32.mrf.mxu1 }
  0xf7   : > { %440 = vst [vmem:[%s805_s28 + $0x8] sm:$0xff] %v379_v22  ;;  %448 = vst [vmem:[%s805_s28 + $0x48] sm:$0xff] %v411_v23 }
  0xf8   : > { %v675_v24 = vpop.f32.mrf.mxu0  ;;  %v683_v25 = vpop.f32.mrf.mxu1 }
  0xf9   : > { %445 = vst [vmem:[%s805_s28 + $0x30] sm:$0xff] %v675_v24  ;;  %453 = vst [vmem:[%s805_s28 + $0x70] sm:$0xff] %v683_v25 }
  0xfa   : > { %v392_v26 = vpop.f32.mrf.mxu0  ;;  %v424_v27 = vpop.f32.mrf.mxu1 }
  0xfb   : > { %443 = vst [vmem:[%s805_s28 + $0x20] sm:$0xff] %v392_v26  ;;  %451 = vst [vmem:[%s805_s28 + $0x60] sm:$0xff] %v424_v27  ;;  %458 = sbr.rel (%p631_p4) target bundleno = 258 (0x102), region = 32 }
  0xfc   : > { %v676_v28 = vpop.f32.mrf.mxu0  ;;  %v684_v29 = vpop.f32.mrf.mxu1 }
  0xfd   : > { %446 = vst [vmem:[%s805_s28 + $0x38] sm:$0xff] %v676_v28  ;;  %454 = vst [vmem:[%s805_s28 + $0x78] sm:$0xff] %v684_v29 }
  0xfe   : > { %v395_v30 = vpop.f32.mrf.mxu0  ;;  %v427_v31 = vpop.f32.mrf.mxu1 }
  0xff   : > { %444 = vst [vmem:[%s805_s28 + $0x28] sm:$0xff] %v395_v30  ;;  %452 = vst [vmem:[%s805_s28 + $0x68] sm:$0xff] %v427_v31 }
 0x100   : > { %v734_v32 = vmov 0.0  }
 0x101   : > { %459 = vst [vmem:[%s854_s3] sm:$0x1] %v734_v32  ;;  %460 = vst [vmem:[%s855_s4] sm:$0x1] %v734_v32 }
 0x102 PF: > { %v462_v33 = vadd.f32 %v379_v22, %v376_v18  ;;  %v486_v34 = vmul.f32 %v376_v18, %v376_v18  ;;  %v487_v35 = vmul.f32 %v379_v22, %v379_v22  ;;  %v488_v37 = vmul.f32 %v671_v16, %v671_v16 }
 0x103   : > { %v489_v39 = vmul.f32 %v672_v20, %v672_v20  ;;  %v490_v42 = vmul.f32 %v392_v26, %v392_v26  ;;  %v491_v45 = vmul.f32 %v395_v30, %v395_v30  ;;  %v492_v48 = vmul.f32 %v675_v24, %v675_v24 }
 0x104   : > { %v463_v36 = vadd.f32 %v671_v16, %v462_v33  ;;  %v502_v40 = vadd.f32 %v487_v35, %v486_v34  ;;  %v493_v51 = vmul.f32 %v676_v28, %v676_v28  ;;  %v494_v54 = vmul.f32 %v408_v19, %v408_v19 }
 0x105   : > { %v495_v57 = vmul.f32 %v411_v23, %v411_v23  ;;  %v496_v60 = vmul.f32 %v807_v17, %v807_v17  ;;  %v497_v63 = vmul.f32 %v680_v21, %v680_v21  ;;  %v498_v2 = vmul.f32 %v424_v27, %v424_v27 }
 0x106   : > { %v464_v38 = vadd.f32 %v672_v20, %v463_v36  ;;  %v503_v43 = vadd.f32 %v502_v40, %v488_v37  ;;  %v499_v5 = vmul.f32 %v427_v31, %v427_v31  ;;  %v500_v8 = vmul.f32 %v683_v25, %v683_v25 }
 0x107   : > { %v501_v11 = vmul.f32 %v684_v29, %v684_v29 }
 0x108   : > { %v465_v41 = vadd.f32 %v464_v38, %v392_v26  ;;  %v504_v46 = vadd.f32 %v503_v43, %v489_v39 }
 0x10a   : > { %v466_v44 = vadd.f32 %v465_v41, %v395_v30  ;;  %v505_v49 = vadd.f32 %v504_v46, %v490_v42 }
 0x10c   : > { %v467_v47 = vadd.f32 %v675_v24, %v466_v44  ;;  %v506_v52 = vadd.f32 %v505_v49, %v491_v45 }
 0x10e   : > { %v468_v50 = vadd.f32 %v676_v28, %v467_v47  ;;  %v507_v55 = vadd.f32 %v506_v52, %v492_v48  ;;  %v485_v28 = vld [vmem:[%s855_s4] sm:$0x1] }
 0x110   : > { %v469_v53 = vadd.f32 %v468_v50, %v408_v19  ;;  %v508_v58 = vadd.f32 %v507_v55, %v493_v51 }
 0x112   : > { %v470_v56 = vadd.f32 %v469_v53, %v411_v23  ;;  %v509_v61 = vadd.f32 %v508_v58, %v494_v54  ;;  %v461_v23 = vld [vmem:[%s854_s3] sm:$0x1] }
 0x114   : > { %v471_v59 = vadd.f32 %v807_v17, %v470_v56  ;;  %v510_v0 = vadd.f32 %v509_v61, %v495_v57 }
 0x116   : > { %v472_v62 = vadd.f32 %v680_v21, %v471_v59  ;;  %v511_v3 = vadd.f32 %v510_v0, %v496_v60 }
 0x118   : > { %v473_v1 = vadd.f32 %v472_v62, %v424_v27  ;;  %v512_v6 = vadd.f32 %v511_v3, %v497_v63 }
 0x11a   : > { %v474_v4 = vadd.f32 %v473_v1, %v427_v31  ;;  %v513_v9 = vadd.f32 %v512_v6, %v498_v2 }
 0x11c   : > { %v475_v7 = vadd.f32 %v683_v25, %v474_v4  ;;  %v514_v12 = vadd.f32 %v513_v9, %v499_v5 }
 0x11e   : > { %v476_v10 = vadd.f32 %v684_v29, %v475_v7  ;;  %v515_v14 = vadd.f32 %v514_v12, %v500_v8 }
 0x120   : > { %v477_v13 = vrot.slane %v476_v10, 4  ;;  %v516_v16 = vadd.f32 %v515_v14, %v501_v11 }
 0x122   : > { %v478_v15 = vadd.f32 %v477_v13, %v476_v10  ;;  %v517_v18 = vrot.slane %v516_v16, 4 }
 0x124   : > { %v479_v17 = vrot.slane %v478_v15, 2  ;;  %v518_v20 = vadd.f32 %v517_v18, %v516_v16 }
 0x126   : > { %v480_v19 = vadd.f32 %v479_v17, %v478_v15  ;;  %v519_v22 = vrot.slane %v518_v20, 2 }
 0x128   : > { %v481_v21 = vrot.slane %v480_v19, 1  ;;  %v520_v25 = vadd.f32 %v519_v22, %v518_v20 }
 0x12a   : > { %v482_v24 = vadd.f32 %v481_v21, %v480_v19  ;;  %v521_v27 = vrot.slane %v520_v25, 1 }
 0x12c   : > { %v483_v26 = vadd.f32 %v482_v24, %v461_v23  ;;  %v522_v29 = vadd.f32 %v521_v27, %v520_v25 }
 0x12e   : > { %484 = vst [vmem:[%s854_s3] sm:$0x1] %v483_v26  ;;  %v523_v30 = vadd.f32 %v522_v29, %v485_v28 }
 0x130   : > { %524 = vst [vmem:[%s855_s4] sm:$0x1] %v523_v30 }
 0x131 PF: > { %s15_s15 = sadd.s32 1, %s732_s15  }
 0x132   : > { %p12_p5 = scmp.ge.s32.totalorder %s15_s15, 6  }
 0x134   :  { %14 = sbr.rel (!%p12_p5) target bundleno = 1 (0x1), region = 81 }

// kernel: netG_forward.14
= control target key start
LH: loop header
LB: loop body
LE: loop exit
PB: predicated region body
PF: predicated region fallthrough
CT: control target
= control target key end

     0   :  { %s1375_s0 = inlined_call_operand.vmem [shape: f32[4,128,128], index: 0, kind: input, shape index: {}]   ;;  %s1376_s1 = inlined_call_operand.vmem [shape: f32[1,1,128], index: 1, kind: input, shape index: {}]   ;;  %s1377_s2 = inlined_call_operand.vmem [shape: f32[1,1,128], index: 2, kind: input, shape index: {}]   ;;  %s1378_s3 = inlined_call_operand.vmem [shape: bf16[4,128,128], index: 3, kind: output, shape index: {}]  }
   0x1   :  { %v14_v0 = vld [vmem:[%s1375_s0] sm:$0xff]  ;;  %v15_v1 = vld [vmem:[%s1375_s0 + $0x8] sm:$0xff]  ;;  %v16_v6 = vld [vmem:[%s1375_s0 + $0x10] sm:$0xff] }
   0x2   :  { %v958_v2 = vld [vmem:[%s1376_s1] ss:$0 sm:$0xff]  ;;  %v17_v7 = vld [vmem:[%s1375_s0 + $0x18] sm:$0xff]  ;;  %v19_v11 = vld [vmem:[%s1375_s0 + $0x28] sm:$0xff] }
   0x3   :  { %v85_v3 = vmul.f32 %v958_v2, %v14_v0  ;;  %v86_v4 = vmul.f32 %v958_v2, %v15_v1  ;;  %v965_v5 = vld [vmem:[%s1377_s2] ss:$0 sm:$0xff]  ;;  %v87_v8 = vmul.f32 %v958_v2, %v16_v6  ;;  %v88_v9 = vmul.f32 %v958_v2, %v17_v7  ;;  %v20_v12 = vld [vmem:[%s1375_s0 + $0x30] sm:$0xff]  ;;  %v21_v17 = vld [vmem:[%s1375_s0 + $0x38] sm:$0xff] }
   0x4   :  { %v18_v10 = vld [vmem:[%s1375_s0 + $0x20] sm:$0xff]  ;;  %v90_v16 = vmul.f32 %v958_v2, %v19_v11  ;;  %v91_v20 = vmul.f32 %v958_v2, %v20_v12  ;;  %v92_v21 = vmul.f32 %v958_v2, %v21_v17  ;;  %v23_v27 = vld [vmem:[%s1375_s0 + $0x48] sm:$0xff]  ;;  %v24_v32 = vld [vmem:[%s1375_s0 + $0x50] sm:$0xff] }
   0x5   :  { %v156_v13 = vadd.f32 %v965_v5, %v85_v3  ;;  %v157_v14 = vadd.f32 %v965_v5, %v86_v4  ;;  %v89_v15 = vmul.f32 %v958_v2, %v18_v10  ;;  %v158_v18 = vadd.f32 %v965_v5, %v87_v8  ;;  %v22_v22 = vld [vmem:[%s1375_s0 + $0x40] sm:$0xff]  ;;  %v25_v33 = vld [vmem:[%s1375_s0 + $0x58] sm:$0xff]  ;;  %v27_v39 = vld [vmem:[%s1375_s0 + $0x68] sm:$0xff] }
   0x6   :  { %v159_v19 = vadd.f32 %v965_v5, %v88_v9  ;;  %v161_v26 = vadd.f32 %v965_v5, %v90_v16  ;;  %v162_v30 = vadd.f32 %v965_v5, %v91_v20  ;;  %v163_v31 = vadd.f32 %v965_v5, %v92_v21  ;;  %v26_v38 = vld [vmem:[%s1375_s0 + $0x60] sm:$0xff]  ;;  %v28_v44 = vld [vmem:[%s1375_s0 + $0x70] sm:$0xff]  ;;  %v29_v49 = vld [vmem:[%s1375_s0 + $0x78] sm:$0xff] }
   0x7   :  { %v220_v23 = vmax.f32 %v156_v13, 0.0  ;;  %v221_v24 = vmax.f32 %v157_v14, 0.0  ;;  %v160_v25 = vadd.f32 %v965_v5, %v89_v15  ;;  %v222_v28 = vmax.f32 %v158_v18, 0.0  ;;  %v30_v54 = vld [vmem:[%s1375_s0 + $0x80] sm:$0xff]  ;;  %v31_v63 = vld [vmem:[%s1375_s0 + $0x88] sm:$0xff]  ;;  %v32_v6 = vld [vmem:[%s1375_s0 + $0x90] sm:$0xff] }
   0x8   :  { %v223_v29 = vmax.f32 %v159_v19, 0.0  ;;  %v225_v36 = vmax.f32 %v161_v26, 0.0  ;;  %v93_v37 = vmul.f32 %v958_v2, %v22_v22  ;;  %v226_v41 = vmax.f32 %v162_v30, 0.0  ;;  %v33_v7 = vld [vmem:[%s1375_s0 + $0x98] sm:$0xff]  ;;  %v34_v12 = vld [vmem:[%s1375_s0 + $0xa0] sm:$0xff]  ;;  %v35_v13 = vld [vmem:[%s1375_s0 + $0xa8] sm:$0xff] }
   0x9   :  { %v741_v34 = vpack.c.bf16 %v221_v24, %v220_v23  ;;  %v224_v35 = vmax.f32 %v160_v25, 0.0  ;;  %v227_v42 = vmax.f32 %v163_v31, 0.0  ;;  %v94_v43 = vmul.f32 %v958_v2, %v23_v27  ;;  %v36_v18 = vld [vmem:[%s1375_s0 + $0xb0] sm:$0xff]  ;;  %v37_v23 = vld [vmem:[%s1375_s0 + $0xb8] sm:$0xff] }
   0xa   :  { %v746_v40 = vpack.c.bf16 %v223_v29, %v222_v28  ;;  %v164_v46 = vadd.f32 %v965_v5, %v93_v37  ;;  %v95_v47 = vmul.f32 %v958_v2, %v24_v32  ;;  %v96_v48 = vmul.f32 %v958_v2, %v25_v33  ;;  %v38_v28 = vld [vmem:[%s1375_s0 + $0xc0] sm:$0xff]  ;;  %v39_v37 = vld [vmem:[%s1375_s0 + $0xc8] sm:$0xff] }
   0xb   :  { %742 = vst [vmem:[%s1378_s3] sm:$0xff] %v741_v34   ;;  %v751_v45 = vpack.c.bf16 %v225_v36, %v224_v35  ;;  %v756_v50 = vpack.c.bf16 %v227_v42, %v226_v41  ;;  %v165_v51 = vadd.f32 %v965_v5, %v94_v43  ;;  %v97_v52 = vmul.f32 %v958_v2, %v26_v38  ;;  %v40_v42 = vld [vmem:[%s1375_s0 + $0xd0] sm:$0xff]  ;;  %v41_v43 = vld [vmem:[%s1375_s0 + $0xd8] sm:$0xff] }
   0xc   :  { %898 = vst [vmem:[%s1378_s3 + $0x8] sm:$0xff] %v746_v40   ;;  %v98_v53 = vmul.f32 %v958_v2, %v27_v39  ;;  %v228_v55 = vmax.f32 %v164_v46, 0.0  ;;  %v166_v56 = vadd.f32 %v965_v5, %v95_v47  ;;  %v167_v57 = vadd.f32 %v965_v5, %v96_v48  ;;  %v42_v48 = vld [vmem:[%s1375_s0 + $0xe0] sm:$0xff] }
   0xd   :  { %899 = vst [vmem:[%s1378_s3 + $0x10] sm:$0xff] %v751_v45   ;;  %v99_v58 = vmul.f32 %v958_v2, %v28_v44  ;;  %900 = vst [vmem:[%s1378_s3 + $0x18] sm:$0xff] %v756_v50   ;;  %v229_v59 = vmax.f32 %v165_v51, 0.0  ;;  %v168_v60 = vadd.f32 %v965_v5, %v97_v52  ;;  %v100_v62 = vmul.f32 %v958_v2, %v29_v49  ;;  %v43_v49 = vld [vmem:[%s1375_s0 + $0xe8] sm:$0xff] }
   0xe   :  { %v169_v61 = vadd.f32 %v965_v5, %v98_v53  ;;  %v230_v0 = vmax.f32 %v166_v56, 0.0  ;;  %v231_v1 = vmax.f32 %v167_v57, 0.0  ;;  %v101_v4 = vmul.f32 %v958_v2, %v30_v54  ;;  %v44_v54 = vld [vmem:[%s1375_s0 + $0xf0] sm:$0xff] }
   0xf   :  { %v170_v3 = vadd.f32 %v965_v5, %v99_v58  ;;  %v761_v8 = vpack.c.bf16 %v229_v59, %v228_v55  ;;  %v232_v9 = vmax.f32 %v168_v60, 0.0  ;;  %v171_v11 = vadd.f32 %v965_v5, %v100_v62  ;;  %v45_v59 = vld [vmem:[%s1375_s0 + $0xf8] sm:$0xff] }
  0x10   :  { %v233_v10 = vmax.f32 %v169_v61, 0.0  ;;  %v766_v14 = vpack.c.bf16 %v231_v1, %v230_v0  ;;  %v102_v16 = vmul.f32 %v958_v2, %v31_v63  ;;  %v172_v17 = vadd.f32 %v965_v5, %v101_v4  ;;  %v46_v0 = vld [vmem:[%s1375_s0 + $0x100] sm:$0xff] }
  0x11   :  { %v234_v15 = vmax.f32 %v170_v3, 0.0  ;;  %901 = vst [vmem:[%s1378_s3 + $0x20] sm:$0xff] %v761_v8   ;;  %v235_v20 = vmax.f32 %v171_v11, 0.0  ;;  %v103_v21 = vmul.f32 %v958_v2, %v32_v6  ;;  %v104_v22 = vmul.f32 %v958_v2, %v33_v7  ;;  %v47_v11 = vld [vmem:[%s1375_s0 + $0x108] sm:$0xff] }
  0x12   :  { %v771_v19 = vpack.c.bf16 %v233_v10, %v232_v9  ;;  %902 = vst [vmem:[%s1378_s3 + $0x28] sm:$0xff] %v766_v14   ;;  %v173_v24 = vadd.f32 %v965_v5, %v102_v16  ;;  %v236_v25 = vmax.f32 %v172_v17, 0.0  ;;  %v105_v26 = vmul.f32 %v958_v2, %v34_v12  ;;  %v48_v16 = vld [vmem:[%s1375_s0 + $0x110] sm:$0xff]  ;;  %v49_v17 = vld [vmem:[%s1375_s0 + $0x118] sm:$0xff] }
  0x13   :  { %v106_v27 = vmul.f32 %v958_v2, %v35_v13  ;;  %v776_v29 = vpack.c.bf16 %v235_v20, %v234_v15  ;;  %v174_v30 = vadd.f32 %v965_v5, %v103_v21  ;;  %v175_v31 = vadd.f32 %v965_v5, %v104_v22  ;;  %v50_v22 = vld [vmem:[%s1375_s0 + $0x120] sm:$0xff] }
  0x14   :  { %903 = vst [vmem:[%s1378_s3 + $0x30] sm:$0xff] %v771_v19   ;;  %v107_v32 = vmul.f32 %v958_v2, %v36_v18  ;;  %v237_v33 = vmax.f32 %v173_v24, 0.0  ;;  %v176_v34 = vadd.f32 %v965_v5, %v105_v26  ;;  %v108_v36 = vmul.f32 %v958_v2, %v37_v23  ;;  %v51_v23 = vld [vmem:[%s1375_s0 + $0x128] sm:$0xff] }
  0x15   :  { %v177_v35 = vadd.f32 %v965_v5, %v106_v27  ;;  %904 = vst [vmem:[%s1378_s3 + $0x38] sm:$0xff] %v776_v29   ;;  %v238_v38 = vmax.f32 %v174_v30, 0.0  ;;  %v239_v39 = vmax.f32 %v175_v31, 0.0  ;;  %v109_v41 = vmul.f32 %v958_v2, %v38_v28  ;;  %v52_v28 = vld [vmem:[%s1375_s0 + $0x130] sm:$0xff] }
  0x16   :  { %v178_v40 = vadd.f32 %v965_v5, %v107_v32  ;;  %v781_v44 = vpack.c.bf16 %v237_v33, %v236_v25  ;;  %v240_v45 = vmax.f32 %v176_v34, 0.0  ;;  %v179_v47 = vadd.f32 %v965_v5, %v108_v36  ;;  %v53_v33 = vld [vmem:[%s1375_s0 + $0x138] sm:$0xff] }
  0x17   :  { %v241_v46 = vmax.f32 %v177_v35, 0.0  ;;  %v786_v50 = vpack.c.bf16 %v239_v39, %v238_v38  ;;  %v110_v52 = vmul.f32 %v958_v2, %v39_v37  ;;  %v180_v53 = vadd.f32 %v965_v5, %v109_v41  ;;  %v54_v38 = vld [vmem:[%s1375_s0 + $0x140] sm:$0xff] }
  0x18   :  { %v242_v51 = vmax.f32 %v178_v40, 0.0  ;;  %905 = vst [vmem:[%s1378_s3 + $0x40] sm:$0xff] %v781_v44   ;;  %v243_v56 = vmax.f32 %v179_v47, 0.0  ;;  %v111_v57 = vmul.f32 %v958_v2, %v40_v42  ;;  %v112_v58 = vmul.f32 %v958_v2, %v41_v43  ;;  %v55_v47 = vld [vmem:[%s1375_s0 + $0x148] sm:$0xff] }
  0x19   :  { %v791_v55 = vpack.c.bf16 %v241_v46, %v240_v45  ;;  %906 = vst [vmem:[%s1378_s3 + $0x48] sm:$0xff] %v786_v50   ;;  %v181_v60 = vadd.f32 %v965_v5, %v110_v52  ;;  %v244_v61 = vmax.f32 %v180_v53, 0.0  ;;  %v113_v62 = vmul.f32 %v958_v2, %v42_v48  ;;  %v56_v52 = vld [vmem:[%s1375_s0 + $0x150] sm:$0xff]  ;;  %v57_v53 = vld [vmem:[%s1375_s0 + $0x158] sm:$0xff] }
  0x1a   :  { %v114_v63 = vmul.f32 %v958_v2, %v43_v49  ;;  %v796_v1 = vpack.c.bf16 %v243_v56, %v242_v51  ;;  %v182_v3 = vadd.f32 %v965_v5, %v111_v57  ;;  %v183_v4 = vadd.f32 %v965_v5, %v112_v58  ;;  %v58_v58 = vld [vmem:[%s1375_s0 + $0x160] sm:$0xff] }
  0x1b   :  { %907 = vst [vmem:[%s1378_s3 + $0x50] sm:$0xff] %v791_v55   ;;  %v115_v6 = vmul.f32 %v958_v2, %v44_v54  ;;  %v245_v7 = vmax.f32 %v181_v60, 0.0  ;;  %v184_v8 = vadd.f32 %v965_v5, %v113_v62  ;;  %v116_v10 = vmul.f32 %v958_v2, %v45_v59  ;;  %v59_v59 = vld [vmem:[%s1375_s0 + $0x168] sm:$0xff] }
  0x1c   :  { %v185_v9 = vadd.f32 %v965_v5, %v114_v63  ;;  %908 = vst [vmem:[%s1378_s3 + $0x58] sm:$0xff] %v796_v1   ;;  %v246_v12 = vmax.f32 %v182_v3, 0.0  ;;  %v247_v13 = vmax.f32 %v183_v4, 0.0  ;;  %v117_v15 = vmul.f32 %v958_v2, %v46_v0  ;;  %v60_v0 = vld [vmem:[%s1375_s0 + $0x170] sm:$0xff] }
  0x1d   :  { %v186_v14 = vadd.f32 %v965_v5, %v115_v6  ;;  %v801_v18 = vpack.c.bf16 %v245_v7, %v244_v61  ;;  %v248_v19 = vmax.f32 %v184_v8, 0.0  ;;  %v187_v21 = vadd.f32 %v965_v5, %v116_v10  ;;  %v61_v7 = vld [vmem:[%s1375_s0 + $0x178] sm:$0xff] }
  0x1e   :  { %v249_v20 = vmax.f32 %v185_v9, 0.0  ;;  %v806_v24 = vpack.c.bf16 %v247_v13, %v246_v12  ;;  %v118_v26 = vmul.f32 %v958_v2, %v47_v11  ;;  %v188_v27 = vadd.f32 %v965_v5, %v117_v15  ;;  %v62_v12 = vld [vmem:[%s1375_s0 + $0x180] sm:$0xff] }
  0x1f   :  { %v250_v25 = vmax.f32 %v186_v14, 0.0  ;;  %909 = vst [vmem:[%s1378_s3 + $0x60] sm:$0xff] %v801_v18   ;;  %v251_v30 = vmax.f32 %v187_v21, 0.0  ;;  %v119_v31 = vmul.f32 %v958_v2, %v48_v16  ;;  %v120_v32 = vmul.f32 %v958_v2, %v49_v17  ;;  %v63_v21 = vld [vmem:[%s1375_s0 + $0x188] sm:$0xff] }
  0x20   :  { %v811_v29 = vpack.c.bf16 %v249_v20, %v248_v19  ;;  %910 = vst [vmem:[%s1378_s3 + $0x68] sm:$0xff] %v806_v24   ;;  %v189_v34 = vadd.f32 %v965_v5, %v118_v26  ;;  %v252_v35 = vmax.f32 %v188_v27, 0.0  ;;  %v121_v36 = vmul.f32 %v958_v2, %v50_v22  ;;  %v64_v26 = vld [vmem:[%s1375_s0 + $0x190] sm:$0xff]  ;;  %v65_v27 = vld [vmem:[%s1375_s0 + $0x198] sm:$0xff] }
  0x21   :  { %v122_v37 = vmul.f32 %v958_v2, %v51_v23  ;;  %v816_v39 = vpack.c.bf16 %v251_v30, %v250_v25  ;;  %v190_v40 = vadd.f32 %v965_v5, %v119_v31  ;;  %v191_v41 = vadd.f32 %v965_v5, %v120_v32  ;;  %v66_v32 = vld [vmem:[%s1375_s0 + $0x1a0] sm:$0xff] }
  0x22   :  { %911 = vst [vmem:[%s1378_s3 + $0x70] sm:$0xff] %v811_v29   ;;  %v123_v42 = vmul.f32 %v958_v2, %v52_v28  ;;  %v253_v43 = vmax.f32 %v189_v34, 0.0  ;;  %v192_v44 = vadd.f32 %v965_v5, %v121_v36  ;;  %v124_v46 = vmul.f32 %v958_v2, %v53_v33  ;;  %v67_v33 = vld [vmem:[%s1375_s0 + $0x1a8] sm:$0xff] }
  0x23   :  { %v193_v45 = vadd.f32 %v965_v5, %v122_v37  ;;  %912 = vst [vmem:[%s1378_s3 + $0x78] sm:$0xff] %v816_v39   ;;  %v254_v48 = vmax.f32 %v190_v40, 0.0  ;;  %v255_v49 = vmax.f32 %v191_v41, 0.0  ;;  %v125_v51 = vmul.f32 %v958_v2, %v54_v38  ;;  %v68_v38 = vld [vmem:[%s1375_s0 + $0x1b0] sm:$0xff] }
  0x24   :  { %v194_v50 = vadd.f32 %v965_v5, %v123_v42  ;;  %v821_v54 = vpack.c.bf16 %v253_v43, %v252_v35  ;;  %v256_v55 = vmax.f32 %v192_v44, 0.0  ;;  %v195_v57 = vadd.f32 %v965_v5, %v124_v46  ;;  %v69_v43 = vld [vmem:[%s1375_s0 + $0x1b8] sm:$0xff] }
  0x25   :  { %v257_v56 = vmax.f32 %v193_v45, 0.0  ;;  %v826_v60 = vpack.c.bf16 %v255_v49, %v254_v48  ;;  %v126_v62 = vmul.f32 %v958_v2, %v55_v47  ;;  %v196_v63 = vadd.f32 %v965_v5, %v125_v51  ;;  %v70_v48 = vld [vmem:[%s1375_s0 + $0x1c0] sm:$0xff] }
  0x26   :  { %v258_v61 = vmax.f32 %v194_v50, 0.0  ;;  %913 = vst [vmem:[%s1378_s3 + $0x80] sm:$0xff] %v821_v54   ;;  %v259_v3 = vmax.f32 %v195_v57, 0.0  ;;  %v127_v4 = vmul.f32 %v958_v2, %v56_v52  ;;  %v128_v6 = vmul.f32 %v958_v2, %v57_v53  ;;  %v71_v57 = vld [vmem:[%s1375_s0 + $0x1c8] sm:$0xff] }
  0x27   :  { %v831_v1 = vpack.c.bf16 %v257_v56, %v256_v55  ;;  %914 = vst [vmem:[%s1378_s3 + $0x88] sm:$0xff] %v826_v60   ;;  %v197_v8 = vadd.f32 %v965_v5, %v126_v62  ;;  %v260_v9 = vmax.f32 %v196_v63, 0.0  ;;  %v129_v10 = vmul.f32 %v958_v2, %v58_v58  ;;  %v72_v62 = vld [vmem:[%s1375_s0 + $0x1d0] sm:$0xff]  ;;  %v73_v63 = vld [vmem:[%s1375_s0 + $0x1d8] sm:$0xff] }
  0x28   :  { %v130_v11 = vmul.f32 %v958_v2, %v59_v59  ;;  %v836_v13 = vpack.c.bf16 %v259_v3, %v258_v61  ;;  %v198_v14 = vadd.f32 %v965_v5, %v127_v4  ;;  %v199_v15 = vadd.f32 %v965_v5, %v128_v6  ;;  %v74_v6 = vld [vmem:[%s1375_s0 + $0x1e0] sm:$0xff] }
  0x29   :  { %915 = vst [vmem:[%s1378_s3 + $0x90] sm:$0xff] %v831_v1   ;;  %v131_v16 = vmul.f32 %v958_v2, %v60_v0  ;;  %v261_v17 = vmax.f32 %v197_v8, 0.0  ;;  %v200_v18 = vadd.f32 %v965_v5, %v129_v10  ;;  %v132_v20 = vmul.f32 %v958_v2, %v61_v7  ;;  %v75_v7 = vld [vmem:[%s1375_s0 + $0x1e8] sm:$0xff] }
  0x2a   :  { %v201_v19 = vadd.f32 %v965_v5, %v130_v11  ;;  %916 = vst [vmem:[%s1378_s3 + $0x98] sm:$0xff] %v836_v13   ;;  %v262_v22 = vmax.f32 %v198_v14, 0.0  ;;  %v263_v23 = vmax.f32 %v199_v15, 0.0  ;;  %v133_v25 = vmul.f32 %v958_v2, %v62_v12  ;;  %v76_v12 = vld [vmem:[%s1375_s0 + $0x1f0] sm:$0xff] }
  0x2b   :  { %v202_v24 = vadd.f32 %v965_v5, %v131_v16  ;;  %v841_v28 = vpack.c.bf16 %v261_v17, %v260_v9  ;;  %v264_v29 = vmax.f32 %v200_v18, 0.0  ;;  %v203_v31 = vadd.f32 %v965_v5, %v132_v20  ;;  %v77_v17 = vld [vmem:[%s1375_s0 + $0x1f8] sm:$0xff] }
  0x2c   :  { %v265_v30 = vmax.f32 %v201_v19, 0.0  ;;  %v846_v34 = vpack.c.bf16 %v263_v23, %v262_v22  ;;  %v134_v36 = vmul.f32 %v958_v2, %v63_v21  ;;  %v204_v37 = vadd.f32 %v965_v5, %v133_v25 }
  0x2d   :  { %v266_v35 = vmax.f32 %v202_v24, 0.0  ;;  %917 = vst [vmem:[%s1378_s3 + $0xa0] sm:$0xff] %v841_v28   ;;  %v267_v40 = vmax.f32 %v203_v31, 0.0  ;;  %v135_v41 = vmul.f32 %v958_v2, %v64_v26  ;;  %v136_v42 = vmul.f32 %v958_v2, %v65_v27 }
  0x2e   :  { %v851_v39 = vpack.c.bf16 %v265_v30, %v264_v29  ;;  %918 = vst [vmem:[%s1378_s3 + $0xa8] sm:$0xff] %v846_v34   ;;  %v205_v44 = vadd.f32 %v965_v5, %v134_v36  ;;  %v268_v45 = vmax.f32 %v204_v37, 0.0  ;;  %v137_v46 = vmul.f32 %v958_v2, %v66_v32 }
  0x2f   :  { %v138_v47 = vmul.f32 %v958_v2, %v67_v33  ;;  %v856_v49 = vpack.c.bf16 %v267_v40, %v266_v35  ;;  %v206_v50 = vadd.f32 %v965_v5, %v135_v41  ;;  %v207_v51 = vadd.f32 %v965_v5, %v136_v42 }
  0x30   :  { %919 = vst [vmem:[%s1378_s3 + $0xb0] sm:$0xff] %v851_v39   ;;  %v139_v52 = vmul.f32 %v958_v2, %v68_v38  ;;  %v269_v53 = vmax.f32 %v205_v44, 0.0  ;;  %v208_v54 = vadd.f32 %v965_v5, %v137_v46  ;;  %v140_v56 = vmul.f32 %v958_v2, %v69_v43 }
  0x31   :  { %v209_v55 = vadd.f32 %v965_v5, %v138_v47  ;;  %920 = vst [vmem:[%s1378_s3 + $0xb8] sm:$0xff] %v856_v49   ;;  %v270_v58 = vmax.f32 %v206_v50, 0.0  ;;  %v271_v59 = vmax.f32 %v207_v51, 0.0  ;;  %v141_v61 = vmul.f32 %v958_v2, %v70_v48 }
  0x32   :  { %v210_v60 = vadd.f32 %v965_v5, %v139_v52  ;;  %v861_v0 = vpack.c.bf16 %v269_v53, %v268_v45  ;;  %v272_v1 = vmax.f32 %v208_v54, 0.0  ;;  %v211_v4 = vadd.f32 %v965_v5, %v140_v56 }
  0x33   :  { %v273_v3 = vmax.f32 %v209_v55, 0.0  ;;  %v866_v8 = vpack.c.bf16 %v271_v59, %v270_v58  ;;  %v142_v10 = vmul.f32 %v958_v2, %v71_v57  ;;  %v212_v11 = vadd.f32 %v965_v5, %v141_v61 }
  0x34   :  { %v274_v9 = vmax.f32 %v210_v60, 0.0  ;;  %921 = vst [vmem:[%s1378_s3 + $0xc0] sm:$0xff] %v861_v0   ;;  %v275_v14 = vmax.f32 %v211_v4, 0.0  ;;  %v143_v15 = vmul.f32 %v958_v2, %v72_v62  ;;  %v144_v16 = vmul.f32 %v958_v2, %v73_v63 }
  0x35   :  { %v871_v13 = vpack.c.bf16 %v273_v3, %v272_v1  ;;  %922 = vst [vmem:[%s1378_s3 + $0xc8] sm:$0xff] %v866_v8   ;;  %v213_v18 = vadd.f32 %v965_v5, %v142_v10  ;;  %v276_v19 = vmax.f32 %v212_v11, 0.0  ;;  %v145_v20 = vmul.f32 %v958_v2, %v74_v6 }
  0x36   :  { %v146_v21 = vmul.f32 %v958_v2, %v75_v7  ;;  %v876_v22 = vpack.c.bf16 %v275_v14, %v274_v9  ;;  %v214_v23 = vadd.f32 %v965_v5, %v143_v15  ;;  %v215_v24 = vadd.f32 %v965_v5, %v144_v16 }
  0x37   :  { %923 = vst [vmem:[%s1378_s3 + $0xd0] sm:$0xff] %v871_v13   ;;  %v147_v25 = vmul.f32 %v958_v2, %v76_v12  ;;  %v277_v26 = vmax.f32 %v213_v18, 0.0  ;;  %v216_v27 = vadd.f32 %v965_v5, %v145_v20  ;;  %v148_v29 = vmul.f32 %v958_v2, %v77_v17 }
  0x38   :  { %v217_v28 = vadd.f32 %v965_v5, %v146_v21  ;;  %924 = vst [vmem:[%s1378_s3 + $0xd8] sm:$0xff] %v876_v22   ;;  %v278_v30 = vmax.f32 %v214_v23, 0.0  ;;  %v279_v31 = vmax.f32 %v215_v24, 0.0 }
  0x39   :  { %v218_v32 = vadd.f32 %v965_v5, %v147_v25  ;;  %v881_v33 = vpack.c.bf16 %v277_v26, %v276_v19  ;;  %v280_v34 = vmax.f32 %v216_v27, 0.0  ;;  %v219_v36 = vadd.f32 %v965_v5, %v148_v29 }
  0x3a   :  { %v281_v35 = vmax.f32 %v217_v28, 0.0  ;;  %v886_v37 = vpack.c.bf16 %v279_v31, %v278_v30 }
  0x3b   :  { %v282_v38 = vmax.f32 %v218_v32, 0.0  ;;  %925 = vst [vmem:[%s1378_s3 + $0xe0] sm:$0xff] %v881_v33   ;;  %v283_v39 = vmax.f32 %v219_v36, 0.0 }
  0x3c   :  { %v891_v2 = vpack.c.bf16 %v281_v35, %v280_v34  ;;  %926 = vst [vmem:[%s1378_s3 + $0xe8] sm:$0xff] %v886_v37  }
  0x3d   :  { %v896_v40 = vpack.c.bf16 %v283_v39, %v282_v38 }
  0x3e   :  { %927 = vst [vmem:[%s1378_s3 + $0xf0] sm:$0xff] %v891_v2  }
  0x3f   :  { %928 = vst [vmem:[%s1378_s3 + $0xf8] sm:$0xff] %v896_v40  }

// kernel: netG_forward.15
= control target key start
LH: loop header
LB: loop body
LE: loop exit
PB: predicated region body
PF: predicated region fallthrough
CT: control target
= control target key end

     0   :  { %s1493_s15 = smov 0   ;;  %s2057_s0 = inlined_call_operand.vmem [shape: bf16[4,512,64], index: 0, kind: input, shape index: {}]   ;;  %s2058_s1 = inlined_call_operand.vmem [shape: bf16[4,64,128], index: 1, kind: input, shape index: {}]   ;;  %s2059_s2 = inlined_call_operand.vmem [shape: f32[4,512,128], index: 2, kind: output, shape index: {0}]   ;;  %s2060_s3 = inlined_call_operand.vmem [shape: f32[1,128], index: 3, kind: output, shape index: {1}]   ;;  %s2061_s4 = inlined_call_operand.vmem [shape: f32[1,128], index: 4, kind: output, shape index: {2}]  }
   0x1 LB: > { %s1499_s16 = sadd.s32 4294967295, %s1465_s15   ;;  %p1217_p0 = scmp.ge.s32.totalorder %s1465_s15, 1  ;;  %s1465_s15 = sphi %s1493_s15, %s15_s15  }
   0x2   : > { %p167_p1 = scmp.lt.s32.totalorder %s1465_s15, 5 }
   0x4   : > { %p168_p2 = pnand %p1217_p0, %p167_p1 }
   0x6   : > { %171 = sbr.rel (%p168_p2) target bundleno = 446 (0x1be), region = 28 }
   0xb   : > { %p198_p3 = scmp.lt.s32.totalorder %s1499_s16, 3  ;;  %vm470_vm0 = vcmask 523264   ;;  %p1292_p4 = scmp.ne.s32.totalorder %s1499_s16, 0 }
   0xd   : > { %s1505_s17 = scalar_select %p198_p3, %s1499_s16, 3 }
   0xf   : > { %s1295_s18 = sshll.u32 %s1505_s17, 8  ;;  %s1296_s19 = sshll.u32 %s1505_s17, 5 }
  0x10   : > { %s207_s22 = scalar_lea.vmem %s2058_s1, %s1296_s19  ;;  %s1515_s25 = scalar_lea.vmem %s2057_s0, %s1295_s18 }
  0x11   : > { %v1423_v0 = vld [vmem:[%s207_s22 + $0x18] sm:$0xff]   ;;  %v1424_v1 = vld [vmem:[%s207_s22 + $0x10] sm:$0xff]   ;;  %v1425_v2 = vld [vmem:[%s207_s22 + $0x8] sm:$0xff]   ;;  %s1297_s26 = sshll.u32 %s1505_s17, 9 }
  0x12   : > { %1334 = vmatprep.subr.bf16.mxu0 %v1423_v0  ;;  %1406 = vmatprep.subr.bf16.mxu1 %v1423_v0  ;;  %v1427_v3 = vld [vmem:[%s1515_s25] sm:$0xff]   ;;  %v1429_v6 = vld [vmem:[%s1515_s25 + $0x8] sm:$0xff]   ;;  %v1431_v8 = vld [vmem:[%s1515_s25 + $0x10] sm:$0xff]   ;;  %s1585_s29 = scalar_lea.vmem %s2059_s2, %s1297_s26 }
  0x13   : > { %1335 = vmatpush3.bf16.msra.mxu0 %v1423_v0  ;;  %1410 = vmatpush3.bf16.msra.mxu1 %v1423_v0  ;;  %v1428_v4 = vld [vmem:[%s1515_s25 + $0x80] sm:$0xff]   ;;  %v1430_v7 = vld [vmem:[%s1515_s25 + $0x88] sm:$0xff]   ;;  %v1432_v9 = vld [vmem:[%s1515_s25 + $0x90] sm:$0xff]  }
  0x14   : > { %1336 = vmatprep.subr.bf16.mxu0 %v1424_v1  ;;  %1407 = vmatprep.subr.bf16.mxu1 %v1424_v1  ;;  %v1426_v5 = vld [vmem:[%s207_s22] sm:$0xff]   ;;  %v1433_v10 = vld [vmem:[%s1515_s25 + $0x18] sm:$0xff]   ;;  %v1437_v14 = vld [vmem:[%s1515_s25 + $0x28] sm:$0xff]  }
  0x15   : > { %1342 = vmatprep.mubr.msk.bf16.mxu0 %vm470_vm0, %v1427_v3  ;;  %1374 = vmatprep.mubr.msk.bf16.mxu1 %vm470_vm0, %v1428_v4  ;;  %v1434_v11 = vld [vmem:[%s1515_s25 + $0x98] sm:$0xff]   ;;  %v1435_v12 = vld [vmem:[%s1515_s25 + $0x20] sm:$0xff]   ;;  %v1438_v15 = vld [vmem:[%s1515_s25 + $0xa8] sm:$0xff]  }
  0x16   : > { %v1436_v13 = vld [vmem:[%s1515_s25 + $0xa0] sm:$0xff]   ;;  %v1439_v16 = vld [vmem:[%s1515_s25 + $0x30] sm:$0xff]   ;;  %v1441_v18 = vld [vmem:[%s1515_s25 + $0x38] sm:$0xff]  }
  0x17   : > { %1337 = vmatpush3.bf16.msra.mxu0 %v1424_v1  ;;  %1411 = vmatpush3.bf16.msra.mxu1 %v1424_v1  ;;  %v1440_v17 = vld [vmem:[%s1515_s25 + $0xb0] sm:$0xff]   ;;  %v1442_v19 = vld [vmem:[%s1515_s25 + $0xb8] sm:$0xff]   ;;  %v1443_v20 = vld [vmem:[%s1515_s25 + $0x40] sm:$0xff]  }
  0x18   : > { %1338 = vmatprep.subr.bf16.mxu0 %v1425_v2  ;;  %1408 = vmatprep.subr.bf16.mxu1 %v1425_v2  ;;  %v1444_v21 = vld [vmem:[%s1515_s25 + $0xc0] sm:$0xff]   ;;  %v1445_v22 = vld [vmem:[%s1515_s25 + $0x48] sm:$0xff]   ;;  %v1447_v24 = vld [vmem:[%s1515_s25 + $0x50] sm:$0xff]  }
  0x19   : > { %v1446_v23 = vld [vmem:[%s1515_s25 + $0xc8] sm:$0xff]   ;;  %v1448_v25 = vld [vmem:[%s1515_s25 + $0xd0] sm:$0xff]   ;;  %v1449_v26 = vld [vmem:[%s1515_s25 + $0x58] sm:$0xff]  }
  0x1a   : > { %v1450_v27 = vld [vmem:[%s1515_s25 + $0xd8] sm:$0xff]   ;;  %v1451_v28 = vld [vmem:[%s1515_s25 + $0x60] sm:$0xff]   ;;  %v1453_v30 = vld [vmem:[%s1515_s25 + $0x68] sm:$0xff]  }
  0x1b   : > { %1339 = vmatpush3.bf16.msra.mxu0 %v1425_v2  ;;  %1412 = vmatpush3.bf16.msra.mxu1 %v1425_v2  ;;  %v1452_v29 = vld [vmem:[%s1515_s25 + $0xe0] sm:$0xff]   ;;  %v1454_v31 = vld [vmem:[%s1515_s25 + $0xe8] sm:$0xff]   ;;  %v1455_v32 = vld [vmem:[%s1515_s25 + $0x70] sm:$0xff]  }
  0x1c   : > { %1340 = vmatprep.subr.bf16.mxu0 %v1426_v5  ;;  %1409 = vmatprep.subr.bf16.mxu1 %v1426_v5  ;;  %v1456_v33 = vld [vmem:[%s1515_s25 + $0xf0] sm:$0xff]   ;;  %v1457_v34 = vld [vmem:[%s1515_s25 + $0x78] sm:$0xff]  }
  0x1d   : > { %v1458_v35 = vld [vmem:[%s1515_s25 + $0xf8] sm:$0xff]  }
  0x1f   : > { %1341 = vmatpush3.bf16.msra.mxu0 %v1426_v5  ;;  %1413 = vmatpush3.bf16.msra.mxu1 %v1426_v5 }
  0x22   : > { %1343 = vmatmul.mubr.msk.bf16.vlgmr.msra.gmra.mxu0 %vm470_vm0, %v1429_v6  ;;  %1375 = vmatmul.mubr.msk.bf16.vlgmr.msra.gmra.mxu1 %vm470_vm0, %v1430_v7 }
  0x23   : > { %1346 = vmatprep.mubr.msk.bf16.mxu0 %vm470_vm0, %v1431_v8  ;;  %1378 = vmatprep.mubr.msk.bf16.mxu1 %vm470_vm0, %v1432_v9 }
  0x2a   : > { %1347 = vmatmul.mubr.msk.bf16.gmra.mxu0 %vm470_vm0, %v1433_v10  ;;  %1379 = vmatmul.mubr.msk.bf16.gmra.mxu1 %vm470_vm0, %v1434_v11 }
  0x2b   : > { %1350 = vmatprep.mubr.msk.bf16.mxu0 %vm470_vm0, %v1435_v12  ;;  %1382 = vmatprep.mubr.msk.bf16.mxu1 %vm470_vm0, %v1436_v13 }
  0x32   : > { %1351 = vmatmul.mubr.msk.bf16.gmra.mxu0 %vm470_vm0, %v1437_v14  ;;  %1383 = vmatmul.mubr.msk.bf16.gmra.mxu1 %vm470_vm0, %v1438_v15 }
  0x33   : > { %1354 = vmatprep.mubr.msk.bf16.mxu0 %vm470_vm0, %v1439_v16  ;;  %1386 = vmatprep.mubr.msk.bf16.mxu1 %vm470_vm0, %v1440_v17 }
  0x3a   : > { %1355 = vmatmul.mubr.msk.bf16.gmra.mxu0 %vm470_vm0, %v1441_v18  ;;  %1387 = vmatmul.mubr.msk.bf16.gmra.mxu1 %vm470_vm0, %v1442_v19 }
  0x3b   : > { %1358 = vmatprep.mubr.msk.bf16.mxu0 %vm470_vm0, %v1443_v20  ;;  %1390 = vmatprep.mubr.msk.bf16.mxu1 %vm470_vm0, %v1444_v21 }
  0x42   : > { %1359 = vmatmul.mubr.msk.bf16.gmra.mxu0 %vm470_vm0, %v1445_v22  ;;  %1391 = vmatmul.mubr.msk.bf16.gmra.mxu1 %vm470_vm0, %v1446_v23 }
  0x43   : > { %1362 = vmatprep.mubr.msk.bf16.mxu0 %vm470_vm0, %v1447_v24  ;;  %1394 = vmatprep.mubr.msk.bf16.mxu1 %vm470_vm0, %v1448_v25 }
  0x4a   : > { %1363 = vmatmul.mubr.msk.bf16.gmra.mxu0 %vm470_vm0, %v1449_v26  ;;  %1395 = vmatmul.mubr.msk.bf16.gmra.mxu1 %vm470_vm0, %v1450_v27 }
  0x4b   : > { %1366 = vmatprep.mubr.msk.bf16.mxu0 %vm470_vm0, %v1451_v28  ;;  %1398 = vmatprep.mubr.msk.bf16.mxu1 %vm470_vm0, %v1452_v29 }
  0x52   : > { %1367 = vmatmul.mubr.msk.bf16.gmra.mxu0 %vm470_vm0, %v1453_v30  ;;  %1399 = vmatmul.mubr.msk.bf16.gmra.mxu1 %vm470_vm0, %v1454_v31 }
  0x53   : > { %1370 = vmatprep.mubr.msk.bf16.mxu0 %vm470_vm0, %v1455_v32  ;;  %1402 = vmatprep.mubr.msk.bf16.mxu1 %vm470_vm0, %v1456_v33 }
  0x5a   : > { %1371 = vmatmul.mubr.msk.bf16.gmra.mxu0 %vm470_vm0, %v1457_v34  ;;  %1403 = vmatmul.mubr.msk.bf16.gmra.mxu1 %vm470_vm0, %v1458_v35 }
  0xe2   : > { %v1587_v36 = vpop.f32.mrf.mxu0  ;;  %v1589_v37 = vpop.f32.mrf.mxu1 }
  0xe3   : > { %858 = vst [vmem:[%s1585_s29 + $0x10] sm:$0xff] %v1587_v36  ;;  %890 = vst [vmem:[%s1585_s29 + $0x110] sm:$0xff] %v1589_v37 }
  0xe4   : > { %v1595_v38 = vpop.f32.mrf.mxu0  ;;  %v1597_v39 = vpop.f32.mrf.mxu1 }
  0xe5   : > { %856 = vst [vmem:[%s1585_s29] sm:$0xff] %v1595_v38  ;;  %888 = vst [vmem:[%s1585_s29 + $0x100] sm:$0xff] %v1597_v39 }
  0xe6   : > { %v1603_v40 = vpop.f32.mrf.mxu0  ;;  %v1605_v41 = vpop.f32.mrf.mxu1 }
  0xe7   : > { %859 = vst [vmem:[%s1585_s29 + $0x18] sm:$0xff] %v1603_v40  ;;  %891 = vst [vmem:[%s1585_s29 + $0x118] sm:$0xff] %v1605_v41 }
  0xe8   : > { %v1611_v42 = vpop.f32.mrf.mxu0  ;;  %v1613_v43 = vpop.f32.mrf.mxu1 }
  0xe9   : > { %857 = vst [vmem:[%s1585_s29 + $0x8] sm:$0xff] %v1611_v42  ;;  %889 = vst [vmem:[%s1585_s29 + $0x108] sm:$0xff] %v1613_v43 }
  0xea   : > { %v1619_v44 = vpop.f32.mrf.mxu0  ;;  %v1621_v45 = vpop.f32.mrf.mxu1 }
  0xeb   : > { %862 = vst [vmem:[%s1585_s29 + $0x30] sm:$0xff] %v1619_v44  ;;  %894 = vst [vmem:[%s1585_s29 + $0x130] sm:$0xff] %v1621_v45 }
  0xec   : > { %v1627_v46 = vpop.f32.mrf.mxu0  ;;  %v1629_v47 = vpop.f32.mrf.mxu1 }
  0xed   : > { %860 = vst [vmem:[%s1585_s29 + $0x20] sm:$0xff] %v1627_v46  ;;  %892 = vst [vmem:[%s1585_s29 + $0x120] sm:$0xff] %v1629_v47 }
  0xee   : > { %v1635_v48 = vpop.f32.mrf.mxu0  ;;  %v1637_v49 = vpop.f32.mrf.mxu1 }
  0xef   : > { %863 = vst [vmem:[%s1585_s29 + $0x38] sm:$0xff] %v1635_v48  ;;  %895 = vst [vmem:[%s1585_s29 + $0x138] sm:$0xff] %v1637_v49 }
  0xf0   : > { %v1643_v50 = vpop.f32.mrf.mxu0  ;;  %v1645_v51 = vpop.f32.mrf.mxu1 }
  0xf1   : > { %861 = vst [vmem:[%s1585_s29 + $0x28] sm:$0xff] %v1643_v50  ;;  %893 = vst [vmem:[%s1585_s29 + $0x128] sm:$0xff] %v1645_v51 }
  0xf2   : > { %v1651_v52 = vpop.f32.mrf.mxu0  ;;  %v1653_v53 = vpop.f32.mrf.mxu1 }
  0xf3   : > { %866 = vst [vmem:[%s1585_s29 + $0x50] sm:$0xff] %v1651_v52  ;;  %898 = vst [vmem:[%s1585_s29 + $0x150] sm:$0xff] %v1653_v53 }
  0xf4   : > { %v1659_v54 = vpop.f32.mrf.mxu0  ;;  %v1661_v55 = vpop.f32.mrf.mxu1 }
  0xf5   : > { %864 = vst [vmem:[%s1585_s29 + $0x40] sm:$0xff] %v1659_v54  ;;  %896 = vst [vmem:[%s1585_s29 + $0x140] sm:$0xff] %v1661_v55 }
  0xf6   : > { %v1667_v56 = vpop.f32.mrf.mxu0  ;;  %v1669_v57 = vpop.f32.mrf.mxu1 }
  0xf7   : > { %867 = vst [vmem:[%s1585_s29 + $0x58] sm:$0xff] %v1667_v56  ;;  %899 = vst [vmem:[%s1585_s29 + $0x158] sm:$0xff] %v1669_v57 }
  0xf8   : > { %v1675_v58 = vpop.f32.mrf.mxu0  ;;  %v1677_v59 = vpop.f32.mrf.mxu1 }
  0xf9   : > { %865 = vst [vmem:[%s1585_s29 + $0x48] sm:$0xff] %v1675_v58  ;;  %897 = vst [vmem:[%s1585_s29 + $0x148] sm:$0xff] %v1677_v59 }
  0xfa   : > { %v1683_v60 = vpop.f32.mrf.mxu0  ;;  %v1685_v61 = vpop.f32.mrf.mxu1 }
  0xfb   : > { %870 = vst [vmem:[%s1585_s29 + $0x70] sm:$0xff] %v1683_v60  ;;  %902 = vst [vmem:[%s1585_s29 + $0x170] sm:$0xff] %v1685_v61 }
  0xfc   : > { %v1691_v62 = vpop.f32.mrf.mxu0  ;;  %v1693_v63 = vpop.f32.mrf.mxu1 }
  0xfd   : > { %868 = vst [vmem:[%s1585_s29 + $0x60] sm:$0xff] %v1691_v62  ;;  %900 = vst [vmem:[%s1585_s29 + $0x160] sm:$0xff] %v1693_v63 }
  0xfe   : > { %v1699_v0 = vpop.f32.mrf.mxu0  ;;  %v1701_v1 = vpop.f32.mrf.mxu1 }
  0xff   : > { %871 = vst [vmem:[%s1585_s29 + $0x78] sm:$0xff] %v1699_v0  ;;  %903 = vst [vmem:[%s1585_s29 + $0x178] sm:$0xff] %v1701_v1 }
 0x100   : > { %v1707_v2 = vpop.f32.mrf.mxu0  ;;  %v1709_v3 = vpop.f32.mrf.mxu1 }
 0x101   : > { %869 = vst [vmem:[%s1585_s29 + $0x68] sm:$0xff] %v1707_v2  ;;  %901 = vst [vmem:[%s1585_s29 + $0x168] sm:$0xff] %v1709_v3 }
 0x102   : > { %v1715_v4 = vpop.f32.mrf.mxu0  ;;  %v1717_v5 = vpop.f32.mrf.mxu1 }
 0x103   : > { %874 = vst [vmem:[%s1585_s29 + $0x90] sm:$0xff] %v1715_v4  ;;  %906 = vst [vmem:[%s1585_s29 + $0x190] sm:$0xff] %v1717_v5 }
 0x104   : > { %v1723_v6 = vpop.f32.mrf.mxu0  ;;  %v1725_v7 = vpop.f32.mrf.mxu1 }
 0x105   : > { %872 = vst [vmem:[%s1585_s29 + $0x80] sm:$0xff] %v1723_v6  ;;  %904 = vst [vmem:[%s1585_s29 + $0x180] sm:$0xff] %v1725_v7 }
 0x106   : > { %v1731_v8 = vpop.f32.mrf.mxu0  ;;  %v1733_v9 = vpop.f32.mrf.mxu1 }
 0x107   : > { %875 = vst [vmem:[%s1585_s29 + $0x98] sm:$0xff] %v1731_v8  ;;  %907 = vst [vmem:[%s1585_s29 + $0x198] sm:$0xff] %v1733_v9 }
 0x108   : > { %v1739_v10 = vpop.f32.mrf.mxu0  ;;  %v1741_v11 = vpop.f32.mrf.mxu1 }
 0x109   : > { %873 = vst [vmem:[%s1585_s29 + $0x88] sm:$0xff] %v1739_v10  ;;  %905 = vst [vmem:[%s1585_s29 + $0x188] sm:$0xff] %v1741_v11 }
 0x10a   : > { %v1747_v12 = vpop.f32.mrf.mxu0  ;;  %v1749_v13 = vpop.f32.mrf.mxu1 }
 0x10b   : > { %2086 = vst [vmem:[#allocation2_spill] sm:$0xff] %v1749_v13  ;;  %878 = vst [vmem:[%s1585_s29 + $0xb0] sm:$0xff] %v1747_v12 }
 0x10c   : > { %910 = vst [vmem:[%s1585_s29 + $0x1b0] sm:$0xff] %v1749_v13  ;;  %v1755_v14 = vpop.f32.mrf.mxu0  ;;  %v1757_v15 = vpop.f32.mrf.mxu1 }
 0x10d   : > { %2087 = vst [vmem:[#allocation3_spill] sm:$0xff] %v1757_v15  ;;  %876 = vst [vmem:[%s1585_s29 + $0xa0] sm:$0xff] %v1755_v14 }
 0x10e   : > { %908 = vst [vmem:[%s1585_s29 + $0x1a0] sm:$0xff] %v1757_v15  ;;  %v1763_v16 = vpop.f32.mrf.mxu0  ;;  %v1765_v17 = vpop.f32.mrf.mxu1 }
 0x10f   : > { %2088 = vst [vmem:[#allocation4_spill] sm:$0xff] %v1765_v17  ;;  %879 = vst [vmem:[%s1585_s29 + $0xb8] sm:$0xff] %v1763_v16 }
 0x110   : > { %911 = vst [vmem:[%s1585_s29 + $0x1b8] sm:$0xff] %v1765_v17  ;;  %v1771_v18 = vpop.f32.mrf.mxu0  ;;  %v1773_v19 = vpop.f32.mrf.mxu1 }
 0x111   : > { %2089 = vst [vmem:[#allocation5_spill] sm:$0xff] %v1773_v19  ;;  %877 = vst [vmem:[%s1585_s29 + $0xa8] sm:$0xff] %v1771_v18 }
 0x112   : > { %909 = vst [vmem:[%s1585_s29 + $0x1a8] sm:$0xff] %v1773_v19  ;;  %v1779_v20 = vpop.f32.mrf.mxu0  ;;  %v1781_v21 = vpop.f32.mrf.mxu1 }
 0x113   : > { %2090 = vst [vmem:[#allocation6_spill] sm:$0xff] %v1781_v21  ;;  %882 = vst [vmem:[%s1585_s29 + $0xd0] sm:$0xff] %v1779_v20 }
 0x114   : > { %914 = vst [vmem:[%s1585_s29 + $0x1d0] sm:$0xff] %v1781_v21  ;;  %v1787_v22 = vpop.f32.mrf.mxu0  ;;  %v1789_v23 = vpop.f32.mrf.mxu1 }
 0x115   : > { %2091 = vst [vmem:[#allocation7_spill] sm:$0xff] %v1789_v23  ;;  %880 = vst [vmem:[%s1585_s29 + $0xc0] sm:$0xff] %v1787_v22 }
 0x116   : > { %912 = vst [vmem:[%s1585_s29 + $0x1c0] sm:$0xff] %v1789_v23  ;;  %v1795_v24 = vpop.f32.mrf.mxu0  ;;  %v1797_v25 = vpop.f32.mrf.mxu1 }
 0x117   : > { %2092 = vst [vmem:[#allocation8_spill] sm:$0xff] %v1797_v25  ;;  %883 = vst [vmem:[%s1585_s29 + $0xd8] sm:$0xff] %v1795_v24 }
 0x118   : > { %915 = vst [vmem:[%s1585_s29 + $0x1d8] sm:$0xff] %v1797_v25  ;;  %v1803_v26 = vpop.f32.mrf.mxu0  ;;  %v1805_v27 = vpop.f32.mrf.mxu1 }
 0x119   : > { %2093 = vst [vmem:[#allocation9_spill] sm:$0xff] %v1805_v27  ;;  %881 = vst [vmem:[%s1585_s29 + $0xc8] sm:$0xff] %v1803_v26 }
 0x11a   : > { %913 = vst [vmem:[%s1585_s29 + $0x1c8] sm:$0xff] %v1805_v27  ;;  %v1811_v28 = vpop.f32.mrf.mxu0  ;;  %v1813_v29 = vpop.f32.mrf.mxu1 }
 0x11b   : > { %2094 = vst [vmem:[#allocation10_spill] sm:$0xff] %v1813_v29  ;;  %886 = vst [vmem:[%s1585_s29 + $0xf0] sm:$0xff] %v1811_v28 }
 0x11c   : > { %918 = vst [vmem:[%s1585_s29 + $0x1f0] sm:$0xff] %v1813_v29  ;;  %v1819_v30 = vpop.f32.mrf.mxu0  ;;  %v1821_v31 = vpop.f32.mrf.mxu1 }
 0x11d   : > { %2095 = vst [vmem:[#allocation11_spill] sm:$0xff] %v1821_v31  ;;  %884 = vst [vmem:[%s1585_s29 + $0xe0] sm:$0xff] %v1819_v30 }
 0x11e   : > { %916 = vst [vmem:[%s1585_s29 + $0x1e0] sm:$0xff] %v1821_v31  ;;  %v1827_v32 = vpop.f32.mrf.mxu0  ;;  %v1829_v33 = vpop.f32.mrf.mxu1  ;;  %923 = sbr.rel (%p1292_p4) target bundleno = 293 (0x125), region = 32 }
 0x11f   : > { %2096 = vst [vmem:[#allocation12_spill] sm:$0xff] %v1829_v33  ;;  %887 = vst [vmem:[%s1585_s29 + $0xf8] sm:$0xff] %v1827_v32 }
 0x120   : > { %919 = vst [vmem:[%s1585_s29 + $0x1f8] sm:$0xff] %v1829_v33  ;;  %v1835_v34 = vpop.f32.mrf.mxu0  ;;  %v1837_v35 = vpop.f32.mrf.mxu1 }
 0x121   : > { %2097 = vst [vmem:[#allocation13_spill] sm:$0xff] %v1837_v35  ;;  %885 = vst [vmem:[%s1585_s29 + $0xe8] sm:$0xff] %v1835_v34 }
 0x122   : > { %917 = vst [vmem:[%s1585_s29 + $0x1e8] sm:$0xff] %v1837_v35 }
 0x123   : > { %v1467_v29 = vmov 0.0  }
 0x124   : > { %924 = vst [vmem:[%s2060_s3] sm:$0x1] %v1467_v29  ;;  %925 = vst [vmem:[%s2061_s4] sm:$0x1] %v1467_v29 }
 0x125 PF: > { %v927_v33 = vadd.f32 %v1611_v42, %v1595_v38  ;;  %v999_v29 = vmul.f32 %v1595_v38, %v1595_v38  ;;  %v1000_v13 = vmul.f32 %v1611_v42, %v1611_v42  ;;  %v1004_v42 = vmul.f32 %v1643_v50, %v1643_v50 }
 0x127   : > { %v928_v31 = vadd.f32 %v1587_v36, %v927_v33 }
 0x129   : > { %v929_v35 = vadd.f32 %v1603_v40, %v928_v31  ;;  %v1001_v31 = vmul.f32 %v1587_v36, %v1587_v36 }
 0x12b   : > { %v930_v25 = vadd.f32 %v929_v35, %v1627_v46 }
 0x12d   : > { %v931_v21 = vadd.f32 %v930_v25, %v1643_v50  ;;  %v1063_v25 = vadd.f32 %v1000_v13, %v999_v29  ;;  %v1006_v13 = vmul.f32 %v1635_v48, %v1635_v48 }
 0x12f   : > { %v932_v27 = vadd.f32 %v1619_v44, %v931_v21  ;;  %v1002_v21 = vmul.f32 %v1603_v40, %v1603_v40  ;;  %v1064_v38 = vadd.f32 %v1063_v25, %v1001_v31  ;;  %v1007_v31 = vmul.f32 %v1659_v54, %v1659_v54 }
 0x130   : > { %v1009_v25 = vmul.f32 %v1651_v52, %v1651_v52 }
 0x131   : > { %v933_v23 = vadd.f32 %v1635_v48, %v932_v27 }
 0x133   : > { %v934_v17 = vadd.f32 %v933_v23, %v1659_v54  ;;  %v1003_v23 = vmul.f32 %v1627_v46, %v1627_v46 }
 0x135   : > { %v935_v33 = vadd.f32 %v934_v17, %v1675_v58  ;;  %v1065_v17 = vadd.f32 %v1064_v38, %v1002_v21  ;;  %v1011_v38 = vmul.f32 %v1691_v62, %v1691_v62 }
 0x137   : > { %v936_v35 = vadd.f32 %v1651_v52, %v935_v33  ;;  %v1005_v33 = vmul.f32 %v1619_v44, %v1619_v44  ;;  %v1066_v15 = vadd.f32 %v1065_v17, %v1003_v23  ;;  %v1012_v17 = vmul.f32 %v1707_v2, %v1707_v2 }
 0x139   : > { %v937_v27 = vadd.f32 %v1667_v56, %v936_v35  ;;  %v1067_v29 = vadd.f32 %v1066_v15, %v1004_v42  ;;  %v1010_v15 = vmul.f32 %v1667_v56, %v1667_v56 }
 0x13b   : > { %v938_v19 = vadd.f32 %v937_v27, %v1691_v62  ;;  %v1068_v35 = vadd.f32 %v1067_v29, %v1005_v33  ;;  %v1013_v33 = vmul.f32 %v1683_v60, %v1683_v60 }
 0x13d   : > { %v939_v36 = vadd.f32 %v938_v19, %v1707_v2  ;;  %v1008_v19 = vmul.f32 %v1675_v58, %v1675_v58  ;;  %v1069_v21 = vadd.f32 %v1068_v35, %v1006_v13  ;;  %v1014_v13 = vmul.f32 %v1699_v0, %v1699_v0 }
 0x13e   : > { %v1016_v35 = vmul.f32 %v1739_v10, %v1739_v10 }
 0x13f   : > { %v940_v40 = vadd.f32 %v1683_v60, %v939_v36  ;;  %v1070_v27 = vadd.f32 %v1069_v21, %v1007_v31 }
 0x141   : > { %v941_v46 = vadd.f32 %v1699_v0, %v940_v40  ;;  %v1071_v23 = vadd.f32 %v1070_v27, %v1008_v19  ;;  %v1017_v19 = vmul.f32 %v1715_v4, %v1715_v4  ;;  %v1019_v27 = vmul.f32 %v1755_v14, %v1755_v14 }
 0x143   : > { %v942_v50 = vadd.f32 %v941_v46, %v1723_v6  ;;  %v1072_v42 = vadd.f32 %v1071_v23, %v1009_v25  ;;  %v1015_v46 = vmul.f32 %v1723_v6, %v1723_v6 }
 0x145   : > { %v943_v44 = vadd.f32 %v942_v50, %v1739_v10  ;;  %v1073_v36 = vadd.f32 %v1072_v42, %v1010_v15  ;;  %v1020_v15 = vmul.f32 %v1771_v18, %v1771_v18  ;;  %v1022_v42 = vmul.f32 %v1763_v16, %v1763_v16 }
 0x147   : > { %v944_v48 = vadd.f32 %v1715_v4, %v943_v44  ;;  %v1074_v40 = vadd.f32 %v1073_v36, %v1011_v38  ;;  %v1018_v44 = vmul.f32 %v1731_v8, %v1731_v8 }
 0x149   : > { %v945_v54 = vadd.f32 %v1731_v8, %v944_v48  ;;  %v1075_v29 = vadd.f32 %v1074_v40, %v1012_v17  ;;  %v1023_v17 = vmul.f32 %v1787_v22, %v1787_v22  ;;  %v1025_v40 = vmul.f32 %v1779_v20, %v1779_v20 }
 0x14b   : > { %v946_v58 = vadd.f32 %v945_v54, %v1755_v14  ;;  %v1076_v31 = vadd.f32 %v1075_v29, %v1013_v33  ;;  %v1021_v54 = vmul.f32 %v1747_v12, %v1747_v12 }
 0x14d   : > { %v947_v52 = vadd.f32 %v946_v58, %v1771_v18  ;;  %v1077_v50 = vadd.f32 %v1076_v31, %v1014_v13  ;;  %v1026_v13 = vmul.f32 %v1795_v24, %v1795_v24  ;;  %v1028_v31 = vmul.f32 %v1835_v34, %v1835_v34 }
 0x14f   : > { %v948_v56 = vadd.f32 %v1747_v12, %v947_v52  ;;  %v1078_v21 = vadd.f32 %v1077_v50, %v1015_v46  ;;  %v1024_v52 = vmul.f32 %v1803_v26, %v1803_v26 }
 0x151   : > { %v949_v62 = vadd.f32 %v1763_v16, %v948_v56  ;;  %v1079_v25 = vadd.f32 %v1078_v21, %v1016_v35  ;;  %v1029_v35 = vmul.f32 %v1811_v28, %v1811_v28  ;;  %v1031_v21 = vmul.f32 %v1597_v39, %v1597_v39 }
 0x153   : > { %v950_v2 = vadd.f32 %v949_v62, %v1787_v22  ;;  %v1080_v48 = vadd.f32 %v1079_v25, %v1017_v19  ;;  %v1027_v62 = vmul.f32 %v1819_v30, %v1819_v30 }
 0x155   : > { %v951_v60 = vadd.f32 %v950_v2, %v1803_v26  ;;  %v1081_v23 = vadd.f32 %v1080_v48, %v1018_v44  ;;  %v1032_v44 = vmul.f32 %v1613_v43, %v1613_v43  ;;  %v1034_v48 = vmul.f32 %v1605_v41, %v1605_v41 }
 0x157   : > { %v952_v0 = vadd.f32 %v1779_v20, %v951_v60  ;;  %v1082_v38 = vadd.f32 %v1081_v23, %v1019_v27  ;;  %v1030_v60 = vmul.f32 %v1827_v32, %v1827_v32 }
 0x159   : > { %v953_v6 = vadd.f32 %v1795_v24, %v952_v0  ;;  %v1083_v58 = vadd.f32 %v1082_v38, %v1020_v15  ;;  %v1035_v15 = vmul.f32 %v1629_v47, %v1629_v47  ;;  %v1037_v38 = vmul.f32 %v1621_v45, %v1621_v45 }
 0x15b   : > { %v954_v10 = vadd.f32 %v953_v6, %v1819_v30  ;;  %v1084_v36 = vadd.f32 %v1083_v58, %v1021_v54  ;;  %v1033_v6 = vmul.f32 %v1589_v37, %v1589_v37 }
 0x15d   : > { %v955_v4 = vadd.f32 %v954_v10, %v1835_v34  ;;  %v1085_v33 = vadd.f32 %v1084_v36, %v1022_v42  ;;  %v1038_v42 = vmul.f32 %v1637_v49, %v1637_v49  ;;  %v1040_v36 = vmul.f32 %v1677_v59, %v1677_v59 }
 0x15f   : > { %v956_v8 = vadd.f32 %v1811_v28, %v955_v4  ;;  %v1086_v56 = vadd.f32 %v1085_v33, %v1023_v17  ;;  %v1036_v4 = vmul.f32 %v1645_v51, %v1645_v51 }
 0x161   : > { %v957_v14 = vadd.f32 %v1827_v32, %v956_v8  ;;  %v1087_v29 = vadd.f32 %v1086_v56, %v1024_v52  ;;  %v1041_v52 = vmul.f32 %v1653_v53, %v1653_v53  ;;  %v1043_v56 = vmul.f32 %v1693_v63, %v1693_v63 }
 0x163   : > { %v958_v18 = vadd.f32 %v957_v14, %v1597_v39  ;;  %v1088_v46 = vadd.f32 %v1087_v29, %v1025_v40  ;;  %v1039_v14 = vmul.f32 %v1661_v55, %v1661_v55  ;;  %v1044_v29 = vmul.f32 %v1709_v3, %v1709_v3 }
 0x165   : > { %v959_v12 = vadd.f32 %v958_v18, %v1613_v43  ;;  %v1089_v2 = vadd.f32 %v1088_v46, %v1026_v13  ;;  %v1045_v46 = vmul.f32 %v1685_v61, %v1685_v61 }
 0x167   : > { %v960_v16 = vadd.f32 %v1589_v37, %v959_v12  ;;  %v1090_v50 = vadd.f32 %v1089_v2, %v1027_v62  ;;  %v1042_v12 = vmul.f32 %v1669_v57, %v1669_v57  ;;  %v1046_v2 = vmul.f32 %v1701_v1, %v1701_v1 }
 0x169   : > { %v961_v22 = vadd.f32 %v1605_v41, %v960_v16  ;;  %v1091_v19 = vadd.f32 %v1090_v50, %v1028_v31  ;;  %v1047_v50 = vmul.f32 %v1725_v7, %v1725_v7 }
 0x16b   : > { %v962_v26 = vadd.f32 %v961_v22, %v1629_v47  ;;  %v1092_v0 = vadd.f32 %v1091_v19, %v1029_v35  ;;  %v1048_v19 = vmul.f32 %v1741_v11, %v1741_v11 }
 0x16d   : > { %v963_v20 = vadd.f32 %v962_v26, %v1645_v51  ;;  %v1093_v25 = vadd.f32 %v1092_v0, %v1030_v60  ;;  %v1049_v0 = vmul.f32 %v1717_v5, %v1717_v5 }
 0x16f   : > { %v964_v24 = vadd.f32 %v1621_v45, %v963_v20  ;;  %v1094_v27 = vadd.f32 %v1093_v25, %v1031_v21  ;;  %v1050_v25 = vmul.f32 %v1733_v9, %v1733_v9 }
 0x171   : > { %v965_v30 = vadd.f32 %v1637_v49, %v964_v24  ;;  %v1095_v10 = vadd.f32 %v1094_v27, %v1032_v44 }
 0x173   : > { %v966_v34 = vadd.f32 %v965_v30, %v1661_v55  ;;  %v1096_v23 = vadd.f32 %v1095_v10, %v1033_v6 }
 0x175   : > { %v967_v28 = vadd.f32 %v966_v34, %v1677_v59  ;;  %v1097_v54 = vadd.f32 %v1096_v23, %v1034_v48  ;;  %v2098_v59 = vld [vmem:[#allocation3_spill] sm:$0xff] }
 0x176   : > { %v1051_v27 = vmul.f32 %v2098_v59, %v2098_v59 }
 0x177   : > { %v968_v32 = vadd.f32 %v1653_v53, %v967_v28  ;;  %v1098_v8 = vadd.f32 %v1097_v54, %v1035_v15  ;;  %v2099_v53 = vld [vmem:[#allocation5_spill] sm:$0xff] }
 0x178   : > { %v1052_v10 = vmul.f32 %v2099_v53, %v2099_v53 }
 0x179   : > { %v969_v39 = vadd.f32 %v1669_v57, %v968_v32  ;;  %v1099_v58 = vadd.f32 %v1098_v8, %v1036_v4  ;;  %v2100_v57 = vld [vmem:[#allocation2_spill] sm:$0xff] }
 0x17a   : > { %v1053_v23 = vmul.f32 %v2100_v57, %v2100_v57 }
 0x17b   : > { %v970_v43 = vadd.f32 %v969_v39, %v1693_v63  ;;  %v1100_v17 = vadd.f32 %v1099_v58, %v1037_v38  ;;  %v2101_v63 = vld [vmem:[#allocation4_spill] sm:$0xff] }
 0x17c   : > { %v1054_v54 = vmul.f32 %v2101_v63, %v2101_v63  ;;  %v2109_v38 = vld [vmem:[#allocation12_spill] sm:$0xff] }
 0x17d   : > { %v971_v37 = vadd.f32 %v970_v43, %v1709_v3  ;;  %v1101_v18 = vadd.f32 %v1100_v17, %v1038_v42  ;;  %v2102_v3 = vld [vmem:[#allocation7_spill] sm:$0xff] }
 0x17f   : > { %v972_v41 = vadd.f32 %v1685_v61, %v971_v37  ;;  %v1102_v33 = vadd.f32 %v1101_v18, %v1039_v14  ;;  %v2103_v61 = vld [vmem:[#allocation9_spill] sm:$0xff] }
 0x181   : > { %v973_v47 = vadd.f32 %v1701_v1, %v972_v41  ;;  %v1103_v40 = vadd.f32 %v1102_v33, %v1040_v36  ;;  %v2104_v1 = vld [vmem:[#allocation6_spill] sm:$0xff]  ;;  %v1055_v41 = vmul.f32 %v2102_v3, %v2102_v3 }
 0x183   : > { %v974_v51 = vadd.f32 %v973_v47, %v1725_v7  ;;  %v1104_v16 = vadd.f32 %v1103_v40, %v1041_v52  ;;  %v2105_v7 = vld [vmem:[#allocation8_spill] sm:$0xff]  ;;  %v1056_v47 = vmul.f32 %v2103_v61, %v2103_v61 }
 0x185   : > { %v975_v45 = vadd.f32 %v974_v51, %v1741_v11  ;;  %v1105_v22 = vadd.f32 %v1104_v16, %v1042_v12  ;;  %v2106_v11 = vld [vmem:[#allocation11_spill] sm:$0xff]  ;;  %v1057_v51 = vmul.f32 %v2104_v1, %v2104_v1  ;;  %v926_v16 = vld [vmem:[%s2060_s3] sm:$0x1] }
 0x187   : > { %v976_v49 = vadd.f32 %v1717_v5, %v975_v45  ;;  %v1106_v26 = vadd.f32 %v1105_v22, %v1043_v56  ;;  %v2107_v5 = vld [vmem:[#allocation13_spill] sm:$0xff]  ;;  %v1058_v45 = vmul.f32 %v2105_v7, %v2105_v7 }
 0x189   : > { %v977_v55 = vadd.f32 %v1733_v9, %v976_v49  ;;  %v1107_v20 = vadd.f32 %v1106_v26, %v1044_v29  ;;  %v2108_v9 = vld [vmem:[#allocation10_spill] sm:$0xff]  ;;  %v1059_v49 = vmul.f32 %v2106_v11, %v2106_v11 }
 0x18b   : > { %v978_v13 = vadd.f32 %v977_v55, %v2098_v59  ;;  %v1108_v24 = vadd.f32 %v1107_v20, %v1045_v46  ;;  %v1060_v55 = vmul.f32 %v2107_v5, %v2107_v5 }
 0x18d   : > { %v979_v62 = vadd.f32 %v978_v13, %v2099_v53  ;;  %v1109_v30 = vadd.f32 %v1108_v24, %v1046_v2  ;;  %v1061_v13 = vmul.f32 %v2108_v9, %v2108_v9  ;;  %v1062_v53 = vmul.f32 %v2109_v38, %v2109_v38 }
 0x18f   : > { %v980_v31 = vadd.f32 %v2100_v57, %v979_v62  ;;  %v1110_v34 = vadd.f32 %v1109_v30, %v1047_v50 }
 0x191   : > { %v981_v35 = vadd.f32 %v2101_v63, %v980_v31  ;;  %v1111_v28 = vadd.f32 %v1110_v34, %v1048_v19 }
 0x193   : > { %v982_v60 = vadd.f32 %v981_v35, %v2102_v3  ;;  %v1112_v32 = vadd.f32 %v1111_v28, %v1049_v0  ;;  %v998_v35 = vld [vmem:[%s2061_s4] sm:$0x1] }
 0x195   : > { %v983_v21 = vadd.f32 %v982_v60, %v2103_v61  ;;  %v1113_v39 = vadd.f32 %v1112_v32, %v1050_v25 }
 0x197   : > { %v984_v44 = vadd.f32 %v2104_v1, %v983_v21  ;;  %v1114_v43 = vadd.f32 %v1113_v39, %v1051_v27 }
 0x199   : > { %v985_v6 = vadd.f32 %v2105_v7, %v984_v44  ;;  %v1115_v37 = vadd.f32 %v1114_v43, %v1052_v10 }
 0x19b   : > { %v986_v48 = vadd.f32 %v985_v6, %v2106_v11  ;;  %v1116_v42 = vadd.f32 %v1115_v37, %v1053_v23 }
 0x19d   : > { %v987_v15 = vadd.f32 %v986_v48, %v2107_v5  ;;  %v1117_v14 = vadd.f32 %v1116_v42, %v1054_v54 }
 0x19f   : > { %v988_v4 = vadd.f32 %v2108_v9, %v987_v15  ;;  %v1118_v36 = vadd.f32 %v1117_v14, %v1055_v41 }
 0x1a1   : > { %v989_v8 = vadd.f32 %v2109_v38, %v988_v4  ;;  %v1119_v52 = vadd.f32 %v1118_v36, %v1056_v47 }
 0x1a3   : > { %v990_v58 = vrot.slane %v989_v8, 4  ;;  %v1120_v12 = vadd.f32 %v1119_v52, %v1057_v51 }
 0x1a5   : > { %v991_v17 = vadd.f32 %v990_v58, %v989_v8  ;;  %v1121_v56 = vadd.f32 %v1120_v12, %v1058_v45 }
 0x1a7   : > { %v992_v18 = vrot.slane %v991_v17, 2  ;;  %v1122_v29 = vadd.f32 %v1121_v56, %v1059_v49 }
 0x1a9   : > { %v993_v33 = vadd.f32 %v992_v18, %v991_v17  ;;  %v1123_v62 = vadd.f32 %v1122_v29, %v1060_v55 }
 0x1ab   : > { %v994_v40 = vrot.slane %v993_v33, 1  ;;  %v1124_v46 = vadd.f32 %v1123_v62, %v1061_v13 }
 0x1ad   : > { %v995_v59 = vadd.f32 %v994_v40, %v993_v33  ;;  %v1125_v26 = vadd.f32 %v1124_v46, %v1062_v53 }
 0x1af   : > { %v996_v22 = vadd.f32 %v995_v59, %v926_v16  ;;  %v1126_v57 = vrot.slane %v1125_v26, 4 }
 0x1b1   : > { %997 = vst [vmem:[%s2060_s3] sm:$0x1] %v996_v22  ;;  %v1127_v31 = vadd.f32 %v1126_v57, %v1125_v26 }
 0x1b3   : > { %v1128_v2 = vrot.slane %v1127_v31, 2 }
 0x1b5   : > { %v1129_v20 = vadd.f32 %v1128_v2, %v1127_v31 }
 0x1b7   : > { %v1130_v63 = vrot.slane %v1129_v20, 1 }
 0x1b9   : > { %v1131_v50 = vadd.f32 %v1130_v63, %v1129_v20 }
 0x1bb   : > { %v1132_v24 = vadd.f32 %v1131_v50, %v998_v35 }
 0x1bd   : > { %1133 = vst [vmem:[%s2061_s4] sm:$0x1] %v1132_v24 }
 0x1be PF: > { %s15_s15 = sadd.s32 1, %s1465_s15  }
 0x1bf   : > { %p12_p5 = scmp.ge.s32.totalorder %s15_s15, 6  }
 0x1c1   :  { %14 = sbr.rel (!%p12_p5) target bundleno = 1 (0x1), region = 81 }

// kernel: netG_forward.16
= control target key start
LH: loop header
LB: loop body
LE: loop exit
PB: predicated region body
PF: predicated region fallthrough
CT: control target
= control target key end

     0   :  { %s5335_s0 = inlined_call_operand.vmem [shape: f32[4,512,128], index: 0, kind: input, shape index: {}]   ;;  %s5336_s1 = inlined_call_operand.vmem [shape: f32[1,1,128], index: 1, kind: input, shape index: {}]   ;;  %s5337_s2 = inlined_call_operand.vmem [shape: f32[1,1,128], index: 2, kind: input, shape index: {}]   ;;  %s5338_s3 = inlined_call_operand.vmem [shape: bf16[4,512,128], index: 3, kind: output, shape index: {}]  }
   0x1   :  { %v14_v0 = vld [vmem:[%s5335_s0] sm:$0xff]  ;;  %v15_v1 = vld [vmem:[%s5335_s0 + $0x8] sm:$0xff]  ;;  %v16_v6 = vld [vmem:[%s5335_s0 + $0x10] sm:$0xff] }
   0x2   :  { %v3650_v2 = vld [vmem:[%s5336_s1] ss:$0 sm:$0xff]  ;;  %v17_v7 = vld [vmem:[%s5335_s0 + $0x18] sm:$0xff]  ;;  %v19_v11 = vld [vmem:[%s5335_s0 + $0x28] sm:$0xff] }
   0x3   :  { %v277_v3 = vmul.f32 %v3650_v2, %v14_v0  ;;  %v278_v4 = vmul.f32 %v3650_v2, %v15_v1  ;;  %v3657_v5 = vld [vmem:[%s5337_s2] ss:$0 sm:$0xff]  ;;  %v279_v8 = vmul.f32 %v3650_v2, %v16_v6  ;;  %v280_v9 = vmul.f32 %v3650_v2, %v17_v7  ;;  %v20_v12 = vld [vmem:[%s5335_s0 + $0x30] sm:$0xff]  ;;  %v21_v17 = vld [vmem:[%s5335_s0 + $0x38] sm:$0xff] }
   0x4   :  { %v18_v10 = vld [vmem:[%s5335_s0 + $0x20] sm:$0xff]  ;;  %v282_v16 = vmul.f32 %v3650_v2, %v19_v11  ;;  %v283_v20 = vmul.f32 %v3650_v2, %v20_v12  ;;  %v284_v21 = vmul.f32 %v3650_v2, %v21_v17  ;;  %v23_v27 = vld [vmem:[%s5335_s0 + $0x48] sm:$0xff]  ;;  %v24_v32 = vld [vmem:[%s5335_s0 + $0x50] sm:$0xff] }
   0x5   :  { %v540_v13 = vadd.f32 %v3657_v5, %v277_v3  ;;  %v541_v14 = vadd.f32 %v3657_v5, %v278_v4  ;;  %v281_v15 = vmul.f32 %v3650_v2, %v18_v10  ;;  %v542_v18 = vadd.f32 %v3657_v5, %v279_v8  ;;  %v22_v22 = vld [vmem:[%s5335_s0 + $0x40] sm:$0xff]  ;;  %v25_v33 = vld [vmem:[%s5335_s0 + $0x58] sm:$0xff]  ;;  %v27_v39 = vld [vmem:[%s5335_s0 + $0x68] sm:$0xff] }
   0x6   :  { %v543_v19 = vadd.f32 %v3657_v5, %v280_v9  ;;  %v545_v26 = vadd.f32 %v3657_v5, %v282_v16  ;;  %v546_v30 = vadd.f32 %v3657_v5, %v283_v20  ;;  %v547_v31 = vadd.f32 %v3657_v5, %v284_v21  ;;  %v26_v38 = vld [vmem:[%s5335_s0 + $0x60] sm:$0xff]  ;;  %v28_v44 = vld [vmem:[%s5335_s0 + $0x70] sm:$0xff]  ;;  %v29_v49 = vld [vmem:[%s5335_s0 + $0x78] sm:$0xff] }
   0x7   :  { %v796_v23 = vmax.f32 %v540_v13, 0.0  ;;  %v797_v24 = vmax.f32 %v541_v14, 0.0  ;;  %v544_v25 = vadd.f32 %v3657_v5, %v281_v15  ;;  %v798_v28 = vmax.f32 %v542_v18, 0.0  ;;  %v30_v54 = vld [vmem:[%s5335_s0 + $0x80] sm:$0xff]  ;;  %v31_v63 = vld [vmem:[%s5335_s0 + $0x88] sm:$0xff]  ;;  %v32_v6 = vld [vmem:[%s5335_s0 + $0x90] sm:$0xff] }
   0x8   :  { %v799_v29 = vmax.f32 %v543_v19, 0.0  ;;  %v801_v36 = vmax.f32 %v545_v26, 0.0  ;;  %v285_v37 = vmul.f32 %v3650_v2, %v22_v22  ;;  %v802_v41 = vmax.f32 %v546_v30, 0.0  ;;  %v33_v7 = vld [vmem:[%s5335_s0 + $0x98] sm:$0xff]  ;;  %v34_v12 = vld [vmem:[%s5335_s0 + $0xa0] sm:$0xff]  ;;  %v35_v13 = vld [vmem:[%s5335_s0 + $0xa8] sm:$0xff] }
   0x9   :  { %v2853_v34 = vpack.c.bf16 %v797_v24, %v796_v23  ;;  %v800_v35 = vmax.f32 %v544_v25, 0.0  ;;  %v803_v42 = vmax.f32 %v547_v31, 0.0  ;;  %v286_v43 = vmul.f32 %v3650_v2, %v23_v27  ;;  %v36_v18 = vld [vmem:[%s5335_s0 + $0xb0] sm:$0xff]  ;;  %v37_v23 = vld [vmem:[%s5335_s0 + $0xb8] sm:$0xff] }
   0xa   :  { %v2858_v40 = vpack.c.bf16 %v799_v29, %v798_v28  ;;  %v548_v46 = vadd.f32 %v3657_v5, %v285_v37  ;;  %v287_v47 = vmul.f32 %v3650_v2, %v24_v32  ;;  %v288_v48 = vmul.f32 %v3650_v2, %v25_v33  ;;  %v38_v28 = vld [vmem:[%s5335_s0 + $0xc0] sm:$0xff]  ;;  %v39_v37 = vld [vmem:[%s5335_s0 + $0xc8] sm:$0xff] }
   0xb   :  { %2854 = vst [vmem:[%s5338_s3] sm:$0xff] %v2853_v34   ;;  %v2863_v45 = vpack.c.bf16 %v801_v36, %v800_v35  ;;  %v2868_v50 = vpack.c.bf16 %v803_v42, %v802_v41  ;;  %v549_v51 = vadd.f32 %v3657_v5, %v286_v43  ;;  %v289_v52 = vmul.f32 %v3650_v2, %v26_v38  ;;  %v40_v42 = vld [vmem:[%s5335_s0 + $0xd0] sm:$0xff]  ;;  %v41_v43 = vld [vmem:[%s5335_s0 + $0xd8] sm:$0xff] }
   0xc   :  { %3490 = vst [vmem:[%s5338_s3 + $0x8] sm:$0xff] %v2858_v40   ;;  %v290_v53 = vmul.f32 %v3650_v2, %v27_v39  ;;  %v804_v55 = vmax.f32 %v548_v46, 0.0  ;;  %v550_v56 = vadd.f32 %v3657_v5, %v287_v47  ;;  %v551_v57 = vadd.f32 %v3657_v5, %v288_v48  ;;  %v42_v48 = vld [vmem:[%s5335_s0 + $0xe0] sm:$0xff] }
   0xd   :  { %3491 = vst [vmem:[%s5338_s3 + $0x10] sm:$0xff] %v2863_v45   ;;  %v291_v58 = vmul.f32 %v3650_v2, %v28_v44  ;;  %3492 = vst [vmem:[%s5338_s3 + $0x18] sm:$0xff] %v2868_v50   ;;  %v805_v59 = vmax.f32 %v549_v51, 0.0  ;;  %v552_v60 = vadd.f32 %v3657_v5, %v289_v52  ;;  %v292_v62 = vmul.f32 %v3650_v2, %v29_v49  ;;  %v43_v49 = vld [vmem:[%s5335_s0 + $0xe8] sm:$0xff] }
   0xe   :  { %v553_v61 = vadd.f32 %v3657_v5, %v290_v53  ;;  %v806_v0 = vmax.f32 %v550_v56, 0.0  ;;  %v807_v1 = vmax.f32 %v551_v57, 0.0  ;;  %v293_v4 = vmul.f32 %v3650_v2, %v30_v54  ;;  %v44_v54 = vld [vmem:[%s5335_s0 + $0xf0] sm:$0xff] }
   0xf   :  { %v554_v3 = vadd.f32 %v3657_v5, %v291_v58  ;;  %v2873_v8 = vpack.c.bf16 %v805_v59, %v804_v55  ;;  %v808_v9 = vmax.f32 %v552_v60, 0.0  ;;  %v555_v11 = vadd.f32 %v3657_v5, %v292_v62  ;;  %v45_v59 = vld [vmem:[%s5335_s0 + $0xf8] sm:$0xff] }
  0x10   :  { %v809_v10 = vmax.f32 %v553_v61, 0.0  ;;  %v2878_v14 = vpack.c.bf16 %v807_v1, %v806_v0  ;;  %v294_v16 = vmul.f32 %v3650_v2, %v31_v63  ;;  %v556_v17 = vadd.f32 %v3657_v5, %v293_v4  ;;  %v46_v0 = vld [vmem:[%s5335_s0 + $0x100] sm:$0xff] }
  0x11   :  { %v810_v15 = vmax.f32 %v554_v3, 0.0  ;;  %3493 = vst [vmem:[%s5338_s3 + $0x20] sm:$0xff] %v2873_v8   ;;  %v811_v20 = vmax.f32 %v555_v11, 0.0  ;;  %v295_v21 = vmul.f32 %v3650_v2, %v32_v6  ;;  %v296_v22 = vmul.f32 %v3650_v2, %v33_v7  ;;  %v47_v11 = vld [vmem:[%s5335_s0 + $0x108] sm:$0xff] }
  0x12   :  { %v2883_v19 = vpack.c.bf16 %v809_v10, %v808_v9  ;;  %3494 = vst [vmem:[%s5338_s3 + $0x28] sm:$0xff] %v2878_v14   ;;  %v557_v24 = vadd.f32 %v3657_v5, %v294_v16  ;;  %v812_v25 = vmax.f32 %v556_v17, 0.0  ;;  %v297_v26 = vmul.f32 %v3650_v2, %v34_v12  ;;  %v48_v16 = vld [vmem:[%s5335_s0 + $0x110] sm:$0xff]  ;;  %v49_v17 = vld [vmem:[%s5335_s0 + $0x118] sm:$0xff] }
  0x13   :  { %v298_v27 = vmul.f32 %v3650_v2, %v35_v13  ;;  %v2888_v29 = vpack.c.bf16 %v811_v20, %v810_v15  ;;  %v558_v30 = vadd.f32 %v3657_v5, %v295_v21  ;;  %v559_v31 = vadd.f32 %v3657_v5, %v296_v22  ;;  %v50_v22 = vld [vmem:[%s5335_s0 + $0x120] sm:$0xff] }
  0x14   :  { %3495 = vst [vmem:[%s5338_s3 + $0x30] sm:$0xff] %v2883_v19   ;;  %v299_v32 = vmul.f32 %v3650_v2, %v36_v18  ;;  %v813_v33 = vmax.f32 %v557_v24, 0.0  ;;  %v560_v34 = vadd.f32 %v3657_v5, %v297_v26  ;;  %v300_v36 = vmul.f32 %v3650_v2, %v37_v23  ;;  %v51_v23 = vld [vmem:[%s5335_s0 + $0x128] sm:$0xff] }
  0x15   :  { %v561_v35 = vadd.f32 %v3657_v5, %v298_v27  ;;  %3496 = vst [vmem:[%s5338_s3 + $0x38] sm:$0xff] %v2888_v29   ;;  %v814_v38 = vmax.f32 %v558_v30, 0.0  ;;  %v815_v39 = vmax.f32 %v559_v31, 0.0  ;;  %v301_v41 = vmul.f32 %v3650_v2, %v38_v28  ;;  %v52_v28 = vld [vmem:[%s5335_s0 + $0x130] sm:$0xff] }
  0x16   :  { %v562_v40 = vadd.f32 %v3657_v5, %v299_v32  ;;  %v2893_v44 = vpack.c.bf16 %v813_v33, %v812_v25  ;;  %v816_v45 = vmax.f32 %v560_v34, 0.0  ;;  %v563_v47 = vadd.f32 %v3657_v5, %v300_v36  ;;  %v53_v33 = vld [vmem:[%s5335_s0 + $0x138] sm:$0xff] }
  0x17   :  { %v817_v46 = vmax.f32 %v561_v35, 0.0  ;;  %v2898_v50 = vpack.c.bf16 %v815_v39, %v814_v38  ;;  %v302_v52 = vmul.f32 %v3650_v2, %v39_v37  ;;  %v564_v53 = vadd.f32 %v3657_v5, %v301_v41  ;;  %v54_v38 = vld [vmem:[%s5335_s0 + $0x140] sm:$0xff] }
  0x18   :  { %v818_v51 = vmax.f32 %v562_v40, 0.0  ;;  %3497 = vst [vmem:[%s5338_s3 + $0x40] sm:$0xff] %v2893_v44   ;;  %v819_v56 = vmax.f32 %v563_v47, 0.0  ;;  %v303_v57 = vmul.f32 %v3650_v2, %v40_v42  ;;  %v304_v58 = vmul.f32 %v3650_v2, %v41_v43  ;;  %v55_v47 = vld [vmem:[%s5335_s0 + $0x148] sm:$0xff] }
  0x19   :  { %v2903_v55 = vpack.c.bf16 %v817_v46, %v816_v45  ;;  %3498 = vst [vmem:[%s5338_s3 + $0x48] sm:$0xff] %v2898_v50   ;;  %v565_v60 = vadd.f32 %v3657_v5, %v302_v52  ;;  %v820_v61 = vmax.f32 %v564_v53, 0.0  ;;  %v305_v62 = vmul.f32 %v3650_v2, %v42_v48  ;;  %v56_v52 = vld [vmem:[%s5335_s0 + $0x150] sm:$0xff]  ;;  %v57_v53 = vld [vmem:[%s5335_s0 + $0x158] sm:$0xff] }
  0x1a   :  { %v306_v63 = vmul.f32 %v3650_v2, %v43_v49  ;;  %v2908_v1 = vpack.c.bf16 %v819_v56, %v818_v51  ;;  %v566_v3 = vadd.f32 %v3657_v5, %v303_v57  ;;  %v567_v4 = vadd.f32 %v3657_v5, %v304_v58  ;;  %v58_v58 = vld [vmem:[%s5335_s0 + $0x160] sm:$0xff] }
  0x1b   :  { %3499 = vst [vmem:[%s5338_s3 + $0x50] sm:$0xff] %v2903_v55   ;;  %v307_v6 = vmul.f32 %v3650_v2, %v44_v54  ;;  %v821_v7 = vmax.f32 %v565_v60, 0.0  ;;  %v568_v8 = vadd.f32 %v3657_v5, %v305_v62  ;;  %v308_v10 = vmul.f32 %v3650_v2, %v45_v59  ;;  %v59_v59 = vld [vmem:[%s5335_s0 + $0x168] sm:$0xff] }
  0x1c   :  { %v569_v9 = vadd.f32 %v3657_v5, %v306_v63  ;;  %3500 = vst [vmem:[%s5338_s3 + $0x58] sm:$0xff] %v2908_v1   ;;  %v822_v12 = vmax.f32 %v566_v3, 0.0  ;;  %v823_v13 = vmax.f32 %v567_v4, 0.0  ;;  %v309_v15 = vmul.f32 %v3650_v2, %v46_v0  ;;  %v60_v0 = vld [vmem:[%s5335_s0 + $0x170] sm:$0xff] }
  0x1d   :  { %v570_v14 = vadd.f32 %v3657_v5, %v307_v6  ;;  %v2913_v18 = vpack.c.bf16 %v821_v7, %v820_v61  ;;  %v824_v19 = vmax.f32 %v568_v8, 0.0  ;;  %v571_v21 = vadd.f32 %v3657_v5, %v308_v10  ;;  %v61_v7 = vld [vmem:[%s5335_s0 + $0x178] sm:$0xff] }
  0x1e   :  { %v825_v20 = vmax.f32 %v569_v9, 0.0  ;;  %v2918_v24 = vpack.c.bf16 %v823_v13, %v822_v12  ;;  %v310_v26 = vmul.f32 %v3650_v2, %v47_v11  ;;  %v572_v27 = vadd.f32 %v3657_v5, %v309_v15  ;;  %v62_v12 = vld [vmem:[%s5335_s0 + $0x180] sm:$0xff] }
  0x1f   :  { %v826_v25 = vmax.f32 %v570_v14, 0.0  ;;  %3501 = vst [vmem:[%s5338_s3 + $0x60] sm:$0xff] %v2913_v18   ;;  %v827_v30 = vmax.f32 %v571_v21, 0.0  ;;  %v311_v31 = vmul.f32 %v3650_v2, %v48_v16  ;;  %v312_v32 = vmul.f32 %v3650_v2, %v49_v17  ;;  %v63_v21 = vld [vmem:[%s5335_s0 + $0x188] sm:$0xff] }
  0x20   :  { %v2923_v29 = vpack.c.bf16 %v825_v20, %v824_v19  ;;  %3502 = vst [vmem:[%s5338_s3 + $0x68] sm:$0xff] %v2918_v24   ;;  %v573_v34 = vadd.f32 %v3657_v5, %v310_v26  ;;  %v828_v35 = vmax.f32 %v572_v27, 0.0  ;;  %v313_v36 = vmul.f32 %v3650_v2, %v50_v22  ;;  %v64_v26 = vld [vmem:[%s5335_s0 + $0x190] sm:$0xff]  ;;  %v65_v27 = vld [vmem:[%s5335_s0 + $0x198] sm:$0xff] }
  0x21   :  { %v314_v37 = vmul.f32 %v3650_v2, %v51_v23  ;;  %v2928_v39 = vpack.c.bf16 %v827_v30, %v826_v25  ;;  %v574_v40 = vadd.f32 %v3657_v5, %v311_v31  ;;  %v575_v41 = vadd.f32 %v3657_v5, %v312_v32  ;;  %v66_v32 = vld [vmem:[%s5335_s0 + $0x1a0] sm:$0xff] }
  0x22   :  { %3503 = vst [vmem:[%s5338_s3 + $0x70] sm:$0xff] %v2923_v29   ;;  %v315_v42 = vmul.f32 %v3650_v2, %v52_v28  ;;  %v829_v43 = vmax.f32 %v573_v34, 0.0  ;;  %v576_v44 = vadd.f32 %v3657_v5, %v313_v36  ;;  %v316_v46 = vmul.f32 %v3650_v2, %v53_v33  ;;  %v67_v33 = vld [vmem:[%s5335_s0 + $0x1a8] sm:$0xff] }
  0x23   :  { %v577_v45 = vadd.f32 %v3657_v5, %v314_v37  ;;  %3504 = vst [vmem:[%s5338_s3 + $0x78] sm:$0xff] %v2928_v39   ;;  %v830_v48 = vmax.f32 %v574_v40, 0.0  ;;  %v831_v49 = vmax.f32 %v575_v41, 0.0  ;;  %v317_v51 = vmul.f32 %v3650_v2, %v54_v38  ;;  %v68_v38 = vld [vmem:[%s5335_s0 + $0x1b0] sm:$0xff] }
  0x24   :  { %v578_v50 = vadd.f32 %v3657_v5, %v315_v42  ;;  %v2933_v54 = vpack.c.bf16 %v829_v43, %v828_v35  ;;  %v832_v55 = vmax.f32 %v576_v44, 0.0  ;;  %v579_v57 = vadd.f32 %v3657_v5, %v316_v46  ;;  %v69_v43 = vld [vmem:[%s5335_s0 + $0x1b8] sm:$0xff] }
  0x25   :  { %v833_v56 = vmax.f32 %v577_v45, 0.0  ;;  %v2938_v60 = vpack.c.bf16 %v831_v49, %v830_v48  ;;  %v318_v62 = vmul.f32 %v3650_v2, %v55_v47  ;;  %v580_v63 = vadd.f32 %v3657_v5, %v317_v51  ;;  %v70_v48 = vld [vmem:[%s5335_s0 + $0x1c0] sm:$0xff] }
  0x26   :  { %v834_v61 = vmax.f32 %v578_v50, 0.0  ;;  %3505 = vst [vmem:[%s5338_s3 + $0x80] sm:$0xff] %v2933_v54   ;;  %v835_v3 = vmax.f32 %v579_v57, 0.0  ;;  %v319_v4 = vmul.f32 %v3650_v2, %v56_v52  ;;  %v320_v6 = vmul.f32 %v3650_v2, %v57_v53  ;;  %v71_v57 = vld [vmem:[%s5335_s0 + $0x1c8] sm:$0xff] }
  0x27   :  { %v2943_v1 = vpack.c.bf16 %v833_v56, %v832_v55  ;;  %3506 = vst [vmem:[%s5338_s3 + $0x88] sm:$0xff] %v2938_v60   ;;  %v581_v8 = vadd.f32 %v3657_v5, %v318_v62  ;;  %v836_v9 = vmax.f32 %v580_v63, 0.0  ;;  %v321_v10 = vmul.f32 %v3650_v2, %v58_v58  ;;  %v72_v62 = vld [vmem:[%s5335_s0 + $0x1d0] sm:$0xff]  ;;  %v73_v63 = vld [vmem:[%s5335_s0 + $0x1d8] sm:$0xff] }
  0x28   :  { %v322_v11 = vmul.f32 %v3650_v2, %v59_v59  ;;  %v2948_v13 = vpack.c.bf16 %v835_v3, %v834_v61  ;;  %v582_v14 = vadd.f32 %v3657_v5, %v319_v4  ;;  %v583_v15 = vadd.f32 %v3657_v5, %v320_v6  ;;  %v74_v6 = vld [vmem:[%s5335_s0 + $0x1e0] sm:$0xff] }
  0x29   :  { %3507 = vst [vmem:[%s5338_s3 + $0x90] sm:$0xff] %v2943_v1   ;;  %v323_v16 = vmul.f32 %v3650_v2, %v60_v0  ;;  %v837_v17 = vmax.f32 %v581_v8, 0.0  ;;  %v584_v18 = vadd.f32 %v3657_v5, %v321_v10  ;;  %v324_v20 = vmul.f32 %v3650_v2, %v61_v7  ;;  %v75_v7 = vld [vmem:[%s5335_s0 + $0x1e8] sm:$0xff] }
  0x2a   :  { %v585_v19 = vadd.f32 %v3657_v5, %v322_v11  ;;  %3508 = vst [vmem:[%s5338_s3 + $0x98] sm:$0xff] %v2948_v13   ;;  %v838_v22 = vmax.f32 %v582_v14, 0.0  ;;  %v839_v23 = vmax.f32 %v583_v15, 0.0  ;;  %v325_v25 = vmul.f32 %v3650_v2, %v62_v12  ;;  %v76_v12 = vld [vmem:[%s5335_s0 + $0x1f0] sm:$0xff] }
  0x2b   :  { %v586_v24 = vadd.f32 %v3657_v5, %v323_v16  ;;  %v2953_v28 = vpack.c.bf16 %v837_v17, %v836_v9  ;;  %v840_v29 = vmax.f32 %v584_v18, 0.0  ;;  %v587_v31 = vadd.f32 %v3657_v5, %v324_v20  ;;  %v77_v17 = vld [vmem:[%s5335_s0 + $0x1f8] sm:$0xff] }
  0x2c   :  { %v841_v30 = vmax.f32 %v585_v19, 0.0  ;;  %v2958_v34 = vpack.c.bf16 %v839_v23, %v838_v22  ;;  %v326_v36 = vmul.f32 %v3650_v2, %v63_v21  ;;  %v588_v37 = vadd.f32 %v3657_v5, %v325_v25  ;;  %v78_v22 = vld [vmem:[%s5335_s0 + $0x200] sm:$0xff] }
  0x2d   :  { %v842_v35 = vmax.f32 %v586_v24, 0.0  ;;  %3509 = vst [vmem:[%s5338_s3 + $0xa0] sm:$0xff] %v2953_v28   ;;  %v843_v40 = vmax.f32 %v587_v31, 0.0  ;;  %v327_v41 = vmul.f32 %v3650_v2, %v64_v26  ;;  %v328_v42 = vmul.f32 %v3650_v2, %v65_v27  ;;  %v79_v31 = vld [vmem:[%s5335_s0 + $0x208] sm:$0xff] }
  0x2e   :  { %v2963_v39 = vpack.c.bf16 %v841_v30, %v840_v29  ;;  %3510 = vst [vmem:[%s5338_s3 + $0xa8] sm:$0xff] %v2958_v34   ;;  %v589_v44 = vadd.f32 %v3657_v5, %v326_v36  ;;  %v844_v45 = vmax.f32 %v588_v37, 0.0  ;;  %v329_v46 = vmul.f32 %v3650_v2, %v66_v32  ;;  %v80_v36 = vld [vmem:[%s5335_s0 + $0x210] sm:$0xff]  ;;  %v81_v37 = vld [vmem:[%s5335_s0 + $0x218] sm:$0xff] }
  0x2f   :  { %v330_v47 = vmul.f32 %v3650_v2, %v67_v33  ;;  %v2968_v49 = vpack.c.bf16 %v843_v40, %v842_v35  ;;  %v590_v50 = vadd.f32 %v3657_v5, %v327_v41  ;;  %v591_v51 = vadd.f32 %v3657_v5, %v328_v42  ;;  %v82_v42 = vld [vmem:[%s5335_s0 + $0x220] sm:$0xff] }
  0x30   :  { %3511 = vst [vmem:[%s5338_s3 + $0xb0] sm:$0xff] %v2963_v39   ;;  %v331_v52 = vmul.f32 %v3650_v2, %v68_v38  ;;  %v845_v53 = vmax.f32 %v589_v44, 0.0  ;;  %v592_v54 = vadd.f32 %v3657_v5, %v329_v46  ;;  %v332_v56 = vmul.f32 %v3650_v2, %v69_v43  ;;  %v83_v43 = vld [vmem:[%s5335_s0 + $0x228] sm:$0xff] }
  0x31   :  { %v593_v55 = vadd.f32 %v3657_v5, %v330_v47  ;;  %3512 = vst [vmem:[%s5338_s3 + $0xb8] sm:$0xff] %v2968_v49   ;;  %v846_v58 = vmax.f32 %v590_v50, 0.0  ;;  %v847_v59 = vmax.f32 %v591_v51, 0.0  ;;  %v333_v61 = vmul.f32 %v3650_v2, %v70_v48  ;;  %v84_v48 = vld [vmem:[%s5335_s0 + $0x230] sm:$0xff] }
  0x32   :  { %v594_v60 = vadd.f32 %v3657_v5, %v331_v52  ;;  %v2973_v0 = vpack.c.bf16 %v845_v53, %v844_v45  ;;  %v848_v1 = vmax.f32 %v592_v54, 0.0  ;;  %v595_v4 = vadd.f32 %v3657_v5, %v332_v56  ;;  %v85_v53 = vld [vmem:[%s5335_s0 + $0x238] sm:$0xff] }
  0x33   :  { %v849_v3 = vmax.f32 %v593_v55, 0.0  ;;  %v2978_v8 = vpack.c.bf16 %v847_v59, %v846_v58  ;;  %v334_v10 = vmul.f32 %v3650_v2, %v71_v57  ;;  %v596_v11 = vadd.f32 %v3657_v5, %v333_v61  ;;  %v86_v58 = vld [vmem:[%s5335_s0 + $0x240] sm:$0xff] }
  0x34   :  { %v850_v9 = vmax.f32 %v594_v60, 0.0  ;;  %3513 = vst [vmem:[%s5338_s3 + $0xc0] sm:$0xff] %v2973_v0   ;;  %v851_v14 = vmax.f32 %v595_v4, 0.0  ;;  %v335_v15 = vmul.f32 %v3650_v2, %v72_v62  ;;  %v336_v16 = vmul.f32 %v3650_v2, %v73_v63  ;;  %v87_v4 = vld [vmem:[%s5335_s0 + $0x248] sm:$0xff] }
  0x35   :  { %v2983_v13 = vpack.c.bf16 %v849_v3, %v848_v1  ;;  %3514 = vst [vmem:[%s5338_s3 + $0xc8] sm:$0xff] %v2978_v8   ;;  %v597_v18 = vadd.f32 %v3657_v5, %v334_v10  ;;  %v852_v19 = vmax.f32 %v596_v11, 0.0  ;;  %v337_v20 = vmul.f32 %v3650_v2, %v74_v6  ;;  %v88_v10 = vld [vmem:[%s5335_s0 + $0x250] sm:$0xff]  ;;  %v89_v11 = vld [vmem:[%s5335_s0 + $0x258] sm:$0xff] }
  0x36   :  { %v338_v21 = vmul.f32 %v3650_v2, %v75_v7  ;;  %v2988_v23 = vpack.c.bf16 %v851_v14, %v850_v9  ;;  %v598_v24 = vadd.f32 %v3657_v5, %v335_v15  ;;  %v599_v25 = vadd.f32 %v3657_v5, %v336_v16  ;;  %v90_v16 = vld [vmem:[%s5335_s0 + $0x260] sm:$0xff] }
  0x37   :  { %3515 = vst [vmem:[%s5338_s3 + $0xd0] sm:$0xff] %v2983_v13   ;;  %v339_v26 = vmul.f32 %v3650_v2, %v76_v12  ;;  %v853_v27 = vmax.f32 %v597_v18, 0.0  ;;  %v600_v28 = vadd.f32 %v3657_v5, %v337_v20  ;;  %v340_v30 = vmul.f32 %v3650_v2, %v77_v17  ;;  %v91_v17 = vld [vmem:[%s5335_s0 + $0x268] sm:$0xff] }
  0x38   :  { %v601_v29 = vadd.f32 %v3657_v5, %v338_v21  ;;  %3516 = vst [vmem:[%s5338_s3 + $0xd8] sm:$0xff] %v2988_v23   ;;  %v854_v32 = vmax.f32 %v598_v24, 0.0  ;;  %v855_v33 = vmax.f32 %v599_v25, 0.0  ;;  %v341_v35 = vmul.f32 %v3650_v2, %v78_v22  ;;  %v92_v22 = vld [vmem:[%s5335_s0 + $0x270] sm:$0xff] }
  0x39   :  { %v602_v34 = vadd.f32 %v3657_v5, %v339_v26  ;;  %v2993_v38 = vpack.c.bf16 %v853_v27, %v852_v19  ;;  %v856_v39 = vmax.f32 %v600_v28, 0.0  ;;  %v603_v41 = vadd.f32 %v3657_v5, %v340_v30  ;;  %v93_v27 = vld [vmem:[%s5335_s0 + $0x278] sm:$0xff] }
  0x3a   :  { %v857_v40 = vmax.f32 %v601_v29, 0.0  ;;  %v2998_v44 = vpack.c.bf16 %v855_v33, %v854_v32  ;;  %v342_v46 = vmul.f32 %v3650_v2, %v79_v31  ;;  %v604_v47 = vadd.f32 %v3657_v5, %v341_v35  ;;  %v94_v32 = vld [vmem:[%s5335_s0 + $0x280] sm:$0xff] }
  0x3b   :  { %v858_v45 = vmax.f32 %v602_v34, 0.0  ;;  %3517 = vst [vmem:[%s5338_s3 + $0xe0] sm:$0xff] %v2993_v38   ;;  %v859_v50 = vmax.f32 %v603_v41, 0.0  ;;  %v343_v51 = vmul.f32 %v3650_v2, %v80_v36  ;;  %v344_v52 = vmul.f32 %v3650_v2, %v81_v37  ;;  %v95_v41 = vld [vmem:[%s5335_s0 + $0x288] sm:$0xff] }
  0x3c   :  { %v3003_v49 = vpack.c.bf16 %v857_v40, %v856_v39  ;;  %3518 = vst [vmem:[%s5338_s3 + $0xe8] sm:$0xff] %v2998_v44   ;;  %v605_v54 = vadd.f32 %v3657_v5, %v342_v46  ;;  %v860_v55 = vmax.f32 %v604_v47, 0.0  ;;  %v345_v56 = vmul.f32 %v3650_v2, %v82_v42  ;;  %v96_v46 = vld [vmem:[%s5335_s0 + $0x290] sm:$0xff]  ;;  %v97_v47 = vld [vmem:[%s5335_s0 + $0x298] sm:$0xff] }
  0x3d   :  { %v346_v57 = vmul.f32 %v3650_v2, %v83_v43  ;;  %v3008_v59 = vpack.c.bf16 %v859_v50, %v858_v45  ;;  %v606_v60 = vadd.f32 %v3657_v5, %v343_v51  ;;  %v607_v61 = vadd.f32 %v3657_v5, %v344_v52  ;;  %v98_v52 = vld [vmem:[%s5335_s0 + $0x2a0] sm:$0xff] }
  0x3e   :  { %3519 = vst [vmem:[%s5338_s3 + $0xf0] sm:$0xff] %v3003_v49   ;;  %v347_v62 = vmul.f32 %v3650_v2, %v84_v48  ;;  %v861_v63 = vmax.f32 %v605_v54, 0.0  ;;  %v608_v0 = vadd.f32 %v3657_v5, %v345_v56  ;;  %v348_v3 = vmul.f32 %v3650_v2, %v85_v53  ;;  %v99_v53 = vld [vmem:[%s5335_s0 + $0x2a8] sm:$0xff] }
  0x3f   :  { %v609_v1 = vadd.f32 %v3657_v5, %v346_v57  ;;  %3520 = vst [vmem:[%s5338_s3 + $0xf8] sm:$0xff] %v3008_v59   ;;  %v862_v6 = vmax.f32 %v606_v60, 0.0  ;;  %v863_v7 = vmax.f32 %v607_v61, 0.0  ;;  %v349_v9 = vmul.f32 %v3650_v2, %v86_v58  ;;  %v100_v58 = vld [vmem:[%s5335_s0 + $0x2b0] sm:$0xff] }
  0x40   :  { %v610_v8 = vadd.f32 %v3657_v5, %v347_v62  ;;  %v3013_v12 = vpack.c.bf16 %v861_v63, %v860_v55  ;;  %v864_v13 = vmax.f32 %v608_v0, 0.0  ;;  %v611_v15 = vadd.f32 %v3657_v5, %v348_v3  ;;  %v101_v63 = vld [vmem:[%s5335_s0 + $0x2b8] sm:$0xff] }
  0x41   :  { %v865_v14 = vmax.f32 %v609_v1, 0.0  ;;  %v3018_v18 = vpack.c.bf16 %v863_v7, %v862_v6  ;;  %v350_v20 = vmul.f32 %v3650_v2, %v87_v4  ;;  %v612_v21 = vadd.f32 %v3657_v5, %v349_v9  ;;  %v102_v6 = vld [vmem:[%s5335_s0 + $0x2c0] sm:$0xff] }
  0x42   :  { %v866_v19 = vmax.f32 %v610_v8, 0.0  ;;  %3521 = vst [vmem:[%s5338_s3 + $0x100] sm:$0xff] %v3013_v12   ;;  %v867_v24 = vmax.f32 %v611_v15, 0.0  ;;  %v351_v25 = vmul.f32 %v3650_v2, %v88_v10  ;;  %v352_v26 = vmul.f32 %v3650_v2, %v89_v11  ;;  %v103_v15 = vld [vmem:[%s5335_s0 + $0x2c8] sm:$0xff] }
  0x43   :  { %v3023_v23 = vpack.c.bf16 %v865_v14, %v864_v13  ;;  %3522 = vst [vmem:[%s5338_s3 + $0x108] sm:$0xff] %v3018_v18   ;;  %v613_v28 = vadd.f32 %v3657_v5, %v350_v20  ;;  %v868_v29 = vmax.f32 %v612_v21, 0.0  ;;  %v353_v30 = vmul.f32 %v3650_v2, %v90_v16  ;;  %v104_v20 = vld [vmem:[%s5335_s0 + $0x2d0] sm:$0xff]  ;;  %v105_v21 = vld [vmem:[%s5335_s0 + $0x2d8] sm:$0xff] }
  0x44   :  { %v354_v31 = vmul.f32 %v3650_v2, %v91_v17  ;;  %v3028_v33 = vpack.c.bf16 %v867_v24, %v866_v19  ;;  %v614_v34 = vadd.f32 %v3657_v5, %v351_v25  ;;  %v615_v35 = vadd.f32 %v3657_v5, %v352_v26  ;;  %v106_v26 = vld [vmem:[%s5335_s0 + $0x2e0] sm:$0xff] }
  0x45   :  { %3523 = vst [vmem:[%s5338_s3 + $0x110] sm:$0xff] %v3023_v23   ;;  %v355_v36 = vmul.f32 %v3650_v2, %v92_v22  ;;  %v869_v37 = vmax.f32 %v613_v28, 0.0  ;;  %v616_v38 = vadd.f32 %v3657_v5, %v353_v30  ;;  %v356_v40 = vmul.f32 %v3650_v2, %v93_v27  ;;  %v107_v27 = vld [vmem:[%s5335_s0 + $0x2e8] sm:$0xff] }
  0x46   :  { %v617_v39 = vadd.f32 %v3657_v5, %v354_v31  ;;  %3524 = vst [vmem:[%s5338_s3 + $0x118] sm:$0xff] %v3028_v33   ;;  %v870_v42 = vmax.f32 %v614_v34, 0.0  ;;  %v871_v43 = vmax.f32 %v615_v35, 0.0  ;;  %v357_v45 = vmul.f32 %v3650_v2, %v94_v32  ;;  %v108_v32 = vld [vmem:[%s5335_s0 + $0x2f0] sm:$0xff] }
  0x47   :  { %v618_v44 = vadd.f32 %v3657_v5, %v355_v36  ;;  %v3033_v48 = vpack.c.bf16 %v869_v37, %v868_v29  ;;  %v872_v49 = vmax.f32 %v616_v38, 0.0  ;;  %v619_v51 = vadd.f32 %v3657_v5, %v356_v40  ;;  %v109_v37 = vld [vmem:[%s5335_s0 + $0x2f8] sm:$0xff] }
  0x48   :  { %v873_v50 = vmax.f32 %v617_v39, 0.0  ;;  %v3038_v54 = vpack.c.bf16 %v871_v43, %v870_v42  ;;  %v358_v56 = vmul.f32 %v3650_v2, %v95_v41  ;;  %v620_v57 = vadd.f32 %v3657_v5, %v357_v45  ;;  %v110_v42 = vld [vmem:[%s5335_s0 + $0x300] sm:$0xff] }
  0x49   :  { %v874_v55 = vmax.f32 %v618_v44, 0.0  ;;  %3525 = vst [vmem:[%s5338_s3 + $0x120] sm:$0xff] %v3033_v48   ;;  %v875_v60 = vmax.f32 %v619_v51, 0.0  ;;  %v359_v61 = vmul.f32 %v3650_v2, %v96_v46  ;;  %v360_v62 = vmul.f32 %v3650_v2, %v97_v47  ;;  %v111_v51 = vld [vmem:[%s5335_s0 + $0x308] sm:$0xff] }
  0x4a   :  { %v3043_v59 = vpack.c.bf16 %v873_v50, %v872_v49  ;;  %3526 = vst [vmem:[%s5338_s3 + $0x128] sm:$0xff] %v3038_v54   ;;  %v621_v0 = vadd.f32 %v3657_v5, %v358_v56  ;;  %v876_v1 = vmax.f32 %v620_v57, 0.0  ;;  %v361_v3 = vmul.f32 %v3650_v2, %v98_v52  ;;  %v112_v56 = vld [vmem:[%s5335_s0 + $0x310] sm:$0xff]  ;;  %v113_v57 = vld [vmem:[%s5335_s0 + $0x318] sm:$0xff] }
  0x4b   :  { %v362_v4 = vmul.f32 %v3650_v2, %v99_v53  ;;  %v3048_v7 = vpack.c.bf16 %v875_v60, %v874_v55  ;;  %v622_v8 = vadd.f32 %v3657_v5, %v359_v61  ;;  %v623_v9 = vadd.f32 %v3657_v5, %v360_v62  ;;  %v114_v62 = vld [vmem:[%s5335_s0 + $0x320] sm:$0xff] }
  0x4c   :  { %3527 = vst [vmem:[%s5338_s3 + $0x130] sm:$0xff] %v3043_v59   ;;  %v363_v10 = vmul.f32 %v3650_v2, %v100_v58  ;;  %v877_v11 = vmax.f32 %v621_v0, 0.0  ;;  %v624_v12 = vadd.f32 %v3657_v5, %v361_v3  ;;  %v364_v14 = vmul.f32 %v3650_v2, %v101_v63  ;;  %v115_v63 = vld [vmem:[%s5335_s0 + $0x328] sm:$0xff] }
  0x4d   :  { %v625_v13 = vadd.f32 %v3657_v5, %v362_v4  ;;  %3528 = vst [vmem:[%s5338_s3 + $0x138] sm:$0xff] %v3048_v7   ;;  %v878_v16 = vmax.f32 %v622_v8, 0.0  ;;  %v879_v17 = vmax.f32 %v623_v9, 0.0  ;;  %v365_v19 = vmul.f32 %v3650_v2, %v102_v6  ;;  %v116_v6 = vld [vmem:[%s5335_s0 + $0x330] sm:$0xff] }
  0x4e   :  { %v626_v18 = vadd.f32 %v3657_v5, %v363_v10  ;;  %v3053_v22 = vpack.c.bf16 %v877_v11, %v876_v1  ;;  %v880_v23 = vmax.f32 %v624_v12, 0.0  ;;  %v627_v25 = vadd.f32 %v3657_v5, %v364_v14  ;;  %v117_v11 = vld [vmem:[%s5335_s0 + $0x338] sm:$0xff] }
  0x4f   :  { %v881_v24 = vmax.f32 %v625_v13, 0.0  ;;  %v3058_v28 = vpack.c.bf16 %v879_v17, %v878_v16  ;;  %v366_v30 = vmul.f32 %v3650_v2, %v103_v15  ;;  %v628_v31 = vadd.f32 %v3657_v5, %v365_v19  ;;  %v118_v16 = vld [vmem:[%s5335_s0 + $0x340] sm:$0xff] }
  0x50   :  { %v882_v29 = vmax.f32 %v626_v18, 0.0  ;;  %3529 = vst [vmem:[%s5338_s3 + $0x140] sm:$0xff] %v3053_v22   ;;  %v883_v34 = vmax.f32 %v627_v25, 0.0  ;;  %v367_v35 = vmul.f32 %v3650_v2, %v104_v20  ;;  %v368_v36 = vmul.f32 %v3650_v2, %v105_v21  ;;  %v119_v25 = vld [vmem:[%s5335_s0 + $0x348] sm:$0xff] }
  0x51   :  { %v3063_v33 = vpack.c.bf16 %v881_v24, %v880_v23  ;;  %3530 = vst [vmem:[%s5338_s3 + $0x148] sm:$0xff] %v3058_v28   ;;  %v629_v38 = vadd.f32 %v3657_v5, %v366_v30  ;;  %v884_v39 = vmax.f32 %v628_v31, 0.0  ;;  %v369_v40 = vmul.f32 %v3650_v2, %v106_v26  ;;  %v120_v30 = vld [vmem:[%s5335_s0 + $0x350] sm:$0xff]  ;;  %v121_v31 = vld [vmem:[%s5335_s0 + $0x358] sm:$0xff] }
  0x52   :  { %v370_v41 = vmul.f32 %v3650_v2, %v107_v27  ;;  %v3068_v43 = vpack.c.bf16 %v883_v34, %v882_v29  ;;  %v630_v44 = vadd.f32 %v3657_v5, %v367_v35  ;;  %v631_v45 = vadd.f32 %v3657_v5, %v368_v36  ;;  %v4330_v35 = vld [vmem:[%s5337_s2] ss:$0 sm:$0xff]  ;;  %v123_v36 = vld [vmem:[%s5335_s0 + $0x368] sm:$0xff] }
  0x53   :  { %3531 = vst [vmem:[%s5338_s3 + $0x150] sm:$0xff] %v3063_v33   ;;  %v371_v46 = vmul.f32 %v3650_v2, %v108_v32  ;;  %v885_v47 = vmax.f32 %v629_v38, 0.0  ;;  %v632_v48 = vadd.f32 %v3657_v5, %v369_v40  ;;  %v372_v50 = vmul.f32 %v3650_v2, %v109_v37 }
  0x54   :  { %v633_v49 = vadd.f32 %v3657_v5, %v370_v41  ;;  %3532 = vst [vmem:[%s5338_s3 + $0x158] sm:$0xff] %v3068_v43   ;;  %v886_v52 = vmax.f32 %v630_v44, 0.0  ;;  %v887_v53 = vmax.f32 %v631_v45, 0.0  ;;  %v373_v55 = vmul.f32 %v3650_v2, %v110_v42  ;;  %v124_v42 = vld [vmem:[%s5335_s0 + $0x370] sm:$0xff] }
  0x55   :  { %v634_v54 = vadd.f32 %v3657_v5, %v371_v46  ;;  %v3073_v58 = vpack.c.bf16 %v885_v47, %v884_v39  ;;  %v888_v59 = vmax.f32 %v632_v48, 0.0  ;;  %v635_v61 = vadd.f32 %v3657_v5, %v372_v50  ;;  %v4342_v39 = vld [vmem:[%s5336_s1] ss:$0 sm:$0xff]  ;;  %v125_v47 = vld [vmem:[%s5335_s0 + $0x378] sm:$0xff] }
  0x56   :  { %v889_v60 = vmax.f32 %v633_v49, 0.0  ;;  %v3078_v0 = vpack.c.bf16 %v887_v53, %v886_v52  ;;  %v374_v3 = vmul.f32 %v3650_v2, %v111_v51  ;;  %v636_v4 = vadd.f32 %v3657_v5, %v373_v55  ;;  %v126_v52 = vld [vmem:[%s5335_s0 + $0x380] sm:$0xff] }
  0x57   :  { %v890_v1 = vmax.f32 %v634_v54, 0.0  ;;  %3533 = vst [vmem:[%s5338_s3 + $0x160] sm:$0xff] %v3073_v58   ;;  %v891_v8 = vmax.f32 %v635_v61, 0.0  ;;  %v375_v9 = vmul.f32 %v3650_v2, %v112_v56  ;;  %v376_v10 = vmul.f32 %v3650_v2, %v113_v57  ;;  %v127_v61 = vld [vmem:[%s5335_s0 + $0x388] sm:$0xff] }
  0x58   :  { %v3083_v7 = vpack.c.bf16 %v889_v60, %v888_v59  ;;  %3534 = vst [vmem:[%s5338_s3 + $0x168] sm:$0xff] %v3078_v0   ;;  %v637_v12 = vadd.f32 %v3657_v5, %v374_v3  ;;  %v892_v13 = vmax.f32 %v636_v4, 0.0  ;;  %v377_v14 = vmul.f32 %v3650_v2, %v114_v62  ;;  %v128_v3 = vld [vmem:[%s5335_s0 + $0x390] sm:$0xff]  ;;  %v129_v4 = vld [vmem:[%s5335_s0 + $0x398] sm:$0xff] }
  0x59   :  { %v378_v15 = vmul.f32 %v3650_v2, %v115_v63  ;;  %v3088_v17 = vpack.c.bf16 %v891_v8, %v890_v1  ;;  %v638_v18 = vadd.f32 %v3657_v5, %v375_v9  ;;  %v639_v19 = vadd.f32 %v3657_v5, %v376_v10  ;;  %v130_v10 = vld [vmem:[%s5335_s0 + $0x3a0] sm:$0xff] }
  0x5a   :  { %3535 = vst [vmem:[%s5338_s3 + $0x170] sm:$0xff] %v3083_v7   ;;  %v379_v20 = vmul.f32 %v3650_v2, %v116_v6  ;;  %v893_v21 = vmax.f32 %v637_v12, 0.0  ;;  %v640_v22 = vadd.f32 %v3657_v5, %v377_v14  ;;  %v380_v24 = vmul.f32 %v3650_v2, %v117_v11  ;;  %v131_v11 = vld [vmem:[%s5335_s0 + $0x3a8] sm:$0xff] }
  0x5b   :  { %v641_v23 = vadd.f32 %v3657_v5, %v378_v15  ;;  %3536 = vst [vmem:[%s5338_s3 + $0x178] sm:$0xff] %v3088_v17   ;;  %v894_v26 = vmax.f32 %v638_v18, 0.0  ;;  %v895_v27 = vmax.f32 %v639_v19, 0.0  ;;  %v381_v29 = vmul.f32 %v3650_v2, %v118_v16  ;;  %v122_v2 = vld [vmem:[%s5335_s0 + $0x360] sm:$0xff]  ;;  %v132_v16 = vld [vmem:[%s5335_s0 + $0x3b0] sm:$0xff] }
  0x5c   :  { %v642_v28 = vadd.f32 %v3657_v5, %v379_v20  ;;  %v3093_v32 = vpack.c.bf16 %v893_v21, %v892_v13  ;;  %v896_v33 = vmax.f32 %v640_v22, 0.0  ;;  %v643_v5 = vadd.f32 %v4330_v35, %v380_v24  ;;  %v133_v21 = vld [vmem:[%s5335_s0 + $0x3b8] sm:$0xff] }
  0x5d   :  { %v897_v34 = vmax.f32 %v641_v23, 0.0  ;;  %v3098_v37 = vpack.c.bf16 %v895_v27, %v894_v26  ;;  %v382_v40 = vmul.f32 %v4342_v39, %v119_v25  ;;  %v644_v41 = vadd.f32 %v4330_v35, %v381_v29  ;;  %v134_v26 = vld [vmem:[%s5335_s0 + $0x3c0] sm:$0xff] }
  0x5e   :  { %v898_v38 = vmax.f32 %v642_v28, 0.0  ;;  %3537 = vst [vmem:[%s5338_s3 + $0x180] sm:$0xff] %v3093_v32   ;;  %v899_v44 = vmax.f32 %v643_v5, 0.0  ;;  %v383_v45 = vmul.f32 %v4342_v39, %v120_v30  ;;  %v384_v46 = vmul.f32 %v4342_v39, %v121_v31  ;;  %v135_v5 = vld [vmem:[%s5335_s0 + $0x3c8] sm:$0xff] }
  0x5f   :  { %v3103_v43 = vpack.c.bf16 %v897_v34, %v896_v33  ;;  %3538 = vst [vmem:[%s5338_s3 + $0x188] sm:$0xff] %v3098_v37   ;;  %v645_v48 = vadd.f32 %v4330_v35, %v382_v40  ;;  %v900_v49 = vmax.f32 %v644_v41, 0.0  ;;  %v385_v50 = vmul.f32 %v4342_v39, %v122_v2  ;;  %v136_v40 = vld [vmem:[%s5335_s0 + $0x3d0] sm:$0xff]  ;;  %v137_v41 = vld [vmem:[%s5335_s0 + $0x3d8] sm:$0xff] }
  0x60   :  { %v386_v51 = vmul.f32 %v4342_v39, %v123_v36  ;;  %v3108_v53 = vpack.c.bf16 %v899_v44, %v898_v38  ;;  %v646_v54 = vadd.f32 %v4330_v35, %v383_v45  ;;  %v647_v55 = vadd.f32 %v4330_v35, %v384_v46  ;;  %v138_v46 = vld [vmem:[%s5335_s0 + $0x3e0] sm:$0xff] }
  0x61   :  { %3539 = vst [vmem:[%s5338_s3 + $0x190] sm:$0xff] %v3103_v43   ;;  %v387_v56 = vmul.f32 %v4342_v39, %v124_v42  ;;  %v901_v57 = vmax.f32 %v645_v48, 0.0  ;;  %v648_v58 = vadd.f32 %v4330_v35, %v385_v50  ;;  %v388_v60 = vmul.f32 %v4342_v39, %v125_v47  ;;  %v139_v47 = vld [vmem:[%s5335_s0 + $0x3e8] sm:$0xff] }
  0x62   :  { %v649_v59 = vadd.f32 %v4330_v35, %v386_v51  ;;  %3540 = vst [vmem:[%s5338_s3 + $0x198] sm:$0xff] %v3108_v53   ;;  %v902_v62 = vmax.f32 %v646_v54, 0.0  ;;  %v903_v63 = vmax.f32 %v647_v55, 0.0  ;;  %v389_v1 = vmul.f32 %v4342_v39, %v126_v52  ;;  %v140_v52 = vld [vmem:[%s5335_s0 + $0x3f0] sm:$0xff] }
  0x63   :  { %v650_v0 = vadd.f32 %v4330_v35, %v387_v56  ;;  %v3113_v6 = vpack.c.bf16 %v901_v57, %v900_v49  ;;  %v904_v7 = vmax.f32 %v648_v58, 0.0  ;;  %v651_v9 = vadd.f32 %v4330_v35, %v388_v60  ;;  %v141_v57 = vld [vmem:[%s5335_s0 + $0x3f8] sm:$0xff] }
  0x64   :  { %v905_v8 = vmax.f32 %v649_v59, 0.0  ;;  %v3118_v12 = vpack.c.bf16 %v903_v63, %v902_v62  ;;  %v390_v14 = vmul.f32 %v4342_v39, %v127_v61  ;;  %v652_v15 = vadd.f32 %v4330_v35, %v389_v1  ;;  %v142_v62 = vld [vmem:[%s5335_s0 + $0x400] sm:$0xff] }
  0x65   :  { %v906_v13 = vmax.f32 %v650_v0, 0.0  ;;  %3541 = vst [vmem:[%s5338_s3 + $0x1a0] sm:$0xff] %v3113_v6   ;;  %v907_v18 = vmax.f32 %v651_v9, 0.0  ;;  %v391_v19 = vmul.f32 %v4342_v39, %v128_v3  ;;  %v392_v20 = vmul.f32 %v4342_v39, %v129_v4  ;;  %v143_v9 = vld [vmem:[%s5335_s0 + $0x408] sm:$0xff] }
  0x66   :  { %v3123_v17 = vpack.c.bf16 %v905_v8, %v904_v7  ;;  %3542 = vst [vmem:[%s5338_s3 + $0x1a8] sm:$0xff] %v3118_v12   ;;  %v653_v22 = vadd.f32 %v4330_v35, %v390_v14  ;;  %v908_v23 = vmax.f32 %v652_v15, 0.0  ;;  %v393_v24 = vmul.f32 %v4342_v39, %v130_v10  ;;  %v144_v14 = vld [vmem:[%s5335_s0 + $0x410] sm:$0xff]  ;;  %v145_v15 = vld [vmem:[%s5335_s0 + $0x418] sm:$0xff] }
  0x67   :  { %v394_v25 = vmul.f32 %v4342_v39, %v131_v11  ;;  %v3128_v27 = vpack.c.bf16 %v907_v18, %v906_v13  ;;  %v654_v28 = vadd.f32 %v4330_v35, %v391_v19  ;;  %v655_v29 = vadd.f32 %v4330_v35, %v392_v20  ;;  %v146_v20 = vld [vmem:[%s5335_s0 + $0x420] sm:$0xff] }
  0x68   :  { %3543 = vst [vmem:[%s5338_s3 + $0x1b0] sm:$0xff] %v3123_v17   ;;  %v395_v30 = vmul.f32 %v4342_v39, %v132_v16  ;;  %v909_v31 = vmax.f32 %v653_v22, 0.0  ;;  %v656_v32 = vadd.f32 %v4330_v35, %v393_v24  ;;  %v396_v34 = vmul.f32 %v4342_v39, %v133_v21  ;;  %v147_v21 = vld [vmem:[%s5335_s0 + $0x428] sm:$0xff] }
  0x69   :  { %v657_v33 = vadd.f32 %v4330_v35, %v394_v25  ;;  %3544 = vst [vmem:[%s5338_s3 + $0x1b8] sm:$0xff] %v3128_v27   ;;  %v910_v2 = vmax.f32 %v654_v28, 0.0  ;;  %v911_v36 = vmax.f32 %v655_v29, 0.0  ;;  %v397_v38 = vmul.f32 %v4342_v39, %v134_v26  ;;  %v148_v26 = vld [vmem:[%s5335_s0 + $0x430] sm:$0xff] }
  0x6a   :  { %v658_v37 = vadd.f32 %v4330_v35, %v395_v30  ;;  %v3133_v42 = vpack.c.bf16 %v909_v31, %v908_v23  ;;  %v912_v43 = vmax.f32 %v656_v32, 0.0  ;;  %v659_v45 = vadd.f32 %v4330_v35, %v396_v34  ;;  %v149_v31 = vld [vmem:[%s5335_s0 + $0x438] sm:$0xff] }
  0x6b   :  { %v913_v44 = vmax.f32 %v657_v33, 0.0  ;;  %v3138_v48 = vpack.c.bf16 %v911_v36, %v910_v2  ;;  %v398_v50 = vmul.f32 %v4342_v39, %v135_v5  ;;  %v660_v51 = vadd.f32 %v4330_v35, %v397_v38  ;;  %v150_v2 = vld [vmem:[%s5335_s0 + $0x440] sm:$0xff] }
  0x6c   :  { %v914_v49 = vmax.f32 %v658_v37, 0.0  ;;  %3545 = vst [vmem:[%s5338_s3 + $0x1c0] sm:$0xff] %v3133_v42   ;;  %v915_v54 = vmax.f32 %v659_v45, 0.0  ;;  %v399_v55 = vmul.f32 %v4342_v39, %v136_v40  ;;  %v400_v56 = vmul.f32 %v4342_v39, %v137_v41  ;;  %v151_v45 = vld [vmem:[%s5335_s0 + $0x448] sm:$0xff] }
  0x6d   :  { %v3143_v53 = vpack.c.bf16 %v913_v44, %v912_v43  ;;  %3546 = vst [vmem:[%s5338_s3 + $0x1c8] sm:$0xff] %v3138_v48   ;;  %v661_v58 = vadd.f32 %v4330_v35, %v398_v50  ;;  %v916_v59 = vmax.f32 %v660_v51, 0.0  ;;  %v401_v60 = vmul.f32 %v4342_v39, %v138_v46  ;;  %v152_v50 = vld [vmem:[%s5335_s0 + $0x450] sm:$0xff]  ;;  %v153_v51 = vld [vmem:[%s5335_s0 + $0x458] sm:$0xff] }
  0x6e   :  { %v402_v61 = vmul.f32 %v4342_v39, %v139_v47  ;;  %v3148_v63 = vpack.c.bf16 %v915_v54, %v914_v49  ;;  %v662_v0 = vadd.f32 %v4330_v35, %v399_v55  ;;  %v663_v1 = vadd.f32 %v4330_v35, %v400_v56  ;;  %v154_v56 = vld [vmem:[%s5335_s0 + $0x460] sm:$0xff] }
  0x6f   :  { %3547 = vst [vmem:[%s5338_s3 + $0x1d0] sm:$0xff] %v3143_v53   ;;  %v403_v3 = vmul.f32 %v4342_v39, %v140_v52  ;;  %v917_v4 = vmax.f32 %v661_v58, 0.0  ;;  %v664_v6 = vadd.f32 %v4330_v35, %v401_v60  ;;  %v404_v8 = vmul.f32 %v4342_v39, %v141_v57  ;;  %v155_v57 = vld [vmem:[%s5335_s0 + $0x468] sm:$0xff] }
  0x70   :  { %v665_v7 = vadd.f32 %v4330_v35, %v402_v61  ;;  %3548 = vst [vmem:[%s5338_s3 + $0x1d8] sm:$0xff] %v3148_v63   ;;  %v918_v10 = vmax.f32 %v662_v0, 0.0  ;;  %v919_v11 = vmax.f32 %v663_v1, 0.0  ;;  %v405_v13 = vmul.f32 %v4342_v39, %v142_v62  ;;  %v156_v62 = vld [vmem:[%s5335_s0 + $0x470] sm:$0xff] }
  0x71   :  { %v666_v12 = vadd.f32 %v4330_v35, %v403_v3  ;;  %v3153_v16 = vpack.c.bf16 %v917_v4, %v916_v59  ;;  %v920_v17 = vmax.f32 %v664_v6, 0.0  ;;  %v667_v19 = vadd.f32 %v4330_v35, %v404_v8  ;;  %v157_v4 = vld [vmem:[%s5335_s0 + $0x478] sm:$0xff] }
  0x72   :  { %v921_v18 = vmax.f32 %v665_v7, 0.0  ;;  %v3158_v22 = vpack.c.bf16 %v919_v11, %v918_v10  ;;  %v406_v24 = vmul.f32 %v4342_v39, %v143_v9  ;;  %v668_v25 = vadd.f32 %v4330_v35, %v405_v13  ;;  %v158_v10 = vld [vmem:[%s5335_s0 + $0x480] sm:$0xff] }
  0x73   :  { %v922_v23 = vmax.f32 %v666_v12, 0.0  ;;  %3549 = vst [vmem:[%s5338_s3 + $0x1e0] sm:$0xff] %v3153_v16   ;;  %v923_v28 = vmax.f32 %v667_v19, 0.0  ;;  %v407_v29 = vmul.f32 %v4342_v39, %v144_v14  ;;  %v408_v30 = vmul.f32 %v4342_v39, %v145_v15  ;;  %v159_v19 = vld [vmem:[%s5335_s0 + $0x488] sm:$0xff] }
  0x74   :  { %v3163_v27 = vpack.c.bf16 %v921_v18, %v920_v17  ;;  %3550 = vst [vmem:[%s5338_s3 + $0x1e8] sm:$0xff] %v3158_v22   ;;  %v669_v32 = vadd.f32 %v4330_v35, %v406_v24  ;;  %v924_v33 = vmax.f32 %v668_v25, 0.0  ;;  %v409_v34 = vmul.f32 %v4342_v39, %v146_v20  ;;  %v160_v24 = vld [vmem:[%s5335_s0 + $0x490] sm:$0xff]  ;;  %v161_v25 = vld [vmem:[%s5335_s0 + $0x498] sm:$0xff] }
  0x75   :  { %v410_v5 = vmul.f32 %v4342_v39, %v147_v21  ;;  %v3168_v36 = vpack.c.bf16 %v923_v28, %v922_v23  ;;  %v670_v37 = vadd.f32 %v4330_v35, %v407_v29  ;;  %v671_v38 = vadd.f32 %v4330_v35, %v408_v30  ;;  %v162_v30 = vld [vmem:[%s5335_s0 + $0x4a0] sm:$0xff] }
  0x76   :  { %3551 = vst [vmem:[%s5338_s3 + $0x1f0] sm:$0xff] %v3163_v27   ;;  %v411_v40 = vmul.f32 %v4342_v39, %v148_v26  ;;  %v925_v41 = vmax.f32 %v669_v32, 0.0  ;;  %v672_v42 = vadd.f32 %v4330_v35, %v409_v34  ;;  %v412_v44 = vmul.f32 %v4342_v39, %v149_v31  ;;  %v163_v31 = vld [vmem:[%s5335_s0 + $0x4a8] sm:$0xff] }
  0x77   :  { %v673_v43 = vadd.f32 %v4330_v35, %v410_v5  ;;  %3552 = vst [vmem:[%s5338_s3 + $0x1f8] sm:$0xff] %v3168_v36   ;;  %v926_v46 = vmax.f32 %v670_v37, 0.0  ;;  %v927_v47 = vmax.f32 %v671_v38, 0.0  ;;  %v413_v49 = vmul.f32 %v4342_v39, %v150_v2  ;;  %v164_v2 = vld [vmem:[%s5335_s0 + $0x4b0] sm:$0xff] }
  0x78   :  { %v674_v48 = vadd.f32 %v4330_v35, %v411_v40  ;;  %v3173_v52 = vpack.c.bf16 %v925_v41, %v924_v33  ;;  %v928_v53 = vmax.f32 %v672_v42, 0.0  ;;  %v675_v55 = vadd.f32 %v4330_v35, %v412_v44  ;;  %v165_v41 = vld [vmem:[%s5335_s0 + $0x4b8] sm:$0xff] }
  0x79   :  { %v929_v54 = vmax.f32 %v673_v43, 0.0  ;;  %v3178_v58 = vpack.c.bf16 %v927_v47, %v926_v46  ;;  %v414_v60 = vmul.f32 %v4342_v39, %v151_v45  ;;  %v676_v61 = vadd.f32 %v4330_v35, %v413_v49  ;;  %v166_v46 = vld [vmem:[%s5335_s0 + $0x4c0] sm:$0xff] }
  0x7a   :  { %v930_v59 = vmax.f32 %v674_v48, 0.0  ;;  %3553 = vst [vmem:[%s5338_s3 + $0x200] sm:$0xff] %v3173_v52   ;;  %v931_v0 = vmax.f32 %v675_v55, 0.0  ;;  %v415_v1 = vmul.f32 %v4342_v39, %v152_v50  ;;  %v416_v3 = vmul.f32 %v4342_v39, %v153_v51  ;;  %v167_v55 = vld [vmem:[%s5335_s0 + $0x4c8] sm:$0xff] }
  0x7b   :  { %v3183_v63 = vpack.c.bf16 %v929_v54, %v928_v53  ;;  %3554 = vst [vmem:[%s5338_s3 + $0x208] sm:$0xff] %v3178_v58   ;;  %v677_v6 = vadd.f32 %v4330_v35, %v414_v60  ;;  %v932_v7 = vmax.f32 %v676_v61, 0.0  ;;  %v417_v8 = vmul.f32 %v4342_v39, %v154_v56  ;;  %v168_v60 = vld [vmem:[%s5335_s0 + $0x4d0] sm:$0xff]  ;;  %v169_v61 = vld [vmem:[%s5335_s0 + $0x4d8] sm:$0xff] }
  0x7c   :  { %v418_v9 = vmul.f32 %v4342_v39, %v155_v57  ;;  %v3188_v11 = vpack.c.bf16 %v931_v0, %v930_v59  ;;  %v678_v12 = vadd.f32 %v4330_v35, %v415_v1  ;;  %v679_v13 = vadd.f32 %v4330_v35, %v416_v3  ;;  %v170_v3 = vld [vmem:[%s5335_s0 + $0x4e0] sm:$0xff] }
  0x7d   :  { %3555 = vst [vmem:[%s5338_s3 + $0x210] sm:$0xff] %v3183_v63   ;;  %v419_v14 = vmul.f32 %v4342_v39, %v156_v62  ;;  %v933_v15 = vmax.f32 %v677_v6, 0.0  ;;  %v680_v16 = vadd.f32 %v4330_v35, %v417_v8  ;;  %v420_v18 = vmul.f32 %v4342_v39, %v157_v4  ;;  %v171_v4 = vld [vmem:[%s5335_s0 + $0x4e8] sm:$0xff] }
  0x7e   :  { %v681_v17 = vadd.f32 %v4330_v35, %v418_v9  ;;  %3556 = vst [vmem:[%s5338_s3 + $0x218] sm:$0xff] %v3188_v11   ;;  %v934_v20 = vmax.f32 %v678_v12, 0.0  ;;  %v935_v21 = vmax.f32 %v679_v13, 0.0  ;;  %v421_v23 = vmul.f32 %v4342_v39, %v158_v10  ;;  %v172_v10 = vld [vmem:[%s5335_s0 + $0x4f0] sm:$0xff] }
  0x7f   :  { %v682_v22 = vadd.f32 %v4330_v35, %v419_v14  ;;  %v3193_v26 = vpack.c.bf16 %v933_v15, %v932_v7  ;;  %v936_v27 = vmax.f32 %v680_v16, 0.0  ;;  %v683_v29 = vadd.f32 %v4330_v35, %v420_v18  ;;  %v173_v15 = vld [vmem:[%s5335_s0 + $0x4f8] sm:$0xff] }
  0x80   :  { %v937_v28 = vmax.f32 %v681_v17, 0.0  ;;  %v3198_v32 = vpack.c.bf16 %v935_v21, %v934_v20  ;;  %v422_v34 = vmul.f32 %v4342_v39, %v159_v19  ;;  %v684_v5 = vadd.f32 %v4330_v35, %v421_v23  ;;  %v174_v20 = vld [vmem:[%s5335_s0 + $0x500] sm:$0xff] }
  0x81   :  { %v938_v33 = vmax.f32 %v682_v22, 0.0  ;;  %3557 = vst [vmem:[%s5338_s3 + $0x220] sm:$0xff] %v3193_v26   ;;  %v939_v37 = vmax.f32 %v683_v29, 0.0  ;;  %v423_v38 = vmul.f32 %v4342_v39, %v160_v24  ;;  %v424_v40 = vmul.f32 %v4342_v39, %v161_v25  ;;  %v175_v29 = vld [vmem:[%s5335_s0 + $0x508] sm:$0xff] }
  0x82   :  { %v3203_v36 = vpack.c.bf16 %v937_v28, %v936_v27  ;;  %3558 = vst [vmem:[%s5338_s3 + $0x228] sm:$0xff] %v3198_v32   ;;  %v685_v42 = vadd.f32 %v4330_v35, %v422_v34  ;;  %v940_v43 = vmax.f32 %v684_v5, 0.0  ;;  %v425_v44 = vmul.f32 %v4342_v39, %v162_v30  ;;  %v176_v34 = vld [vmem:[%s5335_s0 + $0x510] sm:$0xff]  ;;  %v177_v5 = vld [vmem:[%s5335_s0 + $0x518] sm:$0xff] }
  0x83   :  { %v426_v45 = vmul.f32 %v4342_v39, %v163_v31  ;;  %v3208_v47 = vpack.c.bf16 %v939_v37, %v938_v33  ;;  %v686_v48 = vadd.f32 %v4330_v35, %v423_v38  ;;  %v687_v49 = vadd.f32 %v4330_v35, %v424_v40  ;;  %v178_v40 = vld [vmem:[%s5335_s0 + $0x520] sm:$0xff] }
  0x84   :  { %3559 = vst [vmem:[%s5338_s3 + $0x230] sm:$0xff] %v3203_v36   ;;  %v427_v50 = vmul.f32 %v4342_v39, %v164_v2  ;;  %v941_v51 = vmax.f32 %v685_v42, 0.0  ;;  %v688_v52 = vadd.f32 %v4330_v35, %v425_v44  ;;  %v428_v54 = vmul.f32 %v4342_v39, %v165_v41  ;;  %v179_v41 = vld [vmem:[%s5335_s0 + $0x528] sm:$0xff] }
  0x85   :  { %v689_v53 = vadd.f32 %v4330_v35, %v426_v45  ;;  %3560 = vst [vmem:[%s5338_s3 + $0x238] sm:$0xff] %v3208_v47   ;;  %v942_v56 = vmax.f32 %v686_v48, 0.0  ;;  %v943_v57 = vmax.f32 %v687_v49, 0.0  ;;  %v429_v59 = vmul.f32 %v4342_v39, %v166_v46  ;;  %v180_v46 = vld [vmem:[%s5335_s0 + $0x530] sm:$0xff] }
  0x86   :  { %v690_v58 = vadd.f32 %v4330_v35, %v427_v50  ;;  %v3213_v62 = vpack.c.bf16 %v941_v51, %v940_v43  ;;  %v944_v63 = vmax.f32 %v688_v52, 0.0  ;;  %v691_v1 = vadd.f32 %v4330_v35, %v428_v54  ;;  %v181_v51 = vld [vmem:[%s5335_s0 + $0x538] sm:$0xff] }
  0x87   :  { %v945_v0 = vmax.f32 %v689_v53, 0.0  ;;  %v3218_v6 = vpack.c.bf16 %v943_v57, %v942_v56  ;;  %v430_v8 = vmul.f32 %v4342_v39, %v167_v55  ;;  %v692_v9 = vadd.f32 %v4330_v35, %v429_v59  ;;  %v182_v56 = vld [vmem:[%s5335_s0 + $0x540] sm:$0xff] }
  0x88   :  { %v946_v7 = vmax.f32 %v690_v58, 0.0  ;;  %3561 = vst [vmem:[%s5338_s3 + $0x240] sm:$0xff] %v3213_v62   ;;  %v947_v12 = vmax.f32 %v691_v1, 0.0  ;;  %v431_v13 = vmul.f32 %v4342_v39, %v168_v60  ;;  %v432_v14 = vmul.f32 %v4342_v39, %v169_v61  ;;  %v183_v1 = vld [vmem:[%s5335_s0 + $0x548] sm:$0xff] }
  0x89   :  { %v3223_v11 = vpack.c.bf16 %v945_v0, %v944_v63  ;;  %3562 = vst [vmem:[%s5338_s3 + $0x248] sm:$0xff] %v3218_v6   ;;  %v693_v16 = vadd.f32 %v4330_v35, %v430_v8  ;;  %v948_v17 = vmax.f32 %v692_v9, 0.0  ;;  %v433_v18 = vmul.f32 %v4342_v39, %v170_v3  ;;  %v184_v8 = vld [vmem:[%s5335_s0 + $0x550] sm:$0xff]  ;;  %v185_v9 = vld [vmem:[%s5335_s0 + $0x558] sm:$0xff] }
  0x8a   :  { %v434_v19 = vmul.f32 %v4342_v39, %v171_v4  ;;  %v3228_v21 = vpack.c.bf16 %v947_v12, %v946_v7  ;;  %v694_v22 = vadd.f32 %v4330_v35, %v431_v13  ;;  %v695_v23 = vadd.f32 %v4330_v35, %v432_v14  ;;  %v186_v14 = vld [vmem:[%s5335_s0 + $0x560] sm:$0xff] }
  0x8b   :  { %3563 = vst [vmem:[%s5338_s3 + $0x250] sm:$0xff] %v3223_v11   ;;  %v435_v24 = vmul.f32 %v4342_v39, %v172_v10  ;;  %v949_v25 = vmax.f32 %v693_v16, 0.0  ;;  %v696_v26 = vadd.f32 %v4330_v35, %v433_v18  ;;  %v436_v28 = vmul.f32 %v4342_v39, %v173_v15  ;;  %v187_v15 = vld [vmem:[%s5335_s0 + $0x568] sm:$0xff] }
  0x8c   :  { %v697_v27 = vadd.f32 %v4330_v35, %v434_v19  ;;  %3564 = vst [vmem:[%s5338_s3 + $0x258] sm:$0xff] %v3228_v21   ;;  %v950_v30 = vmax.f32 %v694_v22, 0.0  ;;  %v951_v31 = vmax.f32 %v695_v23, 0.0  ;;  %v437_v33 = vmul.f32 %v4342_v39, %v174_v20  ;;  %v188_v20 = vld [vmem:[%s5335_s0 + $0x570] sm:$0xff] }
  0x8d   :  { %v698_v32 = vadd.f32 %v4330_v35, %v435_v24  ;;  %v3233_v2 = vpack.c.bf16 %v949_v25, %v948_v17  ;;  %v952_v36 = vmax.f32 %v696_v26, 0.0  ;;  %v699_v38 = vadd.f32 %v4330_v35, %v436_v28  ;;  %v189_v25 = vld [vmem:[%s5335_s0 + $0x578] sm:$0xff] }
  0x8e   :  { %v953_v37 = vmax.f32 %v697_v27, 0.0  ;;  %v3238_v42 = vpack.c.bf16 %v951_v31, %v950_v30  ;;  %v438_v44 = vmul.f32 %v4342_v39, %v175_v29  ;;  %v700_v45 = vadd.f32 %v4330_v35, %v437_v33  ;;  %v190_v30 = vld [vmem:[%s5335_s0 + $0x580] sm:$0xff] }
  0x8f   :  { %v954_v43 = vmax.f32 %v698_v32, 0.0  ;;  %3565 = vst [vmem:[%s5338_s3 + $0x260] sm:$0xff] %v3233_v2   ;;  %v955_v48 = vmax.f32 %v699_v38, 0.0  ;;  %v439_v49 = vmul.f32 %v4342_v39, %v176_v34  ;;  %v440_v50 = vmul.f32 %v4342_v39, %v177_v5  ;;  %v191_v38 = vld [vmem:[%s5335_s0 + $0x588] sm:$0xff] }
  0x90   :  { %v3243_v47 = vpack.c.bf16 %v953_v37, %v952_v36  ;;  %3566 = vst [vmem:[%s5338_s3 + $0x268] sm:$0xff] %v3238_v42   ;;  %v701_v52 = vadd.f32 %v4330_v35, %v438_v44  ;;  %v956_v53 = vmax.f32 %v700_v45, 0.0  ;;  %v441_v54 = vmul.f32 %v4342_v39, %v178_v40  ;;  %v192_v44 = vld [vmem:[%s5335_s0 + $0x590] sm:$0xff]  ;;  %v193_v45 = vld [vmem:[%s5335_s0 + $0x598] sm:$0xff] }
  0x91   :  { %v442_v55 = vmul.f32 %v4342_v39, %v179_v41  ;;  %v3248_v57 = vpack.c.bf16 %v955_v48, %v954_v43  ;;  %v702_v58 = vadd.f32 %v4330_v35, %v439_v49  ;;  %v703_v59 = vadd.f32 %v4330_v35, %v440_v50  ;;  %v194_v50 = vld [vmem:[%s5335_s0 + $0x5a0] sm:$0xff] }
  0x92   :  { %3567 = vst [vmem:[%s5338_s3 + $0x270] sm:$0xff] %v3243_v47   ;;  %v443_v60 = vmul.f32 %v4342_v39, %v180_v46  ;;  %v957_v61 = vmax.f32 %v701_v52, 0.0  ;;  %v704_v62 = vadd.f32 %v4330_v35, %v441_v54  ;;  %v444_v0 = vmul.f32 %v4342_v39, %v181_v51  ;;  %v195_v51 = vld [vmem:[%s5335_s0 + $0x5a8] sm:$0xff] }
  0x93   :  { %v705_v63 = vadd.f32 %v4330_v35, %v442_v55  ;;  %3568 = vst [vmem:[%s5338_s3 + $0x278] sm:$0xff] %v3248_v57   ;;  %v958_v3 = vmax.f32 %v702_v58, 0.0  ;;  %v959_v4 = vmax.f32 %v703_v59, 0.0  ;;  %v445_v7 = vmul.f32 %v4342_v39, %v182_v56  ;;  %v196_v56 = vld [vmem:[%s5335_s0 + $0x5b0] sm:$0xff] }
  0x94   :  { %v706_v6 = vadd.f32 %v4330_v35, %v443_v60  ;;  %v3253_v10 = vpack.c.bf16 %v957_v61, %v956_v53  ;;  %v960_v11 = vmax.f32 %v704_v62, 0.0  ;;  %v707_v13 = vadd.f32 %v4330_v35, %v444_v0  ;;  %v197_v61 = vld [vmem:[%s5335_s0 + $0x5b8] sm:$0xff] }
  0x95   :  { %v961_v12 = vmax.f32 %v705_v63, 0.0  ;;  %v3258_v16 = vpack.c.bf16 %v959_v4, %v958_v3  ;;  %v446_v18 = vmul.f32 %v4342_v39, %v183_v1  ;;  %v708_v19 = vadd.f32 %v4330_v35, %v445_v7  ;;  %v198_v3 = vld [vmem:[%s5335_s0 + $0x5c0] sm:$0xff] }
  0x96   :  { %v962_v17 = vmax.f32 %v706_v6, 0.0  ;;  %3569 = vst [vmem:[%s5338_s3 + $0x280] sm:$0xff] %v3253_v10   ;;  %v963_v22 = vmax.f32 %v707_v13, 0.0  ;;  %v447_v23 = vmul.f32 %v4342_v39, %v184_v8  ;;  %v448_v24 = vmul.f32 %v4342_v39, %v185_v9  ;;  %v199_v13 = vld [vmem:[%s5335_s0 + $0x5c8] sm:$0xff] }
  0x97   :  { %v3263_v21 = vpack.c.bf16 %v961_v12, %v960_v11  ;;  %3570 = vst [vmem:[%s5338_s3 + $0x288] sm:$0xff] %v3258_v16   ;;  %v709_v26 = vadd.f32 %v4330_v35, %v446_v18  ;;  %v964_v27 = vmax.f32 %v708_v19, 0.0  ;;  %v449_v28 = vmul.f32 %v4342_v39, %v186_v14  ;;  %v200_v18 = vld [vmem:[%s5335_s0 + $0x5d0] sm:$0xff]  ;;  %v201_v19 = vld [vmem:[%s5335_s0 + $0x5d8] sm:$0xff] }
  0x98   :  { %v450_v29 = vmul.f32 %v4342_v39, %v187_v15  ;;  %v3268_v31 = vpack.c.bf16 %v963_v22, %v962_v17  ;;  %v710_v32 = vadd.f32 %v4330_v35, %v447_v23  ;;  %v711_v33 = vadd.f32 %v4330_v35, %v448_v24  ;;  %v202_v24 = vld [vmem:[%s5335_s0 + $0x5e0] sm:$0xff] }
  0x99   :  { %3571 = vst [vmem:[%s5338_s3 + $0x290] sm:$0xff] %v3263_v21   ;;  %v451_v34 = vmul.f32 %v4342_v39, %v188_v20  ;;  %v965_v5 = vmax.f32 %v709_v26, 0.0  ;;  %v712_v2 = vadd.f32 %v4330_v35, %v449_v28  ;;  %v452_v37 = vmul.f32 %v4342_v39, %v189_v25  ;;  %v203_v25 = vld [vmem:[%s5335_s0 + $0x5e8] sm:$0xff] }
  0x9a   :  { %v713_v36 = vadd.f32 %v4330_v35, %v450_v29  ;;  %3572 = vst [vmem:[%s5338_s3 + $0x298] sm:$0xff] %v3268_v31   ;;  %v966_v40 = vmax.f32 %v710_v32, 0.0  ;;  %v967_v41 = vmax.f32 %v711_v33, 0.0  ;;  %v453_v43 = vmul.f32 %v4342_v39, %v190_v30  ;;  %v204_v30 = vld [vmem:[%s5335_s0 + $0x5f0] sm:$0xff] }
  0x9b   :  { %v714_v42 = vadd.f32 %v4330_v35, %v451_v34  ;;  %v3273_v46 = vpack.c.bf16 %v965_v5, %v964_v27  ;;  %v968_v47 = vmax.f32 %v712_v2, 0.0  ;;  %v715_v49 = vadd.f32 %v4330_v35, %v452_v37  ;;  %v205_v5 = vld [vmem:[%s5335_s0 + $0x5f8] sm:$0xff] }
  0x9c   :  { %v969_v48 = vmax.f32 %v713_v36, 0.0  ;;  %v3278_v52 = vpack.c.bf16 %v967_v41, %v966_v40  ;;  %v454_v54 = vmul.f32 %v4342_v39, %v191_v38  ;;  %v716_v55 = vadd.f32 %v4330_v35, %v453_v43  ;;  %v206_v40 = vld [vmem:[%s5335_s0 + $0x600] sm:$0xff] }
  0x9d   :  { %v970_v53 = vmax.f32 %v714_v42, 0.0  ;;  %3573 = vst [vmem:[%s5338_s3 + $0x2a0] sm:$0xff] %v3273_v46   ;;  %v971_v58 = vmax.f32 %v715_v49, 0.0  ;;  %v455_v59 = vmul.f32 %v4342_v39, %v192_v44  ;;  %v456_v60 = vmul.f32 %v4342_v39, %v193_v45  ;;  %v207_v49 = vld [vmem:[%s5335_s0 + $0x608] sm:$0xff] }
  0x9e   :  { %v3283_v57 = vpack.c.bf16 %v969_v48, %v968_v47  ;;  %3574 = vst [vmem:[%s5338_s3 + $0x2a8] sm:$0xff] %v3278_v52   ;;  %v717_v62 = vadd.f32 %v4330_v35, %v454_v54  ;;  %v972_v63 = vmax.f32 %v716_v55, 0.0  ;;  %v457_v0 = vmul.f32 %v4342_v39, %v194_v50  ;;  %v208_v54 = vld [vmem:[%s5335_s0 + $0x610] sm:$0xff]  ;;  %v209_v55 = vld [vmem:[%s5335_s0 + $0x618] sm:$0xff] }
  0x9f   :  { %v458_v1 = vmul.f32 %v4342_v39, %v195_v51  ;;  %v3288_v4 = vpack.c.bf16 %v971_v58, %v970_v53  ;;  %v718_v6 = vadd.f32 %v4330_v35, %v455_v59  ;;  %v719_v7 = vadd.f32 %v4330_v35, %v456_v60  ;;  %v210_v60 = vld [vmem:[%s5335_s0 + $0x620] sm:$0xff] }
  0xa0   :  { %3575 = vst [vmem:[%s5338_s3 + $0x2b0] sm:$0xff] %v3283_v57   ;;  %v459_v8 = vmul.f32 %v4342_v39, %v196_v56  ;;  %v973_v9 = vmax.f32 %v717_v62, 0.0  ;;  %v720_v10 = vadd.f32 %v4330_v35, %v457_v0  ;;  %v460_v12 = vmul.f32 %v4342_v39, %v197_v61  ;;  %v211_v61 = vld [vmem:[%s5335_s0 + $0x628] sm:$0xff] }
  0xa1   :  { %v721_v11 = vadd.f32 %v4330_v35, %v458_v1  ;;  %3576 = vst [vmem:[%s5338_s3 + $0x2b8] sm:$0xff] %v3288_v4   ;;  %v974_v14 = vmax.f32 %v718_v6, 0.0  ;;  %v975_v15 = vmax.f32 %v719_v7, 0.0  ;;  %v461_v17 = vmul.f32 %v4342_v39, %v198_v3  ;;  %v212_v3 = vld [vmem:[%s5335_s0 + $0x630] sm:$0xff] }
  0xa2   :  { %v722_v16 = vadd.f32 %v4330_v35, %v459_v8  ;;  %v3293_v20 = vpack.c.bf16 %v973_v9, %v972_v63  ;;  %v976_v21 = vmax.f32 %v720_v10, 0.0  ;;  %v723_v23 = vadd.f32 %v4330_v35, %v460_v12  ;;  %v213_v9 = vld [vmem:[%s5335_s0 + $0x638] sm:$0xff] }
  0xa3   :  { %v977_v22 = vmax.f32 %v721_v11, 0.0  ;;  %v3298_v26 = vpack.c.bf16 %v975_v15, %v974_v14  ;;  %v462_v28 = vmul.f32 %v4342_v39, %v199_v13  ;;  %v724_v29 = vadd.f32 %v4330_v35, %v461_v17  ;;  %v214_v14 = vld [vmem:[%s5335_s0 + $0x640] sm:$0xff] }
  0xa4   :  { %v978_v27 = vmax.f32 %v722_v16, 0.0  ;;  %3577 = vst [vmem:[%s5338_s3 + $0x2c0] sm:$0xff] %v3293_v20   ;;  %v979_v32 = vmax.f32 %v723_v23, 0.0  ;;  %v463_v33 = vmul.f32 %v4342_v39, %v200_v18  ;;  %v464_v34 = vmul.f32 %v4342_v39, %v201_v19  ;;  %v215_v23 = vld [vmem:[%s5335_s0 + $0x648] sm:$0xff] }
  0xa5   :  { %v3303_v31 = vpack.c.bf16 %v977_v22, %v976_v21  ;;  %3578 = vst [vmem:[%s5338_s3 + $0x2c8] sm:$0xff] %v3298_v26   ;;  %v725_v2 = vadd.f32 %v4330_v35, %v462_v28  ;;  %v980_v36 = vmax.f32 %v724_v29, 0.0  ;;  %v465_v37 = vmul.f32 %v4342_v39, %v202_v24  ;;  %v216_v28 = vld [vmem:[%s5335_s0 + $0x650] sm:$0xff]  ;;  %v217_v29 = vld [vmem:[%s5335_s0 + $0x658] sm:$0xff] }
  0xa6   :  { %v466_v38 = vmul.f32 %v4342_v39, %v203_v25  ;;  %v3308_v41 = vpack.c.bf16 %v979_v32, %v978_v27  ;;  %v726_v42 = vadd.f32 %v4330_v35, %v463_v33  ;;  %v727_v43 = vadd.f32 %v4330_v35, %v464_v34  ;;  %v218_v34 = vld [vmem:[%s5335_s0 + $0x660] sm:$0xff] }
  0xa7   :  { %3579 = vst [vmem:[%s5338_s3 + $0x2d0] sm:$0xff] %v3303_v31   ;;  %v467_v44 = vmul.f32 %v4342_v39, %v204_v30  ;;  %v981_v45 = vmax.f32 %v725_v2, 0.0  ;;  %v728_v46 = vadd.f32 %v4330_v35, %v465_v37  ;;  %v468_v48 = vmul.f32 %v4342_v39, %v205_v5  ;;  %v219_v5 = vld [vmem:[%s5335_s0 + $0x668] sm:$0xff] }
  0xa8   :  { %v729_v47 = vadd.f32 %v4330_v35, %v466_v38  ;;  %3580 = vst [vmem:[%s5338_s3 + $0x2d8] sm:$0xff] %v3308_v41   ;;  %v982_v50 = vmax.f32 %v726_v42, 0.0  ;;  %v983_v51 = vmax.f32 %v727_v43, 0.0  ;;  %v469_v53 = vmul.f32 %v4342_v39, %v206_v40  ;;  %v220_v40 = vld [vmem:[%s5335_s0 + $0x670] sm:$0xff] }
  0xa9   :  { %v730_v52 = vadd.f32 %v4330_v35, %v467_v44  ;;  %v3313_v56 = vpack.c.bf16 %v981_v45, %v980_v36  ;;  %v984_v57 = vmax.f32 %v728_v46, 0.0  ;;  %v731_v59 = vadd.f32 %v4330_v35, %v468_v48  ;;  %v221_v45 = vld [vmem:[%s5335_s0 + $0x678] sm:$0xff] }
  0xaa   :  { %v985_v58 = vmax.f32 %v729_v47, 0.0  ;;  %v3318_v62 = vpack.c.bf16 %v983_v51, %v982_v50  ;;  %v470_v0 = vmul.f32 %v4342_v39, %v207_v49  ;;  %v732_v1 = vadd.f32 %v4330_v35, %v469_v53  ;;  %v222_v50 = vld [vmem:[%s5335_s0 + $0x680] sm:$0xff] }
  0xab   :  { %v986_v63 = vmax.f32 %v730_v52, 0.0  ;;  %3581 = vst [vmem:[%s5338_s3 + $0x2e0] sm:$0xff] %v3313_v56   ;;  %v987_v6 = vmax.f32 %v731_v59, 0.0  ;;  %v471_v7 = vmul.f32 %v4342_v39, %v208_v54  ;;  %v472_v8 = vmul.f32 %v4342_v39, %v209_v55  ;;  %v223_v59 = vld [vmem:[%s5335_s0 + $0x688] sm:$0xff] }
  0xac   :  { %v3323_v4 = vpack.c.bf16 %v985_v58, %v984_v57  ;;  %3582 = vst [vmem:[%s5338_s3 + $0x2e8] sm:$0xff] %v3318_v62   ;;  %v733_v10 = vadd.f32 %v4330_v35, %v470_v0  ;;  %v988_v11 = vmax.f32 %v732_v1, 0.0  ;;  %v473_v12 = vmul.f32 %v4342_v39, %v210_v60  ;;  %v5008_v62 = vld [vmem:[%s5337_s2] ss:$0 sm:$0xff]  ;;  %v224_v0 = vld [vmem:[%s5335_s0 + $0x690] sm:$0xff]  ;;  %v225_v1 = vld [vmem:[%s5335_s0 + $0x698] sm:$0xff] }
  0xad   :  { %v474_v13 = vmul.f32 %v4342_v39, %v211_v61  ;;  %v3328_v15 = vpack.c.bf16 %v987_v6, %v986_v63  ;;  %v734_v16 = vadd.f32 %v4330_v35, %v471_v7  ;;  %v735_v17 = vadd.f32 %v4330_v35, %v472_v8  ;;  %v226_v8 = vld [vmem:[%s5335_s0 + $0x6a0] sm:$0xff] }
  0xae   :  { %3583 = vst [vmem:[%s5338_s3 + $0x2f0] sm:$0xff] %v3323_v4   ;;  %v475_v18 = vmul.f32 %v4342_v39, %v212_v3  ;;  %v989_v19 = vmax.f32 %v733_v10, 0.0  ;;  %v736_v20 = vadd.f32 %v4330_v35, %v473_v12  ;;  %v476_v22 = vmul.f32 %v4342_v39, %v213_v9 }
  0xaf   :  { %v737_v21 = vadd.f32 %v4330_v35, %v474_v13  ;;  %3584 = vst [vmem:[%s5338_s3 + $0x2f8] sm:$0xff] %v3328_v15   ;;  %v990_v24 = vmax.f32 %v734_v16, 0.0  ;;  %v991_v25 = vmax.f32 %v735_v17, 0.0  ;;  %v477_v27 = vmul.f32 %v4342_v39, %v214_v14  ;;  %v228_v14 = vld [vmem:[%s5335_s0 + $0x6b0] sm:$0xff] }
  0xb0   :  { %v738_v26 = vadd.f32 %v4330_v35, %v475_v18  ;;  %v3333_v30 = vpack.c.bf16 %v989_v19, %v988_v11  ;;  %v992_v31 = vmax.f32 %v736_v20, 0.0  ;;  %v739_v33 = vadd.f32 %v4330_v35, %v476_v22  ;;  %v5028_v11 = vld [vmem:[%s5336_s1] ss:$0 sm:$0xff]  ;;  %v229_v19 = vld [vmem:[%s5335_s0 + $0x6b8] sm:$0xff] }
  0xb1   :  { %v993_v32 = vmax.f32 %v737_v21, 0.0  ;;  %v3338_v2 = vpack.c.bf16 %v991_v25, %v990_v24  ;;  %v478_v37 = vmul.f32 %v4342_v39, %v215_v23  ;;  %v740_v38 = vadd.f32 %v4330_v35, %v477_v27  ;;  %v230_v24 = vld [vmem:[%s5335_s0 + $0x6c0] sm:$0xff] }
  0xb2   :  { %v994_v36 = vmax.f32 %v738_v26, 0.0  ;;  %3585 = vst [vmem:[%s5338_s3 + $0x300] sm:$0xff] %v3333_v30   ;;  %v995_v42 = vmax.f32 %v739_v33, 0.0  ;;  %v479_v43 = vmul.f32 %v4342_v39, %v216_v28  ;;  %v480_v44 = vmul.f32 %v4342_v39, %v217_v29  ;;  %v231_v33 = vld [vmem:[%s5335_s0 + $0x6c8] sm:$0xff] }
  0xb3   :  { %v3343_v41 = vpack.c.bf16 %v993_v32, %v992_v31  ;;  %3586 = vst [vmem:[%s5338_s3 + $0x308] sm:$0xff] %v3338_v2   ;;  %v741_v46 = vadd.f32 %v4330_v35, %v478_v37  ;;  %v996_v47 = vmax.f32 %v740_v38, 0.0  ;;  %v481_v48 = vmul.f32 %v4342_v39, %v218_v34  ;;  %v232_v37 = vld [vmem:[%s5335_s0 + $0x6d0] sm:$0xff]  ;;  %v233_v38 = vld [vmem:[%s5335_s0 + $0x6d8] sm:$0xff] }
  0xb4   :  { %v482_v49 = vmul.f32 %v4342_v39, %v219_v5  ;;  %v3348_v51 = vpack.c.bf16 %v995_v42, %v994_v36  ;;  %v742_v52 = vadd.f32 %v4330_v35, %v479_v43  ;;  %v743_v53 = vadd.f32 %v4330_v35, %v480_v44  ;;  %v234_v44 = vld [vmem:[%s5335_s0 + $0x6e0] sm:$0xff] }
  0xb5   :  { %3587 = vst [vmem:[%s5338_s3 + $0x310] sm:$0xff] %v3343_v41   ;;  %v483_v54 = vmul.f32 %v4342_v39, %v220_v40  ;;  %v997_v55 = vmax.f32 %v741_v46, 0.0  ;;  %v744_v56 = vadd.f32 %v4330_v35, %v481_v48  ;;  %v484_v58 = vmul.f32 %v4342_v39, %v221_v45  ;;  %v235_v45 = vld [vmem:[%s5335_s0 + $0x6e8] sm:$0xff] }
  0xb6   :  { %v745_v57 = vadd.f32 %v4330_v35, %v482_v49  ;;  %3588 = vst [vmem:[%s5338_s3 + $0x318] sm:$0xff] %v3348_v51   ;;  %v998_v60 = vmax.f32 %v742_v52, 0.0  ;;  %v999_v61 = vmax.f32 %v743_v53, 0.0  ;;  %v485_v35 = vmul.f32 %v4342_v39, %v222_v50  ;;  %v227_v39 = vld [vmem:[%s5335_s0 + $0x6a8] sm:$0xff]  ;;  %v236_v50 = vld [vmem:[%s5335_s0 + $0x6f0] sm:$0xff] }
  0xb7   :  { %v746_v63 = vadd.f32 %v5008_v62, %v483_v54  ;;  %v3353_v3 = vpack.c.bf16 %v997_v55, %v996_v47  ;;  %v1000_v4 = vmax.f32 %v744_v56, 0.0  ;;  %v747_v7 = vadd.f32 %v5008_v62, %v484_v58  ;;  %v237_v55 = vld [vmem:[%s5335_s0 + $0x6f8] sm:$0xff] }
  0xb8   :  { %v1001_v6 = vmax.f32 %v745_v57, 0.0  ;;  %v3358_v9 = vpack.c.bf16 %v999_v61, %v998_v60  ;;  %v486_v12 = vmul.f32 %v5028_v11, %v223_v59  ;;  %v748_v13 = vadd.f32 %v5008_v62, %v485_v35  ;;  %v238_v60 = vld [vmem:[%s5335_s0 + $0x700] sm:$0xff] }
  0xb9   :  { %v1002_v10 = vmax.f32 %v746_v63, 0.0  ;;  %3589 = vst [vmem:[%s5338_s3 + $0x320] sm:$0xff] %v3353_v3   ;;  %v1003_v16 = vmax.f32 %v747_v7, 0.0  ;;  %v487_v17 = vmul.f32 %v5028_v11, %v224_v0  ;;  %v488_v18 = vmul.f32 %v5028_v11, %v225_v1  ;;  %v239_v7 = vld [vmem:[%s5335_s0 + $0x708] sm:$0xff] }
  0xba   :  { %v3363_v15 = vpack.c.bf16 %v1001_v6, %v1000_v4  ;;  %3590 = vst [vmem:[%s5338_s3 + $0x328] sm:$0xff] %v3358_v9   ;;  %v749_v20 = vadd.f32 %v5008_v62, %v486_v12  ;;  %v1004_v21 = vmax.f32 %v748_v13, 0.0  ;;  %v489_v22 = vmul.f32 %v5028_v11, %v226_v8  ;;  %v240_v12 = vld [vmem:[%s5335_s0 + $0x710] sm:$0xff]  ;;  %v241_v13 = vld [vmem:[%s5335_s0 + $0x718] sm:$0xff] }
  0xbb   :  { %v490_v23 = vmul.f32 %v5028_v11, %v227_v39  ;;  %v3368_v25 = vpack.c.bf16 %v1003_v16, %v1002_v10  ;;  %v750_v26 = vadd.f32 %v5008_v62, %v487_v17  ;;  %v751_v27 = vadd.f32 %v5008_v62, %v488_v18  ;;  %v242_v18 = vld [vmem:[%s5335_s0 + $0x720] sm:$0xff] }
  0xbc   :  { %3591 = vst [vmem:[%s5338_s3 + $0x330] sm:$0xff] %v3363_v15   ;;  %v491_v28 = vmul.f32 %v5028_v11, %v228_v14  ;;  %v1005_v29 = vmax.f32 %v749_v20, 0.0  ;;  %v752_v30 = vadd.f32 %v5008_v62, %v489_v22  ;;  %v492_v32 = vmul.f32 %v5028_v11, %v229_v19  ;;  %v243_v19 = vld [vmem:[%s5335_s0 + $0x728] sm:$0xff] }
  0xbd   :  { %v753_v31 = vadd.f32 %v5008_v62, %v490_v23  ;;  %3592 = vst [vmem:[%s5338_s3 + $0x338] sm:$0xff] %v3368_v25   ;;  %v1006_v34 = vmax.f32 %v750_v26, 0.0  ;;  %v1007_v5 = vmax.f32 %v751_v27, 0.0  ;;  %v493_v36 = vmul.f32 %v5028_v11, %v230_v24  ;;  %v244_v24 = vld [vmem:[%s5335_s0 + $0x730] sm:$0xff] }
  0xbe   :  { %v754_v2 = vadd.f32 %v5008_v62, %v491_v28  ;;  %v3373_v40 = vpack.c.bf16 %v1005_v29, %v1004_v21  ;;  %v1008_v41 = vmax.f32 %v752_v30, 0.0  ;;  %v755_v43 = vadd.f32 %v5008_v62, %v492_v32  ;;  %v245_v29 = vld [vmem:[%s5335_s0 + $0x738] sm:$0xff] }
  0xbf   :  { %v1009_v42 = vmax.f32 %v753_v31, 0.0  ;;  %v3378_v46 = vpack.c.bf16 %v1007_v5, %v1006_v34  ;;  %v494_v48 = vmul.f32 %v5028_v11, %v231_v33  ;;  %v756_v49 = vadd.f32 %v5008_v62, %v493_v36  ;;  %v246_v34 = vld [vmem:[%s5335_s0 + $0x740] sm:$0xff] }
  0xc0   :  { %v1010_v47 = vmax.f32 %v754_v2, 0.0  ;;  %3593 = vst [vmem:[%s5338_s3 + $0x340] sm:$0xff] %v3373_v40   ;;  %v1011_v52 = vmax.f32 %v755_v43, 0.0  ;;  %v495_v53 = vmul.f32 %v5028_v11, %v232_v37  ;;  %v496_v54 = vmul.f32 %v5028_v11, %v233_v38  ;;  %v247_v43 = vld [vmem:[%s5335_s0 + $0x748] sm:$0xff] }
  0xc1   :  { %v3383_v51 = vpack.c.bf16 %v1009_v42, %v1008_v41  ;;  %3594 = vst [vmem:[%s5338_s3 + $0x348] sm:$0xff] %v3378_v46   ;;  %v757_v56 = vadd.f32 %v5008_v62, %v494_v48  ;;  %v1012_v57 = vmax.f32 %v756_v49, 0.0  ;;  %v497_v58 = vmul.f32 %v5028_v11, %v234_v44  ;;  %v248_v48 = vld [vmem:[%s5335_s0 + $0x750] sm:$0xff]  ;;  %v249_v49 = vld [vmem:[%s5335_s0 + $0x758] sm:$0xff] }
  0xc2   :  { %v498_v59 = vmul.f32 %v5028_v11, %v235_v45  ;;  %v3388_v61 = vpack.c.bf16 %v1011_v52, %v1010_v47  ;;  %v758_v63 = vadd.f32 %v5008_v62, %v495_v53  ;;  %v759_v35 = vadd.f32 %v5008_v62, %v496_v54  ;;  %v250_v54 = vld [vmem:[%s5335_s0 + $0x760] sm:$0xff] }
  0xc3   :  { %3595 = vst [vmem:[%s5338_s3 + $0x350] sm:$0xff] %v3383_v51   ;;  %v499_v0 = vmul.f32 %v5028_v11, %v236_v50  ;;  %v1013_v1 = vmax.f32 %v757_v56, 0.0  ;;  %v760_v3 = vadd.f32 %v5008_v62, %v497_v58  ;;  %v500_v6 = vmul.f32 %v5028_v11, %v237_v55  ;;  %v251_v55 = vld [vmem:[%s5335_s0 + $0x768] sm:$0xff] }
  0xc4   :  { %v761_v4 = vadd.f32 %v5008_v62, %v498_v59  ;;  %3596 = vst [vmem:[%s5338_s3 + $0x358] sm:$0xff] %v3388_v61   ;;  %v1014_v8 = vmax.f32 %v758_v63, 0.0  ;;  %v1015_v39 = vmax.f32 %v759_v35, 0.0  ;;  %v501_v10 = vmul.f32 %v5028_v11, %v238_v60  ;;  %v252_v60 = vld [vmem:[%s5335_s0 + $0x770] sm:$0xff] }
  0xc5   :  { %v762_v9 = vadd.f32 %v5008_v62, %v499_v0  ;;  %v3393_v14 = vpack.c.bf16 %v1013_v1, %v1012_v57  ;;  %v1016_v15 = vmax.f32 %v760_v3, 0.0  ;;  %v763_v17 = vadd.f32 %v5008_v62, %v500_v6  ;;  %v253_v1 = vld [vmem:[%s5335_s0 + $0x778] sm:$0xff] }
  0xc6   :  { %v1017_v16 = vmax.f32 %v761_v4, 0.0  ;;  %v3398_v20 = vpack.c.bf16 %v1015_v39, %v1014_v8  ;;  %v502_v22 = vmul.f32 %v5028_v11, %v239_v7  ;;  %v764_v23 = vadd.f32 %v5008_v62, %v501_v10  ;;  %v254_v8 = vld [vmem:[%s5335_s0 + $0x780] sm:$0xff] }
  0xc7   :  { %v1018_v21 = vmax.f32 %v762_v9, 0.0  ;;  %3597 = vst [vmem:[%s5338_s3 + $0x360] sm:$0xff] %v3393_v14   ;;  %v1019_v26 = vmax.f32 %v763_v17, 0.0  ;;  %v503_v27 = vmul.f32 %v5028_v11, %v240_v12  ;;  %v504_v28 = vmul.f32 %v5028_v11, %v241_v13  ;;  %v255_v17 = vld [vmem:[%s5335_s0 + $0x788] sm:$0xff] }
  0xc8   :  { %v3403_v25 = vpack.c.bf16 %v1017_v16, %v1016_v15  ;;  %3598 = vst [vmem:[%s5338_s3 + $0x368] sm:$0xff] %v3398_v20   ;;  %v765_v30 = vadd.f32 %v5008_v62, %v502_v22  ;;  %v1020_v31 = vmax.f32 %v764_v23, 0.0  ;;  %v505_v32 = vmul.f32 %v5028_v11, %v242_v18  ;;  %v256_v22 = vld [vmem:[%s5335_s0 + $0x790] sm:$0xff]  ;;  %v257_v23 = vld [vmem:[%s5335_s0 + $0x798] sm:$0xff] }
  0xc9   :  { %v506_v33 = vmul.f32 %v5028_v11, %v243_v19  ;;  %v3408_v5 = vpack.c.bf16 %v1019_v26, %v1018_v21  ;;  %v766_v2 = vadd.f32 %v5008_v62, %v503_v27  ;;  %v767_v36 = vadd.f32 %v5008_v62, %v504_v28  ;;  %v258_v28 = vld [vmem:[%s5335_s0 + $0x7a0] sm:$0xff] }
  0xca   :  { %3599 = vst [vmem:[%s5338_s3 + $0x370] sm:$0xff] %v3403_v25   ;;  %v507_v37 = vmul.f32 %v5028_v11, %v244_v24  ;;  %v1021_v38 = vmax.f32 %v765_v30, 0.0  ;;  %v768_v40 = vadd.f32 %v5008_v62, %v505_v32  ;;  %v508_v42 = vmul.f32 %v5028_v11, %v245_v29  ;;  %v259_v29 = vld [vmem:[%s5335_s0 + $0x7a8] sm:$0xff] }
  0xcb   :  { %v769_v41 = vadd.f32 %v5008_v62, %v506_v33  ;;  %3600 = vst [vmem:[%s5338_s3 + $0x378] sm:$0xff] %v3408_v5   ;;  %v1022_v44 = vmax.f32 %v766_v2, 0.0  ;;  %v1023_v45 = vmax.f32 %v767_v36, 0.0  ;;  %v509_v47 = vmul.f32 %v5028_v11, %v246_v34  ;;  %v260_v34 = vld [vmem:[%s5335_s0 + $0x7b0] sm:$0xff] }
  0xcc   :  { %v770_v46 = vadd.f32 %v5008_v62, %v507_v37  ;;  %v3413_v50 = vpack.c.bf16 %v1021_v38, %v1020_v31  ;;  %v1024_v51 = vmax.f32 %v768_v40, 0.0  ;;  %v771_v53 = vadd.f32 %v5008_v62, %v508_v42  ;;  %v261_v38 = vld [vmem:[%s5335_s0 + $0x7b8] sm:$0xff] }
  0xcd   :  { %v1025_v52 = vmax.f32 %v769_v41, 0.0  ;;  %v3418_v56 = vpack.c.bf16 %v1023_v45, %v1022_v44  ;;  %v510_v58 = vmul.f32 %v5028_v11, %v247_v43  ;;  %v772_v59 = vadd.f32 %v5008_v62, %v509_v47  ;;  %v262_v44 = vld [vmem:[%s5335_s0 + $0x7c0] sm:$0xff] }
  0xce   :  { %v1026_v57 = vmax.f32 %v770_v46, 0.0  ;;  %3601 = vst [vmem:[%s5338_s3 + $0x380] sm:$0xff] %v3413_v50   ;;  %v1027_v63 = vmax.f32 %v771_v53, 0.0  ;;  %v511_v35 = vmul.f32 %v5028_v11, %v248_v48  ;;  %v512_v0 = vmul.f32 %v5028_v11, %v249_v49  ;;  %v263_v53 = vld [vmem:[%s5335_s0 + $0x7c8] sm:$0xff] }
  0xcf   :  { %v3423_v61 = vpack.c.bf16 %v1025_v52, %v1024_v51  ;;  %3602 = vst [vmem:[%s5338_s3 + $0x388] sm:$0xff] %v3418_v56   ;;  %v773_v3 = vadd.f32 %v5008_v62, %v510_v58  ;;  %v1028_v4 = vmax.f32 %v772_v59, 0.0  ;;  %v513_v6 = vmul.f32 %v5028_v11, %v250_v54  ;;  %v264_v58 = vld [vmem:[%s5335_s0 + $0x7d0] sm:$0xff]  ;;  %v265_v59 = vld [vmem:[%s5335_s0 + $0x7d8] sm:$0xff] }
  0xd0   :  { %v514_v7 = vmul.f32 %v5028_v11, %v251_v55  ;;  %v3428_v39 = vpack.c.bf16 %v1027_v63, %v1026_v57  ;;  %v774_v9 = vadd.f32 %v5008_v62, %v511_v35  ;;  %v775_v10 = vadd.f32 %v5008_v62, %v512_v0  ;;  %v266_v0 = vld [vmem:[%s5335_s0 + $0x7e0] sm:$0xff] }
  0xd1   :  { %3603 = vst [vmem:[%s5338_s3 + $0x390] sm:$0xff] %v3423_v61   ;;  %v515_v12 = vmul.f32 %v5028_v11, %v252_v60  ;;  %v1029_v13 = vmax.f32 %v773_v3, 0.0  ;;  %v776_v14 = vadd.f32 %v5008_v62, %v513_v6  ;;  %v516_v16 = vmul.f32 %v5028_v11, %v253_v1  ;;  %v267_v1 = vld [vmem:[%s5335_s0 + $0x7e8] sm:$0xff] }
  0xd2   :  { %v777_v15 = vadd.f32 %v5008_v62, %v514_v7  ;;  %3604 = vst [vmem:[%s5338_s3 + $0x398] sm:$0xff] %v3428_v39   ;;  %v1030_v18 = vmax.f32 %v774_v9, 0.0  ;;  %v1031_v19 = vmax.f32 %v775_v10, 0.0  ;;  %v517_v21 = vmul.f32 %v5028_v11, %v254_v8  ;;  %v268_v8 = vld [vmem:[%s5335_s0 + $0x7f0] sm:$0xff] }
  0xd3   :  { %v778_v20 = vadd.f32 %v5008_v62, %v515_v12  ;;  %v3433_v24 = vpack.c.bf16 %v1029_v13, %v1028_v4  ;;  %v1032_v25 = vmax.f32 %v776_v14, 0.0  ;;  %v779_v27 = vadd.f32 %v5008_v62, %v516_v16  ;;  %v269_v13 = vld [vmem:[%s5335_s0 + $0x7f8] sm:$0xff] }
  0xd4   :  { %v1033_v26 = vmax.f32 %v777_v15, 0.0  ;;  %v3438_v30 = vpack.c.bf16 %v1031_v19, %v1030_v18  ;;  %v518_v32 = vmul.f32 %v5028_v11, %v255_v17  ;;  %v780_v33 = vadd.f32 %v5008_v62, %v517_v21 }
  0xd5   :  { %v1034_v31 = vmax.f32 %v778_v20, 0.0  ;;  %3605 = vst [vmem:[%s5338_s3 + $0x3a0] sm:$0xff] %v3433_v24   ;;  %v1035_v2 = vmax.f32 %v779_v27, 0.0  ;;  %v519_v36 = vmul.f32 %v5028_v11, %v256_v22  ;;  %v520_v37 = vmul.f32 %v5028_v11, %v257_v23 }
  0xd6   :  { %v3443_v5 = vpack.c.bf16 %v1033_v26, %v1032_v25  ;;  %3606 = vst [vmem:[%s5338_s3 + $0x3a8] sm:$0xff] %v3438_v30   ;;  %v781_v40 = vadd.f32 %v5008_v62, %v518_v32  ;;  %v1036_v41 = vmax.f32 %v780_v33, 0.0  ;;  %v521_v42 = vmul.f32 %v5028_v11, %v258_v28 }
  0xd7   :  { %v522_v43 = vmul.f32 %v5028_v11, %v259_v29  ;;  %v3448_v45 = vpack.c.bf16 %v1035_v2, %v1034_v31  ;;  %v782_v46 = vadd.f32 %v5008_v62, %v519_v36  ;;  %v783_v47 = vadd.f32 %v5008_v62, %v520_v37 }
  0xd8   :  { %3607 = vst [vmem:[%s5338_s3 + $0x3b0] sm:$0xff] %v3443_v5   ;;  %v523_v48 = vmul.f32 %v5028_v11, %v260_v34  ;;  %v1037_v49 = vmax.f32 %v781_v40, 0.0  ;;  %v784_v50 = vadd.f32 %v5008_v62, %v521_v42  ;;  %v524_v52 = vmul.f32 %v5028_v11, %v261_v38 }
  0xd9   :  { %v785_v51 = vadd.f32 %v5008_v62, %v522_v43  ;;  %3608 = vst [vmem:[%s5338_s3 + $0x3b8] sm:$0xff] %v3448_v45   ;;  %v1038_v54 = vmax.f32 %v782_v46, 0.0  ;;  %v1039_v55 = vmax.f32 %v783_v47, 0.0  ;;  %v525_v57 = vmul.f32 %v5028_v11, %v262_v44 }
  0xda   :  { %v786_v56 = vadd.f32 %v5008_v62, %v523_v48  ;;  %v3453_v60 = vpack.c.bf16 %v1037_v49, %v1036_v41  ;;  %v1040_v61 = vmax.f32 %v784_v50, 0.0  ;;  %v787_v35 = vadd.f32 %v5008_v62, %v524_v52 }
  0xdb   :  { %v1041_v63 = vmax.f32 %v785_v51, 0.0  ;;  %v3458_v3 = vpack.c.bf16 %v1039_v55, %v1038_v54  ;;  %v526_v6 = vmul.f32 %v5028_v11, %v263_v53  ;;  %v788_v7 = vadd.f32 %v5008_v62, %v525_v57 }
  0xdc   :  { %v1042_v4 = vmax.f32 %v786_v56, 0.0  ;;  %3609 = vst [vmem:[%s5338_s3 + $0x3c0] sm:$0xff] %v3453_v60   ;;  %v1043_v9 = vmax.f32 %v787_v35, 0.0  ;;  %v527_v10 = vmul.f32 %v5028_v11, %v264_v58  ;;  %v528_v12 = vmul.f32 %v5028_v11, %v265_v59 }
  0xdd   :  { %v3463_v39 = vpack.c.bf16 %v1041_v63, %v1040_v61  ;;  %3610 = vst [vmem:[%s5338_s3 + $0x3c8] sm:$0xff] %v3458_v3   ;;  %v789_v14 = vadd.f32 %v5008_v62, %v526_v6  ;;  %v1044_v15 = vmax.f32 %v788_v7, 0.0  ;;  %v529_v16 = vmul.f32 %v5028_v11, %v266_v0 }
  0xde   :  { %v530_v17 = vmul.f32 %v5028_v11, %v267_v1  ;;  %v3468_v18 = vpack.c.bf16 %v1043_v9, %v1042_v4  ;;  %v790_v19 = vadd.f32 %v5008_v62, %v527_v10  ;;  %v791_v20 = vadd.f32 %v5008_v62, %v528_v12 }
  0xdf   :  { %3611 = vst [vmem:[%s5338_s3 + $0x3d0] sm:$0xff] %v3463_v39   ;;  %v531_v21 = vmul.f32 %v5028_v11, %v268_v8  ;;  %v1045_v22 = vmax.f32 %v789_v14, 0.0  ;;  %v792_v23 = vadd.f32 %v5008_v62, %v529_v16  ;;  %v532_v25 = vmul.f32 %v5028_v11, %v269_v13 }
  0xe0   :  { %v793_v24 = vadd.f32 %v5008_v62, %v530_v17  ;;  %3612 = vst [vmem:[%s5338_s3 + $0x3d8] sm:$0xff] %v3468_v18   ;;  %v1046_v26 = vmax.f32 %v790_v19, 0.0  ;;  %v1047_v27 = vmax.f32 %v791_v20, 0.0 }
  0xe1   :  { %v794_v28 = vadd.f32 %v5008_v62, %v531_v21  ;;  %v3473_v29 = vpack.c.bf16 %v1045_v22, %v1044_v15  ;;  %v1048_v30 = vmax.f32 %v792_v23, 0.0  ;;  %v795_v32 = vadd.f32 %v5008_v62, %v532_v25 }
  0xe2   :  { %v1049_v31 = vmax.f32 %v793_v24, 0.0  ;;  %v3478_v33 = vpack.c.bf16 %v1047_v27, %v1046_v26 }
  0xe3   :  { %v1050_v34 = vmax.f32 %v794_v28, 0.0  ;;  %3613 = vst [vmem:[%s5338_s3 + $0x3e0] sm:$0xff] %v3473_v29   ;;  %v1051_v5 = vmax.f32 %v795_v32, 0.0 }
  0xe4   :  { %v3483_v11 = vpack.c.bf16 %v1049_v31, %v1048_v30  ;;  %3614 = vst [vmem:[%s5338_s3 + $0x3e8] sm:$0xff] %v3478_v33  }
  0xe5   :  { %v3488_v2 = vpack.c.bf16 %v1051_v5, %v1050_v34 }
  0xe6   :  { %3615 = vst [vmem:[%s5338_s3 + $0x3f0] sm:$0xff] %v3483_v11  }
  0xe7   :  { %3616 = vst [vmem:[%s5338_s3 + $0x3f8] sm:$0xff] %v3488_v2  }

// kernel: netG_forward.17
= control target key start
LH: loop header
LB: loop body
LE: loop exit
PB: predicated region body
PF: predicated region fallthrough
CT: control target
= control target key end

     0   :  { %s4439_s9 = smov 0   ;;  %s4980_s0 = inlined_call_operand.vmem [shape: bf16[4,2048,32], index: 0, kind: input, shape index: {}]   ;;  %s4981_s1 = inlined_call_operand.vmem [shape: bf16[4,32,128], index: 1, kind: input, shape index: {}]   ;;  %s4982_s2 = inlined_call_operand.vmem [shape: f32[4,2048,128], index: 2, kind: output, shape index: {}]  }
   0x1 LB: > { %s3098_s10 = sadd.s32 4294967295, %s4422_s9   ;;  %p3102_p0 = scmp.ge.s32.totalorder %s4422_s9, 1  ;;  %s4422_s9 = sphi %s4439_s9, %s12_s9  }
   0x2   : > { %p122_p1 = scmp.lt.s32.totalorder %s4422_s9, 5 }
   0x4   : > { %p123_p2 = pnand %p3102_p0, %p122_p1 }
   0x5   : > { %p149_p3 = scmp.lt.s32.totalorder (!%p123_p2), %s3098_s10, 3 }
   0x6   : > { %126 = sbr.rel (%p123_p2) target bundleno = 486 (0x1e6), region = 28 }
   0xb   : > { %s4984_s10 = smov (!%p149_p3, %s3098_s10), 3  ;;  %vm1077_vm0 = vcmask 261120  }
   0xc   : > { %s3369_s11 = sshll.u32 %s4984_s10, 10  ;;  %s3370_s12 = sshll.u32 %s4984_s10, 4 }
   0xd   : > { %s4454_s15 = scalar_lea.vmem %s4980_s0, %s3369_s11  ;;  %s158_s18 = scalar_lea.vmem %s4981_s1, %s3370_s12 }
   0xe   : > { %v3774_v0 = vld [vmem:[%s158_s18 + $0x8] sm:$0xff]   ;;  %v3775_v1 = vld [vmem:[%s158_s18] sm:$0xff]   ;;  %v3780_v6 = vld [vmem:[%s4454_s15 + $0x10] sm:$0xff]   ;;  %s3371_s19 = sshll.u32 %s4984_s10, 11 }
   0xf   : > { %3502 = vmatprep.subr.bf16.mxu0 %v3774_v0  ;;  %3762 = vmatprep.subr.bf16.mxu1 %v3774_v0  ;;  %v3776_v2 = vld [vmem:[%s4454_s15] sm:$0xff]   ;;  %v3778_v4 = vld [vmem:[%s4454_s15 + $0x8] sm:$0xff]   ;;  %v3781_v7 = vld [vmem:[%s4454_s15 + $0x210] sm:$0xff]   ;;  %s4675_s22 = scalar_lea.vmem %s4982_s2, %s3371_s19 }
  0x10   : > { %3503 = vmatpush3.bf16.msra.mxu0 %v3774_v0  ;;  %3764 = vmatpush3.bf16.msra.mxu1 %v3774_v0  ;;  %v3777_v3 = vld [vmem:[%s4454_s15 + $0x200] sm:$0xff]   ;;  %v3779_v5 = vld [vmem:[%s4454_s15 + $0x208] sm:$0xff]   ;;  %v3782_v8 = vld [vmem:[%s4454_s15 + $0x18] sm:$0xff]  }
  0x11   : > { %3504 = vmatprep.subr.bf16.mxu0 %v3775_v1  ;;  %3763 = vmatprep.subr.bf16.mxu1 %v3775_v1  ;;  %v3783_v9 = vld [vmem:[%s4454_s15 + $0x218] sm:$0xff]   ;;  %v3784_v10 = vld [vmem:[%s4454_s15 + $0x20] sm:$0xff]   ;;  %v3786_v12 = vld [vmem:[%s4454_s15 + $0x28] sm:$0xff]  }
  0x12   : > { %3506 = vmatprep.mubr.msk.bf16.mxu0 %vm1077_vm0, %v3776_v2  ;;  %3634 = vmatprep.mubr.msk.bf16.mxu1 %vm1077_vm0, %v3777_v3  ;;  %v3785_v11 = vld [vmem:[%s4454_s15 + $0x220] sm:$0xff]   ;;  %v3787_v13 = vld [vmem:[%s4454_s15 + $0x228] sm:$0xff]   ;;  %v3788_v14 = vld [vmem:[%s4454_s15 + $0x30] sm:$0xff]  }
  0x13   : > { %v3789_v15 = vld [vmem:[%s4454_s15 + $0x230] sm:$0xff]   ;;  %v3790_v16 = vld [vmem:[%s4454_s15 + $0x38] sm:$0xff]   ;;  %v3792_v18 = vld [vmem:[%s4454_s15 + $0x40] sm:$0xff]  }
  0x14   : > { %3505 = vmatpush3.bf16.msra.mxu0 %v3775_v1  ;;  %3765 = vmatpush3.bf16.msra.mxu1 %v3775_v1  ;;  %v3791_v17 = vld [vmem:[%s4454_s15 + $0x238] sm:$0xff]   ;;  %v3793_v19 = vld [vmem:[%s4454_s15 + $0x240] sm:$0xff]   ;;  %v3794_v20 = vld [vmem:[%s4454_s15 + $0x48] sm:$0xff]  }
  0x15   : > { %v3795_v21 = vld [vmem:[%s4454_s15 + $0x248] sm:$0xff]   ;;  %v3796_v22 = vld [vmem:[%s4454_s15 + $0x50] sm:$0xff]   ;;  %v3798_v24 = vld [vmem:[%s4454_s15 + $0x58] sm:$0xff]  }
  0x16   : > { %v3797_v23 = vld [vmem:[%s4454_s15 + $0x250] sm:$0xff]   ;;  %v3799_v25 = vld [vmem:[%s4454_s15 + $0x258] sm:$0xff]   ;;  %v3800_v26 = vld [vmem:[%s4454_s15 + $0x60] sm:$0xff]  }
  0x17   : > { %3507 = vmatmul.mubr.msk.bf16.vlgmr.msra.gmra.mxu0 %vm1077_vm0, %v3778_v4  ;;  %3635 = vmatmul.mubr.msk.bf16.vlgmr.msra.gmra.mxu1 %vm1077_vm0, %v3779_v5  ;;  %v3801_v27 = vld [vmem:[%s4454_s15 + $0x260] sm:$0xff]   ;;  %v3802_v28 = vld [vmem:[%s4454_s15 + $0x68] sm:$0xff]   ;;  %v3804_v30 = vld [vmem:[%s4454_s15 + $0x70] sm:$0xff]  }
  0x18   : > { %3510 = vmatprep.mubr.msk.bf16.mxu0 %vm1077_vm0, %v3780_v6  ;;  %3638 = vmatprep.mubr.msk.bf16.mxu1 %vm1077_vm0, %v3781_v7  ;;  %v3803_v29 = vld [vmem:[%s4454_s15 + $0x268] sm:$0xff]   ;;  %v3805_v31 = vld [vmem:[%s4454_s15 + $0x270] sm:$0xff]   ;;  %v3806_v32 = vld [vmem:[%s4454_s15 + $0x78] sm:$0xff]  }
  0x19   : > { %v3807_v33 = vld [vmem:[%s4454_s15 + $0x278] sm:$0xff]   ;;  %v3808_v34 = vld [vmem:[%s4454_s15 + $0x80] sm:$0xff]   ;;  %v3810_v36 = vld [vmem:[%s4454_s15 + $0x88] sm:$0xff]  }
  0x1a   : > { %v3809_v35 = vld [vmem:[%s4454_s15 + $0x280] sm:$0xff]   ;;  %v3811_v37 = vld [vmem:[%s4454_s15 + $0x288] sm:$0xff]   ;;  %v3812_v38 = vld [vmem:[%s4454_s15 + $0x90] sm:$0xff]  }
  0x1b   : > { %v3813_v39 = vld [vmem:[%s4454_s15 + $0x290] sm:$0xff]   ;;  %v3814_v40 = vld [vmem:[%s4454_s15 + $0x98] sm:$0xff]   ;;  %v3816_v42 = vld [vmem:[%s4454_s15 + $0xa0] sm:$0xff]  }
  0x1c   : > { %v3815_v41 = vld [vmem:[%s4454_s15 + $0x298] sm:$0xff]   ;;  %v3817_v43 = vld [vmem:[%s4454_s15 + $0x2a0] sm:$0xff]   ;;  %v3818_v44 = vld [vmem:[%s4454_s15 + $0xa8] sm:$0xff]  }
  0x1d   : > { %v3819_v45 = vld [vmem:[%s4454_s15 + $0x2a8] sm:$0xff]   ;;  %v3820_v46 = vld [vmem:[%s4454_s15 + $0xb0] sm:$0xff]   ;;  %v3822_v48 = vld [vmem:[%s4454_s15 + $0xb8] sm:$0xff]  }
  0x1e   : > { %v3821_v47 = vld [vmem:[%s4454_s15 + $0x2b0] sm:$0xff]   ;;  %v3823_v49 = vld [vmem:[%s4454_s15 + $0x2b8] sm:$0xff]   ;;  %v3824_v50 = vld [vmem:[%s4454_s15 + $0xc0] sm:$0xff]  }
  0x1f   : > { %3511 = vmatmul.mubr.msk.bf16.gmra.mxu0 %vm1077_vm0, %v3782_v8  ;;  %3639 = vmatmul.mubr.msk.bf16.gmra.mxu1 %vm1077_vm0, %v3783_v9  ;;  %v3825_v51 = vld [vmem:[%s4454_s15 + $0x2c0] sm:$0xff]   ;;  %v3826_v52 = vld [vmem:[%s4454_s15 + $0xc8] sm:$0xff]   ;;  %v3828_v54 = vld [vmem:[%s4454_s15 + $0xd0] sm:$0xff]  }
  0x20   : > { %3514 = vmatprep.mubr.msk.bf16.mxu0 %vm1077_vm0, %v3784_v10  ;;  %3642 = vmatprep.mubr.msk.bf16.mxu1 %vm1077_vm0, %v3785_v11  ;;  %v3827_v53 = vld [vmem:[%s4454_s15 + $0x2c8] sm:$0xff]   ;;  %v3829_v55 = vld [vmem:[%s4454_s15 + $0x2d0] sm:$0xff]   ;;  %v3830_v56 = vld [vmem:[%s4454_s15 + $0xd8] sm:$0xff]  }
  0x21   : > { %v3831_v57 = vld [vmem:[%s4454_s15 + $0x2d8] sm:$0xff]   ;;  %v3832_v58 = vld [vmem:[%s4454_s15 + $0xe0] sm:$0xff]   ;;  %v3834_v60 = vld [vmem:[%s4454_s15 + $0xe8] sm:$0xff]  }
  0x22   : > { %v3833_v59 = vld [vmem:[%s4454_s15 + $0x2e0] sm:$0xff]   ;;  %v3835_v61 = vld [vmem:[%s4454_s15 + $0x2e8] sm:$0xff]   ;;  %v3836_v62 = vld [vmem:[%s4454_s15 + $0xf0] sm:$0xff]  }
  0x23   : > { %v3837_v63 = vld [vmem:[%s4454_s15 + $0x2f0] sm:$0xff]   ;;  %v3838_v0 = vld [vmem:[%s4454_s15 + $0xf8] sm:$0xff]   ;;  %v3840_v2 = vld [vmem:[%s4454_s15 + $0x100] sm:$0xff]  }
  0x24   : > { %v3839_v1 = vld [vmem:[%s4454_s15 + $0x2f8] sm:$0xff]   ;;  %v3841_v3 = vld [vmem:[%s4454_s15 + $0x300] sm:$0xff]   ;;  %v3842_v4 = vld [vmem:[%s4454_s15 + $0x108] sm:$0xff]  }
  0x25   : > { %v3843_v5 = vld [vmem:[%s4454_s15 + $0x308] sm:$0xff]   ;;  %v3844_v6 = vld [vmem:[%s4454_s15 + $0x110] sm:$0xff]   ;;  %v3846_v8 = vld [vmem:[%s4454_s15 + $0x118] sm:$0xff]  }
  0x26   : > { %v3845_v7 = vld [vmem:[%s4454_s15 + $0x310] sm:$0xff]   ;;  %v3847_v9 = vld [vmem:[%s4454_s15 + $0x318] sm:$0xff]   ;;  %v3848_v10 = vld [vmem:[%s4454_s15 + $0x120] sm:$0xff]  }
  0x27   : > { %3515 = vmatmul.mubr.msk.bf16.gmra.mxu0 %vm1077_vm0, %v3786_v12  ;;  %3643 = vmatmul.mubr.msk.bf16.gmra.mxu1 %vm1077_vm0, %v3787_v13  ;;  %v3849_v11 = vld [vmem:[%s4454_s15 + $0x320] sm:$0xff]   ;;  %v3850_v12 = vld [vmem:[%s4454_s15 + $0x128] sm:$0xff]  }
  0x28   : > { %3518 = vmatprep.mubr.msk.bf16.mxu0 %vm1077_vm0, %v3788_v14  ;;  %3646 = vmatprep.mubr.msk.bf16.mxu1 %vm1077_vm0, %v3789_v15  ;;  %v3851_v13 = vld [vmem:[%s4454_s15 + $0x328] sm:$0xff]   ;;  %v3852_v14 = vld [vmem:[%s4454_s15 + $0x130] sm:$0xff]  }
  0x29   : > { %v3853_v15 = vld [vmem:[%s4454_s15 + $0x330] sm:$0xff]  }
  0x2f   : > { %3519 = vmatmul.mubr.msk.bf16.gmra.mxu0 %vm1077_vm0, %v3790_v16  ;;  %3647 = vmatmul.mubr.msk.bf16.gmra.mxu1 %vm1077_vm0, %v3791_v17  ;;  %v3854_v16 = vld [vmem:[%s4454_s15 + $0x138] sm:$0xff]  }
  0x30   : > { %3522 = vmatprep.mubr.msk.bf16.mxu0 %vm1077_vm0, %v3792_v18  ;;  %3650 = vmatprep.mubr.msk.bf16.mxu1 %vm1077_vm0, %v3793_v19  ;;  %v3855_v17 = vld [vmem:[%s4454_s15 + $0x338] sm:$0xff]   ;;  %v3856_v18 = vld [vmem:[%s4454_s15 + $0x140] sm:$0xff]  }
  0x31   : > { %v3857_v19 = vld [vmem:[%s4454_s15 + $0x340] sm:$0xff]  }
  0x37   : > { %3523 = vmatmul.mubr.msk.bf16.gmra.mxu0 %vm1077_vm0, %v3794_v20  ;;  %3651 = vmatmul.mubr.msk.bf16.gmra.mxu1 %vm1077_vm0, %v3795_v21  ;;  %v3858_v20 = vld [vmem:[%s4454_s15 + $0x148] sm:$0xff]  }
  0x38   : > { %3526 = vmatprep.mubr.msk.bf16.mxu0 %vm1077_vm0, %v3796_v22  ;;  %3654 = vmatprep.mubr.msk.bf16.mxu1 %vm1077_vm0, %v3797_v23  ;;  %v3859_v21 = vld [vmem:[%s4454_s15 + $0x348] sm:$0xff]   ;;  %v3860_v22 = vld [vmem:[%s4454_s15 + $0x150] sm:$0xff]  }
  0x39   : > { %v3861_v23 = vld [vmem:[%s4454_s15 + $0x350] sm:$0xff]  }
  0x3f   : > { %3527 = vmatmul.mubr.msk.bf16.gmra.mxu0 %vm1077_vm0, %v3798_v24  ;;  %3655 = vmatmul.mubr.msk.bf16.gmra.mxu1 %vm1077_vm0, %v3799_v25  ;;  %v3862_v24 = vld [vmem:[%s4454_s15 + $0x158] sm:$0xff]  }
  0x40   : > { %3530 = vmatprep.mubr.msk.bf16.mxu0 %vm1077_vm0, %v3800_v26  ;;  %3658 = vmatprep.mubr.msk.bf16.mxu1 %vm1077_vm0, %v3801_v27  ;;  %v3863_v25 = vld [vmem:[%s4454_s15 + $0x358] sm:$0xff]   ;;  %v3864_v26 = vld [vmem:[%s4454_s15 + $0x160] sm:$0xff]  }
  0x41   : > { %v3865_v27 = vld [vmem:[%s4454_s15 + $0x360] sm:$0xff]  }
  0x47   : > { %3531 = vmatmul.mubr.msk.bf16.gmra.mxu0 %vm1077_vm0, %v3802_v28  ;;  %3659 = vmatmul.mubr.msk.bf16.gmra.mxu1 %vm1077_vm0, %v3803_v29  ;;  %v3866_v28 = vld [vmem:[%s4454_s15 + $0x168] sm:$0xff]  }
  0x48   : > { %3534 = vmatprep.mubr.msk.bf16.mxu0 %vm1077_vm0, %v3804_v30  ;;  %3662 = vmatprep.mubr.msk.bf16.mxu1 %vm1077_vm0, %v3805_v31  ;;  %v3867_v29 = vld [vmem:[%s4454_s15 + $0x368] sm:$0xff]   ;;  %v3868_v30 = vld [vmem:[%s4454_s15 + $0x170] sm:$0xff]  }
  0x49   : > { %v3869_v31 = vld [vmem:[%s4454_s15 + $0x370] sm:$0xff]  }
  0x4f   : > { %3535 = vmatmul.mubr.msk.bf16.gmra.mxu0 %vm1077_vm0, %v3806_v32  ;;  %3663 = vmatmul.mubr.msk.bf16.gmra.mxu1 %vm1077_vm0, %v3807_v33  ;;  %v3870_v32 = vld [vmem:[%s4454_s15 + $0x178] sm:$0xff]  }
  0x50   : > { %3538 = vmatprep.mubr.msk.bf16.mxu0 %vm1077_vm0, %v3808_v34  ;;  %3666 = vmatprep.mubr.msk.bf16.mxu1 %vm1077_vm0, %v3809_v35  ;;  %v3871_v33 = vld [vmem:[%s4454_s15 + $0x378] sm:$0xff]   ;;  %v3872_v34 = vld [vmem:[%s4454_s15 + $0x180] sm:$0xff]  }
  0x51   : > { %v3873_v35 = vld [vmem:[%s4454_s15 + $0x380] sm:$0xff]  }
  0x57   : > { %3539 = vmatmul.mubr.msk.bf16.gmra.mxu0 %vm1077_vm0, %v3810_v36  ;;  %3667 = vmatmul.mubr.msk.bf16.gmra.mxu1 %vm1077_vm0, %v3811_v37  ;;  %v3874_v36 = vld [vmem:[%s4454_s15 + $0x188] sm:$0xff]  }
  0x58   : > { %3542 = vmatprep.mubr.msk.bf16.mxu0 %vm1077_vm0, %v3812_v38  ;;  %3670 = vmatprep.mubr.msk.bf16.mxu1 %vm1077_vm0, %v3813_v39  ;;  %v3875_v37 = vld [vmem:[%s4454_s15 + $0x388] sm:$0xff]   ;;  %v3876_v38 = vld [vmem:[%s4454_s15 + $0x190] sm:$0xff]  }
  0x59   : > { %v3877_v39 = vld [vmem:[%s4454_s15 + $0x390] sm:$0xff]  }
  0x5f   : > { %3543 = vmatmul.mubr.msk.bf16.gmra.mxu0 %vm1077_vm0, %v3814_v40  ;;  %3671 = vmatmul.mubr.msk.bf16.gmra.mxu1 %vm1077_vm0, %v3815_v41 }
  0x60   : > { %3546 = vmatprep.mubr.msk.bf16.mxu0 %vm1077_vm0, %v3816_v42  ;;  %3674 = vmatprep.mubr.msk.bf16.mxu1 %vm1077_vm0, %v3817_v43 }
  0x67   : > { %3547 = vmatmul.mubr.msk.bf16.gmra.mxu0 %vm1077_vm0, %v3818_v44  ;;  %3675 = vmatmul.mubr.msk.bf16.gmra.mxu1 %vm1077_vm0, %v3819_v45 }
  0x68   : > { %3550 = vmatprep.mubr.msk.bf16.mxu0 %vm1077_vm0, %v3820_v46  ;;  %3678 = vmatprep.mubr.msk.bf16.mxu1 %vm1077_vm0, %v3821_v47  ;;  %v3878_v46 = vld [vmem:[%s4454_s15 + $0x198] sm:$0xff]  }
  0x69   : > { %v3879_v47 = vld [vmem:[%s4454_s15 + $0x398] sm:$0xff]  }
  0x6f   : > { %3551 = vmatmul.mubr.msk.bf16.gmra.mxu0 %vm1077_vm0, %v3822_v48  ;;  %3679 = vmatmul.mubr.msk.bf16.gmra.mxu1 %vm1077_vm0, %v3823_v49  ;;  %v3880_v48 = vld [vmem:[%s4454_s15 + $0x1a0] sm:$0xff]  }
  0x70   : > { %3554 = vmatprep.mubr.msk.bf16.mxu0 %vm1077_vm0, %v3824_v50  ;;  %3682 = vmatprep.mubr.msk.bf16.mxu1 %vm1077_vm0, %v3825_v51  ;;  %v3881_v49 = vld [vmem:[%s4454_s15 + $0x3a0] sm:$0xff]  }
  0x77   : > { %3555 = vmatmul.mubr.msk.bf16.gmra.mxu0 %vm1077_vm0, %v3826_v52  ;;  %3683 = vmatmul.mubr.msk.bf16.gmra.mxu1 %vm1077_vm0, %v3827_v53 }
  0x78   : > { %3558 = vmatprep.mubr.msk.bf16.mxu0 %vm1077_vm0, %v3828_v54  ;;  %3686 = vmatprep.mubr.msk.bf16.mxu1 %vm1077_vm0, %v3829_v55 }
  0x7f   : > { %3559 = vmatmul.mubr.msk.bf16.gmra.mxu0 %vm1077_vm0, %v3830_v56  ;;  %3687 = vmatmul.mubr.msk.bf16.gmra.mxu1 %vm1077_vm0, %v3831_v57 }
  0x80   : > { %3562 = vmatprep.mubr.msk.bf16.mxu0 %vm1077_vm0, %v3832_v58  ;;  %3690 = vmatprep.mubr.msk.bf16.mxu1 %vm1077_vm0, %v3833_v59  ;;  %v3882_v58 = vld [vmem:[%s4454_s15 + $0x1a8] sm:$0xff]  }
  0x81   : > { %v3883_v59 = vld [vmem:[%s4454_s15 + $0x3a8] sm:$0xff]  }
  0x87   : > { %3563 = vmatmul.mubr.msk.bf16.gmra.mxu0 %vm1077_vm0, %v3834_v60  ;;  %3691 = vmatmul.mubr.msk.bf16.gmra.mxu1 %vm1077_vm0, %v3835_v61  ;;  %v3884_v60 = vld [vmem:[%s4454_s15 + $0x1b0] sm:$0xff]  }
  0x88   : > { %3566 = vmatprep.mubr.msk.bf16.mxu0 %vm1077_vm0, %v3836_v62  ;;  %3694 = vmatprep.mubr.msk.bf16.mxu1 %vm1077_vm0, %v3837_v63  ;;  %v3885_v61 = vld [vmem:[%s4454_s15 + $0x3b0] sm:$0xff]  }
  0x8f   : > { %3567 = vmatmul.mubr.msk.bf16.gmra.mxu0 %vm1077_vm0, %v3838_v0  ;;  %3695 = vmatmul.mubr.msk.bf16.gmra.mxu1 %vm1077_vm0, %v3839_v1 }
  0x90   : > { %3570 = vmatprep.mubr.msk.bf16.mxu0 %vm1077_vm0, %v3840_v2  ;;  %3698 = vmatprep.mubr.msk.bf16.mxu1 %vm1077_vm0, %v3841_v3 }
  0x97   : > { %3571 = vmatmul.mubr.msk.bf16.gmra.mxu0 %vm1077_vm0, %v3842_v4  ;;  %3699 = vmatmul.mubr.msk.bf16.gmra.mxu1 %vm1077_vm0, %v3843_v5 }
  0x98   : > { %3574 = vmatprep.mubr.msk.bf16.mxu0 %vm1077_vm0, %v3844_v6  ;;  %3702 = vmatprep.mubr.msk.bf16.mxu1 %vm1077_vm0, %v3845_v7 }
  0x9f   : > { %3575 = vmatmul.mubr.msk.bf16.gmra.mxu0 %vm1077_vm0, %v3846_v8  ;;  %3703 = vmatmul.mubr.msk.bf16.gmra.mxu1 %vm1077_vm0, %v3847_v9 }
  0xa0   : > { %3578 = vmatprep.mubr.msk.bf16.mxu0 %vm1077_vm0, %v3848_v10  ;;  %3706 = vmatprep.mubr.msk.bf16.mxu1 %vm1077_vm0, %v3849_v11 }
  0xa7   : > { %3579 = vmatmul.mubr.msk.bf16.gmra.mxu0 %vm1077_vm0, %v3850_v12  ;;  %3707 = vmatmul.mubr.msk.bf16.gmra.mxu1 %vm1077_vm0, %v3851_v13  ;;  %v3886_v13 = vld [vmem:[%s4454_s15 + $0x1b8] sm:$0xff]  }
  0xa8   : > { %3582 = vmatprep.mubr.msk.bf16.mxu0 %vm1077_vm0, %v3852_v14  ;;  %3710 = vmatprep.mubr.msk.bf16.mxu1 %vm1077_vm0, %v3853_v15  ;;  %v3887_v14 = vld [vmem:[%s4454_s15 + $0x3b8] sm:$0xff]  }
  0xaf   : > { %3583 = vmatmul.mubr.msk.bf16.gmra.mxu0 %vm1077_vm0, %v3854_v16  ;;  %3711 = vmatmul.mubr.msk.bf16.gmra.mxu1 %vm1077_vm0, %v3855_v17  ;;  %v3888_v16 = vld [vmem:[%s4454_s15 + $0x1c0] sm:$0xff]  }
  0xb0   : > { %3586 = vmatprep.mubr.msk.bf16.mxu0 %vm1077_vm0, %v3856_v18  ;;  %3714 = vmatprep.mubr.msk.bf16.mxu1 %vm1077_vm0, %v3857_v19  ;;  %v3889_v17 = vld [vmem:[%s4454_s15 + $0x3c0] sm:$0xff]  }
  0xb7   : > { %3587 = vmatmul.mubr.msk.bf16.gmra.mxu0 %vm1077_vm0, %v3858_v20  ;;  %3715 = vmatmul.mubr.msk.bf16.gmra.mxu1 %vm1077_vm0, %v3859_v21 }
  0xb8   : > { %3590 = vmatprep.mubr.msk.bf16.mxu0 %vm1077_vm0, %v3860_v22  ;;  %3718 = vmatprep.mubr.msk.bf16.mxu1 %vm1077_vm0, %v3861_v23 }
  0xbf   : > { %3591 = vmatmul.mubr.msk.bf16.gmra.mxu0 %vm1077_vm0, %v3862_v24  ;;  %3719 = vmatmul.mubr.msk.bf16.gmra.mxu1 %vm1077_vm0, %v3863_v25 }
  0xc0   : > { %3594 = vmatprep.mubr.msk.bf16.mxu0 %vm1077_vm0, %v3864_v26  ;;  %3722 = vmatprep.mubr.msk.bf16.mxu1 %vm1077_vm0, %v3865_v27 }
  0xc7   : > { %3595 = vmatmul.mubr.msk.bf16.gmra.mxu0 %vm1077_vm0, %v3866_v28  ;;  %3723 = vmatmul.mubr.msk.bf16.gmra.mxu1 %vm1077_vm0, %v3867_v29 }
  0xc8   : > { %3598 = vmatprep.mubr.msk.bf16.mxu0 %vm1077_vm0, %v3868_v30  ;;  %3726 = vmatprep.mubr.msk.bf16.mxu1 %vm1077_vm0, %v3869_v31 }
  0xcf   : > { %3599 = vmatmul.mubr.msk.bf16.gmra.mxu0 %vm1077_vm0, %v3870_v32  ;;  %3727 = vmatmul.mubr.msk.bf16.gmra.mxu1 %vm1077_vm0, %v3871_v33  ;;  %v3890_v33 = vld [vmem:[%s4454_s15 + $0x1c8] sm:$0xff]  }
  0xd0   : > { %3602 = vmatprep.mubr.msk.bf16.mxu0 %vm1077_vm0, %v3872_v34  ;;  %3730 = vmatprep.mubr.msk.bf16.mxu1 %vm1077_vm0, %v3873_v35  ;;  %v3891_v34 = vld [vmem:[%s4454_s15 + $0x3c8] sm:$0xff]  }
  0xd7   : > { %v3508_v40 = vpop.f32.mrf.mxu0  ;;  %3603 = vmatmul.mubr.msk.bf16.gmra.mxu0 %vm1077_vm0, %v3874_v36  ;;  %v3636_v41 = vpop.f32.mrf.mxu1  ;;  %3731 = vmatmul.mubr.msk.bf16.gmra.mxu1 %vm1077_vm0, %v3875_v37  ;;  %v3892_v36 = vld [vmem:[%s4454_s15 + $0x1d0] sm:$0xff]  }
  0xd8   : > { %3904 = vtanh.f32 %v3508_v40  ;;  %3606 = vmatprep.mubr.msk.bf16.mxu0 %vm1077_vm0, %v3876_v38  ;;  %3734 = vmatprep.mubr.msk.bf16.mxu1 %vm1077_vm0, %v3877_v39  ;;  %v3893_v37 = vld [vmem:[%s4454_s15 + $0x3d0] sm:$0xff]  }
  0xd9   : > { %3906 = vtanh.f32 %v3636_v41  ;;  %v1496_v42 = vpop.f32.mrf.mxu0  ;;  %v2008_v43 = vpop.f32.mrf.mxu1 }
  0xda   : > { %3908 = vtanh.f32 %v1496_v42 }
  0xdb   : > { %3910 = vtanh.f32 %v2008_v43  ;;  %v3509_v44 = vpop.f32.mrf.mxu0  ;;  %v3637_v45 = vpop.f32.mrf.mxu1 }
  0xdc   : > { %3912 = vtanh.f32 %v3509_v44 }
  0xdd   : > { %3914 = vtanh.f32 %v3637_v45  ;;  %v1499_v50 = vpop.f32.mrf.mxu0  ;;  %v2011_v51 = vpop.f32.mrf.mxu1 }
  0xde   : > { %3916 = vtanh.f32 %v1499_v50 }
  0xdf   : > { %3918 = vtanh.f32 %v2011_v51  ;;  %v3512_v52 = vpop.f32.mrf.mxu0  ;;  %3607 = vmatmul.mubr.msk.bf16.gmra.mxu0 %vm1077_vm0, %v3878_v46  ;;  %v3640_v53 = vpop.f32.mrf.mxu1  ;;  %3735 = vmatmul.mubr.msk.bf16.gmra.mxu1 %vm1077_vm0, %v3879_v47 }
  0xe0   : > { %3920 = vtanh.f32 %v3512_v52  ;;  %3610 = vmatprep.mubr.msk.bf16.mxu0 %vm1077_vm0, %v3880_v48  ;;  %3738 = vmatprep.mubr.msk.bf16.mxu1 %vm1077_vm0, %v3881_v49 }
  0xe1   : > { %3922 = vtanh.f32 %v3640_v53  ;;  %v1512_v54 = vpop.f32.mrf.mxu0  ;;  %v2024_v55 = vpop.f32.mrf.mxu1  ;;  %v3894_v53 = vld [vmem:[%s4454_s15 + $0x1d8] sm:$0xff]  }
  0xe2   : > { %3924 = vtanh.f32 %v1512_v54  ;;  %v3895_v54 = vld [vmem:[%s4454_s15 + $0x3d8] sm:$0xff]  }
  0xe3   : > { %3926 = vtanh.f32 %v2024_v55  ;;  %v3513_v56 = vpop.f32.mrf.mxu0  ;;  %v3641_v57 = vpop.f32.mrf.mxu1 }
  0xe4   : > { %3928 = vtanh.f32 %v3513_v56  ;;  %v3896_v56 = vld [vmem:[%s4454_s15 + $0x1e0] sm:$0xff]  }
  0xe5   : > { %v3905_v62 = vpop.eup %3904  ;;  %3930 = vtanh.f32 %v3641_v57  ;;  %v1515_v63 = vpop.f32.mrf.mxu0  ;;  %v3897_v57 = vld [vmem:[%s4454_s15 + $0x3e0] sm:$0xff]  }
  0xe6   : > { %v2027_v0 = vpop.f32.mrf.mxu1  ;;  %v3907_v1 = vpop.eup %3906  ;;  %2777 = vst [vmem:[%s4675_s22 + $0x10] sm:$0xff] %v3905_v62  ;;  %3932 = vtanh.f32 %v1515_v63 }
  0xe7   : > { %v3909_v2 = vpop.eup %3908  ;;  %2905 = vst [vmem:[%s4675_s22 + $0x410] sm:$0xff] %v3907_v1  ;;  %3934 = vtanh.f32 %v2027_v0  ;;  %v3516_v3 = vpop.f32.mrf.mxu0  ;;  %3611 = vmatmul.mubr.msk.bf16.gmra.mxu0 %vm1077_vm0, %v3882_v58  ;;  %3739 = vmatmul.mubr.msk.bf16.gmra.mxu1 %vm1077_vm0, %v3883_v59 }
  0xe8   : > { %v3644_v4 = vpop.f32.mrf.mxu1  ;;  %v3911_v5 = vpop.eup %3910  ;;  %2775 = vst [vmem:[%s4675_s22] sm:$0xff] %v3909_v2  ;;  %3936 = vtanh.f32 %v3516_v3  ;;  %3614 = vmatprep.mubr.msk.bf16.mxu0 %vm1077_vm0, %v3884_v60  ;;  %3742 = vmatprep.mubr.msk.bf16.mxu1 %vm1077_vm0, %v3885_v61 }
  0xe9   : > { %v3913_v6 = vpop.eup %3912  ;;  %2903 = vst [vmem:[%s4675_s22 + $0x400] sm:$0xff] %v3911_v5  ;;  %3938 = vtanh.f32 %v3644_v4  ;;  %v1528_v7 = vpop.f32.mrf.mxu0 }
  0xea   : > { %v2040_v8 = vpop.f32.mrf.mxu1  ;;  %v3915_v9 = vpop.eup %3914  ;;  %2778 = vst [vmem:[%s4675_s22 + $0x18] sm:$0xff] %v3913_v6  ;;  %3940 = vtanh.f32 %v1528_v7 }
  0xeb   : > { %v3917_v10 = vpop.eup %3916  ;;  %2906 = vst [vmem:[%s4675_s22 + $0x418] sm:$0xff] %v3915_v9  ;;  %3942 = vtanh.f32 %v2040_v8  ;;  %v3517_v11 = vpop.f32.mrf.mxu0  ;;  %v3898_v9 = vld [vmem:[%s4454_s15 + $0x1e8] sm:$0xff]  }
  0xec   : > { %v3645_v12 = vpop.f32.mrf.mxu1  ;;  %v3919_v15 = vpop.eup %3918  ;;  %2776 = vst [vmem:[%s4675_s22 + $0x8] sm:$0xff] %v3917_v10  ;;  %3944 = vtanh.f32 %v3517_v11  ;;  %v3899_v10 = vld [vmem:[%s4454_s15 + $0x3e8] sm:$0xff]  }
  0xed   : > { %v3921_v18 = vpop.eup %3920  ;;  %2904 = vst [vmem:[%s4675_s22 + $0x408] sm:$0xff] %v3919_v15  ;;  %3946 = vtanh.f32 %v3645_v12  ;;  %v1531_v19 = vpop.f32.mrf.mxu0  ;;  %v3900_v12 = vld [vmem:[%s4454_s15 + $0x1f0] sm:$0xff]  }
  0xee   : > { %v2043_v20 = vpop.f32.mrf.mxu1  ;;  %v3923_v21 = vpop.eup %3922  ;;  %2781 = vst [vmem:[%s4675_s22 + $0x30] sm:$0xff] %v3921_v18  ;;  %3948 = vtanh.f32 %v1531_v19 }
  0xef   : > { %v3925_v22 = vpop.eup %3924  ;;  %2909 = vst [vmem:[%s4675_s22 + $0x430] sm:$0xff] %v3923_v21  ;;  %3950 = vtanh.f32 %v2043_v20  ;;  %v3520_v23 = vpop.f32.mrf.mxu0  ;;  %3615 = vmatmul.mubr.msk.bf16.gmra.mxu0 %vm1077_vm0, %v3886_v13  ;;  %3743 = vmatmul.mubr.msk.bf16.gmra.mxu1 %vm1077_vm0, %v3887_v14  ;;  %v3901_v13 = vld [vmem:[%s4454_s15 + $0x3f0] sm:$0xff]  }
  0xf0   : > { %v3648_v24 = vpop.f32.mrf.mxu1  ;;  %v3927_v25 = vpop.eup %3926  ;;  %2779 = vst [vmem:[%s4675_s22 + $0x20] sm:$0xff] %v3925_v22  ;;  %3952 = vtanh.f32 %v3520_v23  ;;  %3618 = vmatprep.mubr.msk.bf16.mxu0 %vm1077_vm0, %v3888_v16  ;;  %3746 = vmatprep.mubr.msk.bf16.mxu1 %vm1077_vm0, %v3889_v17 }
  0xf1   : > { %v3929_v26 = vpop.eup %3928  ;;  %2907 = vst [vmem:[%s4675_s22 + $0x420] sm:$0xff] %v3927_v25  ;;  %3954 = vtanh.f32 %v3648_v24  ;;  %v1544_v27 = vpop.f32.mrf.mxu0 }
  0xf2   : > { %v2056_v28 = vpop.f32.mrf.mxu1  ;;  %v3931_v29 = vpop.eup %3930  ;;  %2782 = vst [vmem:[%s4675_s22 + $0x38] sm:$0xff] %v3929_v26  ;;  %3956 = vtanh.f32 %v1544_v27 }
  0xf3   : > { %v3933_v30 = vpop.eup %3932  ;;  %2910 = vst [vmem:[%s4675_s22 + $0x438] sm:$0xff] %v3931_v29  ;;  %3958 = vtanh.f32 %v2056_v28  ;;  %v3521_v31 = vpop.f32.mrf.mxu0  ;;  %v3902_v29 = vld [vmem:[%s4454_s15 + $0x1f8] sm:$0xff]  }
  0xf4   : > { %v3649_v32 = vpop.f32.mrf.mxu1  ;;  %v3935_v35 = vpop.eup %3934  ;;  %2780 = vst [vmem:[%s4675_s22 + $0x28] sm:$0xff] %v3933_v30  ;;  %3960 = vtanh.f32 %v3521_v31  ;;  %v3903_v30 = vld [vmem:[%s4454_s15 + $0x3f8] sm:$0xff]  }
  0xf5   : > { %v3937_v38 = vpop.eup %3936  ;;  %2908 = vst [vmem:[%s4675_s22 + $0x428] sm:$0xff] %v3935_v35  ;;  %3962 = vtanh.f32 %v3649_v32  ;;  %v1547_v39 = vpop.f32.mrf.mxu0 }
  0xf6   : > { %v2059_v40 = vpop.f32.mrf.mxu1  ;;  %v3939_v41 = vpop.eup %3938  ;;  %2785 = vst [vmem:[%s4675_s22 + $0x50] sm:$0xff] %v3937_v38  ;;  %3964 = vtanh.f32 %v1547_v39 }
  0xf7   : > { %v3941_v42 = vpop.eup %3940  ;;  %2913 = vst [vmem:[%s4675_s22 + $0x450] sm:$0xff] %v3939_v41  ;;  %3966 = vtanh.f32 %v2059_v40  ;;  %v3524_v43 = vpop.f32.mrf.mxu0  ;;  %3619 = vmatmul.mubr.msk.bf16.gmra.mxu0 %vm1077_vm0, %v3890_v33  ;;  %3747 = vmatmul.mubr.msk.bf16.gmra.mxu1 %vm1077_vm0, %v3891_v34 }
  0xf8   : > { %v3652_v44 = vpop.f32.mrf.mxu1  ;;  %v3943_v45 = vpop.eup %3942  ;;  %2783 = vst [vmem:[%s4675_s22 + $0x40] sm:$0xff] %v3941_v42  ;;  %3968 = vtanh.f32 %v3524_v43  ;;  %3622 = vmatprep.mubr.msk.bf16.mxu0 %vm1077_vm0, %v3892_v36  ;;  %3750 = vmatprep.mubr.msk.bf16.mxu1 %vm1077_vm0, %v3893_v37 }
  0xf9   : > { %v3945_v46 = vpop.eup %3944  ;;  %2911 = vst [vmem:[%s4675_s22 + $0x440] sm:$0xff] %v3943_v45  ;;  %3970 = vtanh.f32 %v3652_v44  ;;  %v1560_v47 = vpop.f32.mrf.mxu0 }
  0xfa   : > { %v2072_v48 = vpop.f32.mrf.mxu1  ;;  %v3947_v49 = vpop.eup %3946  ;;  %2786 = vst [vmem:[%s4675_s22 + $0x58] sm:$0xff] %v3945_v46  ;;  %3972 = vtanh.f32 %v1560_v47 }
  0xfb   : > { %v3949_v50 = vpop.eup %3948  ;;  %2914 = vst [vmem:[%s4675_s22 + $0x458] sm:$0xff] %v3947_v49  ;;  %3974 = vtanh.f32 %v2072_v48  ;;  %v3525_v51 = vpop.f32.mrf.mxu0 }
  0xfc   : > { %v3653_v52 = vpop.f32.mrf.mxu1  ;;  %v3951_v55 = vpop.eup %3950  ;;  %2784 = vst [vmem:[%s4675_s22 + $0x48] sm:$0xff] %v3949_v50  ;;  %3976 = vtanh.f32 %v3525_v51 }
  0xfd   : > { %v3953_v58 = vpop.eup %3952  ;;  %2912 = vst [vmem:[%s4675_s22 + $0x448] sm:$0xff] %v3951_v55  ;;  %3978 = vtanh.f32 %v3653_v52  ;;  %v1563_v59 = vpop.f32.mrf.mxu0 }
  0xfe   : > { %v2075_v60 = vpop.f32.mrf.mxu1  ;;  %v3955_v61 = vpop.eup %3954  ;;  %2789 = vst [vmem:[%s4675_s22 + $0x70] sm:$0xff] %v3953_v58  ;;  %3980 = vtanh.f32 %v1563_v59 }
  0xff   : > { %v3957_v62 = vpop.eup %3956  ;;  %2917 = vst [vmem:[%s4675_s22 + $0x470] sm:$0xff] %v3955_v61  ;;  %3982 = vtanh.f32 %v2075_v60  ;;  %v3528_v63 = vpop.f32.mrf.mxu0  ;;  %3623 = vmatmul.mubr.msk.bf16.gmra.mxu0 %vm1077_vm0, %v3894_v53  ;;  %3751 = vmatmul.mubr.msk.bf16.gmra.mxu1 %vm1077_vm0, %v3895_v54 }
 0x100   : > { %v3656_v0 = vpop.f32.mrf.mxu1  ;;  %v3959_v1 = vpop.eup %3958  ;;  %2787 = vst [vmem:[%s4675_s22 + $0x60] sm:$0xff] %v3957_v62  ;;  %3984 = vtanh.f32 %v3528_v63  ;;  %3626 = vmatprep.mubr.msk.bf16.mxu0 %vm1077_vm0, %v3896_v56  ;;  %3754 = vmatprep.mubr.msk.bf16.mxu1 %vm1077_vm0, %v3897_v57 }
 0x101   : > { %v3961_v2 = vpop.eup %3960  ;;  %2915 = vst [vmem:[%s4675_s22 + $0x460] sm:$0xff] %v3959_v1  ;;  %3986 = vtanh.f32 %v3656_v0  ;;  %v1576_v3 = vpop.f32.mrf.mxu0 }
 0x102   : > { %v2088_v4 = vpop.f32.mrf.mxu1  ;;  %v3963_v5 = vpop.eup %3962  ;;  %2790 = vst [vmem:[%s4675_s22 + $0x78] sm:$0xff] %v3961_v2  ;;  %3988 = vtanh.f32 %v1576_v3 }
 0x103   : > { %v3965_v6 = vpop.eup %3964  ;;  %2918 = vst [vmem:[%s4675_s22 + $0x478] sm:$0xff] %v3963_v5  ;;  %3990 = vtanh.f32 %v2088_v4  ;;  %v3529_v7 = vpop.f32.mrf.mxu0 }
 0x104   : > { %v3657_v8 = vpop.f32.mrf.mxu1  ;;  %v3967_v11 = vpop.eup %3966  ;;  %2788 = vst [vmem:[%s4675_s22 + $0x68] sm:$0xff] %v3965_v6  ;;  %3992 = vtanh.f32 %v3529_v7 }
 0x105   : > { %v3969_v14 = vpop.eup %3968  ;;  %2916 = vst [vmem:[%s4675_s22 + $0x468] sm:$0xff] %v3967_v11  ;;  %3994 = vtanh.f32 %v3657_v8  ;;  %v1579_v15 = vpop.f32.mrf.mxu0 }
 0x106   : > { %v2091_v16 = vpop.f32.mrf.mxu1  ;;  %v3971_v17 = vpop.eup %3970  ;;  %2793 = vst [vmem:[%s4675_s22 + $0x90] sm:$0xff] %v3969_v14  ;;  %3996 = vtanh.f32 %v1579_v15 }
 0x107   : > { %v3973_v18 = vpop.eup %3972  ;;  %2921 = vst [vmem:[%s4675_s22 + $0x490] sm:$0xff] %v3971_v17  ;;  %3998 = vtanh.f32 %v2091_v16  ;;  %v3532_v19 = vpop.f32.mrf.mxu0  ;;  %3627 = vmatmul.mubr.msk.bf16.gmra.mxu0 %vm1077_vm0, %v3898_v9  ;;  %3755 = vmatmul.mubr.msk.bf16.gmra.mxu1 %vm1077_vm0, %v3899_v10 }
 0x108   : > { %v3660_v20 = vpop.f32.mrf.mxu1  ;;  %v3975_v21 = vpop.eup %3974  ;;  %2791 = vst [vmem:[%s4675_s22 + $0x80] sm:$0xff] %v3973_v18  ;;  %4000 = vtanh.f32 %v3532_v19  ;;  %3630 = vmatprep.mubr.msk.bf16.mxu0 %vm1077_vm0, %v3900_v12  ;;  %3758 = vmatprep.mubr.msk.bf16.mxu1 %vm1077_vm0, %v3901_v13 }
 0x109   : > { %v3977_v22 = vpop.eup %3976  ;;  %2919 = vst [vmem:[%s4675_s22 + $0x480] sm:$0xff] %v3975_v21  ;;  %4002 = vtanh.f32 %v3660_v20  ;;  %v1592_v23 = vpop.f32.mrf.mxu0 }
 0x10a   : > { %v2104_v24 = vpop.f32.mrf.mxu1  ;;  %v3979_v25 = vpop.eup %3978  ;;  %2794 = vst [vmem:[%s4675_s22 + $0x98] sm:$0xff] %v3977_v22  ;;  %4004 = vtanh.f32 %v1592_v23 }
 0x10b   : > { %v3981_v26 = vpop.eup %3980  ;;  %2922 = vst [vmem:[%s4675_s22 + $0x498] sm:$0xff] %v3979_v25  ;;  %4006 = vtanh.f32 %v2104_v24  ;;  %v3533_v27 = vpop.f32.mrf.mxu0 }
 0x10c   : > { %v3661_v28 = vpop.f32.mrf.mxu1  ;;  %v3983_v31 = vpop.eup %3982  ;;  %2792 = vst [vmem:[%s4675_s22 + $0x88] sm:$0xff] %v3981_v26  ;;  %4008 = vtanh.f32 %v3533_v27 }
 0x10d   : > { %v3985_v32 = vpop.eup %3984  ;;  %2920 = vst [vmem:[%s4675_s22 + $0x488] sm:$0xff] %v3983_v31  ;;  %4010 = vtanh.f32 %v3661_v28  ;;  %v1595_v33 = vpop.f32.mrf.mxu0 }
 0x10e   : > { %v2107_v34 = vpop.f32.mrf.mxu1  ;;  %v3987_v35 = vpop.eup %3986  ;;  %2797 = vst [vmem:[%s4675_s22 + $0xb0] sm:$0xff] %v3985_v32  ;;  %4012 = vtanh.f32 %v1595_v33 }
 0x10f   : > { %v3989_v36 = vpop.eup %3988  ;;  %2925 = vst [vmem:[%s4675_s22 + $0x4b0] sm:$0xff] %v3987_v35  ;;  %4014 = vtanh.f32 %v2107_v34  ;;  %v3536_v37 = vpop.f32.mrf.mxu0  ;;  %3631 = vmatmul.mubr.msk.bf16.gmra.mxu0 %vm1077_vm0, %v3902_v29  ;;  %3759 = vmatmul.mubr.msk.bf16.gmra.mxu1 %vm1077_vm0, %v3903_v30 }
 0x110   : > { %v3664_v38 = vpop.f32.mrf.mxu1  ;;  %v3991_v39 = vpop.eup %3990  ;;  %2795 = vst [vmem:[%s4675_s22 + $0xa0] sm:$0xff] %v3989_v36  ;;  %4016 = vtanh.f32 %v3536_v37 }
 0x111   : > { %v3993_v40 = vpop.eup %3992  ;;  %2923 = vst [vmem:[%s4675_s22 + $0x4a0] sm:$0xff] %v3991_v39  ;;  %4018 = vtanh.f32 %v3664_v38  ;;  %v1608_v41 = vpop.f32.mrf.mxu0 }
 0x112   : > { %v2120_v42 = vpop.f32.mrf.mxu1  ;;  %v3995_v43 = vpop.eup %3994  ;;  %2798 = vst [vmem:[%s4675_s22 + $0xb8] sm:$0xff] %v3993_v40  ;;  %4020 = vtanh.f32 %v1608_v41 }
 0x113   : > { %v3997_v44 = vpop.eup %3996  ;;  %2926 = vst [vmem:[%s4675_s22 + $0x4b8] sm:$0xff] %v3995_v43  ;;  %4022 = vtanh.f32 %v2120_v42  ;;  %v3537_v45 = vpop.f32.mrf.mxu0 }
 0x114   : > { %v3665_v46 = vpop.f32.mrf.mxu1  ;;  %v3999_v47 = vpop.eup %3998  ;;  %2796 = vst [vmem:[%s4675_s22 + $0xa8] sm:$0xff] %v3997_v44  ;;  %4024 = vtanh.f32 %v3537_v45 }
 0x115   : > { %v4001_v48 = vpop.eup %4000  ;;  %2924 = vst [vmem:[%s4675_s22 + $0x4a8] sm:$0xff] %v3999_v47  ;;  %4026 = vtanh.f32 %v3665_v46  ;;  %v1611_v49 = vpop.f32.mrf.mxu0 }
 0x116   : > { %v2123_v50 = vpop.f32.mrf.mxu1  ;;  %v4003_v51 = vpop.eup %4002  ;;  %2801 = vst [vmem:[%s4675_s22 + $0xd0] sm:$0xff] %v4001_v48  ;;  %4028 = vtanh.f32 %v1611_v49 }
 0x117   : > { %v4005_v52 = vpop.eup %4004  ;;  %2929 = vst [vmem:[%s4675_s22 + $0x4d0] sm:$0xff] %v4003_v51  ;;  %4030 = vtanh.f32 %v2123_v50  ;;  %v3540_v53 = vpop.f32.mrf.mxu0 }
 0x118   : > { %v3668_v54 = vpop.f32.mrf.mxu1  ;;  %v4007_v55 = vpop.eup %4006  ;;  %2799 = vst [vmem:[%s4675_s22 + $0xc0] sm:$0xff] %v4005_v52  ;;  %4032 = vtanh.f32 %v3540_v53 }
 0x119   : > { %v4009_v56 = vpop.eup %4008  ;;  %2927 = vst [vmem:[%s4675_s22 + $0x4c0] sm:$0xff] %v4007_v55  ;;  %4034 = vtanh.f32 %v3668_v54  ;;  %v1624_v57 = vpop.f32.mrf.mxu0 }
 0x11a   : > { %v2136_v58 = vpop.f32.mrf.mxu1  ;;  %v4011_v59 = vpop.eup %4010  ;;  %2802 = vst [vmem:[%s4675_s22 + $0xd8] sm:$0xff] %v4009_v56  ;;  %4036 = vtanh.f32 %v1624_v57 }
 0x11b   : > { %v4013_v60 = vpop.eup %4012  ;;  %2930 = vst [vmem:[%s4675_s22 + $0x4d8] sm:$0xff] %v4011_v59  ;;  %4038 = vtanh.f32 %v2136_v58  ;;  %v3541_v61 = vpop.f32.mrf.mxu0 }
 0x11c   : > { %v3669_v62 = vpop.f32.mrf.mxu1  ;;  %v4015_v63 = vpop.eup %4014  ;;  %2800 = vst [vmem:[%s4675_s22 + $0xc8] sm:$0xff] %v4013_v60  ;;  %4040 = vtanh.f32 %v3541_v61 }
 0x11d   : > { %v4017_v0 = vpop.eup %4016  ;;  %2928 = vst [vmem:[%s4675_s22 + $0x4c8] sm:$0xff] %v4015_v63  ;;  %4042 = vtanh.f32 %v3669_v62  ;;  %v1627_v1 = vpop.f32.mrf.mxu0 }
 0x11e   : > { %v2139_v2 = vpop.f32.mrf.mxu1  ;;  %v4019_v3 = vpop.eup %4018  ;;  %2805 = vst [vmem:[%s4675_s22 + $0xf0] sm:$0xff] %v4017_v0  ;;  %4044 = vtanh.f32 %v1627_v1 }
 0x11f   : > { %v4021_v4 = vpop.eup %4020  ;;  %2933 = vst [vmem:[%s4675_s22 + $0x4f0] sm:$0xff] %v4019_v3  ;;  %4046 = vtanh.f32 %v2139_v2  ;;  %v3544_v5 = vpop.f32.mrf.mxu0 }
 0x120   : > { %v3672_v6 = vpop.f32.mrf.mxu1  ;;  %v4023_v7 = vpop.eup %4022  ;;  %2803 = vst [vmem:[%s4675_s22 + $0xe0] sm:$0xff] %v4021_v4  ;;  %4048 = vtanh.f32 %v3544_v5 }
 0x121   : > { %v4025_v8 = vpop.eup %4024  ;;  %2931 = vst [vmem:[%s4675_s22 + $0x4e0] sm:$0xff] %v4023_v7  ;;  %4050 = vtanh.f32 %v3672_v6  ;;  %v1640_v9 = vpop.f32.mrf.mxu0 }
 0x122   : > { %v2152_v10 = vpop.f32.mrf.mxu1  ;;  %v4027_v11 = vpop.eup %4026  ;;  %2806 = vst [vmem:[%s4675_s22 + $0xf8] sm:$0xff] %v4025_v8  ;;  %4052 = vtanh.f32 %v1640_v9 }
 0x123   : > { %v4029_v12 = vpop.eup %4028  ;;  %2934 = vst [vmem:[%s4675_s22 + $0x4f8] sm:$0xff] %v4027_v11  ;;  %4054 = vtanh.f32 %v2152_v10  ;;  %v3545_v13 = vpop.f32.mrf.mxu0 }
 0x124   : > { %v3673_v14 = vpop.f32.mrf.mxu1  ;;  %v4031_v15 = vpop.eup %4030  ;;  %2804 = vst [vmem:[%s4675_s22 + $0xe8] sm:$0xff] %v4029_v12  ;;  %4056 = vtanh.f32 %v3545_v13 }
 0x125   : > { %v4033_v16 = vpop.eup %4032  ;;  %2932 = vst [vmem:[%s4675_s22 + $0x4e8] sm:$0xff] %v4031_v15  ;;  %4058 = vtanh.f32 %v3673_v14  ;;  %v1643_v17 = vpop.f32.mrf.mxu0 }
 0x126   : > { %v2155_v18 = vpop.f32.mrf.mxu1  ;;  %v4035_v19 = vpop.eup %4034  ;;  %2809 = vst [vmem:[%s4675_s22 + $0x110] sm:$0xff] %v4033_v16  ;;  %4060 = vtanh.f32 %v1643_v17 }
 0x127   : > { %v4037_v20 = vpop.eup %4036  ;;  %2937 = vst [vmem:[%s4675_s22 + $0x510] sm:$0xff] %v4035_v19  ;;  %4062 = vtanh.f32 %v2155_v18  ;;  %v3548_v21 = vpop.f32.mrf.mxu0 }
 0x128   : > { %v3676_v22 = vpop.f32.mrf.mxu1  ;;  %v4039_v23 = vpop.eup %4038  ;;  %2807 = vst [vmem:[%s4675_s22 + $0x100] sm:$0xff] %v4037_v20  ;;  %4064 = vtanh.f32 %v3548_v21 }
 0x129   : > { %v4041_v24 = vpop.eup %4040  ;;  %2935 = vst [vmem:[%s4675_s22 + $0x500] sm:$0xff] %v4039_v23  ;;  %4066 = vtanh.f32 %v3676_v22  ;;  %v1656_v25 = vpop.f32.mrf.mxu0 }
 0x12a   : > { %v2168_v26 = vpop.f32.mrf.mxu1  ;;  %v4043_v27 = vpop.eup %4042  ;;  %2810 = vst [vmem:[%s4675_s22 + $0x118] sm:$0xff] %v4041_v24  ;;  %4068 = vtanh.f32 %v1656_v25 }
 0x12b   : > { %v4045_v28 = vpop.eup %4044  ;;  %2938 = vst [vmem:[%s4675_s22 + $0x518] sm:$0xff] %v4043_v27  ;;  %4070 = vtanh.f32 %v2168_v26  ;;  %v3549_v29 = vpop.f32.mrf.mxu0 }
 0x12c   : > { %v3677_v30 = vpop.f32.mrf.mxu1  ;;  %v4047_v31 = vpop.eup %4046  ;;  %2808 = vst [vmem:[%s4675_s22 + $0x108] sm:$0xff] %v4045_v28  ;;  %4072 = vtanh.f32 %v3549_v29 }
 0x12d   : > { %v4049_v32 = vpop.eup %4048  ;;  %2936 = vst [vmem:[%s4675_s22 + $0x508] sm:$0xff] %v4047_v31  ;;  %4074 = vtanh.f32 %v3677_v30  ;;  %v1659_v33 = vpop.f32.mrf.mxu0 }
 0x12e   : > { %v2171_v34 = vpop.f32.mrf.mxu1  ;;  %v4051_v35 = vpop.eup %4050  ;;  %2813 = vst [vmem:[%s4675_s22 + $0x130] sm:$0xff] %v4049_v32  ;;  %4076 = vtanh.f32 %v1659_v33 }
 0x12f   : > { %v4053_v36 = vpop.eup %4052  ;;  %2941 = vst [vmem:[%s4675_s22 + $0x530] sm:$0xff] %v4051_v35  ;;  %4078 = vtanh.f32 %v2171_v34  ;;  %v3552_v37 = vpop.f32.mrf.mxu0 }
 0x130   : > { %v3680_v38 = vpop.f32.mrf.mxu1  ;;  %v4055_v39 = vpop.eup %4054  ;;  %2811 = vst [vmem:[%s4675_s22 + $0x120] sm:$0xff] %v4053_v36  ;;  %4080 = vtanh.f32 %v3552_v37 }
 0x131   : > { %v4057_v40 = vpop.eup %4056  ;;  %2939 = vst [vmem:[%s4675_s22 + $0x520] sm:$0xff] %v4055_v39  ;;  %4082 = vtanh.f32 %v3680_v38  ;;  %v1672_v41 = vpop.f32.mrf.mxu0 }
 0x132   : > { %v2184_v42 = vpop.f32.mrf.mxu1  ;;  %v4059_v43 = vpop.eup %4058  ;;  %2814 = vst [vmem:[%s4675_s22 + $0x138] sm:$0xff] %v4057_v40  ;;  %4084 = vtanh.f32 %v1672_v41 }
 0x133   : > { %v4061_v44 = vpop.eup %4060  ;;  %2942 = vst [vmem:[%s4675_s22 + $0x538] sm:$0xff] %v4059_v43  ;;  %4086 = vtanh.f32 %v2184_v42  ;;  %v3553_v45 = vpop.f32.mrf.mxu0 }
 0x134   : > { %v3681_v46 = vpop.f32.mrf.mxu1  ;;  %v4063_v47 = vpop.eup %4062  ;;  %2812 = vst [vmem:[%s4675_s22 + $0x128] sm:$0xff] %v4061_v44  ;;  %4088 = vtanh.f32 %v3553_v45 }
 0x135   : > { %v4065_v48 = vpop.eup %4064  ;;  %2940 = vst [vmem:[%s4675_s22 + $0x528] sm:$0xff] %v4063_v47  ;;  %4090 = vtanh.f32 %v3681_v46  ;;  %v1675_v49 = vpop.f32.mrf.mxu0 }
 0x136   : > { %v2187_v50 = vpop.f32.mrf.mxu1  ;;  %v4067_v51 = vpop.eup %4066  ;;  %2817 = vst [vmem:[%s4675_s22 + $0x150] sm:$0xff] %v4065_v48  ;;  %4092 = vtanh.f32 %v1675_v49 }
 0x137   : > { %v4069_v52 = vpop.eup %4068  ;;  %2945 = vst [vmem:[%s4675_s22 + $0x550] sm:$0xff] %v4067_v51  ;;  %4094 = vtanh.f32 %v2187_v50  ;;  %v3556_v53 = vpop.f32.mrf.mxu0 }
 0x138   : > { %v3684_v54 = vpop.f32.mrf.mxu1  ;;  %v4071_v55 = vpop.eup %4070  ;;  %2815 = vst [vmem:[%s4675_s22 + $0x140] sm:$0xff] %v4069_v52  ;;  %4096 = vtanh.f32 %v3556_v53 }
 0x139   : > { %v4073_v56 = vpop.eup %4072  ;;  %2943 = vst [vmem:[%s4675_s22 + $0x540] sm:$0xff] %v4071_v55  ;;  %4098 = vtanh.f32 %v3684_v54  ;;  %v1688_v57 = vpop.f32.mrf.mxu0 }
 0x13a   : > { %v2200_v58 = vpop.f32.mrf.mxu1  ;;  %v4075_v59 = vpop.eup %4074  ;;  %2818 = vst [vmem:[%s4675_s22 + $0x158] sm:$0xff] %v4073_v56  ;;  %4100 = vtanh.f32 %v1688_v57 }
 0x13b   : > { %v4077_v60 = vpop.eup %4076  ;;  %2946 = vst [vmem:[%s4675_s22 + $0x558] sm:$0xff] %v4075_v59  ;;  %4102 = vtanh.f32 %v2200_v58  ;;  %v3557_v61 = vpop.f32.mrf.mxu0 }
 0x13c   : > { %v3685_v62 = vpop.f32.mrf.mxu1  ;;  %v4079_v63 = vpop.eup %4078  ;;  %2816 = vst [vmem:[%s4675_s22 + $0x148] sm:$0xff] %v4077_v60  ;;  %4104 = vtanh.f32 %v3557_v61 }
 0x13d   : > { %v4081_v0 = vpop.eup %4080  ;;  %2944 = vst [vmem:[%s4675_s22 + $0x548] sm:$0xff] %v4079_v63  ;;  %4106 = vtanh.f32 %v3685_v62  ;;  %v1691_v1 = vpop.f32.mrf.mxu0 }
 0x13e   : > { %v2203_v2 = vpop.f32.mrf.mxu1  ;;  %v4083_v3 = vpop.eup %4082  ;;  %2821 = vst [vmem:[%s4675_s22 + $0x170] sm:$0xff] %v4081_v0  ;;  %4108 = vtanh.f32 %v1691_v1 }
 0x13f   : > { %v4085_v4 = vpop.eup %4084  ;;  %2949 = vst [vmem:[%s4675_s22 + $0x570] sm:$0xff] %v4083_v3  ;;  %4110 = vtanh.f32 %v2203_v2  ;;  %v3560_v5 = vpop.f32.mrf.mxu0 }
 0x140   : > { %v3688_v6 = vpop.f32.mrf.mxu1  ;;  %v4087_v7 = vpop.eup %4086  ;;  %2819 = vst [vmem:[%s4675_s22 + $0x160] sm:$0xff] %v4085_v4  ;;  %4112 = vtanh.f32 %v3560_v5 }
 0x141   : > { %v4089_v8 = vpop.eup %4088  ;;  %2947 = vst [vmem:[%s4675_s22 + $0x560] sm:$0xff] %v4087_v7  ;;  %4114 = vtanh.f32 %v3688_v6  ;;  %v1704_v9 = vpop.f32.mrf.mxu0 }
 0x142   : > { %v2216_v10 = vpop.f32.mrf.mxu1  ;;  %v4091_v11 = vpop.eup %4090  ;;  %2822 = vst [vmem:[%s4675_s22 + $0x178] sm:$0xff] %v4089_v8  ;;  %4116 = vtanh.f32 %v1704_v9 }
 0x143   : > { %v4093_v12 = vpop.eup %4092  ;;  %2950 = vst [vmem:[%s4675_s22 + $0x578] sm:$0xff] %v4091_v11  ;;  %4118 = vtanh.f32 %v2216_v10  ;;  %v3561_v13 = vpop.f32.mrf.mxu0 }
 0x144   : > { %v3689_v14 = vpop.f32.mrf.mxu1  ;;  %v4095_v15 = vpop.eup %4094  ;;  %2820 = vst [vmem:[%s4675_s22 + $0x168] sm:$0xff] %v4093_v12  ;;  %4120 = vtanh.f32 %v3561_v13 }
 0x145   : > { %v4097_v16 = vpop.eup %4096  ;;  %2948 = vst [vmem:[%s4675_s22 + $0x568] sm:$0xff] %v4095_v15  ;;  %4122 = vtanh.f32 %v3689_v14  ;;  %v1707_v17 = vpop.f32.mrf.mxu0 }
 0x146   : > { %v2219_v18 = vpop.f32.mrf.mxu1  ;;  %v4099_v19 = vpop.eup %4098  ;;  %2825 = vst [vmem:[%s4675_s22 + $0x190] sm:$0xff] %v4097_v16  ;;  %4124 = vtanh.f32 %v1707_v17 }
 0x147   : > { %v4101_v20 = vpop.eup %4100  ;;  %2953 = vst [vmem:[%s4675_s22 + $0x590] sm:$0xff] %v4099_v19  ;;  %4126 = vtanh.f32 %v2219_v18  ;;  %v3564_v21 = vpop.f32.mrf.mxu0 }
 0x148   : > { %v3692_v22 = vpop.f32.mrf.mxu1  ;;  %v4103_v23 = vpop.eup %4102  ;;  %2823 = vst [vmem:[%s4675_s22 + $0x180] sm:$0xff] %v4101_v20  ;;  %4128 = vtanh.f32 %v3564_v21 }
 0x149   : > { %v4105_v24 = vpop.eup %4104  ;;  %2951 = vst [vmem:[%s4675_s22 + $0x580] sm:$0xff] %v4103_v23  ;;  %4130 = vtanh.f32 %v3692_v22  ;;  %v1720_v25 = vpop.f32.mrf.mxu0 }
 0x14a   : > { %v2232_v26 = vpop.f32.mrf.mxu1  ;;  %v4107_v27 = vpop.eup %4106  ;;  %2826 = vst [vmem:[%s4675_s22 + $0x198] sm:$0xff] %v4105_v24  ;;  %4132 = vtanh.f32 %v1720_v25 }
 0x14b   : > { %v4109_v28 = vpop.eup %4108  ;;  %2954 = vst [vmem:[%s4675_s22 + $0x598] sm:$0xff] %v4107_v27  ;;  %4134 = vtanh.f32 %v2232_v26  ;;  %v3565_v29 = vpop.f32.mrf.mxu0 }
 0x14c   : > { %v3693_v30 = vpop.f32.mrf.mxu1  ;;  %v4111_v31 = vpop.eup %4110  ;;  %2824 = vst [vmem:[%s4675_s22 + $0x188] sm:$0xff] %v4109_v28  ;;  %4136 = vtanh.f32 %v3565_v29 }
 0x14d   : > { %v4113_v32 = vpop.eup %4112  ;;  %2952 = vst [vmem:[%s4675_s22 + $0x588] sm:$0xff] %v4111_v31  ;;  %4138 = vtanh.f32 %v3693_v30  ;;  %v1723_v33 = vpop.f32.mrf.mxu0 }
 0x14e   : > { %v2235_v34 = vpop.f32.mrf.mxu1  ;;  %v4115_v35 = vpop.eup %4114  ;;  %2829 = vst [vmem:[%s4675_s22 + $0x1b0] sm:$0xff] %v4113_v32  ;;  %4140 = vtanh.f32 %v1723_v33 }
 0x14f   : > { %v4117_v36 = vpop.eup %4116  ;;  %2957 = vst [vmem:[%s4675_s22 + $0x5b0] sm:$0xff] %v4115_v35  ;;  %4142 = vtanh.f32 %v2235_v34  ;;  %v3568_v37 = vpop.f32.mrf.mxu0 }
 0x150   : > { %v3696_v38 = vpop.f32.mrf.mxu1  ;;  %v4119_v39 = vpop.eup %4118  ;;  %2827 = vst [vmem:[%s4675_s22 + $0x1a0] sm:$0xff] %v4117_v36  ;;  %4144 = vtanh.f32 %v3568_v37 }
 0x151   : > { %v4121_v40 = vpop.eup %4120  ;;  %2955 = vst [vmem:[%s4675_s22 + $0x5a0] sm:$0xff] %v4119_v39  ;;  %4146 = vtanh.f32 %v3696_v38  ;;  %v1736_v41 = vpop.f32.mrf.mxu0 }
 0x152   : > { %v2248_v42 = vpop.f32.mrf.mxu1  ;;  %v4123_v43 = vpop.eup %4122  ;;  %2830 = vst [vmem:[%s4675_s22 + $0x1b8] sm:$0xff] %v4121_v40  ;;  %4148 = vtanh.f32 %v1736_v41 }
 0x153   : > { %v4125_v44 = vpop.eup %4124  ;;  %2958 = vst [vmem:[%s4675_s22 + $0x5b8] sm:$0xff] %v4123_v43  ;;  %4150 = vtanh.f32 %v2248_v42  ;;  %v3569_v45 = vpop.f32.mrf.mxu0 }
 0x154   : > { %v3697_v46 = vpop.f32.mrf.mxu1  ;;  %v4127_v47 = vpop.eup %4126  ;;  %2828 = vst [vmem:[%s4675_s22 + $0x1a8] sm:$0xff] %v4125_v44  ;;  %4152 = vtanh.f32 %v3569_v45 }
 0x155   : > { %v4129_v48 = vpop.eup %4128  ;;  %2956 = vst [vmem:[%s4675_s22 + $0x5a8] sm:$0xff] %v4127_v47  ;;  %4154 = vtanh.f32 %v3697_v46  ;;  %v1739_v49 = vpop.f32.mrf.mxu0 }
 0x156   : > { %v2251_v50 = vpop.f32.mrf.mxu1  ;;  %v4131_v51 = vpop.eup %4130  ;;  %2833 = vst [vmem:[%s4675_s22 + $0x1d0] sm:$0xff] %v4129_v48  ;;  %4156 = vtanh.f32 %v1739_v49 }
 0x157   : > { %v4133_v52 = vpop.eup %4132  ;;  %2961 = vst [vmem:[%s4675_s22 + $0x5d0] sm:$0xff] %v4131_v51  ;;  %4158 = vtanh.f32 %v2251_v50  ;;  %v3572_v53 = vpop.f32.mrf.mxu0 }
 0x158   : > { %v3700_v54 = vpop.f32.mrf.mxu1  ;;  %v4135_v55 = vpop.eup %4134  ;;  %2831 = vst [vmem:[%s4675_s22 + $0x1c0] sm:$0xff] %v4133_v52  ;;  %4160 = vtanh.f32 %v3572_v53 }
 0x159   : > { %v4137_v56 = vpop.eup %4136  ;;  %2959 = vst [vmem:[%s4675_s22 + $0x5c0] sm:$0xff] %v4135_v55  ;;  %4162 = vtanh.f32 %v3700_v54  ;;  %v1752_v57 = vpop.f32.mrf.mxu0 }
 0x15a   : > { %v2264_v58 = vpop.f32.mrf.mxu1  ;;  %v4139_v59 = vpop.eup %4138  ;;  %2834 = vst [vmem:[%s4675_s22 + $0x1d8] sm:$0xff] %v4137_v56  ;;  %4164 = vtanh.f32 %v1752_v57 }
 0x15b   : > { %v4141_v60 = vpop.eup %4140  ;;  %2962 = vst [vmem:[%s4675_s22 + $0x5d8] sm:$0xff] %v4139_v59  ;;  %4166 = vtanh.f32 %v2264_v58  ;;  %v3573_v61 = vpop.f32.mrf.mxu0 }
 0x15c   : > { %v3701_v62 = vpop.f32.mrf.mxu1  ;;  %v4143_v63 = vpop.eup %4142  ;;  %2832 = vst [vmem:[%s4675_s22 + $0x1c8] sm:$0xff] %v4141_v60  ;;  %4168 = vtanh.f32 %v3573_v61 }
 0x15d   : > { %v4145_v0 = vpop.eup %4144  ;;  %2960 = vst [vmem:[%s4675_s22 + $0x5c8] sm:$0xff] %v4143_v63  ;;  %4170 = vtanh.f32 %v3701_v62  ;;  %v1755_v1 = vpop.f32.mrf.mxu0 }
 0x15e   : > { %v2267_v2 = vpop.f32.mrf.mxu1  ;;  %v4147_v3 = vpop.eup %4146  ;;  %2837 = vst [vmem:[%s4675_s22 + $0x1f0] sm:$0xff] %v4145_v0  ;;  %4172 = vtanh.f32 %v1755_v1 }
 0x15f   : > { %v4149_v4 = vpop.eup %4148  ;;  %2965 = vst [vmem:[%s4675_s22 + $0x5f0] sm:$0xff] %v4147_v3  ;;  %4174 = vtanh.f32 %v2267_v2  ;;  %v3576_v5 = vpop.f32.mrf.mxu0 }
 0x160   : > { %v3704_v6 = vpop.f32.mrf.mxu1  ;;  %v4151_v7 = vpop.eup %4150  ;;  %2835 = vst [vmem:[%s4675_s22 + $0x1e0] sm:$0xff] %v4149_v4  ;;  %4176 = vtanh.f32 %v3576_v5 }
 0x161   : > { %v4153_v8 = vpop.eup %4152  ;;  %2963 = vst [vmem:[%s4675_s22 + $0x5e0] sm:$0xff] %v4151_v7  ;;  %4178 = vtanh.f32 %v3704_v6  ;;  %v1768_v9 = vpop.f32.mrf.mxu0 }
 0x162   : > { %v2280_v10 = vpop.f32.mrf.mxu1  ;;  %v4155_v11 = vpop.eup %4154  ;;  %2838 = vst [vmem:[%s4675_s22 + $0x1f8] sm:$0xff] %v4153_v8  ;;  %4180 = vtanh.f32 %v1768_v9 }
 0x163   : > { %v4157_v12 = vpop.eup %4156  ;;  %2966 = vst [vmem:[%s4675_s22 + $0x5f8] sm:$0xff] %v4155_v11  ;;  %4182 = vtanh.f32 %v2280_v10  ;;  %v3577_v13 = vpop.f32.mrf.mxu0 }
 0x164   : > { %v3705_v14 = vpop.f32.mrf.mxu1  ;;  %v4159_v15 = vpop.eup %4158  ;;  %2836 = vst [vmem:[%s4675_s22 + $0x1e8] sm:$0xff] %v4157_v12  ;;  %4184 = vtanh.f32 %v3577_v13 }
 0x165   : > { %v4161_v16 = vpop.eup %4160  ;;  %2964 = vst [vmem:[%s4675_s22 + $0x5e8] sm:$0xff] %v4159_v15  ;;  %4186 = vtanh.f32 %v3705_v14  ;;  %v1771_v17 = vpop.f32.mrf.mxu0 }
 0x166   : > { %v2283_v18 = vpop.f32.mrf.mxu1  ;;  %v4163_v19 = vpop.eup %4162  ;;  %2841 = vst [vmem:[%s4675_s22 + $0x210] sm:$0xff] %v4161_v16  ;;  %4188 = vtanh.f32 %v1771_v17 }
 0x167   : > { %v4165_v20 = vpop.eup %4164  ;;  %2969 = vst [vmem:[%s4675_s22 + $0x610] sm:$0xff] %v4163_v19  ;;  %4190 = vtanh.f32 %v2283_v18  ;;  %v3580_v21 = vpop.f32.mrf.mxu0 }
 0x168   : > { %v3708_v22 = vpop.f32.mrf.mxu1  ;;  %v4167_v23 = vpop.eup %4166  ;;  %2839 = vst [vmem:[%s4675_s22 + $0x200] sm:$0xff] %v4165_v20  ;;  %4192 = vtanh.f32 %v3580_v21 }
 0x169   : > { %v4169_v24 = vpop.eup %4168  ;;  %2967 = vst [vmem:[%s4675_s22 + $0x600] sm:$0xff] %v4167_v23  ;;  %4194 = vtanh.f32 %v3708_v22  ;;  %v1784_v25 = vpop.f32.mrf.mxu0 }
 0x16a   : > { %v2296_v26 = vpop.f32.mrf.mxu1  ;;  %v4171_v27 = vpop.eup %4170  ;;  %2842 = vst [vmem:[%s4675_s22 + $0x218] sm:$0xff] %v4169_v24  ;;  %4196 = vtanh.f32 %v1784_v25 }
 0x16b   : > { %v4173_v28 = vpop.eup %4172  ;;  %2970 = vst [vmem:[%s4675_s22 + $0x618] sm:$0xff] %v4171_v27  ;;  %4198 = vtanh.f32 %v2296_v26  ;;  %v3581_v29 = vpop.f32.mrf.mxu0 }
 0x16c   : > { %v3709_v30 = vpop.f32.mrf.mxu1  ;;  %v4175_v31 = vpop.eup %4174  ;;  %2840 = vst [vmem:[%s4675_s22 + $0x208] sm:$0xff] %v4173_v28  ;;  %4200 = vtanh.f32 %v3581_v29 }
 0x16d   : > { %v4177_v32 = vpop.eup %4176  ;;  %2968 = vst [vmem:[%s4675_s22 + $0x608] sm:$0xff] %v4175_v31  ;;  %4202 = vtanh.f32 %v3709_v30  ;;  %v1787_v33 = vpop.f32.mrf.mxu0 }
 0x16e   : > { %v2299_v34 = vpop.f32.mrf.mxu1  ;;  %v4179_v35 = vpop.eup %4178  ;;  %2845 = vst [vmem:[%s4675_s22 + $0x230] sm:$0xff] %v4177_v32  ;;  %4204 = vtanh.f32 %v1787_v33 }
 0x16f   : > { %v4181_v36 = vpop.eup %4180  ;;  %2973 = vst [vmem:[%s4675_s22 + $0x630] sm:$0xff] %v4179_v35  ;;  %4206 = vtanh.f32 %v2299_v34  ;;  %v3584_v37 = vpop.f32.mrf.mxu0 }
 0x170   : > { %v3712_v38 = vpop.f32.mrf.mxu1  ;;  %v4183_v39 = vpop.eup %4182  ;;  %2843 = vst [vmem:[%s4675_s22 + $0x220] sm:$0xff] %v4181_v36  ;;  %4208 = vtanh.f32 %v3584_v37 }
 0x171   : > { %v4185_v40 = vpop.eup %4184  ;;  %2971 = vst [vmem:[%s4675_s22 + $0x620] sm:$0xff] %v4183_v39  ;;  %4210 = vtanh.f32 %v3712_v38  ;;  %v1800_v41 = vpop.f32.mrf.mxu0 }
 0x172   : > { %v2312_v42 = vpop.f32.mrf.mxu1  ;;  %v4187_v43 = vpop.eup %4186  ;;  %2846 = vst [vmem:[%s4675_s22 + $0x238] sm:$0xff] %v4185_v40  ;;  %4212 = vtanh.f32 %v1800_v41 }
 0x173   : > { %v4189_v44 = vpop.eup %4188  ;;  %2974 = vst [vmem:[%s4675_s22 + $0x638] sm:$0xff] %v4187_v43  ;;  %4214 = vtanh.f32 %v2312_v42  ;;  %v3585_v45 = vpop.f32.mrf.mxu0 }
 0x174   : > { %v3713_v46 = vpop.f32.mrf.mxu1  ;;  %v4191_v47 = vpop.eup %4190  ;;  %2844 = vst [vmem:[%s4675_s22 + $0x228] sm:$0xff] %v4189_v44  ;;  %4216 = vtanh.f32 %v3585_v45 }
 0x175   : > { %v4193_v48 = vpop.eup %4192  ;;  %2972 = vst [vmem:[%s4675_s22 + $0x628] sm:$0xff] %v4191_v47  ;;  %4218 = vtanh.f32 %v3713_v46  ;;  %v1803_v49 = vpop.f32.mrf.mxu0 }
 0x176   : > { %v2315_v50 = vpop.f32.mrf.mxu1  ;;  %v4195_v51 = vpop.eup %4194  ;;  %2849 = vst [vmem:[%s4675_s22 + $0x250] sm:$0xff] %v4193_v48  ;;  %4220 = vtanh.f32 %v1803_v49 }
 0x177   : > { %v4197_v52 = vpop.eup %4196  ;;  %2977 = vst [vmem:[%s4675_s22 + $0x650] sm:$0xff] %v4195_v51  ;;  %4222 = vtanh.f32 %v2315_v50  ;;  %v3588_v53 = vpop.f32.mrf.mxu0 }
 0x178   : > { %v3716_v54 = vpop.f32.mrf.mxu1  ;;  %v4199_v55 = vpop.eup %4198  ;;  %2847 = vst [vmem:[%s4675_s22 + $0x240] sm:$0xff] %v4197_v52  ;;  %4224 = vtanh.f32 %v3588_v53 }
 0x179   : > { %v4201_v56 = vpop.eup %4200  ;;  %2975 = vst [vmem:[%s4675_s22 + $0x640] sm:$0xff] %v4199_v55  ;;  %4226 = vtanh.f32 %v3716_v54  ;;  %v1816_v57 = vpop.f32.mrf.mxu0 }
 0x17a   : > { %v2328_v58 = vpop.f32.mrf.mxu1  ;;  %v4203_v59 = vpop.eup %4202  ;;  %2850 = vst [vmem:[%s4675_s22 + $0x258] sm:$0xff] %v4201_v56  ;;  %4228 = vtanh.f32 %v1816_v57 }
 0x17b   : > { %v4205_v60 = vpop.eup %4204  ;;  %2978 = vst [vmem:[%s4675_s22 + $0x658] sm:$0xff] %v4203_v59  ;;  %4230 = vtanh.f32 %v2328_v58  ;;  %v3589_v61 = vpop.f32.mrf.mxu0 }
 0x17c   : > { %v3717_v62 = vpop.f32.mrf.mxu1  ;;  %v4207_v63 = vpop.eup %4206  ;;  %2848 = vst [vmem:[%s4675_s22 + $0x248] sm:$0xff] %v4205_v60  ;;  %4232 = vtanh.f32 %v3589_v61 }
 0x17d   : > { %v4209_v0 = vpop.eup %4208  ;;  %2976 = vst [vmem:[%s4675_s22 + $0x648] sm:$0xff] %v4207_v63  ;;  %4234 = vtanh.f32 %v3717_v62  ;;  %v1819_v1 = vpop.f32.mrf.mxu0 }
 0x17e   : > { %v2331_v2 = vpop.f32.mrf.mxu1  ;;  %v4211_v3 = vpop.eup %4210  ;;  %2853 = vst [vmem:[%s4675_s22 + $0x270] sm:$0xff] %v4209_v0  ;;  %4236 = vtanh.f32 %v1819_v1 }
 0x17f   : > { %v4213_v4 = vpop.eup %4212  ;;  %2981 = vst [vmem:[%s4675_s22 + $0x670] sm:$0xff] %v4211_v3  ;;  %4238 = vtanh.f32 %v2331_v2  ;;  %v3592_v5 = vpop.f32.mrf.mxu0 }
 0x180   : > { %v3720_v6 = vpop.f32.mrf.mxu1  ;;  %v4215_v7 = vpop.eup %4214  ;;  %2851 = vst [vmem:[%s4675_s22 + $0x260] sm:$0xff] %v4213_v4  ;;  %4240 = vtanh.f32 %v3592_v5 }
 0x181   : > { %v4217_v8 = vpop.eup %4216  ;;  %2979 = vst [vmem:[%s4675_s22 + $0x660] sm:$0xff] %v4215_v7  ;;  %4242 = vtanh.f32 %v3720_v6  ;;  %v1832_v9 = vpop.f32.mrf.mxu0 }
 0x182   : > { %v2344_v10 = vpop.f32.mrf.mxu1  ;;  %v4219_v11 = vpop.eup %4218  ;;  %2854 = vst [vmem:[%s4675_s22 + $0x278] sm:$0xff] %v4217_v8  ;;  %4244 = vtanh.f32 %v1832_v9 }
 0x183   : > { %v4221_v12 = vpop.eup %4220  ;;  %2982 = vst [vmem:[%s4675_s22 + $0x678] sm:$0xff] %v4219_v11  ;;  %4246 = vtanh.f32 %v2344_v10  ;;  %v3593_v13 = vpop.f32.mrf.mxu0 }
 0x184   : > { %v3721_v14 = vpop.f32.mrf.mxu1  ;;  %v4223_v15 = vpop.eup %4222  ;;  %2852 = vst [vmem:[%s4675_s22 + $0x268] sm:$0xff] %v4221_v12  ;;  %4248 = vtanh.f32 %v3593_v13 }
 0x185   : > { %v4225_v16 = vpop.eup %4224  ;;  %2980 = vst [vmem:[%s4675_s22 + $0x668] sm:$0xff] %v4223_v15  ;;  %4250 = vtanh.f32 %v3721_v14  ;;  %v1835_v17 = vpop.f32.mrf.mxu0 }
 0x186   : > { %v2347_v18 = vpop.f32.mrf.mxu1  ;;  %v4227_v19 = vpop.eup %4226  ;;  %2857 = vst [vmem:[%s4675_s22 + $0x290] sm:$0xff] %v4225_v16  ;;  %4252 = vtanh.f32 %v1835_v17 }
 0x187   : > { %v4229_v20 = vpop.eup %4228  ;;  %2985 = vst [vmem:[%s4675_s22 + $0x690] sm:$0xff] %v4227_v19  ;;  %4254 = vtanh.f32 %v2347_v18  ;;  %v3596_v21 = vpop.f32.mrf.mxu0 }
 0x188   : > { %v3724_v22 = vpop.f32.mrf.mxu1  ;;  %v4231_v23 = vpop.eup %4230  ;;  %2855 = vst [vmem:[%s4675_s22 + $0x280] sm:$0xff] %v4229_v20  ;;  %4256 = vtanh.f32 %v3596_v21 }
 0x189   : > { %v4233_v24 = vpop.eup %4232  ;;  %2983 = vst [vmem:[%s4675_s22 + $0x680] sm:$0xff] %v4231_v23  ;;  %4258 = vtanh.f32 %v3724_v22  ;;  %v1848_v25 = vpop.f32.mrf.mxu0 }
 0x18a   : > { %v2360_v26 = vpop.f32.mrf.mxu1  ;;  %v4235_v27 = vpop.eup %4234  ;;  %2858 = vst [vmem:[%s4675_s22 + $0x298] sm:$0xff] %v4233_v24  ;;  %4260 = vtanh.f32 %v1848_v25 }
 0x18b   : > { %v4237_v28 = vpop.eup %4236  ;;  %2986 = vst [vmem:[%s4675_s22 + $0x698] sm:$0xff] %v4235_v27  ;;  %4262 = vtanh.f32 %v2360_v26  ;;  %v3597_v29 = vpop.f32.mrf.mxu0 }
 0x18c   : > { %v3725_v30 = vpop.f32.mrf.mxu1  ;;  %v4239_v31 = vpop.eup %4238  ;;  %2856 = vst [vmem:[%s4675_s22 + $0x288] sm:$0xff] %v4237_v28  ;;  %4264 = vtanh.f32 %v3597_v29 }
 0x18d   : > { %v4241_v32 = vpop.eup %4240  ;;  %2984 = vst [vmem:[%s4675_s22 + $0x688] sm:$0xff] %v4239_v31  ;;  %4266 = vtanh.f32 %v3725_v30  ;;  %v1851_v33 = vpop.f32.mrf.mxu0 }
 0x18e   : > { %v2363_v34 = vpop.f32.mrf.mxu1  ;;  %v4243_v35 = vpop.eup %4242  ;;  %2861 = vst [vmem:[%s4675_s22 + $0x2b0] sm:$0xff] %v4241_v32  ;;  %4268 = vtanh.f32 %v1851_v33 }
 0x18f   : > { %v4245_v36 = vpop.eup %4244  ;;  %2989 = vst [vmem:[%s4675_s22 + $0x6b0] sm:$0xff] %v4243_v35  ;;  %4270 = vtanh.f32 %v2363_v34  ;;  %v3600_v37 = vpop.f32.mrf.mxu0 }
 0x190   : > { %v3728_v38 = vpop.f32.mrf.mxu1  ;;  %v4247_v39 = vpop.eup %4246  ;;  %2859 = vst [vmem:[%s4675_s22 + $0x2a0] sm:$0xff] %v4245_v36  ;;  %4272 = vtanh.f32 %v3600_v37 }
 0x191   : > { %v4249_v40 = vpop.eup %4248  ;;  %2987 = vst [vmem:[%s4675_s22 + $0x6a0] sm:$0xff] %v4247_v39  ;;  %4274 = vtanh.f32 %v3728_v38  ;;  %v1864_v41 = vpop.f32.mrf.mxu0 }
 0x192   : > { %v2376_v42 = vpop.f32.mrf.mxu1  ;;  %v4251_v43 = vpop.eup %4250  ;;  %2862 = vst [vmem:[%s4675_s22 + $0x2b8] sm:$0xff] %v4249_v40  ;;  %4276 = vtanh.f32 %v1864_v41 }
 0x193   : > { %v4253_v44 = vpop.eup %4252  ;;  %2990 = vst [vmem:[%s4675_s22 + $0x6b8] sm:$0xff] %v4251_v43  ;;  %4278 = vtanh.f32 %v2376_v42  ;;  %v3601_v45 = vpop.f32.mrf.mxu0 }
 0x194   : > { %v3729_v46 = vpop.f32.mrf.mxu1  ;;  %v4255_v47 = vpop.eup %4254  ;;  %2860 = vst [vmem:[%s4675_s22 + $0x2a8] sm:$0xff] %v4253_v44  ;;  %4280 = vtanh.f32 %v3601_v45 }
 0x195   : > { %v4257_v48 = vpop.eup %4256  ;;  %2988 = vst [vmem:[%s4675_s22 + $0x6a8] sm:$0xff] %v4255_v47  ;;  %4282 = vtanh.f32 %v3729_v46  ;;  %v1867_v49 = vpop.f32.mrf.mxu0 }
 0x196   : > { %v2379_v50 = vpop.f32.mrf.mxu1  ;;  %v4259_v51 = vpop.eup %4258  ;;  %2865 = vst [vmem:[%s4675_s22 + $0x2d0] sm:$0xff] %v4257_v48  ;;  %4284 = vtanh.f32 %v1867_v49 }
 0x197   : > { %v4261_v52 = vpop.eup %4260  ;;  %2993 = vst [vmem:[%s4675_s22 + $0x6d0] sm:$0xff] %v4259_v51  ;;  %4286 = vtanh.f32 %v2379_v50  ;;  %v3604_v53 = vpop.f32.mrf.mxu0 }
 0x198   : > { %v3732_v54 = vpop.f32.mrf.mxu1  ;;  %v4263_v55 = vpop.eup %4262  ;;  %2863 = vst [vmem:[%s4675_s22 + $0x2c0] sm:$0xff] %v4261_v52  ;;  %4288 = vtanh.f32 %v3604_v53 }
 0x199   : > { %v4265_v56 = vpop.eup %4264  ;;  %2991 = vst [vmem:[%s4675_s22 + $0x6c0] sm:$0xff] %v4263_v55  ;;  %4290 = vtanh.f32 %v3732_v54  ;;  %v1880_v57 = vpop.f32.mrf.mxu0 }
 0x19a   : > { %v2392_v58 = vpop.f32.mrf.mxu1  ;;  %v4267_v59 = vpop.eup %4266  ;;  %2866 = vst [vmem:[%s4675_s22 + $0x2d8] sm:$0xff] %v4265_v56  ;;  %4292 = vtanh.f32 %v1880_v57 }
 0x19b   : > { %v4269_v60 = vpop.eup %4268  ;;  %2994 = vst [vmem:[%s4675_s22 + $0x6d8] sm:$0xff] %v4267_v59  ;;  %4294 = vtanh.f32 %v2392_v58  ;;  %v3605_v61 = vpop.f32.mrf.mxu0 }
 0x19c   : > { %v3733_v62 = vpop.f32.mrf.mxu1  ;;  %v4271_v63 = vpop.eup %4270  ;;  %2864 = vst [vmem:[%s4675_s22 + $0x2c8] sm:$0xff] %v4269_v60  ;;  %4296 = vtanh.f32 %v3605_v61 }
 0x19d   : > { %v4273_v0 = vpop.eup %4272  ;;  %2992 = vst [vmem:[%s4675_s22 + $0x6c8] sm:$0xff] %v4271_v63  ;;  %4298 = vtanh.f32 %v3733_v62  ;;  %v1883_v1 = vpop.f32.mrf.mxu0 }
 0x19e   : > { %v2395_v2 = vpop.f32.mrf.mxu1  ;;  %v4275_v3 = vpop.eup %4274  ;;  %2869 = vst [vmem:[%s4675_s22 + $0x2f0] sm:$0xff] %v4273_v0  ;;  %4300 = vtanh.f32 %v1883_v1 }
 0x19f   : > { %v4277_v4 = vpop.eup %4276  ;;  %2997 = vst [vmem:[%s4675_s22 + $0x6f0] sm:$0xff] %v4275_v3  ;;  %4302 = vtanh.f32 %v2395_v2  ;;  %v3608_v5 = vpop.f32.mrf.mxu0 }
 0x1a0   : > { %v3736_v6 = vpop.f32.mrf.mxu1  ;;  %v4279_v7 = vpop.eup %4278  ;;  %2867 = vst [vmem:[%s4675_s22 + $0x2e0] sm:$0xff] %v4277_v4  ;;  %4304 = vtanh.f32 %v3608_v5 }
 0x1a1   : > { %v4281_v8 = vpop.eup %4280  ;;  %2995 = vst [vmem:[%s4675_s22 + $0x6e0] sm:$0xff] %v4279_v7  ;;  %4306 = vtanh.f32 %v3736_v6  ;;  %v1896_v9 = vpop.f32.mrf.mxu0 }
 0x1a2   : > { %v2408_v10 = vpop.f32.mrf.mxu1  ;;  %v4283_v11 = vpop.eup %4282  ;;  %2870 = vst [vmem:[%s4675_s22 + $0x2f8] sm:$0xff] %v4281_v8  ;;  %4308 = vtanh.f32 %v1896_v9 }
 0x1a3   : > { %v4285_v12 = vpop.eup %4284  ;;  %2998 = vst [vmem:[%s4675_s22 + $0x6f8] sm:$0xff] %v4283_v11  ;;  %4310 = vtanh.f32 %v2408_v10  ;;  %v3609_v13 = vpop.f32.mrf.mxu0 }
 0x1a4   : > { %v3737_v14 = vpop.f32.mrf.mxu1  ;;  %v4287_v15 = vpop.eup %4286  ;;  %2868 = vst [vmem:[%s4675_s22 + $0x2e8] sm:$0xff] %v4285_v12  ;;  %4312 = vtanh.f32 %v3609_v13 }
 0x1a5   : > { %v4289_v16 = vpop.eup %4288  ;;  %2996 = vst [vmem:[%s4675_s22 + $0x6e8] sm:$0xff] %v4287_v15  ;;  %4314 = vtanh.f32 %v3737_v14  ;;  %v1899_v17 = vpop.f32.mrf.mxu0 }
 0x1a6   : > { %v2411_v18 = vpop.f32.mrf.mxu1  ;;  %v4291_v19 = vpop.eup %4290  ;;  %2873 = vst [vmem:[%s4675_s22 + $0x310] sm:$0xff] %v4289_v16  ;;  %4316 = vtanh.f32 %v1899_v17 }
 0x1a7   : > { %v4293_v20 = vpop.eup %4292  ;;  %3001 = vst [vmem:[%s4675_s22 + $0x710] sm:$0xff] %v4291_v19  ;;  %4318 = vtanh.f32 %v2411_v18  ;;  %v3612_v21 = vpop.f32.mrf.mxu0 }
 0x1a8   : > { %v3740_v22 = vpop.f32.mrf.mxu1  ;;  %v4295_v23 = vpop.eup %4294  ;;  %2871 = vst [vmem:[%s4675_s22 + $0x300] sm:$0xff] %v4293_v20  ;;  %4320 = vtanh.f32 %v3612_v21 }
 0x1a9   : > { %v4297_v24 = vpop.eup %4296  ;;  %2999 = vst [vmem:[%s4675_s22 + $0x700] sm:$0xff] %v4295_v23  ;;  %4322 = vtanh.f32 %v3740_v22  ;;  %v1912_v25 = vpop.f32.mrf.mxu0 }
 0x1aa   : > { %v2424_v26 = vpop.f32.mrf.mxu1  ;;  %v4299_v27 = vpop.eup %4298  ;;  %2874 = vst [vmem:[%s4675_s22 + $0x318] sm:$0xff] %v4297_v24  ;;  %4324 = vtanh.f32 %v1912_v25 }
 0x1ab   : > { %v4301_v28 = vpop.eup %4300  ;;  %3002 = vst [vmem:[%s4675_s22 + $0x718] sm:$0xff] %v4299_v27  ;;  %4326 = vtanh.f32 %v2424_v26  ;;  %v3613_v29 = vpop.f32.mrf.mxu0 }
 0x1ac   : > { %v3741_v30 = vpop.f32.mrf.mxu1  ;;  %v4303_v31 = vpop.eup %4302  ;;  %2872 = vst [vmem:[%s4675_s22 + $0x308] sm:$0xff] %v4301_v28  ;;  %4328 = vtanh.f32 %v3613_v29 }
 0x1ad   : > { %v4305_v32 = vpop.eup %4304  ;;  %3000 = vst [vmem:[%s4675_s22 + $0x708] sm:$0xff] %v4303_v31  ;;  %4330 = vtanh.f32 %v3741_v30  ;;  %v1915_v33 = vpop.f32.mrf.mxu0 }
 0x1ae   : > { %v2427_v34 = vpop.f32.mrf.mxu1  ;;  %v4307_v35 = vpop.eup %4306  ;;  %2877 = vst [vmem:[%s4675_s22 + $0x330] sm:$0xff] %v4305_v32  ;;  %4332 = vtanh.f32 %v1915_v33 }
 0x1af   : > { %v4309_v36 = vpop.eup %4308  ;;  %3005 = vst [vmem:[%s4675_s22 + $0x730] sm:$0xff] %v4307_v35  ;;  %4334 = vtanh.f32 %v2427_v34  ;;  %v3616_v37 = vpop.f32.mrf.mxu0 }
 0x1b0   : > { %v3744_v38 = vpop.f32.mrf.mxu1  ;;  %v4311_v39 = vpop.eup %4310  ;;  %2875 = vst [vmem:[%s4675_s22 + $0x320] sm:$0xff] %v4309_v36  ;;  %4336 = vtanh.f32 %v3616_v37 }
 0x1b1   : > { %v4313_v40 = vpop.eup %4312  ;;  %3003 = vst [vmem:[%s4675_s22 + $0x720] sm:$0xff] %v4311_v39  ;;  %4338 = vtanh.f32 %v3744_v38  ;;  %v1928_v41 = vpop.f32.mrf.mxu0 }
 0x1b2   : > { %v2440_v42 = vpop.f32.mrf.mxu1  ;;  %v4315_v43 = vpop.eup %4314  ;;  %2878 = vst [vmem:[%s4675_s22 + $0x338] sm:$0xff] %v4313_v40  ;;  %4340 = vtanh.f32 %v1928_v41 }
 0x1b3   : > { %v4317_v44 = vpop.eup %4316  ;;  %3006 = vst [vmem:[%s4675_s22 + $0x738] sm:$0xff] %v4315_v43  ;;  %4342 = vtanh.f32 %v2440_v42  ;;  %v3617_v45 = vpop.f32.mrf.mxu0 }
 0x1b4   : > { %v3745_v46 = vpop.f32.mrf.mxu1  ;;  %v4319_v47 = vpop.eup %4318  ;;  %2876 = vst [vmem:[%s4675_s22 + $0x328] sm:$0xff] %v4317_v44  ;;  %4344 = vtanh.f32 %v3617_v45 }
 0x1b5   : > { %v4321_v48 = vpop.eup %4320  ;;  %3004 = vst [vmem:[%s4675_s22 + $0x728] sm:$0xff] %v4319_v47  ;;  %4346 = vtanh.f32 %v3745_v46  ;;  %v1931_v49 = vpop.f32.mrf.mxu0 }
 0x1b6   : > { %v2443_v50 = vpop.f32.mrf.mxu1  ;;  %v4323_v51 = vpop.eup %4322  ;;  %2881 = vst [vmem:[%s4675_s22 + $0x350] sm:$0xff] %v4321_v48  ;;  %4348 = vtanh.f32 %v1931_v49 }
 0x1b7   : > { %v4325_v52 = vpop.eup %4324  ;;  %3009 = vst [vmem:[%s4675_s22 + $0x750] sm:$0xff] %v4323_v51  ;;  %4350 = vtanh.f32 %v2443_v50  ;;  %v3620_v53 = vpop.f32.mrf.mxu0 }
 0x1b8   : > { %v3748_v54 = vpop.f32.mrf.mxu1  ;;  %v4327_v55 = vpop.eup %4326  ;;  %2879 = vst [vmem:[%s4675_s22 + $0x340] sm:$0xff] %v4325_v52  ;;  %4352 = vtanh.f32 %v3620_v53 }
 0x1b9   : > { %v4329_v56 = vpop.eup %4328  ;;  %3007 = vst [vmem:[%s4675_s22 + $0x740] sm:$0xff] %v4327_v55  ;;  %4354 = vtanh.f32 %v3748_v54  ;;  %v1944_v57 = vpop.f32.mrf.mxu0 }
 0x1ba   : > { %v2456_v58 = vpop.f32.mrf.mxu1  ;;  %v4331_v59 = vpop.eup %4330  ;;  %2882 = vst [vmem:[%s4675_s22 + $0x358] sm:$0xff] %v4329_v56  ;;  %4356 = vtanh.f32 %v1944_v57 }
 0x1bb   : > { %v4333_v60 = vpop.eup %4332  ;;  %3010 = vst [vmem:[%s4675_s22 + $0x758] sm:$0xff] %v4331_v59  ;;  %4358 = vtanh.f32 %v2456_v58  ;;  %v3621_v61 = vpop.f32.mrf.mxu0 }
 0x1bc   : > { %v3749_v62 = vpop.f32.mrf.mxu1  ;;  %v4335_v63 = vpop.eup %4334  ;;  %2880 = vst [vmem:[%s4675_s22 + $0x348] sm:$0xff] %v4333_v60  ;;  %4360 = vtanh.f32 %v3621_v61 }
 0x1bd   : > { %v4337_v0 = vpop.eup %4336  ;;  %3008 = vst [vmem:[%s4675_s22 + $0x748] sm:$0xff] %v4335_v63  ;;  %4362 = vtanh.f32 %v3749_v62  ;;  %v1947_v1 = vpop.f32.mrf.mxu0 }
 0x1be   : > { %v2459_v2 = vpop.f32.mrf.mxu1  ;;  %v4339_v3 = vpop.eup %4338  ;;  %2885 = vst [vmem:[%s4675_s22 + $0x370] sm:$0xff] %v4337_v0  ;;  %4364 = vtanh.f32 %v1947_v1 }
 0x1bf   : > { %v4341_v4 = vpop.eup %4340  ;;  %3013 = vst [vmem:[%s4675_s22 + $0x770] sm:$0xff] %v4339_v3  ;;  %4366 = vtanh.f32 %v2459_v2  ;;  %v3624_v5 = vpop.f32.mrf.mxu0 }
 0x1c0   : > { %v3752_v6 = vpop.f32.mrf.mxu1  ;;  %v4343_v7 = vpop.eup %4342  ;;  %2883 = vst [vmem:[%s4675_s22 + $0x360] sm:$0xff] %v4341_v4  ;;  %4368 = vtanh.f32 %v3624_v5 }
 0x1c1   : > { %v4345_v8 = vpop.eup %4344  ;;  %3011 = vst [vmem:[%s4675_s22 + $0x760] sm:$0xff] %v4343_v7  ;;  %4370 = vtanh.f32 %v3752_v6  ;;  %v1960_v9 = vpop.f32.mrf.mxu0 }
 0x1c2   : > { %v2472_v10 = vpop.f32.mrf.mxu1  ;;  %v4347_v11 = vpop.eup %4346  ;;  %2886 = vst [vmem:[%s4675_s22 + $0x378] sm:$0xff] %v4345_v8  ;;  %4372 = vtanh.f32 %v1960_v9 }
 0x1c3   : > { %v4349_v12 = vpop.eup %4348  ;;  %3014 = vst [vmem:[%s4675_s22 + $0x778] sm:$0xff] %v4347_v11  ;;  %4374 = vtanh.f32 %v2472_v10  ;;  %v3625_v13 = vpop.f32.mrf.mxu0 }
 0x1c4   : > { %v3753_v14 = vpop.f32.mrf.mxu1  ;;  %v4351_v15 = vpop.eup %4350  ;;  %2884 = vst [vmem:[%s4675_s22 + $0x368] sm:$0xff] %v4349_v12  ;;  %4376 = vtanh.f32 %v3625_v13 }
 0x1c5   : > { %v4353_v16 = vpop.eup %4352  ;;  %3012 = vst [vmem:[%s4675_s22 + $0x768] sm:$0xff] %v4351_v15  ;;  %4378 = vtanh.f32 %v3753_v14  ;;  %v1963_v17 = vpop.f32.mrf.mxu0 }
 0x1c6   : > { %v2475_v18 = vpop.f32.mrf.mxu1  ;;  %v4355_v19 = vpop.eup %4354  ;;  %2889 = vst [vmem:[%s4675_s22 + $0x390] sm:$0xff] %v4353_v16  ;;  %4380 = vtanh.f32 %v1963_v17 }
 0x1c7   : > { %v4357_v20 = vpop.eup %4356  ;;  %3017 = vst [vmem:[%s4675_s22 + $0x790] sm:$0xff] %v4355_v19  ;;  %4382 = vtanh.f32 %v2475_v18  ;;  %v3628_v21 = vpop.f32.mrf.mxu0 }
 0x1c8   : > { %v3756_v22 = vpop.f32.mrf.mxu1  ;;  %v4359_v23 = vpop.eup %4358  ;;  %2887 = vst [vmem:[%s4675_s22 + $0x380] sm:$0xff] %v4357_v20  ;;  %4384 = vtanh.f32 %v3628_v21 }
 0x1c9   : > { %v4361_v24 = vpop.eup %4360  ;;  %3015 = vst [vmem:[%s4675_s22 + $0x780] sm:$0xff] %v4359_v23  ;;  %4386 = vtanh.f32 %v3756_v22  ;;  %v1976_v25 = vpop.f32.mrf.mxu0 }
 0x1ca   : > { %v2488_v26 = vpop.f32.mrf.mxu1  ;;  %v4363_v27 = vpop.eup %4362  ;;  %2890 = vst [vmem:[%s4675_s22 + $0x398] sm:$0xff] %v4361_v24  ;;  %4388 = vtanh.f32 %v1976_v25 }
 0x1cb   : > { %v4365_v28 = vpop.eup %4364  ;;  %3018 = vst [vmem:[%s4675_s22 + $0x798] sm:$0xff] %v4363_v27  ;;  %4390 = vtanh.f32 %v2488_v26  ;;  %v3629_v29 = vpop.f32.mrf.mxu0 }
 0x1cc   : > { %v3757_v30 = vpop.f32.mrf.mxu1  ;;  %v4367_v31 = vpop.eup %4366  ;;  %2888 = vst [vmem:[%s4675_s22 + $0x388] sm:$0xff] %v4365_v28  ;;  %4392 = vtanh.f32 %v3629_v29 }
 0x1cd   : > { %v4369_v32 = vpop.eup %4368  ;;  %3016 = vst [vmem:[%s4675_s22 + $0x788] sm:$0xff] %v4367_v31  ;;  %4394 = vtanh.f32 %v3757_v30  ;;  %v1979_v33 = vpop.f32.mrf.mxu0 }
 0x1ce   : > { %v2491_v34 = vpop.f32.mrf.mxu1  ;;  %v4371_v35 = vpop.eup %4370  ;;  %2893 = vst [vmem:[%s4675_s22 + $0x3b0] sm:$0xff] %v4369_v32  ;;  %4396 = vtanh.f32 %v1979_v33 }
 0x1cf   : > { %v4373_v36 = vpop.eup %4372  ;;  %3021 = vst [vmem:[%s4675_s22 + $0x7b0] sm:$0xff] %v4371_v35  ;;  %4398 = vtanh.f32 %v2491_v34  ;;  %v3632_v37 = vpop.f32.mrf.mxu0 }
 0x1d0   : > { %v3760_v38 = vpop.f32.mrf.mxu1  ;;  %v4375_v39 = vpop.eup %4374  ;;  %2891 = vst [vmem:[%s4675_s22 + $0x3a0] sm:$0xff] %v4373_v36  ;;  %4400 = vtanh.f32 %v3632_v37 }
 0x1d1   : > { %v4377_v40 = vpop.eup %4376  ;;  %3019 = vst [vmem:[%s4675_s22 + $0x7a0] sm:$0xff] %v4375_v39  ;;  %4402 = vtanh.f32 %v3760_v38  ;;  %v1992_v41 = vpop.f32.mrf.mxu0 }
 0x1d2   : > { %v2504_v42 = vpop.f32.mrf.mxu1  ;;  %v4379_v43 = vpop.eup %4378  ;;  %2894 = vst [vmem:[%s4675_s22 + $0x3b8] sm:$0xff] %v4377_v40  ;;  %4404 = vtanh.f32 %v1992_v41 }
 0x1d3   : > { %v4381_v44 = vpop.eup %4380  ;;  %3022 = vst [vmem:[%s4675_s22 + $0x7b8] sm:$0xff] %v4379_v43  ;;  %4406 = vtanh.f32 %v2504_v42  ;;  %v3633_v45 = vpop.f32.mrf.mxu0 }
 0x1d4   : > { %v3761_v46 = vpop.f32.mrf.mxu1  ;;  %v4383_v47 = vpop.eup %4382  ;;  %2892 = vst [vmem:[%s4675_s22 + $0x3a8] sm:$0xff] %v4381_v44  ;;  %4408 = vtanh.f32 %v3633_v45 }
 0x1d5   : > { %v4385_v48 = vpop.eup %4384  ;;  %3020 = vst [vmem:[%s4675_s22 + $0x7a8] sm:$0xff] %v4383_v47  ;;  %4410 = vtanh.f32 %v3761_v46  ;;  %v1995_v49 = vpop.f32.mrf.mxu0 }
 0x1d6   : > { %v2507_v50 = vpop.f32.mrf.mxu1  ;;  %v4387_v51 = vpop.eup %4386  ;;  %2897 = vst [vmem:[%s4675_s22 + $0x3d0] sm:$0xff] %v4385_v48  ;;  %4412 = vtanh.f32 %v1995_v49 }
 0x1d7   : > { %v4389_v52 = vpop.eup %4388  ;;  %3025 = vst [vmem:[%s4675_s22 + $0x7d0] sm:$0xff] %v4387_v51  ;;  %4414 = vtanh.f32 %v2507_v50 }
 0x1d8   : > { %v4391_v53 = vpop.eup %4390  ;;  %2895 = vst [vmem:[%s4675_s22 + $0x3c0] sm:$0xff] %v4389_v52 }
 0x1d9   : > { %v4393_v54 = vpop.eup %4392  ;;  %3023 = vst [vmem:[%s4675_s22 + $0x7c0] sm:$0xff] %v4391_v53 }
 0x1da   : > { %v4395_v55 = vpop.eup %4394  ;;  %2898 = vst [vmem:[%s4675_s22 + $0x3d8] sm:$0xff] %v4393_v54 }
 0x1db   : > { %v4397_v56 = vpop.eup %4396  ;;  %3026 = vst [vmem:[%s4675_s22 + $0x7d8] sm:$0xff] %v4395_v55 }
 0x1dc   : > { %v4399_v57 = vpop.eup %4398  ;;  %2896 = vst [vmem:[%s4675_s22 + $0x3c8] sm:$0xff] %v4397_v56 }
 0x1dd   : > { %v4401_v58 = vpop.eup %4400  ;;  %3024 = vst [vmem:[%s4675_s22 + $0x7c8] sm:$0xff] %v4399_v57 }
 0x1de   : > { %v4403_v59 = vpop.eup %4402  ;;  %2901 = vst [vmem:[%s4675_s22 + $0x3f0] sm:$0xff] %v4401_v58 }
 0x1df   : > { %v4405_v60 = vpop.eup %4404  ;;  %3029 = vst [vmem:[%s4675_s22 + $0x7f0] sm:$0xff] %v4403_v59 }
 0x1e0   : > { %v4407_v61 = vpop.eup %4406  ;;  %2899 = vst [vmem:[%s4675_s22 + $0x3e0] sm:$0xff] %v4405_v60 }
 0x1e1   : > { %v4409_v62 = vpop.eup %4408  ;;  %3027 = vst [vmem:[%s4675_s22 + $0x7e0] sm:$0xff] %v4407_v61 }
 0x1e2   : > { %v4411_v63 = vpop.eup %4410  ;;  %2902 = vst [vmem:[%s4675_s22 + $0x3f8] sm:$0xff] %v4409_v62 }
 0x1e3   : > { %v4413_v0 = vpop.eup %4412  ;;  %3030 = vst [vmem:[%s4675_s22 + $0x7f8] sm:$0xff] %v4411_v63 }
 0x1e4   : > { %v4415_v1 = vpop.eup %4414  ;;  %2900 = vst [vmem:[%s4675_s22 + $0x3e8] sm:$0xff] %v4413_v0 }
 0x1e5   : > { %3028 = vst [vmem:[%s4675_s22 + $0x7e8] sm:$0xff] %v4415_v1 }
 0x1e6 PF: > { %s12_s9 = sadd.s32 1, %s4422_s9  }
 0x1e7   : > { %p9_p4 = scmp.ge.s32.totalorder %s12_s9, 6  }
 0x1e9   :  { %11 = sbr.rel (!%p9_p4) target bundleno = 1 (0x1), region = 61 }

</bundles_post_ra>
